<compile_context>
chip_gen: v7x
topology: tpu7x:2x2x1
jax: 0.10.0
libtpu: 0.0.40
codegen_flags: <defaults>
</compile_context>

<pallas_src>
import functools
import math

import jax
import jax.numpy as jnp
from jax.experimental import pallas as pl
from jax.experimental.pallas import tpu as pltpu

# ----- synthetic config (stands in for model.hocon), small shapes -----
NUM_CLASSES = 10
NUM_QUERIES = 8
HIDDEN = 32          # transformer hidden_dim (d_model)
NHEADS = 4
HEAD_DIM = HIDDEN // NHEADS
DIM_FFN = 64
ENC_LAYERS = 2
DEC_LAYERS = 2
NUM_CHANNELS = 64    # backbone output channels
PATCH = 4            # simplified backbone downsample factor
ATTN_SCALE = 1.0 / math.sqrt(HEAD_DIM)

SLAB_COLS = 64       # every packed tensor is <= 64 columns wide (max(DIM_FFN, NUM_CHANNELS, 2E))
PATCH_DIM = 3 * PATCH * PATCH


# ---------------------------------------------------------------------------
# Weight-slab layouts (static row offsets shared by init-time packing and the
# in-kernel static ref slices)
# ---------------------------------------------------------------------------
def _build_layout(specs):
    layout, rows = {}, 0
    for name, r, c in specs:
        assert c <= SLAB_COLS
        layout[name] = (rows, r, c)
        rows += r
    return layout, ((rows + 7) // 8) * 8


_E, _F = HIDDEN, DIM_FFN

ENC_LAYOUT, R_ENC = _build_layout([
    ("wq", _E, _E), ("wk", _E, _E), ("wv", _E, _E), ("wo", _E, _E),
    ("bq", 1, _E), ("bk", 1, _E), ("bv", 1, _E), ("bo", 1, _E),
    ("ln1_g", 1, _E), ("ln1_b", 1, _E),
    ("w1", _E, _F), ("b1", 1, _F), ("w2", _F, _E), ("b2", 1, _E),
    ("ln2_g", 1, _E), ("ln2_b", 1, _E),
])

DEC_LAYOUT, R_DEC = _build_layout([
    ("s_wq", _E, _E), ("s_wk", _E, _E), ("s_wv", _E, _E), ("s_wo", _E, _E),
    ("s_bq", 1, _E), ("s_bk", 1, _E), ("s_bv", 1, _E), ("s_bo", 1, _E),
    ("ln1_g", 1, _E), ("ln1_b", 1, _E),
    ("c_wq", _E, _E), ("c_wk", _E, _E), ("c_wv", _E, _E), ("c_wo", _E, _E),
    ("c_bq", 1, _E), ("c_bk", 1, _E), ("c_bv", 1, _E), ("c_bo", 1, _E),
    ("ln2_g", 1, _E), ("ln2_b", 1, _E),
    ("w1", _E, _F), ("b1", 1, _F), ("w2", _F, _E), ("b2", 1, _E),
    ("ln3_g", 1, _E), ("ln3_b", 1, _E),
])

BB_LAYOUT, R_BB = _build_layout([
    ("wb", PATCH_DIM, NUM_CHANNELS), ("bb", 1, NUM_CHANNELS),
    ("wp", NUM_CHANNELS, _E), ("bp", 1, _E),
])

HEAD_LAYOUT, R_HEAD = _build_layout([
    ("norm_g", 1, _E), ("norm_b", 1, _E),
    ("wc", _E, NUM_CLASSES + 1), ("bc", 1, NUM_CLASSES + 1),
    ("w1", _E, _E), ("b1", 1, _E), ("w2", _E, _E), ("b2", 1, _E),
    ("w3", _E, 4), ("b3", 1, 4),
])


def _pack_slab(layout, rows, tensors):
    slab = jnp.zeros((rows, SLAB_COLS), jnp.float32)
    for name, (r0, r, c) in layout.items():
        slab = slab.at[r0:r0 + r, :c].set(
            jnp.asarray(tensors[name], jnp.float32).reshape(r, c))
    return slab


def _gslab(slab_ref, layout, name):
    """Static slice of a packed weight slab ref (zero-cost view + masked vload)."""
    r0, r, c = layout[name]
    return slab_ref[r0:r0 + r, 0:c]


# ---------------------------------------------------------------------------
# In-kernel helpers (traced inside Pallas kernel bodies)
# ---------------------------------------------------------------------------
def _ln(x, g, b, eps=1e-5):
    mu = jnp.mean(x, axis=-1, keepdims=True)
    d = x - mu
    var = jnp.mean(d * d, axis=-1, keepdims=True)
    return d * jax.lax.rsqrt(var + eps) * g + b


def _mha(x_q, x_k, x_v, wq, bq, wk, bk, wv, bv, wo, bo, nb, lq, lk, bias):
    """Multi-head attention on batch-folded rows.

    x_q:[nb*lq,E], x_k/x_v:[nb*lk,E]; weights [E,E] / biases [1,E]; bias:[nb,lk] or None.
    Q scale (1/sqrt(head_dim)) is pre-folded into wq/bq. Returns [nb*lq,E] including the
    output projection (per-head results are accumulated through wo -> no lane-axis concat).
    """
    q = jnp.dot(x_q, wq, preferred_element_type=jnp.float32) + bq
    k = jnp.dot(x_k, wk, preferred_element_type=jnp.float32) + bk
    v = jnp.dot(x_v, wv, preferred_element_type=jnp.float32) + bv
    outs = []
    for b in range(nb):
        qb = q[b * lq:(b + 1) * lq, :]
        kb = k[b * lk:(b + 1) * lk, :]
        vb = v[b * lk:(b + 1) * lk, :]
        bias_b = None
        if bias is not None:
            # hoisted out of the head loop (JAX does not CSE broadcast_in_dim)
            bias_b = jnp.broadcast_to(bias[b:b + 1, :], (lq, lk))
        acc = jnp.zeros((lq, HIDDEN), jnp.float32)
        for h in range(NHEADS):
            sl = slice(h * HEAD_DIM, (h + 1) * HEAD_DIM)
            s = jax.lax.dot_general(qb[:, sl], kb[:, sl],
                                    (((1,), (1,)), ((), ())),
                                    preferred_element_type=jnp.float32)   # [lq, lk]
            if bias_b is not None:
                s = s + bias_b
            s = s - jnp.max(s, axis=-1, keepdims=True)
            p = jnp.exp(s)
            p = p * pl.reciprocal(jnp.sum(p, axis=-1, keepdims=True), approx=True)
            pv = jnp.dot(p, vb[:, sl], preferred_element_type=jnp.float32)   # [lq, D]
            acc = acc + jnp.dot(pv, wo[sl, :], preferred_element_type=jnp.float32)
        outs.append(acc)
    out = outs[0] if nb == 1 else jnp.concatenate(outs, axis=0)
    return out + bo


# ---------------------------------------------------------------------------
# Fused stack kernels
# ---------------------------------------------------------------------------
def _encoder_stack_kernel(patches_ref, pos_ref, bias_ref, bb_ref, slab_ref, out_ref,
                          *, nb, seq):
    layer = pl.program_id(0)

    @pl.when(layer == 0)
    def _():
        # fused simplified backbone (patch-embed + ReLU) + 1x1 input_proj
        wb = _gslab(bb_ref, BB_LAYOUT, "wb")
        bb = _gslab(bb_ref, BB_LAYOUT, "bb")
        wp = _gslab(bb_ref, BB_LAYOUT, "wp")
        bp = _gslab(bb_ref, BB_LAYOUT, "bp")
        f = jnp.maximum(
            jnp.dot(patches_ref[...], wb, preferred_element_type=jnp.float32) + bb, 0.0)
        out_ref[...] = jnp.dot(f, wp, preferred_element_type=jnp.float32) + bp

    def g(name):
        return _gslab(slab_ref, ENC_LAYOUT, name)

    x = out_ref[...]            # activation carry (out block resident across the layer axis)
    pos = pos_ref[...]
    bias = bias_ref[...]

    # self-attention: q = k = src + pos, v = src (q scale folded into wq/bq)
    qk_in = x + pos
    attn = _mha(qk_in, qk_in, x,
                g("wq"), g("bq"), g("wk"), g("bk"), g("wv"), g("bv"), g("wo"), g("bo"),
                nb, seq, seq, bias)
    x = _ln(x + attn, g("ln1_g"), g("ln1_b"))

    # FFN
    h = jnp.maximum(jnp.dot(x, g("w1"), preferred_element_type=jnp.float32) + g("b1"), 0.0)
    x = _ln(x + jnp.dot(h, g("w2"), preferred_element_type=jnp.float32) + g("b2"),
            g("ln2_g"), g("ln2_b"))
    out_ref[...] = x


def _decoder_stack_kernel(mem_ref, pos_ref, qpos_ref, bias_ref, slab_ref, head_ref,
                          logits_ref, boxes_ref, tgt_ref, *, nb, seq):
    layer = pl.program_id(0)

    @pl.when(layer == 0)
    def _():
        tgt_ref[...] = jnp.zeros_like(tgt_ref)   # tgt = zeros (DETR decoder input)

    def g(name):
        return _gslab(slab_ref, DEC_LAYOUT, name)

    tgt = tgt_ref[...]
    mem = mem_ref[...]
    pos = pos_ref[...]
    qpos = qpos_ref[...]
    bias = bias_ref[...]

    # self-attention: q = k = tgt + query_pos, v = tgt, no mask
    qk_in = tgt + qpos
    sa = _mha(qk_in, qk_in, tgt,
              g("s_wq"), g("s_bq"), g("s_wk"), g("s_bk"), g("s_wv"), g("s_bv"),
              g("s_wo"), g("s_bo"),
              nb, NUM_QUERIES, NUM_QUERIES, None)
    x = _ln(tgt + sa, g("ln1_g"), g("ln1_b"))

    # cross-attention: q = x + query_pos, k = memory + pos, v = memory, key-padding bias
    ca = _mha(x + qpos, mem + pos, mem,
              g("c_wq"), g("c_bq"), g("c_wk"), g("c_bk"), g("c_wv"), g("c_bv"),
              g("c_wo"), g("c_bo"),
              nb, NUM_QUERIES, seq, bias)
    x = _ln(x + ca, g("ln2_g"), g("ln2_b"))

    # FFN
    h = jnp.maximum(jnp.dot(x, g("w1"), preferred_element_type=jnp.float32) + g("b1"), 0.0)
    x = _ln(x + jnp.dot(h, g("w2"), preferred_element_type=jnp.float32) + g("b2"),
            g("ln3_g"), g("ln3_b"))
    tgt_ref[...] = x

    # fused heads on the FINAL layer only (final decoder LayerNorm + class + bbox MLP)
    @pl.when(layer == pl.num_programs(0) - 1)
    def _():
        def hg(name):
            return _gslab(head_ref, HEAD_LAYOUT, name)
        hs = _ln(x, hg("norm_g"), hg("norm_b"))
        logits_ref[...] = (jnp.dot(hs, hg("wc"), preferred_element_type=jnp.float32)
                           + hg("bc"))
        t = jnp.maximum(jnp.dot(hs, hg("w1"), preferred_element_type=jnp.float32)
                        + hg("b1"), 0.0)
        t = jnp.maximum(jnp.dot(t, hg("w2"), preferred_element_type=jnp.float32)
                        + hg("b2"), 0.0)
        boxes_ref[...] = jax.nn.sigmoid(
            jnp.dot(t, hg("w3"), preferred_element_type=jnp.float32) + hg("b3"))


# ---------------------------------------------------------------------------
# pallas_call wrappers (2 launches total)
# ---------------------------------------------------------------------------
_ARB = pltpu.CompilerParams(dimension_semantics=("arbitrary",))


def encoder_stack(patches, pos, bias, bb_slab, enc_slab):
    M = patches.shape[0]
    nb = bias.shape[0]
    seq = M // nb
    kernel = functools.partial(_encoder_stack_kernel, nb=nb, seq=seq)
    return pl.pallas_call(
        kernel,
        out_shape=jax.ShapeDtypeStruct((M, HIDDEN), jnp.float32),
        grid=(ENC_LAYERS,),
        in_specs=[
            pl.BlockSpec(patches.shape, lambda l: (0, 0)),
            pl.BlockSpec(pos.shape, lambda l: (0, 0)),
            pl.BlockSpec(bias.shape, lambda l: (0, 0)),
            pl.BlockSpec(bb_slab.shape, lambda l: (0, 0)),
            pl.BlockSpec((None, R_ENC, SLAB_COLS), lambda l: (l, 0, 0)),
        ],
        out_specs=pl.BlockSpec((M, HIDDEN), lambda l: (0, 0)),
        compiler_params=_ARB,
    )(patches, pos, bias, bb_slab, enc_slab)


def decoder_stack(memory, pos, qpos, bias, dec_slab, head_slab):
    nb = bias.shape[0]
    seq = memory.shape[0] // nb
    nq_rows = qpos.shape[0]
    kernel = functools.partial(_decoder_stack_kernel, nb=nb, seq=seq)
    return pl.pallas_call(
        kernel,
        out_shape=(jax.ShapeDtypeStruct((nq_rows, NUM_CLASSES + 1), jnp.float32),
                   jax.ShapeDtypeStruct((nq_rows, 4), jnp.float32)),
        grid=(DEC_LAYERS,),
        in_specs=[
            pl.BlockSpec(memory.shape, lambda l: (0, 0)),
            pl.BlockSpec(pos.shape, lambda l: (0, 0)),
            pl.BlockSpec(qpos.shape, lambda l: (0, 0)),
            pl.BlockSpec(bias.shape, lambda l: (0, 0)),
            pl.BlockSpec((None, R_DEC, SLAB_COLS), lambda l: (l, 0, 0)),
            pl.BlockSpec(head_slab.shape, lambda l: (0, 0)),
        ],
        out_specs=(pl.BlockSpec((nq_rows, NUM_CLASSES + 1), lambda l: (0, 0)),
                   pl.BlockSpec((nq_rows, 4), lambda l: (0, 0))),
        scratch_shapes=[pltpu.VMEM((nq_rows, HIDDEN), jnp.float32)],   # tgt carry
        compiler_params=_ARB,
    )(memory, pos, qpos, bias, dec_slab, head_slab)


# ---------------------------------------------------------------------------
# Plain-JAX glue (positional embedding, patchify, layout plumbing)
# ---------------------------------------------------------------------------
def position_embedding_sine(mask, num_pos_feats, temperature=10000.0):
    """Channel-LAST positional embedding [B, H, W, 2*num_pos_feats]."""
    not_mask = (~mask).astype(jnp.float32)
    y_embed = jnp.cumsum(not_mask, axis=1)
    x_embed = jnp.cumsum(not_mask, axis=2)
    eps = 1e-6
    scale = 2.0 * math.pi
    y_embed = y_embed / (y_embed[:, -1:, :] + eps) * scale
    x_embed = x_embed / (x_embed[:, :, -1:] + eps) * scale
    dim_t = jnp.arange(num_pos_feats, dtype=jnp.float32)
    dim_t = temperature ** (2.0 * jnp.floor(dim_t / 2.0) / num_pos_feats)
    pos_x = x_embed[..., None] / dim_t
    pos_y = y_embed[..., None] / dim_t
    pos_x = jnp.stack((jnp.sin(pos_x[..., 0::2]), jnp.cos(pos_x[..., 1::2])),
                      axis=4).reshape(*pos_x.shape[:3], -1)
    pos_y = jnp.stack((jnp.sin(pos_y[..., 0::2]), jnp.cos(pos_y[..., 1::2])),
                      axis=4).reshape(*pos_y.shape[:3], -1)
    return jnp.concatenate((pos_y, pos_x), axis=3)   # [B, H, W, C]


def detr_forward(params, images, mask):
    B, C_in, H, W = images.shape
    h, w_sp = H // PATCH, W // PATCH
    HW = h * w_sp

    # patchify (layout plumbing only; the projection itself runs inside the encoder kernel)
    patches = images.reshape(B, C_in, h, PATCH, w_sp, PATCH)
    patches = patches.transpose(0, 2, 4, 1, 3, 5).reshape(B * HW, C_in * PATCH * PATCH)

    # positional embedding + key-padding bias (tiny, not in the hot path)
    m_ds = mask[:, ::PATCH, ::PATCH]                                   # [B, h, w]
    pos = position_embedding_sine(m_ds, HIDDEN // 2).reshape(B * HW, HIDDEN)
    bias = jnp.where(m_ds.reshape(B, HW), -1e9, 0.0).astype(jnp.float32)   # [B, HW]

    # one fused pallas_call per transformer stack
    memory = encoder_stack(patches, pos, bias, params["bb_slab"], params["enc_slab"])

    qpos = jnp.broadcast_to(params["query_embed"][None],
                            (B, NUM_QUERIES, HIDDEN)).reshape(B * NUM_QUERIES, HIDDEN)
    logits, boxes = decoder_stack(memory, pos, qpos, bias,
                                  params["dec_slab"], params["head_slab"])

    return {"pred_logits": logits.reshape(B, NUM_QUERIES, NUM_CLASSES + 1),
            "pred_boxes": boxes.reshape(B, NUM_QUERIES, 4)}


# ---------------------------------------------------------------------------
# Deterministic synthetic parameter init (packed-slab layout, scale folded into q proj)
# ---------------------------------------------------------------------------
def init_params(key):
    keys = iter(jax.random.split(key, 512))

    def w(shape, scale=0.02):
        return (scale * jax.random.normal(next(keys), shape)).astype(jnp.float32)

    def zeros(shape):
        return jnp.zeros(shape, jnp.float32)

    def ones(shape):
        return jnp.ones(shape, jnp.float32)

    def enc_layer():
        # NOTE: when importing real checkpoint weights, the q bias must be scaled too.
        return dict(
            wq=w((HIDDEN, HIDDEN)) * ATTN_SCALE, bq=zeros((1, HIDDEN)) * ATTN_SCALE,
            wk=w((HIDDEN, HIDDEN)), bk=zeros((1, HIDDEN)),
            wv=w((HIDDEN, HIDDEN)), bv=zeros((1, HIDDEN)),
            wo=w((HIDDEN, HIDDEN)), bo=zeros((1, HIDDEN)),
            ln1_g=ones((1, HIDDEN)), ln1_b=zeros((1, HIDDEN)),
            w1=w((HIDDEN, DIM_FFN)), b1=zeros((1, DIM_FFN)),
            w2=w((DIM_FFN, HIDDEN)), b2=zeros((1, HIDDEN)),
            ln2_g=ones((1, HIDDEN)), ln2_b=zeros((1, HIDDEN)),
        )

    def dec_layer():
        return dict(
            s_wq=w((HIDDEN, HIDDEN)) * ATTN_SCALE, s_bq=zeros((1, HIDDEN)) * ATTN_SCALE,
            s_wk=w((HIDDEN, HIDDEN)), s_bk=zeros((1, HIDDEN)),
            s_wv=w((HIDDEN, HIDDEN)), s_bv=zeros((1, HIDDEN)),
            s_wo=w((HIDDEN, HIDDEN)), s_bo=zeros((1, HIDDEN)),
            c_wq=w((HIDDEN, HIDDEN)) * ATTN_SCALE, c_bq=zeros((1, HIDDEN)) * ATTN_SCALE,
            c_wk=w((HIDDEN, HIDDEN)), c_bk=zeros((1, HIDDEN)),
            c_wv=w((HIDDEN, HIDDEN)), c_bv=zeros((1, HIDDEN)),
            c_wo=w((HIDDEN, HIDDEN)), c_bo=zeros((1, HIDDEN)),
            ln1_g=ones((1, HIDDEN)), ln1_b=zeros((1, HIDDEN)),
            ln2_g=ones((1, HIDDEN)), ln2_b=zeros((1, HIDDEN)),
            w1=w((HIDDEN, DIM_FFN)), b1=zeros((1, DIM_FFN)),
            w2=w((DIM_FFN, HIDDEN)), b2=zeros((1, HIDDEN)),
            ln3_g=ones((1, HIDDEN)), ln3_b=zeros((1, HIDDEN)),
        )

    bb = dict(wb=w((PATCH_DIM, NUM_CHANNELS)), bb=zeros((1, NUM_CHANNELS)),
              wp=w((NUM_CHANNELS, HIDDEN)), bp=zeros((1, HIDDEN)))
    heads = dict(norm_g=ones((1, HIDDEN)), norm_b=zeros((1, HIDDEN)),
                 wc=w((HIDDEN, NUM_CLASSES + 1)), bc=zeros((1, NUM_CLASSES + 1)),
                 w1=w((HIDDEN, HIDDEN)), b1=zeros((1, HIDDEN)),
                 w2=w((HIDDEN, HIDDEN)), b2=zeros((1, HIDDEN)),
                 w3=w((HIDDEN, 4)), b3=zeros((1, 4)))

    enc_slab = jnp.stack([_pack_slab(ENC_LAYOUT, R_ENC, enc_layer())
                          for _ in range(ENC_LAYERS)])
    dec_slab = jnp.stack([_pack_slab(DEC_LAYOUT, R_DEC, dec_layer())
                          for _ in range(DEC_LAYERS)])

    return dict(
        bb_slab=_pack_slab(BB_LAYOUT, R_BB, bb),
        enc_slab=enc_slab,
        dec_slab=dec_slab,
        head_slab=_pack_slab(HEAD_LAYOUT, R_HEAD, heads),
        query_embed=w((NUM_QUERIES, HIDDEN), scale=1.0),
    )


if __name__ == "__main__":
    key = jax.random.PRNGKey(0)
    pk, ik = jax.random.split(key)
    params = init_params(pk)

    B, H, W = 2, 32, 32
    images = jax.random.normal(ik, (B, 3, H, W), dtype=jnp.float32)
    # padding mask (True = padded pixel); image 1 padded on the right/bottom quarter
    mask = jnp.zeros((B, H, W), dtype=bool)
    mask = mask.at[1, :, 24:].set(True)
    mask = mask.at[1, 24:, :].set(True)

    forward = jax.jit(detr_forward)
    out = forward(params, images, mask)
    jax.block_until_ready(out)

    assert out["pred_logits"].shape == (B, NUM_QUERIES, NUM_CLASSES + 1)
    assert out["pred_boxes"].shape == (B, NUM_QUERIES, 4)
    assert bool(jnp.all(jnp.isfinite(out["pred_logits"])))
    assert bool(jnp.all((out["pred_boxes"] >= 0.0) & (out["pred_boxes"] <= 1.0)))
    print("KERNEL_OK")
</pallas_src>

<mosaic_0001>
module attributes {stable_mosaic.version = 11 : i64} {
  func.func @_encoder_stack_kernel(%arg0: i32, %arg1: memref<128x48xf32, #tpu.memory_space<vmem>>, %arg2: memref<128x32xf32, #tpu.memory_space<vmem>>, %arg3: memref<2x64xf32, #tpu.memory_space<vmem>>, %arg4: memref<120x64xf32, #tpu.memory_space<vmem>>, %arg5: memref<1x240x64xf32, #tpu.memory_space<vmem>>, %arg6: memref<128x32xf32, #tpu.memory_space<vmem>>) attributes {dimension_semantics = [#tpu.dimension_semantics<arbitrary>], iteration_bounds = array<i64: 2>, scalar_prefetch = 0 : i64, scratch_operands = 0 : i64, tpu.core_type = #tpu.core_type<tc>, window_params = [{pipeline_mode = #tpu.pipeline_mode<synchronous>, transform_indices = @transform_0, window_bounds = array<i64: 128, 48>}, {pipeline_mode = #tpu.pipeline_mode<synchronous>, transform_indices = @transform_1, window_bounds = array<i64: 128, 32>}, {pipeline_mode = #tpu.pipeline_mode<synchronous>, transform_indices = @transform_2, window_bounds = array<i64: 2, 64>}, {pipeline_mode = #tpu.pipeline_mode<synchronous>, transform_indices = @transform_3, window_bounds = array<i64: 120, 64>}, {transform_indices = @transform_4, window_bounds = array<i64: 1, 240, 64>}, {pipeline_mode = #tpu.pipeline_mode<synchronous>, transform_indices = @transform_5, window_bounds = array<i64: 128, 32>}]} {
    %c0_i32 = arith.constant 0 : i32
    %0 = arith.cmpi eq, %arg0, %c0_i32 : i32
    %1 = arith.extui %0 : i1 to i32
    %c0_i32_0 = arith.constant 0 : i32
    %2 = arith.cmpi ne, %1, %c0_i32_0 : i32
    scf.if %2 {
      %c0_98 = arith.constant 0 : index
      %c0_99 = arith.constant 0 : index
      %268 = vector.load %arg4[%c0_98, %c0_99] : memref<120x64xf32, #tpu.memory_space<vmem>>, vector<48x64xf32>
      %c48 = arith.constant 48 : index
      %c0_100 = arith.constant 0 : index
      %269 = vector.load %arg4[%c48, %c0_100] : memref<120x64xf32, #tpu.memory_space<vmem>>, vector<1x64xf32>
      %c49 = arith.constant 49 : index
      %c0_101 = arith.constant 0 : index
      %270 = vector.load %arg4[%c49, %c0_101] : memref<120x64xf32, #tpu.memory_space<vmem>>, vector<64x32xf32>
      %c113 = arith.constant 113 : index
      %c0_102 = arith.constant 0 : index
      %271 = vector.load %arg4[%c113, %c0_102] : memref<120x64xf32, #tpu.memory_space<vmem>>, vector<1x32xf32>
      %c0_103 = arith.constant 0 : index
      %c0_104 = arith.constant 0 : index
      %272 = vector.load %arg1[%c0_103, %c0_104] : memref<128x48xf32, #tpu.memory_space<vmem>>, vector<128x48xf32>
      %cst_105 = arith.constant dense<0.000000e+00> : vector<128x64xf32>
      %273 = tpu.matmul %272, %268, %cst_105 {dimension_numbers = #tpu.dot_dimension_numbers<[1], [0], [0], [1], [0, 0, 1, 1], [], []>} : vector<128x48xf32>, vector<48x64xf32>, vector<128x64xf32> -> vector<128x64xf32>
      %274 = vector.broadcast %269 : vector<1x64xf32> to vector<128x64xf32>
      %275 = arith.addf %273, %274 : vector<128x64xf32>
      %cst_106 = arith.constant 0.000000e+00 : f32
      %276 = vector.broadcast %cst_106 : f32 to vector<128x64xf32>
      %277 = arith.maximumf %275, %276 : vector<128x64xf32>
      %cst_107 = arith.constant dense<0.000000e+00> : vector<128x32xf32>
      %278 = tpu.matmul %277, %270, %cst_107 {dimension_numbers = #tpu.dot_dimension_numbers<[1], [0], [0], [1], [0, 0, 1, 1], [], []>} : vector<128x64xf32>, vector<64x32xf32>, vector<128x32xf32> -> vector<128x32xf32>
      %279 = vector.broadcast %271 : vector<1x32xf32> to vector<128x32xf32>
      %280 = arith.addf %278, %279 : vector<128x32xf32>
      %c0_108 = arith.constant 0 : index
      %c0_109 = arith.constant 0 : index
      %281 = vector.load %arg6[%c0_108, %c0_109] : memref<128x32xf32, #tpu.memory_space<vmem>>, vector<128x32xf32>
      tpu.vector_store %arg6[%c0_108, %c0_109], %280 {strides = array<i32>} : memref<128x32xf32, #tpu.memory_space<vmem>>, vector<128x32xf32>,
    } else {
    }
    %c0 = arith.constant 0 : index
    %c0_1 = arith.constant 0 : index
    %3 = vector.load %arg6[%c0, %c0_1] : memref<128x32xf32, #tpu.memory_space<vmem>>, vector<128x32xf32>
    %c0_2 = arith.constant 0 : index
    %c0_3 = arith.constant 0 : index
    %4 = vector.load %arg2[%c0_2, %c0_3] : memref<128x32xf32, #tpu.memory_space<vmem>>, vector<128x32xf32>
    %c0_4 = arith.constant 0 : index
    %c0_5 = arith.constant 0 : index
    %5 = vector.load %arg3[%c0_4, %c0_5] : memref<2x64xf32, #tpu.memory_space<vmem>>, vector<2x64xf32>
    %6 = arith.addf %3, %4 : vector<128x32xf32>
    %c0_6 = arith.constant 0 : index
    %c0_7 = arith.constant 0 : index
    %c0_8 = arith.constant 0 : index
    %7 = vector.load %arg5[%c0_6, %c0_7, %c0_8] : memref<1x240x64xf32, #tpu.memory_space<vmem>>, vector<1x32x32xf32>
    %8 = vector.shape_cast %7 : vector<1x32x32xf32> to vector<32x32xf32>
    %c0_9 = arith.constant 0 : index
    %c128 = arith.constant 128 : index
    %c0_10 = arith.constant 0 : index
    %9 = vector.load %arg5[%c0_9, %c128, %c0_10] : memref<1x240x64xf32, #tpu.memory_space<vmem>>, vector<1x1x32xf32>
    %10 = vector.shape_cast %9 : vector<1x1x32xf32> to vector<1x32xf32>
    %c0_11 = arith.constant 0 : index
    %c32 = arith.constant 32 : index
    %c0_12 = arith.constant 0 : index
    %11 = vector.load %arg5[%c0_11, %c32, %c0_12] : memref<1x240x64xf32, #tpu.memory_space<vmem>>, vector<1x32x32xf32>
    %12 = vector.shape_cast %11 : vector<1x32x32xf32> to vector<32x32xf32>
    %c0_13 = arith.constant 0 : index
    %c129 = arith.constant 129 : index
    %c0_14 = arith.constant 0 : index
    %13 = vector.load %arg5[%c0_13, %c129, %c0_14] : memref<1x240x64xf32, #tpu.memory_space<vmem>>, vector<1x1x32xf32>
    %14 = vector.shape_cast %13 : vector<1x1x32xf32> to vector<1x32xf32>
    %c0_15 = arith.constant 0 : index
    %c64 = arith.constant 64 : index
    %c0_16 = arith.constant 0 : index
    %15 = vector.load %arg5[%c0_15, %c64, %c0_16] : memref<1x240x64xf32, #tpu.memory_space<vmem>>, vector<1x32x32xf32>
    %16 = vector.shape_cast %15 : vector<1x32x32xf32> to vector<32x32xf32>
    %c0_17 = arith.constant 0 : index
    %c130 = arith.constant 130 : index
    %c0_18 = arith.constant 0 : index
    %17 = vector.load %arg5[%c0_17, %c130, %c0_18] : memref<1x240x64xf32, #tpu.memory_space<vmem>>, vector<1x1x32xf32>
    %18 = vector.shape_cast %17 : vector<1x1x32xf32> to vector<1x32xf32>
    %c0_19 = arith.constant 0 : index
    %c96 = arith.constant 96 : index
    %c0_20 = arith.constant 0 : index
    %19 = vector.load %arg5[%c0_19, %c96, %c0_20] : memref<1x240x64xf32, #tpu.memory_space<vmem>>, vector<1x32x32xf32>
    %20 = vector.shape_cast %19 : vector<1x32x32xf32> to vector<32x32xf32>
    %c0_21 = arith.constant 0 : index
    %c131 = arith.constant 131 : index
    %c0_22 = arith.constant 0 : index
    %21 = vector.load %arg5[%c0_21, %c131, %c0_22] : memref<1x240x64xf32, #tpu.memory_space<vmem>>, vector<1x1x32xf32>
    %22 = vector.shape_cast %21 : vector<1x1x32xf32> to vector<1x32xf32>
    %cst = arith.constant dense<0.000000e+00> : vector<128x32xf32>
    %23 = tpu.matmul %6, %8, %cst {dimension_numbers = #tpu.dot_dimension_numbers<[1], [0], [0], [1], [0, 0, 1, 1], [], []>} : vector<128x32xf32>, vector<32x32xf32>, vector<128x32xf32> -> vector<128x32xf32>
    %24 = vector.broadcast %10 : vector<1x32xf32> to vector<128x32xf32>
    %25 = arith.addf %23, %24 : vector<128x32xf32>
    %cst_23 = arith.constant dense<0.000000e+00> : vector<128x32xf32>
    %26 = tpu.matmul %6, %12, %cst_23 {dimension_numbers = #tpu.dot_dimension_numbers<[1], [0], [0], [1], [0, 0, 1, 1], [], []>} : vector<128x32xf32>, vector<32x32xf32>, vector<128x32xf32> -> vector<128x32xf32>
    %27 = vector.broadcast %14 : vector<1x32xf32> to vector<128x32xf32>
    %28 = arith.addf %26, %27 : vector<128x32xf32>
    %cst_24 = arith.constant dense<0.000000e+00> : vector<128x32xf32>
    %29 = tpu.matmul %3, %16, %cst_24 {dimension_numbers = #tpu.dot_dimension_numbers<[1], [0], [0], [1], [0, 0, 1, 1], [], []>} : vector<128x32xf32>, vector<32x32xf32>, vector<128x32xf32> -> vector<128x32xf32>
    %30 = vector.broadcast %18 : vector<1x32xf32> to vector<128x32xf32>
    %31 = arith.addf %29, %30 : vector<128x32xf32>
    %32 = vector.extract_strided_slice %25 {offsets = [0, 0], sizes = [64, 32], strides = [1, 1]} : vector<128x32xf32> to vector<64x32xf32>
    %33 = vector.extract_strided_slice %28 {offsets = [0, 0], sizes = [64, 32], strides = [1, 1]} : vector<128x32xf32> to vector<64x32xf32>
    %34 = vector.extract_strided_slice %31 {offsets = [0, 0], sizes = [64, 32], strides = [1, 1]} : vector<128x32xf32> to vector<64x32xf32>
    %35 = vector.extract_strided_slice %5 {offsets = [0, 0], sizes = [1, 64], strides = [1, 1]} : vector<2x64xf32> to vector<1x64xf32>
    %36 = vector.shape_cast %35 : vector<1x64xf32> to vector<1x64xf32>
    %37 = vector.broadcast %36 : vector<1x64xf32> to vector<64x64xf32>
    %cst_25 = arith.constant 0.000000e+00 : f32
    %38 = vector.broadcast %cst_25 : f32 to vector<64x32xf32>
    %39 = vector.extract_strided_slice %32 {offsets = [0, 0], sizes = [64, 8], strides = [1, 1]} : vector<64x32xf32> to vector<64x8xf32>
    %40 = vector.extract_strided_slice %33 {offsets = [0, 0], sizes = [64, 8], strides = [1, 1]} : vector<64x32xf32> to vector<64x8xf32>
    %cst_26 = arith.constant dense<0.000000e+00> : vector<64x64xf32>
    %41 = tpu.matmul %39, %40, %cst_26 {dimension_numbers = #tpu.dot_dimension_numbers<[1], [1], [0], [0], [0, 0, 1, 0], [], []>} : vector<64x8xf32>, vector<64x8xf32>, vector<64x64xf32> -> vector<64x64xf32>
    %42 = arith.addf %41, %37 : vector<64x64xf32>
    %cst_27 = arith.constant dense<0xFF800000> : vector<64xf32>
    %43 = vector.multi_reduction <maximumf>, %42, %cst_27 [1] : vector<64x64xf32> to vector<64xf32>
    %44 = vector.shape_cast %43 : vector<64xf32> to vector<64x1xf32>
    %45 = vector.broadcast %44 : vector<64x1xf32> to vector<64x64xf32>
    %46 = arith.subf %42, %45 : vector<64x64xf32>
    %47 = math.exp %46 : vector<64x64xf32>
    %cst_28 = arith.constant dense<0.000000e+00> : vector<64xf32>
    %48 = vector.multi_reduction <add>, %47, %cst_28 [1] : vector<64x64xf32> to vector<64xf32>
    %49 = vector.shape_cast %48 : vector<64xf32> to vector<64x1xf32>
    %50 = tpu.reciprocal %49 {approx = true} : vector<64x1xf32> -> vector<64x1xf32>
    %51 = vector.broadcast %50 : vector<64x1xf32> to vector<64x64xf32>
    %52 = arith.mulf %47, %51 : vector<64x64xf32>
    %53 = vector.extract_strided_slice %34 {offsets = [0, 0], sizes = [64, 8], strides = [1, 1]} : vector<64x32xf32> to vector<64x8xf32>
    %cst_29 = arith.constant dense<0.000000e+00> : vector<64x8xf32>
    %54 = tpu.matmul %52, %53, %cst_29 {dimension_numbers = #tpu.dot_dimension_numbers<[1], [0], [0], [1], [0, 0, 1, 1], [], []>} : vector<64x64xf32>, vector<64x8xf32>, vector<64x8xf32> -> vector<64x8xf32>
    %55 = vector.extract_strided_slice %20 {offsets = [0, 0], sizes = [8, 32], strides = [1, 1]} : vector<32x32xf32> to vector<8x32xf32>
    %cst_30 = arith.constant dense<0.000000e+00> : vector<64x32xf32>
    %56 = tpu.matmul %54, %55, %cst_30 {dimension_numbers = #tpu.dot_dimension_numbers<[1], [0], [0], [1], [0, 0, 1, 1], [], []>} : vector<64x8xf32>, vector<8x32xf32>, vector<64x32xf32> -> vector<64x32xf32>
    %57 = arith.addf %38, %56 : vector<64x32xf32>
    %58 = vector.extract_strided_slice %32 {offsets = [0, 8], sizes = [64, 8], strides = [1, 1]} : vector<64x32xf32> to vector<64x8xf32>
    %59 = vector.extract_strided_slice %33 {offsets = [0, 8], sizes = [64, 8], strides = [1, 1]} : vector<64x32xf32> to vector<64x8xf32>
    %cst_31 = arith.constant dense<0.000000e+00> : vector<64x64xf32>
    %60 = tpu.matmul %58, %59, %cst_31 {dimension_numbers = #tpu.dot_dimension_numbers<[1], [1], [0], [0], [0, 0, 1, 0], [], []>} : vector<64x8xf32>, vector<64x8xf32>, vector<64x64xf32> -> vector<64x64xf32>
    %61 = arith.addf %60, %37 : vector<64x64xf32>
    %cst_32 = arith.constant dense<0xFF800000> : vector<64xf32>
    %62 = vector.multi_reduction <maximumf>, %61, %cst_32 [1] : vector<64x64xf32> to vector<64xf32>
    %63 = vector.shape_cast %62 : vector<64xf32> to vector<64x1xf32>
    %64 = vector.broadcast %63 : vector<64x1xf32> to vector<64x64xf32>
    %65 = arith.subf %61, %64 : vector<64x64xf32>
    %66 = math.exp %65 : vector<64x64xf32>
    %cst_33 = arith.constant dense<0.000000e+00> : vector<64xf32>
    %67 = vector.multi_reduction <add>, %66, %cst_33 [1] : vector<64x64xf32> to vector<64xf32>
    %68 = vector.shape_cast %67 : vector<64xf32> to vector<64x1xf32>
    %69 = tpu.reciprocal %68 {approx = true} : vector<64x1xf32> -> vector<64x1xf32>
    %70 = vector.broadcast %69 : vector<64x1xf32> to vector<64x64xf32>
    %71 = arith.mulf %66, %70 : vector<64x64xf32>
    %72 = vector.extract_strided_slice %34 {offsets = [0, 8], sizes = [64, 8], strides = [1, 1]} : vector<64x32xf32> to vector<64x8xf32>
    %cst_34 = arith.constant dense<0.000000e+00> : vector<64x8xf32>
    %73 = tpu.matmul %71, %72, %cst_34 {dimension_numbers = #tpu.dot_dimension_numbers<[1], [0], [0], [1], [0, 0, 1, 1], [], []>} : vector<64x64xf32>, vector<64x8xf32>, vector<64x8xf32> -> vector<64x8xf32>
    %74 = vector.extract_strided_slice %20 {offsets = [8, 0], sizes = [8, 32], strides = [1, 1]} : vector<32x32xf32> to vector<8x32xf32>
    %cst_35 = arith.constant dense<0.000000e+00> : vector<64x32xf32>
    %75 = tpu.matmul %73, %74, %cst_35 {dimension_numbers = #tpu.dot_dimension_numbers<[1], [0], [0], [1], [0, 0, 1, 1], [], []>} : vector<64x8xf32>, vector<8x32xf32>, vector<64x32xf32> -> vector<64x32xf32>
    %76 = arith.addf %57, %75 : vector<64x32xf32>
    %77 = vector.extract_strided_slice %32 {offsets = [0, 16], sizes = [64, 8], strides = [1, 1]} : vector<64x32xf32> to vector<64x8xf32>
    %78 = vector.extract_strided_slice %33 {offsets = [0, 16], sizes = [64, 8], strides = [1, 1]} : vector<64x32xf32> to vector<64x8xf32>
    %cst_36 = arith.constant dense<0.000000e+00> : vector<64x64xf32>
    %79 = tpu.matmul %77, %78, %cst_36 {dimension_numbers = #tpu.dot_dimension_numbers<[1], [1], [0], [0], [0, 0, 1, 0], [], []>} : vector<64x8xf32>, vector<64x8xf32>, vector<64x64xf32> -> vector<64x64xf32>
    %80 = arith.addf %79, %37 : vector<64x64xf32>
    %cst_37 = arith.constant dense<0xFF800000> : vector<64xf32>
    %81 = vector.multi_reduction <maximumf>, %80, %cst_37 [1] : vector<64x64xf32> to vector<64xf32>
    %82 = vector.shape_cast %81 : vector<64xf32> to vector<64x1xf32>
    %83 = vector.broadcast %82 : vector<64x1xf32> to vector<64x64xf32>
    %84 = arith.subf %80, %83 : vector<64x64xf32>
    %85 = math.exp %84 : vector<64x64xf32>
    %cst_38 = arith.constant dense<0.000000e+00> : vector<64xf32>
    %86 = vector.multi_reduction <add>, %85, %cst_38 [1] : vector<64x64xf32> to vector<64xf32>
    %87 = vector.shape_cast %86 : vector<64xf32> to vector<64x1xf32>
    %88 = tpu.reciprocal %87 {approx = true} : vector<64x1xf32> -> vector<64x1xf32>
    %89 = vector.broadcast %88 : vector<64x1xf32> to vector<64x64xf32>
    %90 = arith.mulf %85, %89 : vector<64x64xf32>
    %91 = vector.extract_strided_slice %34 {offsets = [0, 16], sizes = [64, 8], strides = [1, 1]} : vector<64x32xf32> to vector<64x8xf32>
    %cst_39 = arith.constant dense<0.000000e+00> : vector<64x8xf32>
    %92 = tpu.matmul %90, %91, %cst_39 {dimension_numbers = #tpu.dot_dimension_numbers<[1], [0], [0], [1], [0, 0, 1, 1], [], []>} : vector<64x64xf32>, vector<64x8xf32>, vector<64x8xf32> -> vector<64x8xf32>
    %93 = vector.extract_strided_slice %20 {offsets = [16, 0], sizes = [8, 32], strides = [1, 1]} : vector<32x32xf32> to vector<8x32xf32>
    %cst_40 = arith.constant dense<0.000000e+00> : vector<64x32xf32>
    %94 = tpu.matmul %92, %93, %cst_40 {dimension_numbers = #tpu.dot_dimension_numbers<[1], [0], [0], [1], [0, 0, 1, 1], [], []>} : vector<64x8xf32>, vector<8x32xf32>, vector<64x32xf32> -> vector<64x32xf32>
    %95 = arith.addf %76, %94 : vector<64x32xf32>
    %96 = vector.extract_strided_slice %32 {offsets = [0, 24], sizes = [64, 8], strides = [1, 1]} : vector<64x32xf32> to vector<64x8xf32>
    %97 = vector.extract_strided_slice %33 {offsets = [0, 24], sizes = [64, 8], strides = [1, 1]} : vector<64x32xf32> to vector<64x8xf32>
    %cst_41 = arith.constant dense<0.000000e+00> : vector<64x64xf32>
    %98 = tpu.matmul %96, %97, %cst_41 {dimension_numbers = #tpu.dot_dimension_numbers<[1], [1], [0], [0], [0, 0, 1, 0], [], []>} : vector<64x8xf32>, vector<64x8xf32>, vector<64x64xf32> -> vector<64x64xf32>
    %99 = arith.addf %98, %37 : vector<64x64xf32>
    %cst_42 = arith.constant dense<0xFF800000> : vector<64xf32>
    %100 = vector.multi_reduction <maximumf>, %99, %cst_42 [1] : vector<64x64xf32> to vector<64xf32>
    %101 = vector.shape_cast %100 : vector<64xf32> to vector<64x1xf32>
    %102 = vector.broadcast %101 : vector<64x1xf32> to vector<64x64xf32>
    %103 = arith.subf %99, %102 : vector<64x64xf32>
    %104 = math.exp %103 : vector<64x64xf32>
    %cst_43 = arith.constant dense<0.000000e+00> : vector<64xf32>
    %105 = vector.multi_reduction <add>, %104, %cst_43 [1] : vector<64x64xf32> to vector<64xf32>
    %106 = vector.shape_cast %105 : vector<64xf32> to vector<64x1xf32>
    %107 = tpu.reciprocal %106 {approx = true} : vector<64x1xf32> -> vector<64x1xf32>
    %108 = vector.broadcast %107 : vector<64x1xf32> to vector<64x64xf32>
    %109 = arith.mulf %104, %108 : vector<64x64xf32>
    %110 = vector.extract_strided_slice %34 {offsets = [0, 24], sizes = [64, 8], strides = [1, 1]} : vector<64x32xf32> to vector<64x8xf32>
    %cst_44 = arith.constant dense<0.000000e+00> : vector<64x8xf32>
    %111 = tpu.matmul %109, %110, %cst_44 {dimension_numbers = #tpu.dot_dimension_numbers<[1], [0], [0], [1], [0, 0, 1, 1], [], []>} : vector<64x64xf32>, vector<64x8xf32>, vector<64x8xf32> -> vector<64x8xf32>
    %112 = vector.extract_strided_slice %20 {offsets = [24, 0], sizes = [8, 32], strides = [1, 1]} : vector<32x32xf32> to vector<8x32xf32>
    %cst_45 = arith.constant dense<0.000000e+00> : vector<64x32xf32>
    %113 = tpu.matmul %111, %112, %cst_45 {dimension_numbers = #tpu.dot_dimension_numbers<[1], [0], [0], [1], [0, 0, 1, 1], [], []>} : vector<64x8xf32>, vector<8x32xf32>, vector<64x32xf32> -> vector<64x32xf32>
    %114 = arith.addf %95, %113 : vector<64x32xf32>
    %115 = vector.extract_strided_slice %25 {offsets = [64, 0], sizes = [64, 32], strides = [1, 1]} : vector<128x32xf32> to vector<64x32xf32>
    %116 = vector.extract_strided_slice %28 {offsets = [64, 0], sizes = [64, 32], strides = [1, 1]} : vector<128x32xf32> to vector<64x32xf32>
    %117 = vector.extract_strided_slice %31 {offsets = [64, 0], sizes = [64, 32], strides = [1, 1]} : vector<128x32xf32> to vector<64x32xf32>
    %118 = vector.extract_strided_slice %5 {offsets = [1, 0], sizes = [1, 64], strides = [1, 1]} : vector<2x64xf32> to vector<1x64xf32>
    %119 = vector.shape_cast %118 : vector<1x64xf32> to vector<1x64xf32>
    %120 = vector.broadcast %119 : vector<1x64xf32> to vector<64x64xf32>
    %cst_46 = arith.constant 0.000000e+00 : f32
    %121 = vector.broadcast %cst_46 : f32 to vector<64x32xf32>
    %122 = vector.extract_strided_slice %115 {offsets = [0, 0], sizes = [64, 8], strides = [1, 1]} : vector<64x32xf32> to vector<64x8xf32>
    %123 = vector.extract_strided_slice %116 {offsets = [0, 0], sizes = [64, 8], strides = [1, 1]} : vector<64x32xf32> to vector<64x8xf32>
    %cst_47 = arith.constant dense<0.000000e+00> : vector<64x64xf32>
    %124 = tpu.matmul %122, %123, %cst_47 {dimension_numbers = #tpu.dot_dimension_numbers<[1], [1], [0], [0], [0, 0, 1, 0], [], []>} : vector<64x8xf32>, vector<64x8xf32>, vector<64x64xf32> -> vector<64x64xf32>
    %125 = arith.addf %124, %120 : vector<64x64xf32>
    %cst_48 = arith.constant dense<0xFF800000> : vector<64xf32>
    %126 = vector.multi_reduction <maximumf>, %125, %cst_48 [1] : vector<64x64xf32> to vector<64xf32>
    %127 = vector.shape_cast %126 : vector<64xf32> to vector<64x1xf32>
    %128 = vector.broadcast %127 : vector<64x1xf32> to vector<64x64xf32>
    %129 = arith.subf %125, %128 : vector<64x64xf32>
    %130 = math.exp %129 : vector<64x64xf32>
    %cst_49 = arith.constant dense<0.000000e+00> : vector<64xf32>
    %131 = vector.multi_reduction <add>, %130, %cst_49 [1] : vector<64x64xf32> to vector<64xf32>
    %132 = vector.shape_cast %131 : vector<64xf32> to vector<64x1xf32>
    %133 = tpu.reciprocal %132 {approx = true} : vector<64x1xf32> -> vector<64x1xf32>
    %134 = vector.broadcast %133 : vector<64x1xf32> to vector<64x64xf32>
    %135 = arith.mulf %130, %134 : vector<64x64xf32>
    %136 = vector.extract_strided_slice %117 {offsets = [0, 0], sizes = [64, 8], strides = [1, 1]} : vector<64x32xf32> to vector<64x8xf32>
    %cst_50 = arith.constant dense<0.000000e+00> : vector<64x8xf32>
    %137 = tpu.matmul %135, %136, %cst_50 {dimension_numbers = #tpu.dot_dimension_numbers<[1], [0], [0], [1], [0, 0, 1, 1], [], []>} : vector<64x64xf32>, vector<64x8xf32>, vector<64x8xf32> -> vector<64x8xf32>
    %138 = vector.extract_strided_slice %20 {offsets = [0, 0], sizes = [8, 32], strides = [1, 1]} : vector<32x32xf32> to vector<8x32xf32>
    %cst_51 = arith.constant dense<0.000000e+00> : vector<64x32xf32>
    %139 = tpu.matmul %137, %138, %cst_51 {dimension_numbers = #tpu.dot_dimension_numbers<[1], [0], [0], [1], [0, 0, 1, 1], [], []>} : vector<64x8xf32>, vector<8x32xf32>, vector<64x32xf32> -> vector<64x32xf32>
    %140 = arith.addf %121, %139 : vector<64x32xf32>
    %141 = vector.extract_strided_slice %115 {offsets = [0, 8], sizes = [64, 8], strides = [1, 1]} : vector<64x32xf32> to vector<64x8xf32>
    %142 = vector.extract_strided_slice %116 {offsets = [0, 8], sizes = [64, 8], strides = [1, 1]} : vector<64x32xf32> to vector<64x8xf32>
    %cst_52 = arith.constant dense<0.000000e+00> : vector<64x64xf32>
    %143 = tpu.matmul %141, %142, %cst_52 {dimension_numbers = #tpu.dot_dimension_numbers<[1], [1], [0], [0], [0, 0, 1, 0], [], []>} : vector<64x8xf32>, vector<64x8xf32>, vector<64x64xf32> -> vector<64x64xf32>
    %144 = arith.addf %143, %120 : vector<64x64xf32>
    %cst_53 = arith.constant dense<0xFF800000> : vector<64xf32>
    %145 = vector.multi_reduction <maximumf>, %144, %cst_53 [1] : vector<64x64xf32> to vector<64xf32>
    %146 = vector.shape_cast %145 : vector<64xf32> to vector<64x1xf32>
    %147 = vector.broadcast %146 : vector<64x1xf32> to vector<64x64xf32>
    %148 = arith.subf %144, %147 : vector<64x64xf32>
    %149 = math.exp %148 : vector<64x64xf32>
    %cst_54 = arith.constant dense<0.000000e+00> : vector<64xf32>
    %150 = vector.multi_reduction <add>, %149, %cst_54 [1] : vector<64x64xf32> to vector<64xf32>
    %151 = vector.shape_cast %150 : vector<64xf32> to vector<64x1xf32>
    %152 = tpu.reciprocal %151 {approx = true} : vector<64x1xf32> -> vector<64x1xf32>
    %153 = vector.broadcast %152 : vector<64x1xf32> to vector<64x64xf32>
    %154 = arith.mulf %149, %153 : vector<64x64xf32>
    %155 = vector.extract_strided_slice %117 {offsets = [0, 8], sizes = [64, 8], strides = [1, 1]} : vector<64x32xf32> to vector<64x8xf32>
    %cst_55 = arith.constant dense<0.000000e+00> : vector<64x8xf32>
    %156 = tpu.matmul %154, %155, %cst_55 {dimension_numbers = #tpu.dot_dimension_numbers<[1], [0], [0], [1], [0, 0, 1, 1], [], []>} : vector<64x64xf32>, vector<64x8xf32>, vector<64x8xf32> -> vector<64x8xf32>
    %157 = vector.extract_strided_slice %20 {offsets = [8, 0], sizes = [8, 32], strides = [1, 1]} : vector<32x32xf32> to vector<8x32xf32>
    %cst_56 = arith.constant dense<0.000000e+00> : vector<64x32xf32>
    %158 = tpu.matmul %156, %157, %cst_56 {dimension_numbers = #tpu.dot_dimension_numbers<[1], [0], [0], [1], [0, 0, 1, 1], [], []>} : vector<64x8xf32>, vector<8x32xf32>, vector<64x32xf32> -> vector<64x32xf32>
    %159 = arith.addf %140, %158 : vector<64x32xf32>
    %160 = vector.extract_strided_slice %115 {offsets = [0, 16], sizes = [64, 8], strides = [1, 1]} : vector<64x32xf32> to vector<64x8xf32>
    %161 = vector.extract_strided_slice %116 {offsets = [0, 16], sizes = [64, 8], strides = [1, 1]} : vector<64x32xf32> to vector<64x8xf32>
    %cst_57 = arith.constant dense<0.000000e+00> : vector<64x64xf32>
    %162 = tpu.matmul %160, %161, %cst_57 {dimension_numbers = #tpu.dot_dimension_numbers<[1], [1], [0], [0], [0, 0, 1, 0], [], []>} : vector<64x8xf32>, vector<64x8xf32>, vector<64x64xf32> -> vector<64x64xf32>
    %163 = arith.addf %162, %120 : vector<64x64xf32>
    %cst_58 = arith.constant dense<0xFF800000> : vector<64xf32>
    %164 = vector.multi_reduction <maximumf>, %163, %cst_58 [1] : vector<64x64xf32> to vector<64xf32>
    %165 = vector.shape_cast %164 : vector<64xf32> to vector<64x1xf32>
    %166 = vector.broadcast %165 : vector<64x1xf32> to vector<64x64xf32>
    %167 = arith.subf %163, %166 : vector<64x64xf32>
    %168 = math.exp %167 : vector<64x64xf32>
    %cst_59 = arith.constant dense<0.000000e+00> : vector<64xf32>
    %169 = vector.multi_reduction <add>, %168, %cst_59 [1] : vector<64x64xf32> to vector<64xf32>
    %170 = vector.shape_cast %169 : vector<64xf32> to vector<64x1xf32>
    %171 = tpu.reciprocal %170 {approx = true} : vector<64x1xf32> -> vector<64x1xf32>
    %172 = vector.broadcast %171 : vector<64x1xf32> to vector<64x64xf32>
    %173 = arith.mulf %168, %172 : vector<64x64xf32>
    %174 = vector.extract_strided_slice %117 {offsets = [0, 16], sizes = [64, 8], strides = [1, 1]} : vector<64x32xf32> to vector<64x8xf32>
    %cst_60 = arith.constant dense<0.000000e+00> : vector<64x8xf32>
    %175 = tpu.matmul %173, %174, %cst_60 {dimension_numbers = #tpu.dot_dimension_numbers<[1], [0], [0], [1], [0, 0, 1, 1], [], []>} : vector<64x64xf32>, vector<64x8xf32>, vector<64x8xf32> -> vector<64x8xf32>
    %176 = vector.extract_strided_slice %20 {offsets = [16, 0], sizes = [8, 32], strides = [1, 1]} : vector<32x32xf32> to vector<8x32xf32>
    %cst_61 = arith.constant dense<0.000000e+00> : vector<64x32xf32>
    %177 = tpu.matmul %175, %176, %cst_61 {dimension_numbers = #tpu.dot_dimension_numbers<[1], [0], [0], [1], [0, 0, 1, 1], [], []>} : vector<64x8xf32>, vector<8x32xf32>, vector<64x32xf32> -> vector<64x32xf32>
    %178 = arith.addf %159, %177 : vector<64x32xf32>
    %179 = vector.extract_strided_slice %115 {offsets = [0, 24], sizes = [64, 8], strides = [1, 1]} : vector<64x32xf32> to vector<64x8xf32>
    %180 = vector.extract_strided_slice %116 {offsets = [0, 24], sizes = [64, 8], strides = [1, 1]} : vector<64x32xf32> to vector<64x8xf32>
    %cst_62 = arith.constant dense<0.000000e+00> : vector<64x64xf32>
    %181 = tpu.matmul %179, %180, %cst_62 {dimension_numbers = #tpu.dot_dimension_numbers<[1], [1], [0], [0], [0, 0, 1, 0], [], []>} : vector<64x8xf32>, vector<64x8xf32>, vector<64x64xf32> -> vector<64x64xf32>
    %182 = arith.addf %181, %120 : vector<64x64xf32>
    %cst_63 = arith.constant dense<0xFF800000> : vector<64xf32>
    %183 = vector.multi_reduction <maximumf>, %182, %cst_63 [1] : vector<64x64xf32> to vector<64xf32>
    %184 = vector.shape_cast %183 : vector<64xf32> to vector<64x1xf32>
    %185 = vector.broadcast %184 : vector<64x1xf32> to vector<64x64xf32>
    %186 = arith.subf %182, %185 : vector<64x64xf32>
    %187 = math.exp %186 : vector<64x64xf32>
    %cst_64 = arith.constant dense<0.000000e+00> : vector<64xf32>
    %188 = vector.multi_reduction <add>, %187, %cst_64 [1] : vector<64x64xf32> to vector<64xf32>
    %189 = vector.shape_cast %188 : vector<64xf32> to vector<64x1xf32>
    %190 = tpu.reciprocal %189 {approx = true} : vector<64x1xf32> -> vector<64x1xf32>
    %191 = vector.broadcast %190 : vector<64x1xf32> to vector<64x64xf32>
    %192 = arith.mulf %187, %191 : vector<64x64xf32>
    %193 = vector.extract_strided_slice %117 {offsets = [0, 24], sizes = [64, 8], strides = [1, 1]} : vector<64x32xf32> to vector<64x8xf32>
    %cst_65 = arith.constant dense<0.000000e+00> : vector<64x8xf32>
    %194 = tpu.matmul %192, %193, %cst_65 {dimension_numbers = #tpu.dot_dimension_numbers<[1], [0], [0], [1], [0, 0, 1, 1], [], []>} : vector<64x64xf32>, vector<64x8xf32>, vector<64x8xf32> -> vector<64x8xf32>
    %195 = vector.extract_strided_slice %20 {offsets = [24, 0], sizes = [8, 32], strides = [1, 1]} : vector<32x32xf32> to vector<8x32xf32>
    %cst_66 = arith.constant dense<0.000000e+00> : vector<64x32xf32>
    %196 = tpu.matmul %194, %195, %cst_66 {dimension_numbers = #tpu.dot_dimension_numbers<[1], [0], [0], [1], [0, 0, 1, 1], [], []>} : vector<64x8xf32>, vector<8x32xf32>, vector<64x32xf32> -> vector<64x32xf32>
    %197 = arith.addf %178, %196 : vector<64x32xf32>
    %198 = tpu.concatenate %114, %197 in 0 : vector<64x32xf32>, vector<64x32xf32> -> vector<128x32xf32>
    %199 = vector.broadcast %22 : vector<1x32xf32> to vector<128x32xf32>
    %200 = arith.addf %198, %199 : vector<128x32xf32>
    %201 = arith.addf %3, %200 : vector<128x32xf32>
    %c0_67 = arith.constant 0 : index
    %c132 = arith.constant 132 : index
    %c0_68 = arith.constant 0 : index
    %202 = vector.load %arg5[%c0_67, %c132, %c0_68] : memref<1x240x64xf32, #tpu.memory_space<vmem>>, vector<1x1x32xf32>
    %203 = vector.shape_cast %202 : vector<1x1x32xf32> to vector<1x32xf32>
    %c0_69 = arith.constant 0 : index
    %c133 = arith.constant 133 : index
    %c0_70 = arith.constant 0 : index
    %204 = vector.load %arg5[%c0_69, %c133, %c0_70] : memref<1x240x64xf32, #tpu.memory_space<vmem>>, vector<1x1x32xf32>
    %205 = vector.shape_cast %204 : vector<1x1x32xf32> to vector<1x32xf32>
    %cst_71 = arith.constant dense<0.000000e+00> : vector<128xf32>
    %206 = vector.multi_reduction <add>, %201, %cst_71 [1] : vector<128x32xf32> to vector<128xf32>
    %207 = vector.shape_cast %206 : vector<128xf32> to vector<128x1xf32>
    %cst_72 = arith.constant 3.200000e+01 : f32
    %208 = vector.broadcast %cst_72 : f32 to vector<128x1xf32>
    %209 = arith.divf %207, %208 : vector<128x1xf32>
    %210 = vector.broadcast %209 : vector<128x1xf32> to vector<128x32xf32>
    %211 = arith.subf %201, %210 : vector<128x32xf32>
    %212 = arith.mulf %211, %211 : vector<128x32xf32>
    %cst_73 = arith.constant dense<0.000000e+00> : vector<128xf32>
    %213 = vector.multi_reduction <add>, %212, %cst_73 [1] : vector<128x32xf32> to vector<128xf32>
    %214 = vector.shape_cast %213 : vector<128xf32> to vector<128x1xf32>
    %cst_74 = arith.constant 3.200000e+01 : f32
    %215 = vector.broadcast %cst_74 : f32 to vector<128x1xf32>
    %216 = arith.divf %214, %215 : vector<128x1xf32>
    %cst_75 = arith.constant 9.99999974E-6 : f32
    %217 = vector.broadcast %cst_75 : f32 to vector<128x1xf32>
    %218 = arith.addf %216, %217 : vector<128x1xf32>
    %219 = math.rsqrt %218 : vector<128x1xf32>
    %220 = vector.broadcast %219 : vector<128x1xf32> to vector<128x32xf32>
    %221 = arith.mulf %211, %220 : vector<128x32xf32>
    %222 = vector.broadcast %203 : vector<1x32xf32> to vector<128x32xf32>
    %223 = arith.mulf %221, %222 : vector<128x32xf32>
    %224 = vector.broadcast %205 : vector<1x32xf32> to vector<128x32xf32>
    %225 = arith.addf %223, %224 : vector<128x32xf32>
    %c0_76 = arith.constant 0 : index
    %c134 = arith.constant 134 : index
    %c0_77 = arith.constant 0 : index
    %226 = vector.load %arg5[%c0_76, %c134, %c0_77] : memref<1x240x64xf32, #tpu.memory_space<vmem>>, vector<1x32x64xf32>
    %227 = vector.shape_cast %226 : vector<1x32x64xf32> to vector<32x64xf32>
    %cst_78 = arith.constant dense<0.000000e+00> : vector<128x64xf32>
    %228 = tpu.matmul %225, %227, %cst_78 {dimension_numbers = #tpu.dot_dimension_numbers<[1], [0], [0], [1], [0, 0, 1, 1], [], []>} : vector<128x32xf32>, vector<32x64xf32>, vector<128x64xf32> -> vector<128x64xf32>
    %c0_79 = arith.constant 0 : index
    %c166 = arith.constant 166 : index
    %c0_80 = arith.constant 0 : index
    %229 = vector.load %arg5[%c0_79, %c166, %c0_80] : memref<1x240x64xf32, #tpu.memory_space<vmem>>, vector<1x1x64xf32>
    %230 = vector.shape_cast %229 : vector<1x1x64xf32> to vector<1x64xf32>
    %231 = vector.broadcast %230 : vector<1x64xf32> to vector<128x64xf32>
    %232 = arith.addf %228, %231 : vector<128x64xf32>
    %cst_81 = arith.constant 0.000000e+00 : f32
    %233 = vector.broadcast %cst_81 : f32 to vector<128x64xf32>
    %234 = arith.maximumf %232, %233 : vector<128x64xf32>
    %c0_82 = arith.constant 0 : index
    %c167 = arith.constant 167 : index
    %c0_83 = arith.constant 0 : index
    %235 = vector.load %arg5[%c0_82, %c167, %c0_83] : memref<1x240x64xf32, #tpu.memory_space<vmem>>, vector<1x64x32xf32>
    %236 = vector.shape_cast %235 : vector<1x64x32xf32> to vector<64x32xf32>
    %cst_84 = arith.constant dense<0.000000e+00> : vector<128x32xf32>
    %237 = tpu.matmul %234, %236, %cst_84 {dimension_numbers = #tpu.dot_dimension_numbers<[1], [0], [0], [1], [0, 0, 1, 1], [], []>} : vector<128x64xf32>, vector<64x32xf32>, vector<128x32xf32> -> vector<128x32xf32>
    %238 = arith.addf %225, %237 : vector<128x32xf32>
    %c0_85 = arith.constant 0 : index
    %c231 = arith.constant 231 : index
    %c0_86 = arith.constant 0 : index
    %239 = vector.load %arg5[%c0_85, %c231, %c0_86] : memref<1x240x64xf32, #tpu.memory_space<vmem>>, vector<1x1x32xf32>
    %240 = vector.shape_cast %239 : vector<1x1x32xf32> to vector<1x32xf32>
    %241 = vector.broadcast %240 : vector<1x32xf32> to vector<128x32xf32>
    %242 = arith.addf %238, %241 : vector<128x32xf32>
    %c0_87 = arith.constant 0 : index
    %c232 = arith.constant 232 : index
    %c0_88 = arith.constant 0 : index
    %243 = vector.load %arg5[%c0_87, %c232, %c0_88] : memref<1x240x64xf32, #tpu.memory_space<vmem>>, vector<1x1x32xf32>
    %244 = vector.shape_cast %243 : vector<1x1x32xf32> to vector<1x32xf32>
    %c0_89 = arith.constant 0 : index
    %c233 = arith.constant 233 : index
    %c0_90 = arith.constant 0 : index
    %245 = vector.load %arg5[%c0_89, %c233, %c0_90] : memref<1x240x64xf32, #tpu.memory_space<vmem>>, vector<1x1x32xf32>
    %246 = vector.shape_cast %245 : vector<1x1x32xf32> to vector<1x32xf32>
    %cst_91 = arith.constant dense<0.000000e+00> : vector<128xf32>
    %247 = vector.multi_reduction <add>, %242, %cst_91 [1] : vector<128x32xf32> to vector<128xf32>
    %248 = vector.shape_cast %247 : vector<128xf32> to vector<128x1xf32>
    %cst_92 = arith.constant 3.200000e+01 : f32
    %249 = vector.broadcast %cst_92 : f32 to vector<128x1xf32>
    %250 = arith.divf %248, %249 : vector<128x1xf32>
    %251 = vector.broadcast %250 : vector<128x1xf32> to vector<128x32xf32>
    %252 = arith.subf %242, %251 : vector<128x32xf32>
    %253 = arith.mulf %252, %252 : vector<128x32xf32>
    %cst_93 = arith.constant dense<0.000000e+00> : vector<128xf32>
    %254 = vector.multi_reduction <add>, %253, %cst_93 [1] : vector<128x32xf32> to vector<128xf32>
    %255 = vector.shape_cast %254 : vector<128xf32> to vector<128x1xf32>
    %cst_94 = arith.constant 3.200000e+01 : f32
    %256 = vector.broadcast %cst_94 : f32 to vector<128x1xf32>
    %257 = arith.divf %255, %256 : vector<128x1xf32>
    %cst_95 = arith.constant 9.99999974E-6 : f32
    %258 = vector.broadcast %cst_95 : f32 to vector<128x1xf32>
    %259 = arith.addf %257, %258 : vector<128x1xf32>
    %260 = math.rsqrt %259 : vector<128x1xf32>
    %261 = vector.broadcast %260 : vector<128x1xf32> to vector<128x32xf32>
    %262 = arith.mulf %252, %261 : vector<128x32xf32>
    %263 = vector.broadcast %244 : vector<1x32xf32> to vector<128x32xf32>
    %264 = arith.mulf %262, %263 : vector<128x32xf32>
    %265 = vector.broadcast %246 : vector<1x32xf32> to vector<128x32xf32>
    %266 = arith.addf %264, %265 : vector<128x32xf32>
    %c0_96 = arith.constant 0 : index
    %c0_97 = arith.constant 0 : index
    %267 = vector.load %arg6[%c0_96, %c0_97] : memref<128x32xf32, #tpu.memory_space<vmem>>, vector<128x32xf32>
    tpu.vector_store %arg6[%c0_96, %c0_97], %266 {strides = array<i32>} : memref<128x32xf32, #tpu.memory_space<vmem>>, vector<128x32xf32>,
    return
  }
  func.func @transform_0(%arg0: i32) -> (i32, i32) {
    %c0_i32 = arith.constant 0 : i32
    %c0_i32_0 = arith.constant 0 : i32
    %c0_i32_1 = arith.constant 0 : i32
    return %c0_i32, %c0_i32_0 : i32, i32
  }
  func.func @transform_1(%arg0: i32) -> (i32, i32) {
    %c0_i32 = arith.constant 0 : i32
    %c0_i32_0 = arith.constant 0 : i32
    %c0_i32_1 = arith.constant 0 : i32
    return %c0_i32, %c0_i32_0 : i32, i32
  }
  func.func @transform_2(%arg0: i32) -> (i32, i32) {
    %c0_i32 = arith.constant 0 : i32
    %c0_i32_0 = arith.constant 0 : i32
    %c0_i32_1 = arith.constant 0 : i32
    return %c0_i32, %c0_i32_0 : i32, i32
  }
  func.func @transform_3(%arg0: i32) -> (i32, i32) {
    %c0_i32 = arith.constant 0 : i32
    %c0_i32_0 = arith.constant 0 : i32
    %c0_i32_1 = arith.constant 0 : i32
    return %c0_i32, %c0_i32_0 : i32, i32
  }
  func.func @transform_4(%arg0: i32) -> (i32, i32, i32) {
    %c0_i32 = arith.constant 0 : i32
    %c0_i32_0 = arith.constant 0 : i32
    %c0_i32_1 = arith.constant 0 : i32
    return %arg0, %c0_i32, %c0_i32_0 : i32, i32, i32
  }
  func.func @transform_5(%arg0: i32) -> (i32, i32) {
    %c0_i32 = arith.constant 0 : i32
    %c0_i32_0 = arith.constant 0 : i32
    %c0_i32_1 = arith.constant 0 : i32
    return %c0_i32, %c0_i32_0 : i32, i32
  }
}

module attributes {stable_mosaic.version = 11 : i64} {
  func.func @_decoder_stack_kernel(%arg0: i32, %arg1: memref<128x32xf32, #tpu.memory_space<vmem>>, %arg2: memref<128x32xf32, #tpu.memory_space<vmem>>, %arg3: memref<16x32xf32, #tpu.memory_space<vmem>>, %arg4: memref<2x64xf32, #tpu.memory_space<vmem>>, %arg5: memref<1x368x64xf32, #tpu.memory_space<vmem>>, %arg6: memref<136x64xf32, #tpu.memory_space<vmem>>, %arg7: memref<16x11xf32, #tpu.memory_space<vmem>>, %arg8: memref<16x4xf32, #tpu.memory_space<vmem>>, %arg9: memref<16x32xf32, #tpu.memory_space<vmem>>) attributes {dimension_semantics = [#tpu.dimension_semantics<arbitrary>], iteration_bounds = array<i64: 2>, scalar_prefetch = 0 : i64, scratch_operands = 1 : i64, tpu.core_type = #tpu.core_type<tc>, window_params = [{pipeline_mode = #tpu.pipeline_mode<synchronous>, transform_indices = @transform_0, window_bounds = array<i64: 128, 32>}, {pipeline_mode = #tpu.pipeline_mode<synchronous>, transform_indices = @transform_1, window_bounds = array<i64: 128, 32>}, {pipeline_mode = #tpu.pipeline_mode<synchronous>, transform_indices = @transform_2, window_bounds = array<i64: 16, 32>}, {pipeline_mode = #tpu.pipeline_mode<synchronous>, transform_indices = @transform_3, window_bounds = array<i64: 2, 64>}, {transform_indices = @transform_4, window_bounds = array<i64: 1, 368, 64>}, {pipeline_mode = #tpu.pipeline_mode<synchronous>, transform_indices = @transform_5, window_bounds = array<i64: 136, 64>}, {pipeline_mode = #tpu.pipeline_mode<synchronous>, transform_indices = @transform_6, window_bounds = array<i64: 16, 11>}, {pipeline_mode = #tpu.pipeline_mode<synchronous>, transform_indices = @transform_7, window_bounds = array<i64: 16, 4>}]} {
    %c0_i32 = arith.constant 0 : i32
    %0 = arith.cmpi eq, %arg0, %c0_i32 : i32
    %1 = arith.extui %0 : i1 to i32
    %c0_i32_0 = arith.constant 0 : i32
    %2 = arith.cmpi ne, %1, %c0_i32_0 : i32
    scf.if %2 {
      %cst_173 = arith.constant 0.000000e+00 : f32
      %480 = vector.broadcast %cst_173 : f32 to vector<16x32xf32>
      %c0_174 = arith.constant 0 : index
      %c0_175 = arith.constant 0 : index
      %481 = vector.load %arg9[%c0_174, %c0_175] : memref<16x32xf32, #tpu.memory_space<vmem>>, vector<16x32xf32>
      tpu.vector_store %arg9[%c0_174, %c0_175], %480 {strides = array<i32>} : memref<16x32xf32, #tpu.memory_space<vmem>>, vector<16x32xf32>,
    } else {
    }
    %c0 = arith.constant 0 : index
    %c0_1 = arith.constant 0 : index
    %3 = vector.load %arg9[%c0, %c0_1] : memref<16x32xf32, #tpu.memory_space<vmem>>, vector<16x32xf32>
    %c0_2 = arith.constant 0 : index
    %c0_3 = arith.constant 0 : index
    %4 = vector.load %arg1[%c0_2, %c0_3] : memref<128x32xf32, #tpu.memory_space<vmem>>, vector<128x32xf32>
    %c0_4 = arith.constant 0 : index
    %c0_5 = arith.constant 0 : index
    %5 = vector.load %arg2[%c0_4, %c0_5] : memref<128x32xf32, #tpu.memory_space<vmem>>, vector<128x32xf32>
    %c0_6 = arith.constant 0 : index
    %c0_7 = arith.constant 0 : index
    %6 = vector.load %arg3[%c0_6, %c0_7] : memref<16x32xf32, #tpu.memory_space<vmem>>, vector<16x32xf32>
    %c0_8 = arith.constant 0 : index
    %c0_9 = arith.constant 0 : index
    %7 = vector.load %arg4[%c0_8, %c0_9] : memref<2x64xf32, #tpu.memory_space<vmem>>, vector<2x64xf32>
    %8 = arith.addf %3, %6 : vector<16x32xf32>
    %c0_10 = arith.constant 0 : index
    %c0_11 = arith.constant 0 : index
    %c0_12 = arith.constant 0 : index
    %9 = vector.load %arg5[%c0_10, %c0_11, %c0_12] : memref<1x368x64xf32, #tpu.memory_space<vmem>>, vector<1x32x32xf32>
    %10 = vector.shape_cast %9 : vector<1x32x32xf32> to vector<32x32xf32>
    %c0_13 = arith.constant 0 : index
    %c128 = arith.constant 128 : index
    %c0_14 = arith.constant 0 : index
    %11 = vector.load %arg5[%c0_13, %c128, %c0_14] : memref<1x368x64xf32, #tpu.memory_space<vmem>>, vector<1x1x32xf32>
    %12 = vector.shape_cast %11 : vector<1x1x32xf32> to vector<1x32xf32>
    %c0_15 = arith.constant 0 : index
    %c32 = arith.constant 32 : index
    %c0_16 = arith.constant 0 : index
    %13 = vector.load %arg5[%c0_15, %c32, %c0_16] : memref<1x368x64xf32, #tpu.memory_space<vmem>>, vector<1x32x32xf32>
    %14 = vector.shape_cast %13 : vector<1x32x32xf32> to vector<32x32xf32>
    %c0_17 = arith.constant 0 : index
    %c129 = arith.constant 129 : index
    %c0_18 = arith.constant 0 : index
    %15 = vector.load %arg5[%c0_17, %c129, %c0_18] : memref<1x368x64xf32, #tpu.memory_space<vmem>>, vector<1x1x32xf32>
    %16 = vector.shape_cast %15 : vector<1x1x32xf32> to vector<1x32xf32>
    %c0_19 = arith.constant 0 : index
    %c64 = arith.constant 64 : index
    %c0_20 = arith.constant 0 : index
    %17 = vector.load %arg5[%c0_19, %c64, %c0_20] : memref<1x368x64xf32, #tpu.memory_space<vmem>>, vector<1x32x32xf32>
    %18 = vector.shape_cast %17 : vector<1x32x32xf32> to vector<32x32xf32>
    %c0_21 = arith.constant 0 : index
    %c130 = arith.constant 130 : index
    %c0_22 = arith.constant 0 : index
    %19 = vector.load %arg5[%c0_21, %c130, %c0_22] : memref<1x368x64xf32, #tpu.memory_space<vmem>>, vector<1x1x32xf32>
    %20 = vector.shape_cast %19 : vector<1x1x32xf32> to vector<1x32xf32>
    %c0_23 = arith.constant 0 : index
    %c96 = arith.constant 96 : index
    %c0_24 = arith.constant 0 : index
    %21 = vector.load %arg5[%c0_23, %c96, %c0_24] : memref<1x368x64xf32, #tpu.memory_space<vmem>>, vector<1x32x32xf32>
    %22 = vector.shape_cast %21 : vector<1x32x32xf32> to vector<32x32xf32>
    %c0_25 = arith.constant 0 : index
    %c131 = arith.constant 131 : index
    %c0_26 = arith.constant 0 : index
    %23 = vector.load %arg5[%c0_25, %c131, %c0_26] : memref<1x368x64xf32, #tpu.memory_space<vmem>>, vector<1x1x32xf32>
    %24 = vector.shape_cast %23 : vector<1x1x32xf32> to vector<1x32xf32>
    %cst = arith.constant dense<0.000000e+00> : vector<16x32xf32>
    %25 = tpu.matmul %8, %10, %cst {dimension_numbers = #tpu.dot_dimension_numbers<[1], [0], [0], [1], [0, 0, 1, 1], [], []>} : vector<16x32xf32>, vector<32x32xf32>, vector<16x32xf32> -> vector<16x32xf32>
    %26 = vector.broadcast %12 : vector<1x32xf32> to vector<16x32xf32>
    %27 = arith.addf %25, %26 : vector<16x32xf32>
    %cst_27 = arith.constant dense<0.000000e+00> : vector<16x32xf32>
    %28 = tpu.matmul %8, %14, %cst_27 {dimension_numbers = #tpu.dot_dimension_numbers<[1], [0], [0], [1], [0, 0, 1, 1], [], []>} : vector<16x32xf32>, vector<32x32xf32>, vector<16x32xf32> -> vector<16x32xf32>
    %29 = vector.broadcast %16 : vector<1x32xf32> to vector<16x32xf32>
    %30 = arith.addf %28, %29 : vector<16x32xf32>
    %cst_28 = arith.constant dense<0.000000e+00> : vector<16x32xf32>
    %31 = tpu.matmul %3, %18, %cst_28 {dimension_numbers = #tpu.dot_dimension_numbers<[1], [0], [0], [1], [0, 0, 1, 1], [], []>} : vector<16x32xf32>, vector<32x32xf32>, vector<16x32xf32> -> vector<16x32xf32>
    %32 = vector.broadcast %20 : vector<1x32xf32> to vector<16x32xf32>
    %33 = arith.addf %31, %32 : vector<16x32xf32>
    %34 = vector.extract_strided_slice %27 {offsets = [0, 0], sizes = [8, 32], strides = [1, 1]} : vector<16x32xf32> to vector<8x32xf32>
    %35 = vector.extract_strided_slice %30 {offsets = [0, 0], sizes = [8, 32], strides = [1, 1]} : vector<16x32xf32> to vector<8x32xf32>
    %36 = vector.extract_strided_slice %33 {offsets = [0, 0], sizes = [8, 32], strides = [1, 1]} : vector<16x32xf32> to vector<8x32xf32>
    %cst_29 = arith.constant 0.000000e+00 : f32
    %37 = vector.broadcast %cst_29 : f32 to vector<8x32xf32>
    %38 = vector.extract_strided_slice %34 {offsets = [0, 0], sizes = [8, 8], strides = [1, 1]} : vector<8x32xf32> to vector<8x8xf32>
    %39 = vector.extract_strided_slice %35 {offsets = [0, 0], sizes = [8, 8], strides = [1, 1]} : vector<8x32xf32> to vector<8x8xf32>
    %cst_30 = arith.constant dense<0.000000e+00> : vector<8x8xf32>
    %40 = tpu.matmul %38, %39, %cst_30 {dimension_numbers = #tpu.dot_dimension_numbers<[1], [1], [0], [0], [0, 0, 1, 0], [], []>} : vector<8x8xf32>, vector<8x8xf32>, vector<8x8xf32> -> vector<8x8xf32>
    %cst_31 = arith.constant dense<0xFF800000> : vector<8xf32>
    %41 = vector.multi_reduction <maximumf>, %40, %cst_31 [1] : vector<8x8xf32> to vector<8xf32>
    %42 = vector.shape_cast %41 : vector<8xf32> to vector<8x1xf32>
    %43 = vector.broadcast %42 : vector<8x1xf32> to vector<8x8xf32>
    %44 = arith.subf %40, %43 : vector<8x8xf32>
    %45 = math.exp %44 : vector<8x8xf32>
    %cst_32 = arith.constant dense<0.000000e+00> : vector<8xf32>
    %46 = vector.multi_reduction <add>, %45, %cst_32 [1] : vector<8x8xf32> to vector<8xf32>
    %47 = vector.shape_cast %46 : vector<8xf32> to vector<8x1xf32>
    %48 = tpu.reciprocal %47 {approx = true} : vector<8x1xf32> -> vector<8x1xf32>
    %49 = vector.broadcast %48 : vector<8x1xf32> to vector<8x8xf32>
    %50 = arith.mulf %45, %49 : vector<8x8xf32>
    %51 = vector.extract_strided_slice %36 {offsets = [0, 0], sizes = [8, 8], strides = [1, 1]} : vector<8x32xf32> to vector<8x8xf32>
    %cst_33 = arith.constant dense<0.000000e+00> : vector<8x8xf32>
    %52 = tpu.matmul %50, %51, %cst_33 {dimension_numbers = #tpu.dot_dimension_numbers<[1], [0], [0], [1], [0, 0, 1, 1], [], []>} : vector<8x8xf32>, vector<8x8xf32>, vector<8x8xf32> -> vector<8x8xf32>
    %53 = vector.extract_strided_slice %22 {offsets = [0, 0], sizes = [8, 32], strides = [1, 1]} : vector<32x32xf32> to vector<8x32xf32>
    %cst_34 = arith.constant dense<0.000000e+00> : vector<8x32xf32>
    %54 = tpu.matmul %52, %53, %cst_34 {dimension_numbers = #tpu.dot_dimension_numbers<[1], [0], [0], [1], [0, 0, 1, 1], [], []>} : vector<8x8xf32>, vector<8x32xf32>, vector<8x32xf32> -> vector<8x32xf32>
    %55 = arith.addf %37, %54 : vector<8x32xf32>
    %56 = vector.extract_strided_slice %34 {offsets = [0, 8], sizes = [8, 8], strides = [1, 1]} : vector<8x32xf32> to vector<8x8xf32>
    %57 = vector.extract_strided_slice %35 {offsets = [0, 8], sizes = [8, 8], strides = [1, 1]} : vector<8x32xf32> to vector<8x8xf32>
    %cst_35 = arith.constant dense<0.000000e+00> : vector<8x8xf32>
    %58 = tpu.matmul %56, %57, %cst_35 {dimension_numbers = #tpu.dot_dimension_numbers<[1], [1], [0], [0], [0, 0, 1, 0], [], []>} : vector<8x8xf32>, vector<8x8xf32>, vector<8x8xf32> -> vector<8x8xf32>
    %cst_36 = arith.constant dense<0xFF800000> : vector<8xf32>
    %59 = vector.multi_reduction <maximumf>, %58, %cst_36 [1] : vector<8x8xf32> to vector<8xf32>
    %60 = vector.shape_cast %59 : vector<8xf32> to vector<8x1xf32>
    %61 = vector.broadcast %60 : vector<8x1xf32> to vector<8x8xf32>
    %62 = arith.subf %58, %61 : vector<8x8xf32>
    %63 = math.exp %62 : vector<8x8xf32>
    %cst_37 = arith.constant dense<0.000000e+00> : vector<8xf32>
    %64 = vector.multi_reduction <add>, %63, %cst_37 [1] : vector<8x8xf32> to vector<8xf32>
    %65 = vector.shape_cast %64 : vector<8xf32> to vector<8x1xf32>
    %66 = tpu.reciprocal %65 {approx = true} : vector<8x1xf32> -> vector<8x1xf32>
    %67 = vector.broadcast %66 : vector<8x1xf32> to vector<8x8xf32>
    %68 = arith.mulf %63, %67 : vector<8x8xf32>
    %69 = vector.extract_strided_slice %36 {offsets = [0, 8], sizes = [8, 8], strides = [1, 1]} : vector<8x32xf32> to vector<8x8xf32>
    %cst_38 = arith.constant dense<0.000000e+00> : vector<8x8xf32>
    %70 = tpu.matmul %68, %69, %cst_38 {dimension_numbers = #tpu.dot_dimension_numbers<[1], [0], [0], [1], [0, 0, 1, 1], [], []>} : vector<8x8xf32>, vector<8x8xf32>, vector<8x8xf32> -> vector<8x8xf32>
    %71 = vector.extract_strided_slice %22 {offsets = [8, 0], sizes = [8, 32], strides = [1, 1]} : vector<32x32xf32> to vector<8x32xf32>
    %cst_39 = arith.constant dense<0.000000e+00> : vector<8x32xf32>
    %72 = tpu.matmul %70, %71, %cst_39 {dimension_numbers = #tpu.dot_dimension_numbers<[1], [0], [0], [1], [0, 0, 1, 1], [], []>} : vector<8x8xf32>, vector<8x32xf32>, vector<8x32xf32> -> vector<8x32xf32>
    %73 = arith.addf %55, %72 : vector<8x32xf32>
    %74 = vector.extract_strided_slice %34 {offsets = [0, 16], sizes = [8, 8], strides = [1, 1]} : vector<8x32xf32> to vector<8x8xf32>
    %75 = vector.extract_strided_slice %35 {offsets = [0, 16], sizes = [8, 8], strides = [1, 1]} : vector<8x32xf32> to vector<8x8xf32>
    %cst_40 = arith.constant dense<0.000000e+00> : vector<8x8xf32>
    %76 = tpu.matmul %74, %75, %cst_40 {dimension_numbers = #tpu.dot_dimension_numbers<[1], [1], [0], [0], [0, 0, 1, 0], [], []>} : vector<8x8xf32>, vector<8x8xf32>, vector<8x8xf32> -> vector<8x8xf32>
    %cst_41 = arith.constant dense<0xFF800000> : vector<8xf32>
    %77 = vector.multi_reduction <maximumf>, %76, %cst_41 [1] : vector<8x8xf32> to vector<8xf32>
    %78 = vector.shape_cast %77 : vector<8xf32> to vector<8x1xf32>
    %79 = vector.broadcast %78 : vector<8x1xf32> to vector<8x8xf32>
    %80 = arith.subf %76, %79 : vector<8x8xf32>
    %81 = math.exp %80 : vector<8x8xf32>
    %cst_42 = arith.constant dense<0.000000e+00> : vector<8xf32>
    %82 = vector.multi_reduction <add>, %81, %cst_42 [1] : vector<8x8xf32> to vector<8xf32>
    %83 = vector.shape_cast %82 : vector<8xf32> to vector<8x1xf32>
    %84 = tpu.reciprocal %83 {approx = true} : vector<8x1xf32> -> vector<8x1xf32>
    %85 = vector.broadcast %84 : vector<8x1xf32> to vector<8x8xf32>
    %86 = arith.mulf %81, %85 : vector<8x8xf32>
    %87 = vector.extract_strided_slice %36 {offsets = [0, 16], sizes = [8, 8], strides = [1, 1]} : vector<8x32xf32> to vector<8x8xf32>
    %cst_43 = arith.constant dense<0.000000e+00> : vector<8x8xf32>
    %88 = tpu.matmul %86, %87, %cst_43 {dimension_numbers = #tpu.dot_dimension_numbers<[1], [0], [0], [1], [0, 0, 1, 1], [], []>} : vector<8x8xf32>, vector<8x8xf32>, vector<8x8xf32> -> vector<8x8xf32>
    %89 = vector.extract_strided_slice %22 {offsets = [16, 0], sizes = [8, 32], strides = [1, 1]} : vector<32x32xf32> to vector<8x32xf32>
    %cst_44 = arith.constant dense<0.000000e+00> : vector<8x32xf32>
    %90 = tpu.matmul %88, %89, %cst_44 {dimension_numbers = #tpu.dot_dimension_numbers<[1], [0], [0], [1], [0, 0, 1, 1], [], []>} : vector<8x8xf32>, vector<8x32xf32>, vector<8x32xf32> -> vector<8x32xf32>
    %91 = arith.addf %73, %90 : vector<8x32xf32>
    %92 = vector.extract_strided_slice %34 {offsets = [0, 24], sizes = [8, 8], strides = [1, 1]} : vector<8x32xf32> to vector<8x8xf32>
    %93 = vector.extract_strided_slice %35 {offsets = [0, 24], sizes = [8, 8], strides = [1, 1]} : vector<8x32xf32> to vector<8x8xf32>
    %cst_45 = arith.constant dense<0.000000e+00> : vector<8x8xf32>
    %94 = tpu.matmul %92, %93, %cst_45 {dimension_numbers = #tpu.dot_dimension_numbers<[1], [1], [0], [0], [0, 0, 1, 0], [], []>} : vector<8x8xf32>, vector<8x8xf32>, vector<8x8xf32> -> vector<8x8xf32>
    %cst_46 = arith.constant dense<0xFF800000> : vector<8xf32>
    %95 = vector.multi_reduction <maximumf>, %94, %cst_46 [1] : vector<8x8xf32> to vector<8xf32>
    %96 = vector.shape_cast %95 : vector<8xf32> to vector<8x1xf32>
    %97 = vector.broadcast %96 : vector<8x1xf32> to vector<8x8xf32>
    %98 = arith.subf %94, %97 : vector<8x8xf32>
    %99 = math.exp %98 : vector<8x8xf32>
    %cst_47 = arith.constant dense<0.000000e+00> : vector<8xf32>
    %100 = vector.multi_reduction <add>, %99, %cst_47 [1] : vector<8x8xf32> to vector<8xf32>
    %101 = vector.shape_cast %100 : vector<8xf32> to vector<8x1xf32>
    %102 = tpu.reciprocal %101 {approx = true} : vector<8x1xf32> -> vector<8x1xf32>
    %103 = vector.broadcast %102 : vector<8x1xf32> to vector<8x8xf32>
    %104 = arith.mulf %99, %103 : vector<8x8xf32>
    %105 = vector.extract_strided_slice %36 {offsets = [0, 24], sizes = [8, 8], strides = [1, 1]} : vector<8x32xf32> to vector<8x8xf32>
    %cst_48 = arith.constant dense<0.000000e+00> : vector<8x8xf32>
    %106 = tpu.matmul %104, %105, %cst_48 {dimension_numbers = #tpu.dot_dimension_numbers<[1], [0], [0], [1], [0, 0, 1, 1], [], []>} : vector<8x8xf32>, vector<8x8xf32>, vector<8x8xf32> -> vector<8x8xf32>
    %107 = vector.extract_strided_slice %22 {offsets = [24, 0], sizes = [8, 32], strides = [1, 1]} : vector<32x32xf32> to vector<8x32xf32>
    %cst_49 = arith.constant dense<0.000000e+00> : vector<8x32xf32>
    %108 = tpu.matmul %106, %107, %cst_49 {dimension_numbers = #tpu.dot_dimension_numbers<[1], [0], [0], [1], [0, 0, 1, 1], [], []>} : vector<8x8xf32>, vector<8x32xf32>, vector<8x32xf32> -> vector<8x32xf32>
    %109 = arith.addf %91, %108 : vector<8x32xf32>
    %110 = vector.extract_strided_slice %27 {offsets = [8, 0], sizes = [8, 32], strides = [1, 1]} : vector<16x32xf32> to vector<8x32xf32>
    %111 = vector.extract_strided_slice %30 {offsets = [8, 0], sizes = [8, 32], strides = [1, 1]} : vector<16x32xf32> to vector<8x32xf32>
    %112 = vector.extract_strided_slice %33 {offsets = [8, 0], sizes = [8, 32], strides = [1, 1]} : vector<16x32xf32> to vector<8x32xf32>
    %cst_50 = arith.constant 0.000000e+00 : f32
    %113 = vector.broadcast %cst_50 : f32 to vector<8x32xf32>
    %114 = vector.extract_strided_slice %110 {offsets = [0, 0], sizes = [8, 8], strides = [1, 1]} : vector<8x32xf32> to vector<8x8xf32>
    %115 = vector.extract_strided_slice %111 {offsets = [0, 0], sizes = [8, 8], strides = [1, 1]} : vector<8x32xf32> to vector<8x8xf32>
    %cst_51 = arith.constant dense<0.000000e+00> : vector<8x8xf32>
    %116 = tpu.matmul %114, %115, %cst_51 {dimension_numbers = #tpu.dot_dimension_numbers<[1], [1], [0], [0], [0, 0, 1, 0], [], []>} : vector<8x8xf32>, vector<8x8xf32>, vector<8x8xf32> -> vector<8x8xf32>
    %cst_52 = arith.constant dense<0xFF800000> : vector<8xf32>
    %117 = vector.multi_reduction <maximumf>, %116, %cst_52 [1] : vector<8x8xf32> to vector<8xf32>
    %118 = vector.shape_cast %117 : vector<8xf32> to vector<8x1xf32>
    %119 = vector.broadcast %118 : vector<8x1xf32> to vector<8x8xf32>
    %120 = arith.subf %116, %119 : vector<8x8xf32>
    %121 = math.exp %120 : vector<8x8xf32>
    %cst_53 = arith.constant dense<0.000000e+00> : vector<8xf32>
    %122 = vector.multi_reduction <add>, %121, %cst_53 [1] : vector<8x8xf32> to vector<8xf32>
    %123 = vector.shape_cast %122 : vector<8xf32> to vector<8x1xf32>
    %124 = tpu.reciprocal %123 {approx = true} : vector<8x1xf32> -> vector<8x1xf32>
    %125 = vector.broadcast %124 : vector<8x1xf32> to vector<8x8xf32>
    %126 = arith.mulf %121, %125 : vector<8x8xf32>
    %127 = vector.extract_strided_slice %112 {offsets = [0, 0], sizes = [8, 8], strides = [1, 1]} : vector<8x32xf32> to vector<8x8xf32>
    %cst_54 = arith.constant dense<0.000000e+00> : vector<8x8xf32>
    %128 = tpu.matmul %126, %127, %cst_54 {dimension_numbers = #tpu.dot_dimension_numbers<[1], [0], [0], [1], [0, 0, 1, 1], [], []>} : vector<8x8xf32>, vector<8x8xf32>, vector<8x8xf32> -> vector<8x8xf32>
    %129 = vector.extract_strided_slice %22 {offsets = [0, 0], sizes = [8, 32], strides = [1, 1]} : vector<32x32xf32> to vector<8x32xf32>
    %cst_55 = arith.constant dense<0.000000e+00> : vector<8x32xf32>
    %130 = tpu.matmul %128, %129, %cst_55 {dimension_numbers = #tpu.dot_dimension_numbers<[1], [0], [0], [1], [0, 0, 1, 1], [], []>} : vector<8x8xf32>, vector<8x32xf32>, vector<8x32xf32> -> vector<8x32xf32>
    %131 = arith.addf %113, %130 : vector<8x32xf32>
    %132 = vector.extract_strided_slice %110 {offsets = [0, 8], sizes = [8, 8], strides = [1, 1]} : vector<8x32xf32> to vector<8x8xf32>
    %133 = vector.extract_strided_slice %111 {offsets = [0, 8], sizes = [8, 8], strides = [1, 1]} : vector<8x32xf32> to vector<8x8xf32>
    %cst_56 = arith.constant dense<0.000000e+00> : vector<8x8xf32>
    %134 = tpu.matmul %132, %133, %cst_56 {dimension_numbers = #tpu.dot_dimension_numbers<[1], [1], [0], [0], [0, 0, 1, 0], [], []>} : vector<8x8xf32>, vector<8x8xf32>, vector<8x8xf32> -> vector<8x8xf32>
    %cst_57 = arith.constant dense<0xFF800000> : vector<8xf32>
    %135 = vector.multi_reduction <maximumf>, %134, %cst_57 [1] : vector<8x8xf32> to vector<8xf32>
    %136 = vector.shape_cast %135 : vector<8xf32> to vector<8x1xf32>
    %137 = vector.broadcast %136 : vector<8x1xf32> to vector<8x8xf32>
    %138 = arith.subf %134, %137 : vector<8x8xf32>
    %139 = math.exp %138 : vector<8x8xf32>
    %cst_58 = arith.constant dense<0.000000e+00> : vector<8xf32>
    %140 = vector.multi_reduction <add>, %139, %cst_58 [1] : vector<8x8xf32> to vector<8xf32>
    %141 = vector.shape_cast %140 : vector<8xf32> to vector<8x1xf32>
    %142 = tpu.reciprocal %141 {approx = true} : vector<8x1xf32> -> vector<8x1xf32>
    %143 = vector.broadcast %142 : vector<8x1xf32> to vector<8x8xf32>
    %144 = arith.mulf %139, %143 : vector<8x8xf32>
    %145 = vector.extract_strided_slice %112 {offsets = [0, 8], sizes = [8, 8], strides = [1, 1]} : vector<8x32xf32> to vector<8x8xf32>
    %cst_59 = arith.constant dense<0.000000e+00> : vector<8x8xf32>
    %146 = tpu.matmul %144, %145, %cst_59 {dimension_numbers = #tpu.dot_dimension_numbers<[1], [0], [0], [1], [0, 0, 1, 1], [], []>} : vector<8x8xf32>, vector<8x8xf32>, vector<8x8xf32> -> vector<8x8xf32>
    %147 = vector.extract_strided_slice %22 {offsets = [8, 0], sizes = [8, 32], strides = [1, 1]} : vector<32x32xf32> to vector<8x32xf32>
    %cst_60 = arith.constant dense<0.000000e+00> : vector<8x32xf32>
    %148 = tpu.matmul %146, %147, %cst_60 {dimension_numbers = #tpu.dot_dimension_numbers<[1], [0], [0], [1], [0, 0, 1, 1], [], []>} : vector<8x8xf32>, vector<8x32xf32>, vector<8x32xf32> -> vector<8x32xf32>
    %149 = arith.addf %131, %148 : vector<8x32xf32>
    %150 = vector.extract_strided_slice %110 {offsets = [0, 16], sizes = [8, 8], strides = [1, 1]} : vector<8x32xf32> to vector<8x8xf32>
    %151 = vector.extract_strided_slice %111 {offsets = [0, 16], sizes = [8, 8], strides = [1, 1]} : vector<8x32xf32> to vector<8x8xf32>
    %cst_61 = arith.constant dense<0.000000e+00> : vector<8x8xf32>
    %152 = tpu.matmul %150, %151, %cst_61 {dimension_numbers = #tpu.dot_dimension_numbers<[1], [1], [0], [0], [0, 0, 1, 0], [], []>} : vector<8x8xf32>, vector<8x8xf32>, vector<8x8xf32> -> vector<8x8xf32>
    %cst_62 = arith.constant dense<0xFF800000> : vector<8xf32>
    %153 = vector.multi_reduction <maximumf>, %152, %cst_62 [1] : vector<8x8xf32> to vector<8xf32>
    %154 = vector.shape_cast %153 : vector<8xf32> to vector<8x1xf32>
    %155 = vector.broadcast %154 : vector<8x1xf32> to vector<8x8xf32>
    %156 = arith.subf %152, %155 : vector<8x8xf32>
    %157 = math.exp %156 : vector<8x8xf32>
    %cst_63 = arith.constant dense<0.000000e+00> : vector<8xf32>
    %158 = vector.multi_reduction <add>, %157, %cst_63 [1] : vector<8x8xf32> to vector<8xf32>
    %159 = vector.shape_cast %158 : vector<8xf32> to vector<8x1xf32>
    %160 = tpu.reciprocal %159 {approx = true} : vector<8x1xf32> -> vector<8x1xf32>
    %161 = vector.broadcast %160 : vector<8x1xf32> to vector<8x8xf32>
    %162 = arith.mulf %157, %161 : vector<8x8xf32>
    %163 = vector.extract_strided_slice %112 {offsets = [0, 16], sizes = [8, 8], strides = [1, 1]} : vector<8x32xf32> to vector<8x8xf32>
    %cst_64 = arith.constant dense<0.000000e+00> : vector<8x8xf32>
    %164 = tpu.matmul %162, %163, %cst_64 {dimension_numbers = #tpu.dot_dimension_numbers<[1], [0], [0], [1], [0, 0, 1, 1], [], []>} : vector<8x8xf32>, vector<8x8xf32>, vector<8x8xf32> -> vector<8x8xf32>
    %165 = vector.extract_strided_slice %22 {offsets = [16, 0], sizes = [8, 32], strides = [1, 1]} : vector<32x32xf32> to vector<8x32xf32>
    %cst_65 = arith.constant dense<0.000000e+00> : vector<8x32xf32>
    %166 = tpu.matmul %164, %165, %cst_65 {dimension_numbers = #tpu.dot_dimension_numbers<[1], [0], [0], [1], [0, 0, 1, 1], [], []>} : vector<8x8xf32>, vector<8x32xf32>, vector<8x32xf32> -> vector<8x32xf32>
    %167 = arith.addf %149, %166 : vector<8x32xf32>
    %168 = vector.extract_strided_slice %110 {offsets = [0, 24], sizes = [8, 8], strides = [1, 1]} : vector<8x32xf32> to vector<8x8xf32>
    %169 = vector.extract_strided_slice %111 {offsets = [0, 24], sizes = [8, 8], strides = [1, 1]} : vector<8x32xf32> to vector<8x8xf32>
    %cst_66 = arith.constant dense<0.000000e+00> : vector<8x8xf32>
    %170 = tpu.matmul %168, %169, %cst_66 {dimension_numbers = #tpu.dot_dimension_numbers<[1], [1], [0], [0], [0, 0, 1, 0], [], []>} : vector<8x8xf32>, vector<8x8xf32>, vector<8x8xf32> -> vector<8x8xf32>
    %cst_67 = arith.constant dense<0xFF800000> : vector<8xf32>
    %171 = vector.multi_reduction <maximumf>, %170, %cst_67 [1] : vector<8x8xf32> to vector<8xf32>
    %172 = vector.shape_cast %171 : vector<8xf32> to vector<8x1xf32>
    %173 = vector.broadcast %172 : vector<8x1xf32> to vector<8x8xf32>
    %174 = arith.subf %170, %173 : vector<8x8xf32>
    %175 = math.exp %174 : vector<8x8xf32>
    %cst_68 = arith.constant dense<0.000000e+00> : vector<8xf32>
    %176 = vector.multi_reduction <add>, %175, %cst_68 [1] : vector<8x8xf32> to vector<8xf32>
    %177 = vector.shape_cast %176 : vector<8xf32> to vector<8x1xf32>
    %178 = tpu.reciprocal %177 {approx = true} : vector<8x1xf32> -> vector<8x1xf32>
    %179 = vector.broadcast %178 : vector<8x1xf32> to vector<8x8xf32>
    %180 = arith.mulf %175, %179 : vector<8x8xf32>
    %181 = vector.extract_strided_slice %112 {offsets = [0, 24], sizes = [8, 8], strides = [1, 1]} : vector<8x32xf32> to vector<8x8xf32>
    %cst_69 = arith.constant dense<0.000000e+00> : vector<8x8xf32>
    %182 = tpu.matmul %180, %181, %cst_69 {dimension_numbers = #tpu.dot_dimension_numbers<[1], [0], [0], [1], [0, 0, 1, 1], [], []>} : vector<8x8xf32>, vector<8x8xf32>, vector<8x8xf32> -> vector<8x8xf32>
    %183 = vector.extract_strided_slice %22 {offsets = [24, 0], sizes = [8, 32], strides = [1, 1]} : vector<32x32xf32> to vector<8x32xf32>
    %cst_70 = arith.constant dense<0.000000e+00> : vector<8x32xf32>
    %184 = tpu.matmul %182, %183, %cst_70 {dimension_numbers = #tpu.dot_dimension_numbers<[1], [0], [0], [1], [0, 0, 1, 1], [], []>} : vector<8x8xf32>, vector<8x32xf32>, vector<8x32xf32> -> vector<8x32xf32>
    %185 = arith.addf %167, %184 : vector<8x32xf32>
    %186 = tpu.concatenate %109, %185 in 0 : vector<8x32xf32>, vector<8x32xf32> -> vector<16x32xf32>
    %187 = vector.broadcast %24 : vector<1x32xf32> to vector<16x32xf32>
    %188 = arith.addf %186, %187 : vector<16x32xf32>
    %189 = arith.addf %3, %188 : vector<16x32xf32>
    %c0_71 = arith.constant 0 : index
    %c132 = arith.constant 132 : index
    %c0_72 = arith.constant 0 : index
    %190 = vector.load %arg5[%c0_71, %c132, %c0_72] : memref<1x368x64xf32, #tpu.memory_space<vmem>>, vector<1x1x32xf32>
    %191 = vector.shape_cast %190 : vector<1x1x32xf32> to vector<1x32xf32>
    %c0_73 = arith.constant 0 : index
    %c133 = arith.constant 133 : index
    %c0_74 = arith.constant 0 : index
    %192 = vector.load %arg5[%c0_73, %c133, %c0_74] : memref<1x368x64xf32, #tpu.memory_space<vmem>>, vector<1x1x32xf32>
    %193 = vector.shape_cast %192 : vector<1x1x32xf32> to vector<1x32xf32>
    %cst_75 = arith.constant dense<0.000000e+00> : vector<16xf32>
    %194 = vector.multi_reduction <add>, %189, %cst_75 [1] : vector<16x32xf32> to vector<16xf32>
    %195 = vector.shape_cast %194 : vector<16xf32> to vector<16x1xf32>
    %cst_76 = arith.constant 3.200000e+01 : f32
    %196 = vector.broadcast %cst_76 : f32 to vector<16x1xf32>
    %197 = arith.divf %195, %196 : vector<16x1xf32>
    %198 = vector.broadcast %197 : vector<16x1xf32> to vector<16x32xf32>
    %199 = arith.subf %189, %198 : vector<16x32xf32>
    %200 = arith.mulf %199, %199 : vector<16x32xf32>
    %cst_77 = arith.constant dense<0.000000e+00> : vector<16xf32>
    %201 = vector.multi_reduction <add>, %200, %cst_77 [1] : vector<16x32xf32> to vector<16xf32>
    %202 = vector.shape_cast %201 : vector<16xf32> to vector<16x1xf32>
    %cst_78 = arith.constant 3.200000e+01 : f32
    %203 = vector.broadcast %cst_78 : f32 to vector<16x1xf32>
    %204 = arith.divf %202, %203 : vector<16x1xf32>
    %cst_79 = arith.constant 9.99999974E-6 : f32
    %205 = vector.broadcast %cst_79 : f32 to vector<16x1xf32>
    %206 = arith.addf %204, %205 : vector<16x1xf32>
    %207 = math.rsqrt %206 : vector<16x1xf32>
    %208 = vector.broadcast %207 : vector<16x1xf32> to vector<16x32xf32>
    %209 = arith.mulf %199, %208 : vector<16x32xf32>
    %210 = vector.broadcast %191 : vector<1x32xf32> to vector<16x32xf32>
    %211 = arith.mulf %209, %210 : vector<16x32xf32>
    %212 = vector.broadcast %193 : vector<1x32xf32> to vector<16x32xf32>
    %213 = arith.addf %211, %212 : vector<16x32xf32>
    %214 = arith.addf %213, %6 : vector<16x32xf32>
    %215 = arith.addf %4, %5 : vector<128x32xf32>
    %c0_80 = arith.constant 0 : index
    %c134 = arith.constant 134 : index
    %c0_81 = arith.constant 0 : index
    %216 = vector.load %arg5[%c0_80, %c134, %c0_81] : memref<1x368x64xf32, #tpu.memory_space<vmem>>, vector<1x32x32xf32>
    %217 = vector.shape_cast %216 : vector<1x32x32xf32> to vector<32x32xf32>
    %c0_82 = arith.constant 0 : index
    %c262 = arith.constant 262 : index
    %c0_83 = arith.constant 0 : index
    %218 = vector.load %arg5[%c0_82, %c262, %c0_83] : memref<1x368x64xf32, #tpu.memory_space<vmem>>, vector<1x1x32xf32>
    %219 = vector.shape_cast %218 : vector<1x1x32xf32> to vector<1x32xf32>
    %c0_84 = arith.constant 0 : index
    %c166 = arith.constant 166 : index
    %c0_85 = arith.constant 0 : index
    %220 = vector.load %arg5[%c0_84, %c166, %c0_85] : memref<1x368x64xf32, #tpu.memory_space<vmem>>, vector<1x32x32xf32>
    %221 = vector.shape_cast %220 : vector<1x32x32xf32> to vector<32x32xf32>
    %c0_86 = arith.constant 0 : index
    %c263 = arith.constant 263 : index
    %c0_87 = arith.constant 0 : index
    %222 = vector.load %arg5[%c0_86, %c263, %c0_87] : memref<1x368x64xf32, #tpu.memory_space<vmem>>, vector<1x1x32xf32>
    %223 = vector.shape_cast %222 : vector<1x1x32xf32> to vector<1x32xf32>
    %c0_88 = arith.constant 0 : index
    %c198 = arith.constant 198 : index
    %c0_89 = arith.constant 0 : index
    %224 = vector.load %arg5[%c0_88, %c198, %c0_89] : memref<1x368x64xf32, #tpu.memory_space<vmem>>, vector<1x32x32xf32>
    %225 = vector.shape_cast %224 : vector<1x32x32xf32> to vector<32x32xf32>
    %c0_90 = arith.constant 0 : index
    %c264 = arith.constant 264 : index
    %c0_91 = arith.constant 0 : index
    %226 = vector.load %arg5[%c0_90, %c264, %c0_91] : memref<1x368x64xf32, #tpu.memory_space<vmem>>, vector<1x1x32xf32>
    %227 = vector.shape_cast %226 : vector<1x1x32xf32> to vector<1x32xf32>
    %c0_92 = arith.constant 0 : index
    %c230 = arith.constant 230 : index
    %c0_93 = arith.constant 0 : index
    %228 = vector.load %arg5[%c0_92, %c230, %c0_93] : memref<1x368x64xf32, #tpu.memory_space<vmem>>, vector<1x32x32xf32>
    %229 = vector.shape_cast %228 : vector<1x32x32xf32> to vector<32x32xf32>
    %c0_94 = arith.constant 0 : index
    %c265 = arith.constant 265 : index
    %c0_95 = arith.constant 0 : index
    %230 = vector.load %arg5[%c0_94, %c265, %c0_95] : memref<1x368x64xf32, #tpu.memory_space<vmem>>, vector<1x1x32xf32>
    %231 = vector.shape_cast %230 : vector<1x1x32xf32> to vector<1x32xf32>
    %cst_96 = arith.constant dense<0.000000e+00> : vector<16x32xf32>
    %232 = tpu.matmul %214, %217, %cst_96 {dimension_numbers = #tpu.dot_dimension_numbers<[1], [0], [0], [1], [0, 0, 1, 1], [], []>} : vector<16x32xf32>, vector<32x32xf32>, vector<16x32xf32> -> vector<16x32xf32>
    %233 = vector.broadcast %219 : vector<1x32xf32> to vector<16x32xf32>
    %234 = arith.addf %232, %233 : vector<16x32xf32>
    %cst_97 = arith.constant dense<0.000000e+00> : vector<128x32xf32>
    %235 = tpu.matmul %215, %221, %cst_97 {dimension_numbers = #tpu.dot_dimension_numbers<[1], [0], [0], [1], [0, 0, 1, 1], [], []>} : vector<128x32xf32>, vector<32x32xf32>, vector<128x32xf32> -> vector<128x32xf32>
    %236 = vector.broadcast %223 : vector<1x32xf32> to vector<128x32xf32>
    %237 = arith.addf %235, %236 : vector<128x32xf32>
    %cst_98 = arith.constant dense<0.000000e+00> : vector<128x32xf32>
    %238 = tpu.matmul %4, %225, %cst_98 {dimension_numbers = #tpu.dot_dimension_numbers<[1], [0], [0], [1], [0, 0, 1, 1], [], []>} : vector<128x32xf32>, vector<32x32xf32>, vector<128x32xf32> -> vector<128x32xf32>
    %239 = vector.broadcast %227 : vector<1x32xf32> to vector<128x32xf32>
    %240 = arith.addf %238, %239 : vector<128x32xf32>
    %241 = vector.extract_strided_slice %234 {offsets = [0, 0], sizes = [8, 32], strides = [1, 1]} : vector<16x32xf32> to vector<8x32xf32>
    %242 = vector.extract_strided_slice %237 {offsets = [0, 0], sizes = [64, 32], strides = [1, 1]} : vector<128x32xf32> to vector<64x32xf32>
    %243 = vector.extract_strided_slice %240 {offsets = [0, 0], sizes = [64, 32], strides = [1, 1]} : vector<128x32xf32> to vector<64x32xf32>
    %244 = vector.extract_strided_slice %7 {offsets = [0, 0], sizes = [1, 64], strides = [1, 1]} : vector<2x64xf32> to vector<1x64xf32>
    %245 = vector.shape_cast %244 : vector<1x64xf32> to vector<1x64xf32>
    %246 = vector.broadcast %245 : vector<1x64xf32> to vector<8x64xf32>
    %cst_99 = arith.constant 0.000000e+00 : f32
    %247 = vector.broadcast %cst_99 : f32 to vector<8x32xf32>
    %248 = vector.extract_strided_slice %241 {offsets = [0, 0], sizes = [8, 8], strides = [1, 1]} : vector<8x32xf32> to vector<8x8xf32>
    %249 = vector.extract_strided_slice %242 {offsets = [0, 0], sizes = [64, 8], strides = [1, 1]} : vector<64x32xf32> to vector<64x8xf32>
    %cst_100 = arith.constant dense<0.000000e+00> : vector<8x64xf32>
    %250 = tpu.matmul %248, %249, %cst_100 {dimension_numbers = #tpu.dot_dimension_numbers<[1], [1], [0], [0], [0, 0, 1, 0], [], []>} : vector<8x8xf32>, vector<64x8xf32>, vector<8x64xf32> -> vector<8x64xf32>
    %251 = arith.addf %250, %246 : vector<8x64xf32>
    %cst_101 = arith.constant dense<0xFF800000> : vector<8xf32>
    %252 = vector.multi_reduction <maximumf>, %251, %cst_101 [1] : vector<8x64xf32> to vector<8xf32>
    %253 = vector.shape_cast %252 : vector<8xf32> to vector<8x1xf32>
    %254 = vector.broadcast %253 : vector<8x1xf32> to vector<8x64xf32>
    %255 = arith.subf %251, %254 : vector<8x64xf32>
    %256 = math.exp %255 : vector<8x64xf32>
    %cst_102 = arith.constant dense<0.000000e+00> : vector<8xf32>
    %257 = vector.multi_reduction <add>, %256, %cst_102 [1] : vector<8x64xf32> to vector<8xf32>
    %258 = vector.shape_cast %257 : vector<8xf32> to vector<8x1xf32>
    %259 = tpu.reciprocal %258 {approx = true} : vector<8x1xf32> -> vector<8x1xf32>
    %260 = vector.broadcast %259 : vector<8x1xf32> to vector<8x64xf32>
    %261 = arith.mulf %256, %260 : vector<8x64xf32>
    %262 = vector.extract_strided_slice %243 {offsets = [0, 0], sizes = [64, 8], strides = [1, 1]} : vector<64x32xf32> to vector<64x8xf32>
    %cst_103 = arith.constant dense<0.000000e+00> : vector<8x8xf32>
    %263 = tpu.matmul %261, %262, %cst_103 {dimension_numbers = #tpu.dot_dimension_numbers<[1], [0], [0], [1], [0, 0, 1, 1], [], []>} : vector<8x64xf32>, vector<64x8xf32>, vector<8x8xf32> -> vector<8x8xf32>
    %264 = vector.extract_strided_slice %229 {offsets = [0, 0], sizes = [8, 32], strides = [1, 1]} : vector<32x32xf32> to vector<8x32xf32>
    %cst_104 = arith.constant dense<0.000000e+00> : vector<8x32xf32>
    %265 = tpu.matmul %263, %264, %cst_104 {dimension_numbers = #tpu.dot_dimension_numbers<[1], [0], [0], [1], [0, 0, 1, 1], [], []>} : vector<8x8xf32>, vector<8x32xf32>, vector<8x32xf32> -> vector<8x32xf32>
    %266 = arith.addf %247, %265 : vector<8x32xf32>
    %267 = vector.extract_strided_slice %241 {offsets = [0, 8], sizes = [8, 8], strides = [1, 1]} : vector<8x32xf32> to vector<8x8xf32>
    %268 = vector.extract_strided_slice %242 {offsets = [0, 8], sizes = [64, 8], strides = [1, 1]} : vector<64x32xf32> to vector<64x8xf32>
    %cst_105 = arith.constant dense<0.000000e+00> : vector<8x64xf32>
    %269 = tpu.matmul %267, %268, %cst_105 {dimension_numbers = #tpu.dot_dimension_numbers<[1], [1], [0], [0], [0, 0, 1, 0], [], []>} : vector<8x8xf32>, vector<64x8xf32>, vector<8x64xf32> -> vector<8x64xf32>
    %270 = arith.addf %269, %246 : vector<8x64xf32>
    %cst_106 = arith.constant dense<0xFF800000> : vector<8xf32>
    %271 = vector.multi_reduction <maximumf>, %270, %cst_106 [1] : vector<8x64xf32> to vector<8xf32>
    %272 = vector.shape_cast %271 : vector<8xf32> to vector<8x1xf32>
    %273 = vector.broadcast %272 : vector<8x1xf32> to vector<8x64xf32>
    %274 = arith.subf %270, %273 : vector<8x64xf32>
    %275 = math.exp %274 : vector<8x64xf32>
    %cst_107 = arith.constant dense<0.000000e+00> : vector<8xf32>
    %276 = vector.multi_reduction <add>, %275, %cst_107 [1] : vector<8x64xf32> to vector<8xf32>
    %277 = vector.shape_cast %276 : vector<8xf32> to vector<8x1xf32>
    %278 = tpu.reciprocal %277 {approx = true} : vector<8x1xf32> -> vector<8x1xf32>
    %279 = vector.broadcast %278 : vector<8x1xf32> to vector<8x64xf32>
    %280 = arith.mulf %275, %279 : vector<8x64xf32>
    %281 = vector.extract_strided_slice %243 {offsets = [0, 8], sizes = [64, 8], strides = [1, 1]} : vector<64x32xf32> to vector<64x8xf32>
    %cst_108 = arith.constant dense<0.000000e+00> : vector<8x8xf32>
    %282 = tpu.matmul %280, %281, %cst_108 {dimension_numbers = #tpu.dot_dimension_numbers<[1], [0], [0], [1], [0, 0, 1, 1], [], []>} : vector<8x64xf32>, vector<64x8xf32>, vector<8x8xf32> -> vector<8x8xf32>
    %283 = vector.extract_strided_slice %229 {offsets = [8, 0], sizes = [8, 32], strides = [1, 1]} : vector<32x32xf32> to vector<8x32xf32>
    %cst_109 = arith.constant dense<0.000000e+00> : vector<8x32xf32>
    %284 = tpu.matmul %282, %283, %cst_109 {dimension_numbers = #tpu.dot_dimension_numbers<[1], [0], [0], [1], [0, 0, 1, 1], [], []>} : vector<8x8xf32>, vector<8x32xf32>, vector<8x32xf32> -> vector<8x32xf32>
    %285 = arith.addf %266, %284 : vector<8x32xf32>
    %286 = vector.extract_strided_slice %241 {offsets = [0, 16], sizes = [8, 8], strides = [1, 1]} : vector<8x32xf32> to vector<8x8xf32>
    %287 = vector.extract_strided_slice %242 {offsets = [0, 16], sizes = [64, 8], strides = [1, 1]} : vector<64x32xf32> to vector<64x8xf32>
    %cst_110 = arith.constant dense<0.000000e+00> : vector<8x64xf32>
    %288 = tpu.matmul %286, %287, %cst_110 {dimension_numbers = #tpu.dot_dimension_numbers<[1], [1], [0], [0], [0, 0, 1, 0], [], []>} : vector<8x8xf32>, vector<64x8xf32>, vector<8x64xf32> -> vector<8x64xf32>
    %289 = arith.addf %288, %246 : vector<8x64xf32>
    %cst_111 = arith.constant dense<0xFF800000> : vector<8xf32>
    %290 = vector.multi_reduction <maximumf>, %289, %cst_111 [1] : vector<8x64xf32> to vector<8xf32>
    %291 = vector.shape_cast %290 : vector<8xf32> to vector<8x1xf32>
    %292 = vector.broadcast %291 : vector<8x1xf32> to vector<8x64xf32>
    %293 = arith.subf %289, %292 : vector<8x64xf32>
    %294 = math.exp %293 : vector<8x64xf32>
    %cst_112 = arith.constant dense<0.000000e+00> : vector<8xf32>
    %295 = vector.multi_reduction <add>, %294, %cst_112 [1] : vector<8x64xf32> to vector<8xf32>
    %296 = vector.shape_cast %295 : vector<8xf32> to vector<8x1xf32>
    %297 = tpu.reciprocal %296 {approx = true} : vector<8x1xf32> -> vector<8x1xf32>
    %298 = vector.broadcast %297 : vector<8x1xf32> to vector<8x64xf32>
    %299 = arith.mulf %294, %298 : vector<8x64xf32>
    %300 = vector.extract_strided_slice %243 {offsets = [0, 16], sizes = [64, 8], strides = [1, 1]} : vector<64x32xf32> to vector<64x8xf32>
    %cst_113 = arith.constant dense<0.000000e+00> : vector<8x8xf32>
    %301 = tpu.matmul %299, %300, %cst_113 {dimension_numbers = #tpu.dot_dimension_numbers<[1], [0], [0], [1], [0, 0, 1, 1], [], []>} : vector<8x64xf32>, vector<64x8xf32>, vector<8x8xf32> -> vector<8x8xf32>
    %302 = vector.extract_strided_slice %229 {offsets = [16, 0], sizes = [8, 32], strides = [1, 1]} : vector<32x32xf32> to vector<8x32xf32>
    %cst_114 = arith.constant dense<0.000000e+00> : vector<8x32xf32>
    %303 = tpu.matmul %301, %302, %cst_114 {dimension_numbers = #tpu.dot_dimension_numbers<[1], [0], [0], [1], [0, 0, 1, 1], [], []>} : vector<8x8xf32>, vector<8x32xf32>, vector<8x32xf32> -> vector<8x32xf32>
    %304 = arith.addf %285, %303 : vector<8x32xf32>
    %305 = vector.extract_strided_slice %241 {offsets = [0, 24], sizes = [8, 8], strides = [1, 1]} : vector<8x32xf32> to vector<8x8xf32>
    %306 = vector.extract_strided_slice %242 {offsets = [0, 24], sizes = [64, 8], strides = [1, 1]} : vector<64x32xf32> to vector<64x8xf32>
    %cst_115 = arith.constant dense<0.000000e+00> : vector<8x64xf32>
    %307 = tpu.matmul %305, %306, %cst_115 {dimension_numbers = #tpu.dot_dimension_numbers<[1], [1], [0], [0], [0, 0, 1, 0], [], []>} : vector<8x8xf32>, vector<64x8xf32>, vector<8x64xf32> -> vector<8x64xf32>
    %308 = arith.addf %307, %246 : vector<8x64xf32>
    %cst_116 = arith.constant dense<0xFF800000> : vector<8xf32>
    %309 = vector.multi_reduction <maximumf>, %308, %cst_116 [1] : vector<8x64xf32> to vector<8xf32>
    %310 = vector.shape_cast %309 : vector<8xf32> to vector<8x1xf32>
    %311 = vector.broadcast %310 : vector<8x1xf32> to vector<8x64xf32>
    %312 = arith.subf %308, %311 : vector<8x64xf32>
    %313 = math.exp %312 : vector<8x64xf32>
    %cst_117 = arith.constant dense<0.000000e+00> : vector<8xf32>
    %314 = vector.multi_reduction <add>, %313, %cst_117 [1] : vector<8x64xf32> to vector<8xf32>
    %315 = vector.shape_cast %314 : vector<8xf32> to vector<8x1xf32>
    %316 = tpu.reciprocal %315 {approx = true} : vector<8x1xf32> -> vector<8x1xf32>
    %317 = vector.broadcast %316 : vector<8x1xf32> to vector<8x64xf32>
    %318 = arith.mulf %313, %317 : vector<8x64xf32>
    %319 = vector.extract_strided_slice %243 {offsets = [0, 24], sizes = [64, 8], strides = [1, 1]} : vector<64x32xf32> to vector<64x8xf32>
    %cst_118 = arith.constant dense<0.000000e+00> : vector<8x8xf32>
    %320 = tpu.matmul %318, %319, %cst_118 {dimension_numbers = #tpu.dot_dimension_numbers<[1], [0], [0], [1], [0, 0, 1, 1], [], []>} : vector<8x64xf32>, vector<64x8xf32>, vector<8x8xf32> -> vector<8x8xf32>
    %321 = vector.extract_strided_slice %229 {offsets = [24, 0], sizes = [8, 32], strides = [1, 1]} : vector<32x32xf32> to vector<8x32xf32>
    %cst_119 = arith.constant dense<0.000000e+00> : vector<8x32xf32>
    %322 = tpu.matmul %320, %321, %cst_119 {dimension_numbers = #tpu.dot_dimension_numbers<[1], [0], [0], [1], [0, 0, 1, 1], [], []>} : vector<8x8xf32>, vector<8x32xf32>, vector<8x32xf32> -> vector<8x32xf32>
    %323 = arith.addf %304, %322 : vector<8x32xf32>
    %324 = vector.extract_strided_slice %234 {offsets = [8, 0], sizes = [8, 32], strides = [1, 1]} : vector<16x32xf32> to vector<8x32xf32>
    %325 = vector.extract_strided_slice %237 {offsets = [64, 0], sizes = [64, 32], strides = [1, 1]} : vector<128x32xf32> to vector<64x32xf32>
    %326 = vector.extract_strided_slice %240 {offsets = [64, 0], sizes = [64, 32], strides = [1, 1]} : vector<128x32xf32> to vector<64x32xf32>
    %327 = vector.extract_strided_slice %7 {offsets = [1, 0], sizes = [1, 64], strides = [1, 1]} : vector<2x64xf32> to vector<1x64xf32>
    %328 = vector.shape_cast %327 : vector<1x64xf32> to vector<1x64xf32>
    %329 = vector.broadcast %328 : vector<1x64xf32> to vector<8x64xf32>
    %cst_120 = arith.constant 0.000000e+00 : f32
    %330 = vector.broadcast %cst_120 : f32 to vector<8x32xf32>
    %331 = vector.extract_strided_slice %324 {offsets = [0, 0], sizes = [8, 8], strides = [1, 1]} : vector<8x32xf32> to vector<8x8xf32>
    %332 = vector.extract_strided_slice %325 {offsets = [0, 0], sizes = [64, 8], strides = [1, 1]} : vector<64x32xf32> to vector<64x8xf32>
    %cst_121 = arith.constant dense<0.000000e+00> : vector<8x64xf32>
    %333 = tpu.matmul %331, %332, %cst_121 {dimension_numbers = #tpu.dot_dimension_numbers<[1], [1], [0], [0], [0, 0, 1, 0], [], []>} : vector<8x8xf32>, vector<64x8xf32>, vector<8x64xf32> -> vector<8x64xf32>
    %334 = arith.addf %333, %329 : vector<8x64xf32>
    %cst_122 = arith.constant dense<0xFF800000> : vector<8xf32>
    %335 = vector.multi_reduction <maximumf>, %334, %cst_122 [1] : vector<8x64xf32> to vector<8xf32>
    %336 = vector.shape_cast %335 : vector<8xf32> to vector<8x1xf32>
    %337 = vector.broadcast %336 : vector<8x1xf32> to vector<8x64xf32>
    %338 = arith.subf %334, %337 : vector<8x64xf32>
    %339 = math.exp %338 : vector<8x64xf32>
    %cst_123 = arith.constant dense<0.000000e+00> : vector<8xf32>
    %340 = vector.multi_reduction <add>, %339, %cst_123 [1] : vector<8x64xf32> to vector<8xf32>
    %341 = vector.shape_cast %340 : vector<8xf32> to vector<8x1xf32>
    %342 = tpu.reciprocal %341 {approx = true} : vector<8x1xf32> -> vector<8x1xf32>
    %343 = vector.broadcast %342 : vector<8x1xf32> to vector<8x64xf32>
    %344 = arith.mulf %339, %343 : vector<8x64xf32>
    %345 = vector.extract_strided_slice %326 {offsets = [0, 0], sizes = [64, 8], strides = [1, 1]} : vector<64x32xf32> to vector<64x8xf32>
    %cst_124 = arith.constant dense<0.000000e+00> : vector<8x8xf32>
    %346 = tpu.matmul %344, %345, %cst_124 {dimension_numbers = #tpu.dot_dimension_numbers<[1], [0], [0], [1], [0, 0, 1, 1], [], []>} : vector<8x64xf32>, vector<64x8xf32>, vector<8x8xf32> -> vector<8x8xf32>
    %347 = vector.extract_strided_slice %229 {offsets = [0, 0], sizes = [8, 32], strides = [1, 1]} : vector<32x32xf32> to vector<8x32xf32>
    %cst_125 = arith.constant dense<0.000000e+00> : vector<8x32xf32>
    %348 = tpu.matmul %346, %347, %cst_125 {dimension_numbers = #tpu.dot_dimension_numbers<[1], [0], [0], [1], [0, 0, 1, 1], [], []>} : vector<8x8xf32>, vector<8x32xf32>, vector<8x32xf32> -> vector<8x32xf32>
    %349 = arith.addf %330, %348 : vector<8x32xf32>
    %350 = vector.extract_strided_slice %324 {offsets = [0, 8], sizes = [8, 8], strides = [1, 1]} : vector<8x32xf32> to vector<8x8xf32>
    %351 = vector.extract_strided_slice %325 {offsets = [0, 8], sizes = [64, 8], strides = [1, 1]} : vector<64x32xf32> to vector<64x8xf32>
    %cst_126 = arith.constant dense<0.000000e+00> : vector<8x64xf32>
    %352 = tpu.matmul %350, %351, %cst_126 {dimension_numbers = #tpu.dot_dimension_numbers<[1], [1], [0], [0], [0, 0, 1, 0], [], []>} : vector<8x8xf32>, vector<64x8xf32>, vector<8x64xf32> -> vector<8x64xf32>
    %353 = arith.addf %352, %329 : vector<8x64xf32>
    %cst_127 = arith.constant dense<0xFF800000> : vector<8xf32>
    %354 = vector.multi_reduction <maximumf>, %353, %cst_127 [1] : vector<8x64xf32> to vector<8xf32>
    %355 = vector.shape_cast %354 : vector<8xf32> to vector<8x1xf32>
    %356 = vector.broadcast %355 : vector<8x1xf32> to vector<8x64xf32>
    %357 = arith.subf %353, %356 : vector<8x64xf32>
    %358 = math.exp %357 : vector<8x64xf32>
    %cst_128 = arith.constant dense<0.000000e+00> : vector<8xf32>
    %359 = vector.multi_reduction <add>, %358, %cst_128 [1] : vector<8x64xf32> to vector<8xf32>
    %360 = vector.shape_cast %359 : vector<8xf32> to vector<8x1xf32>
    %361 = tpu.reciprocal %360 {approx = true} : vector<8x1xf32> -> vector<8x1xf32>
    %362 = vector.broadcast %361 : vector<8x1xf32> to vector<8x64xf32>
    %363 = arith.mulf %358, %362 : vector<8x64xf32>
    %364 = vector.extract_strided_slice %326 {offsets = [0, 8], sizes = [64, 8], strides = [1, 1]} : vector<64x32xf32> to vector<64x8xf32>
    %cst_129 = arith.constant dense<0.000000e+00> : vector<8x8xf32>
    %365 = tpu.matmul %363, %364, %cst_129 {dimension_numbers = #tpu.dot_dimension_numbers<[1], [0], [0], [1], [0, 0, 1, 1], [], []>} : vector<8x64xf32>, vector<64x8xf32>, vector<8x8xf32> -> vector<8x8xf32>
    %366 = vector.extract_strided_slice %229 {offsets = [8, 0], sizes = [8, 32], strides = [1, 1]} : vector<32x32xf32> to vector<8x32xf32>
    %cst_130 = arith.constant dense<0.000000e+00> : vector<8x32xf32>
    %367 = tpu.matmul %365, %366, %cst_130 {dimension_numbers = #tpu.dot_dimension_numbers<[1], [0], [0], [1], [0, 0, 1, 1], [], []>} : vector<8x8xf32>, vector<8x32xf32>, vector<8x32xf32> -> vector<8x32xf32>
    %368 = arith.addf %349, %367 : vector<8x32xf32>
    %369 = vector.extract_strided_slice %324 {offsets = [0, 16], sizes = [8, 8], strides = [1, 1]} : vector<8x32xf32> to vector<8x8xf32>
    %370 = vector.extract_strided_slice %325 {offsets = [0, 16], sizes = [64, 8], strides = [1, 1]} : vector<64x32xf32> to vector<64x8xf32>
    %cst_131 = arith.constant dense<0.000000e+00> : vector<8x64xf32>
    %371 = tpu.matmul %369, %370, %cst_131 {dimension_numbers = #tpu.dot_dimension_numbers<[1], [1], [0], [0], [0, 0, 1, 0], [], []>} : vector<8x8xf32>, vector<64x8xf32>, vector<8x64xf32> -> vector<8x64xf32>
    %372 = arith.addf %371, %329 : vector<8x64xf32>
    %cst_132 = arith.constant dense<0xFF800000> : vector<8xf32>
    %373 = vector.multi_reduction <maximumf>, %372, %cst_132 [1] : vector<8x64xf32> to vector<8xf32>
    %374 = vector.shape_cast %373 : vector<8xf32> to vector<8x1xf32>
    %375 = vector.broadcast %374 : vector<8x1xf32> to vector<8x64xf32>
    %376 = arith.subf %372, %375 : vector<8x64xf32>
    %377 = math.exp %376 : vector<8x64xf32>
    %cst_133 = arith.constant dense<0.000000e+00> : vector<8xf32>
    %378 = vector.multi_reduction <add>, %377, %cst_133 [1] : vector<8x64xf32> to vector<8xf32>
    %379 = vector.shape_cast %378 : vector<8xf32> to vector<8x1xf32>
    %380 = tpu.reciprocal %379 {approx = true} : vector<8x1xf32> -> vector<8x1xf32>
    %381 = vector.broadcast %380 : vector<8x1xf32> to vector<8x64xf32>
    %382 = arith.mulf %377, %381 : vector<8x64xf32>
    %383 = vector.extract_strided_slice %326 {offsets = [0, 16], sizes = [64, 8], strides = [1, 1]} : vector<64x32xf32> to vector<64x8xf32>
    %cst_134 = arith.constant dense<0.000000e+00> : vector<8x8xf32>
    %384 = tpu.matmul %382, %383, %cst_134 {dimension_numbers = #tpu.dot_dimension_numbers<[1], [0], [0], [1], [0, 0, 1, 1], [], []>} : vector<8x64xf32>, vector<64x8xf32>, vector<8x8xf32> -> vector<8x8xf32>
    %385 = vector.extract_strided_slice %229 {offsets = [16, 0], sizes = [8, 32], strides = [1, 1]} : vector<32x32xf32> to vector<8x32xf32>
    %cst_135 = arith.constant dense<0.000000e+00> : vector<8x32xf32>
    %386 = tpu.matmul %384, %385, %cst_135 {dimension_numbers = #tpu.dot_dimension_numbers<[1], [0], [0], [1], [0, 0, 1, 1], [], []>} : vector<8x8xf32>, vector<8x32xf32>, vector<8x32xf32> -> vector<8x32xf32>
    %387 = arith.addf %368, %386 : vector<8x32xf32>
    %388 = vector.extract_strided_slice %324 {offsets = [0, 24], sizes = [8, 8], strides = [1, 1]} : vector<8x32xf32> to vector<8x8xf32>
    %389 = vector.extract_strided_slice %325 {offsets = [0, 24], sizes = [64, 8], strides = [1, 1]} : vector<64x32xf32> to vector<64x8xf32>
    %cst_136 = arith.constant dense<0.000000e+00> : vector<8x64xf32>
    %390 = tpu.matmul %388, %389, %cst_136 {dimension_numbers = #tpu.dot_dimension_numbers<[1], [1], [0], [0], [0, 0, 1, 0], [], []>} : vector<8x8xf32>, vector<64x8xf32>, vector<8x64xf32> -> vector<8x64xf32>
    %391 = arith.addf %390, %329 : vector<8x64xf32>
    %cst_137 = arith.constant dense<0xFF800000> : vector<8xf32>
    %392 = vector.multi_reduction <maximumf>, %391, %cst_137 [1] : vector<8x64xf32> to vector<8xf32>
    %393 = vector.shape_cast %392 : vector<8xf32> to vector<8x1xf32>
    %394 = vector.broadcast %393 : vector<8x1xf32> to vector<8x64xf32>
    %395 = arith.subf %391, %394 : vector<8x64xf32>
    %396 = math.exp %395 : vector<8x64xf32>
    %cst_138 = arith.constant dense<0.000000e+00> : vector<8xf32>
    %397 = vector.multi_reduction <add>, %396, %cst_138 [1] : vector<8x64xf32> to vector<8xf32>
    %398 = vector.shape_cast %397 : vector<8xf32> to vector<8x1xf32>
    %399 = tpu.reciprocal %398 {approx = true} : vector<8x1xf32> -> vector<8x1xf32>
    %400 = vector.broadcast %399 : vector<8x1xf32> to vector<8x64xf32>
    %401 = arith.mulf %396, %400 : vector<8x64xf32>
    %402 = vector.extract_strided_slice %326 {offsets = [0, 24], sizes = [64, 8], strides = [1, 1]} : vector<64x32xf32> to vector<64x8xf32>
    %cst_139 = arith.constant dense<0.000000e+00> : vector<8x8xf32>
    %403 = tpu.matmul %401, %402, %cst_139 {dimension_numbers = #tpu.dot_dimension_numbers<[1], [0], [0], [1], [0, 0, 1, 1], [], []>} : vector<8x64xf32>, vector<64x8xf32>, vector<8x8xf32> -> vector<8x8xf32>
    %404 = vector.extract_strided_slice %229 {offsets = [24, 0], sizes = [8, 32], strides = [1, 1]} : vector<32x32xf32> to vector<8x32xf32>
    %cst_140 = arith.constant dense<0.000000e+00> : vector<8x32xf32>
    %405 = tpu.matmul %403, %404, %cst_140 {dimension_numbers = #tpu.dot_dimension_numbers<[1], [0], [0], [1], [0, 0, 1, 1], [], []>} : vector<8x8xf32>, vector<8x32xf32>, vector<8x32xf32> -> vector<8x32xf32>
    %406 = arith.addf %387, %405 : vector<8x32xf32>
    %407 = tpu.concatenate %323, %406 in 0 : vector<8x32xf32>, vector<8x32xf32> -> vector<16x32xf32>
    %408 = vector.broadcast %231 : vector<1x32xf32> to vector<16x32xf32>
    %409 = arith.addf %407, %408 : vector<16x32xf32>
    %410 = arith.addf %213, %409 : vector<16x32xf32>
    %c0_141 = arith.constant 0 : index
    %c266 = arith.constant 266 : index
    %c0_142 = arith.constant 0 : index
    %411 = vector.load %arg5[%c0_141, %c266, %c0_142] : memref<1x368x64xf32, #tpu.memory_space<vmem>>, vector<1x1x32xf32>
    %412 = vector.shape_cast %411 : vector<1x1x32xf32> to vector<1x32xf32>
    %c0_143 = arith.constant 0 : index
    %c267 = arith.constant 267 : index
    %c0_144 = arith.constant 0 : index
    %413 = vector.load %arg5[%c0_143, %c267, %c0_144] : memref<1x368x64xf32, #tpu.memory_space<vmem>>, vector<1x1x32xf32>
    %414 = vector.shape_cast %413 : vector<1x1x32xf32> to vector<1x32xf32>
    %cst_145 = arith.constant dense<0.000000e+00> : vector<16xf32>
    %415 = vector.multi_reduction <add>, %410, %cst_145 [1] : vector<16x32xf32> to vector<16xf32>
    %416 = vector.shape_cast %415 : vector<16xf32> to vector<16x1xf32>
    %cst_146 = arith.constant 3.200000e+01 : f32
    %417 = vector.broadcast %cst_146 : f32 to vector<16x1xf32>
    %418 = arith.divf %416, %417 : vector<16x1xf32>
    %419 = vector.broadcast %418 : vector<16x1xf32> to vector<16x32xf32>
    %420 = arith.subf %410, %419 : vector<16x32xf32>
    %421 = arith.mulf %420, %420 : vector<16x32xf32>
    %cst_147 = arith.constant dense<0.000000e+00> : vector<16xf32>
    %422 = vector.multi_reduction <add>, %421, %cst_147 [1] : vector<16x32xf32> to vector<16xf32>
    %423 = vector.shape_cast %422 : vector<16xf32> to vector<16x1xf32>
    %cst_148 = arith.constant 3.200000e+01 : f32
    %424 = vector.broadcast %cst_148 : f32 to vector<16x1xf32>
    %425 = arith.divf %423, %424 : vector<16x1xf32>
    %cst_149 = arith.constant 9.99999974E-6 : f32
    %426 = vector.broadcast %cst_149 : f32 to vector<16x1xf32>
    %427 = arith.addf %425, %426 : vector<16x1xf32>
    %428 = math.rsqrt %427 : vector<16x1xf32>
    %429 = vector.broadcast %428 : vector<16x1xf32> to vector<16x32xf32>
    %430 = arith.mulf %420, %429 : vector<16x32xf32>
    %431 = vector.broadcast %412 : vector<1x32xf32> to vector<16x32xf32>
    %432 = arith.mulf %430, %431 : vector<16x32xf32>
    %433 = vector.broadcast %414 : vector<1x32xf32> to vector<16x32xf32>
    %434 = arith.addf %432, %433 : vector<16x32xf32>
    %c0_150 = arith.constant 0 : index
    %c268 = arith.constant 268 : index
    %c0_151 = arith.constant 0 : index
    %435 = vector.load %arg5[%c0_150, %c268, %c0_151] : memref<1x368x64xf32, #tpu.memory_space<vmem>>, vector<1x32x64xf32>
    %436 = vector.shape_cast %435 : vector<1x32x64xf32> to vector<32x64xf32>
    %cst_152 = arith.constant dense<0.000000e+00> : vector<16x64xf32>
    %437 = tpu.matmul %434, %436, %cst_152 {dimension_numbers = #tpu.dot_dimension_numbers<[1], [0], [0], [1], [0, 0, 1, 1], [], []>} : vector<16x32xf32>, vector<32x64xf32>, vector<16x64xf32> -> vector<16x64xf32>
    %c0_153 = arith.constant 0 : index
    %c300 = arith.constant 300 : index
    %c0_154 = arith.constant 0 : index
    %438 = vector.load %arg5[%c0_153, %c300, %c0_154] : memref<1x368x64xf32, #tpu.memory_space<vmem>>, vector<1x1x64xf32>
    %439 = vector.shape_cast %438 : vector<1x1x64xf32> to vector<1x64xf32>
    %440 = vector.broadcast %439 : vector<1x64xf32> to vector<16x64xf32>
    %441 = arith.addf %437, %440 : vector<16x64xf32>
    %cst_155 = arith.constant 0.000000e+00 : f32
    %442 = vector.broadcast %cst_155 : f32 to vector<16x64xf32>
    %443 = arith.maximumf %441, %442 : vector<16x64xf32>
    %c0_156 = arith.constant 0 : index
    %c301 = arith.constant 301 : index
    %c0_157 = arith.constant 0 : index
    %444 = vector.load %arg5[%c0_156, %c301, %c0_157] : memref<1x368x64xf32, #tpu.memory_space<vmem>>, vector<1x64x32xf32>
    %445 = vector.shape_cast %444 : vector<1x64x32xf32> to vector<64x32xf32>
    %cst_158 = arith.constant dense<0.000000e+00> : vector<16x32xf32>
    %446 = tpu.matmul %443, %445, %cst_158 {dimension_numbers = #tpu.dot_dimension_numbers<[1], [0], [0], [1], [0, 0, 1, 1], [], []>} : vector<16x64xf32>, vector<64x32xf32>, vector<16x32xf32> -> vector<16x32xf32>
    %447 = arith.addf %434, %446 : vector<16x32xf32>
    %c0_159 = arith.constant 0 : index
    %c365 = arith.constant 365 : index
    %c0_160 = arith.constant 0 : index
    %448 = vector.load %arg5[%c0_159, %c365, %c0_160] : memref<1x368x64xf32, #tpu.memory_space<vmem>>, vector<1x1x32xf32>
    %449 = vector.shape_cast %448 : vector<1x1x32xf32> to vector<1x32xf32>
    %450 = vector.broadcast %449 : vector<1x32xf32> to vector<16x32xf32>
    %451 = arith.addf %447, %450 : vector<16x32xf32>
    %c0_161 = arith.constant 0 : index
    %c366 = arith.constant 366 : index
    %c0_162 = arith.constant 0 : index
    %452 = vector.load %arg5[%c0_161, %c366, %c0_162] : memref<1x368x64xf32, #tpu.memory_space<vmem>>, vector<1x1x32xf32>
    %453 = vector.shape_cast %452 : vector<1x1x32xf32> to vector<1x32xf32>
    %c0_163 = arith.constant 0 : index
    %c367 = arith.constant 367 : index
    %c0_164 = arith.constant 0 : index
    %454 = vector.load %arg5[%c0_163, %c367, %c0_164] : memref<1x368x64xf32, #tpu.memory_space<vmem>>, vector<1x1x32xf32>
    %455 = vector.shape_cast %454 : vector<1x1x32xf32> to vector<1x32xf32>
    %cst_165 = arith.constant dense<0.000000e+00> : vector<16xf32>
    %456 = vector.multi_reduction <add>, %451, %cst_165 [1] : vector<16x32xf32> to vector<16xf32>
    %457 = vector.shape_cast %456 : vector<16xf32> to vector<16x1xf32>
    %cst_166 = arith.constant 3.200000e+01 : f32
    %458 = vector.broadcast %cst_166 : f32 to vector<16x1xf32>
    %459 = arith.divf %457, %458 : vector<16x1xf32>
    %460 = vector.broadcast %459 : vector<16x1xf32> to vector<16x32xf32>
    %461 = arith.subf %451, %460 : vector<16x32xf32>
    %462 = arith.mulf %461, %461 : vector<16x32xf32>
    %cst_167 = arith.constant dense<0.000000e+00> : vector<16xf32>
    %463 = vector.multi_reduction <add>, %462, %cst_167 [1] : vector<16x32xf32> to vector<16xf32>
    %464 = vector.shape_cast %463 : vector<16xf32> to vector<16x1xf32>
    %cst_168 = arith.constant 3.200000e+01 : f32
    %465 = vector.broadcast %cst_168 : f32 to vector<16x1xf32>
    %466 = arith.divf %464, %465 : vector<16x1xf32>
    %cst_169 = arith.constant 9.99999974E-6 : f32
    %467 = vector.broadcast %cst_169 : f32 to vector<16x1xf32>
    %468 = arith.addf %466, %467 : vector<16x1xf32>
    %469 = math.rsqrt %468 : vector<16x1xf32>
    %470 = vector.broadcast %469 : vector<16x1xf32> to vector<16x32xf32>
    %471 = arith.mulf %461, %470 : vector<16x32xf32>
    %472 = vector.broadcast %453 : vector<1x32xf32> to vector<16x32xf32>
    %473 = arith.mulf %471, %472 : vector<16x32xf32>
    %474 = vector.broadcast %455 : vector<1x32xf32> to vector<16x32xf32>
    %475 = arith.addf %473, %474 : vector<16x32xf32>
    %c0_170 = arith.constant 0 : index
    %c0_171 = arith.constant 0 : index
    %476 = vector.load %arg9[%c0_170, %c0_171] : memref<16x32xf32, #tpu.memory_space<vmem>>, vector<16x32xf32>
    tpu.vector_store %arg9[%c0_170, %c0_171], %475 {strides = array<i32>} : memref<16x32xf32, #tpu.memory_space<vmem>>, vector<16x32xf32>,
    %c1_i32 = arith.constant 1 : i32
    %477 = arith.cmpi eq, %arg0, %c1_i32 : i32
    %478 = arith.extui %477 : i1 to i32
    %c0_i32_172 = arith.constant 0 : i32
    %479 = arith.cmpi ne, %478, %c0_i32_172 : i32
    scf.if %479 {
      %c0_173 = arith.constant 0 : index
      %c0_174 = arith.constant 0 : index
      %480 = vector.load %arg6[%c0_173, %c0_174] : memref<136x64xf32, #tpu.memory_space<vmem>>, vector<1x32xf32>
      %c1 = arith.constant 1 : index
      %c0_175 = arith.constant 0 : index
      %481 = vector.load %arg6[%c1, %c0_175] : memref<136x64xf32, #tpu.memory_space<vmem>>, vector<1x32xf32>
      %cst_176 = arith.constant dense<0.000000e+00> : vector<16xf32>
      %482 = vector.multi_reduction <add>, %475, %cst_176 [1] : vector<16x32xf32> to vector<16xf32>
      %483 = vector.shape_cast %482 : vector<16xf32> to vector<16x1xf32>
      %cst_177 = arith.constant 3.200000e+01 : f32
      %484 = vector.broadcast %cst_177 : f32 to vector<16x1xf32>
      %485 = arith.divf %483, %484 : vector<16x1xf32>
      %486 = vector.broadcast %485 : vector<16x1xf32> to vector<16x32xf32>
      %487 = arith.subf %475, %486 : vector<16x32xf32>
      %488 = arith.mulf %487, %487 : vector<16x32xf32>
      %cst_178 = arith.constant dense<0.000000e+00> : vector<16xf32>
      %489 = vector.multi_reduction <add>, %488, %cst_178 [1] : vector<16x32xf32> to vector<16xf32>
      %490 = vector.shape_cast %489 : vector<16xf32> to vector<16x1xf32>
      %cst_179 = arith.constant 3.200000e+01 : f32
      %491 = vector.broadcast %cst_179 : f32 to vector<16x1xf32>
      %492 = arith.divf %490, %491 : vector<16x1xf32>
      %cst_180 = arith.constant 9.99999974E-6 : f32
      %493 = vector.broadcast %cst_180 : f32 to vector<16x1xf32>
      %494 = arith.addf %492, %493 : vector<16x1xf32>
      %495 = math.rsqrt %494 : vector<16x1xf32>
      %496 = vector.broadcast %495 : vector<16x1xf32> to vector<16x32xf32>
      %497 = arith.mulf %487, %496 : vector<16x32xf32>
      %498 = vector.broadcast %480 : vector<1x32xf32> to vector<16x32xf32>
      %499 = arith.mulf %497, %498 : vector<16x32xf32>
      %500 = vector.broadcast %481 : vector<1x32xf32> to vector<16x32xf32>
      %501 = arith.addf %499, %500 : vector<16x32xf32>
      %c2 = arith.constant 2 : index
      %c0_181 = arith.constant 0 : index
      %502 = vector.load %arg6[%c2, %c0_181] : memref<136x64xf32, #tpu.memory_space<vmem>>, vector<32x11xf32>
      %cst_182 = arith.constant dense<0.000000e+00> : vector<16x11xf32>
      %503 = tpu.matmul %501, %502, %cst_182 {dimension_numbers = #tpu.dot_dimension_numbers<[1], [0], [0], [1], [0, 0, 1, 1], [], []>} : vector<16x32xf32>, vector<32x11xf32>, vector<16x11xf32> -> vector<16x11xf32>
      %c34 = arith.constant 34 : index
      %c0_183 = arith.constant 0 : index
      %504 = vector.load %arg6[%c34, %c0_183] : memref<136x64xf32, #tpu.memory_space<vmem>>, vector<1x11xf32>
      %505 = vector.broadcast %504 : vector<1x11xf32> to vector<16x11xf32>
      %506 = arith.addf %503, %505 : vector<16x11xf32>
      %c0_184 = arith.constant 0 : index
      %c0_185 = arith.constant 0 : index
      %507 = vector.load %arg7[%c0_184, %c0_185] : memref<16x11xf32, #tpu.memory_space<vmem>>, vector<16x11xf32>
      tpu.vector_store %arg7[%c0_184, %c0_185], %506 {strides = array<i32>} : memref<16x11xf32, #tpu.memory_space<vmem>>, vector<16x11xf32>,
      %c35 = arith.constant 35 : index
      %c0_186 = arith.constant 0 : index
      %508 = vector.load %arg6[%c35, %c0_186] : memref<136x64xf32, #tpu.memory_space<vmem>>, vector<32x32xf32>
      %cst_187 = arith.constant dense<0.000000e+00> : vector<16x32xf32>
      %509 = tpu.matmul %501, %508, %cst_187 {dimension_numbers = #tpu.dot_dimension_numbers<[1], [0], [0], [1], [0, 0, 1, 1], [], []>} : vector<16x32xf32>, vector<32x32xf32>, vector<16x32xf32> -> vector<16x32xf32>
      %c67 = arith.constant 67 : index
      %c0_188 = arith.constant 0 : index
      %510 = vector.load %arg6[%c67, %c0_188] : memref<136x64xf32, #tpu.memory_space<vmem>>, vector<1x32xf32>
      %511 = vector.broadcast %510 : vector<1x32xf32> to vector<16x32xf32>
      %512 = arith.addf %509, %511 : vector<16x32xf32>
      %cst_189 = arith.constant 0.000000e+00 : f32
      %513 = vector.broadcast %cst_189 : f32 to vector<16x32xf32>
      %514 = arith.maximumf %512, %513 : vector<16x32xf32>
      %c68 = arith.constant 68 : index
      %c0_190 = arith.constant 0 : index
      %515 = vector.load %arg6[%c68, %c0_190] : memref<136x64xf32, #tpu.memory_space<vmem>>, vector<32x32xf32>
      %cst_191 = arith.constant dense<0.000000e+00> : vector<16x32xf32>
      %516 = tpu.matmul %514, %515, %cst_191 {dimension_numbers = #tpu.dot_dimension_numbers<[1], [0], [0], [1], [0, 0, 1, 1], [], []>} : vector<16x32xf32>, vector<32x32xf32>, vector<16x32xf32> -> vector<16x32xf32>
      %c100 = arith.constant 100 : index
      %c0_192 = arith.constant 0 : index
      %517 = vector.load %arg6[%c100, %c0_192] : memref<136x64xf32, #tpu.memory_space<vmem>>, vector<1x32xf32>
      %518 = vector.broadcast %517 : vector<1x32xf32> to vector<16x32xf32>
      %519 = arith.addf %516, %518 : vector<16x32xf32>
      %cst_193 = arith.constant 0.000000e+00 : f32
      %520 = vector.broadcast %cst_193 : f32 to vector<16x32xf32>
      %521 = arith.maximumf %519, %520 : vector<16x32xf32>
      %c101 = arith.constant 101 : index
      %c0_194 = arith.constant 0 : index
      %522 = vector.load %arg6[%c101, %c0_194] : memref<136x64xf32, #tpu.memory_space<vmem>>, vector<32x4xf32>
      %cst_195 = arith.constant dense<0.000000e+00> : vector<16x4xf32>
      %523 = tpu.matmul %521, %522, %cst_195 {dimension_numbers = #tpu.dot_dimension_numbers<[1], [0], [0], [1], [0, 0, 1, 1], [], []>} : vector<16x32xf32>, vector<32x4xf32>, vector<16x4xf32> -> vector<16x4xf32>
      %c133_196 = arith.constant 133 : index
      %c0_197 = arith.constant 0 : index
      %524 = vector.load %arg6[%c133_196, %c0_197] : memref<136x64xf32, #tpu.memory_space<vmem>>, vector<1x4xf32>
      %525 = vector.broadcast %524 : vector<1x4xf32> to vector<16x4xf32>
      %526 = arith.addf %523, %525 : vector<16x4xf32>
      %527 = arith.negf %526 : vector<16x4xf32>
      %528 = math.exp %527 : vector<16x4xf32>
      %cst_198 = arith.constant 1.000000e+00 : f32
      %529 = vector.broadcast %cst_198 : f32 to vector<16x4xf32>
      %530 = arith.addf %529, %528 : vector<16x4xf32>
      %531 = arith.divf %529, %530 : vector<16x4xf32>
      %c0_199 = arith.constant 0 : index
      %c0_200 = arith.constant 0 : index
      %532 = vector.load %arg8[%c0_199, %c0_200] : memref<16x4xf32, #tpu.memory_space<vmem>>, vector<16x4xf32>
      tpu.vector_store %arg8[%c0_199, %c0_200], %531 {strides = array<i32>} : memref<16x4xf32, #tpu.memory_space<vmem>>, vector<16x4xf32>,
    } else {
    }
    return
  }
  func.func @transform_0(%arg0: i32) -> (i32, i32) {
    %c0_i32 = arith.constant 0 : i32
    %c0_i32_0 = arith.constant 0 : i32
    %c0_i32_1 = arith.constant 0 : i32
    return %c0_i32, %c0_i32_0 : i32, i32
  }
  func.func @transform_1(%arg0: i32) -> (i32, i32) {
    %c0_i32 = arith.constant 0 : i32
    %c0_i32_0 = arith.constant 0 : i32
    %c0_i32_1 = arith.constant 0 : i32
    return %c0_i32, %c0_i32_0 : i32, i32
  }
  func.func @transform_2(%arg0: i32) -> (i32, i32) {
    %c0_i32 = arith.constant 0 : i32
    %c0_i32_0 = arith.constant 0 : i32
    %c0_i32_1 = arith.constant 0 : i32
    return %c0_i32, %c0_i32_0 : i32, i32
  }
  func.func @transform_3(%arg0: i32) -> (i32, i32) {
    %c0_i32 = arith.constant 0 : i32
    %c0_i32_0 = arith.constant 0 : i32
    %c0_i32_1 = arith.constant 0 : i32
    return %c0_i32, %c0_i32_0 : i32, i32
  }
  func.func @transform_4(%arg0: i32) -> (i32, i32, i32) {
    %c0_i32 = arith.constant 0 : i32
    %c0_i32_0 = arith.constant 0 : i32
    %c0_i32_1 = arith.constant 0 : i32
    return %arg0, %c0_i32, %c0_i32_0 : i32, i32, i32
  }
  func.func @transform_5(%arg0: i32) -> (i32, i32) {
    %c0_i32 = arith.constant 0 : i32
    %c0_i32_0 = arith.constant 0 : i32
    %c0_i32_1 = arith.constant 0 : i32
    return %c0_i32, %c0_i32_0 : i32, i32
  }
  func.func @transform_6(%arg0: i32) -> (i32, i32) {
    %c0_i32 = arith.constant 0 : i32
    %c0_i32_0 = arith.constant 0 : i32
    %c0_i32_1 = arith.constant 0 : i32
    return %c0_i32, %c0_i32_0 : i32, i32
  }
  func.func @transform_7(%arg0: i32) -> (i32, i32) {
    %c0_i32 = arith.constant 0 : i32
    %c0_i32_0 = arith.constant 0 : i32
    %c0_i32_1 = arith.constant 0 : i32
    return %c0_i32, %c0_i32_0 : i32, i32
  }
}

</mosaic_0001>

<bundles_post_ra>
// kernel: detr_forward.3
= control target key start
LH: loop header
LB: loop body
LE: loop exit
PB: predicated region body
PF: predicated region fallthrough
CT: control target
= control target key end

     0   :  { %13 = vsyncpa [#allocation4], 0  ;;  %s7994_s24 = smov 0   ;;  %s9168_s0 = inlined_call_operand.vmem [shape: f32[128,32], index: 0, kind: input, shape index: {}]   ;;  %s9169_s1 = inlined_call_operand.vmem [shape: f32[128,32], index: 1, kind: input, shape index: {}]   ;;  %s9170_s2 = inlined_call_operand.vmem [shape: f32[16,32], index: 2, kind: input, shape index: {}]   ;;  %s9171_s3 = inlined_call_operand.vmem [shape: f32[2,64], index: 3, kind: input, shape index: {}]   ;;  %s9172_s4 = inlined_call_operand.vmem [shape: f32[2,368,64], index: 4, kind: input, shape index: {}]   ;;  %s9173_s5 = inlined_call_operand.vmem [shape: f32[136,64], index: 5, kind: input, shape index: {}]   ;;  %s9174_s6 = inlined_call_operand.hbm [shape: f32[16,11], index: 6, kind: output, shape index: {0}]   ;;  %s9175_s7 = inlined_call_operand.vmem [shape: f32[16,4], index: 7, kind: output, shape index: {1}]  }
   0x1 LB: > { %s8000_s25 = sadd.s32 4294967295, %s7942_s24   ;;  %p6062_p0 = scmp.ge.s32.totalorder %s7942_s24, 1  ;;  %s7942_s24 = sphi %s7994_s24, %s19_s24  }
   0x2   : > { %p231_p1 = scmp.lt.s32.totalorder %s7942_s24, 3 }
   0x4   : > { %p232_p2 = pnand %p6062_p0, %p231_p1 }
   0x5   : > { %p258_p3 = scmp.lt.s32.totalorder (!%p232_p2), %s8000_s25, 1  ;;  %p6064_p4 = scmp.ne.s32.totalorder (!%p232_p2), %s8000_s25, 0 }
   0x6   : > { %235 = sbr.rel (%p232_p2) target bundleno = 12512 (0x30e0), region = 44 }
   0xd   : > { %s259_s26 = scalar_select %p258_p3, %s8000_s25, 1 }
   0xe   : > { %266 = sbr.rel (%p6064_p4) target bundleno = 21 (0x15), region = 48  ;;  %vm267_vm0 = vcmask (!%p6064_p4), 261120   ;;  %v7944_v0 = vmov (!%p6064_p4), 0.0  }
   0xf   : > { %s7552_s27 = smul.u32 368, %s259_s26  ;;  %268 = vst.msk [vmem:[#allocation2] sm:$0xff] (!%p6064_p4), %vm267_vm0, %v7944_v0  ;;  %269 = vst.msk [vmem:[#allocation2 + $0x8] sm:$0xff] (!%p6064_p4), %vm267_vm0, %v7944_v0 }
  0x11   : > { %s8009_s30 = scalar_lea.vmem %s9172_s4, %s7552_s27 }
  0x15 PF: > { %v314_v1 = vld [vmem:[%s8009_s30 + $0x20] sm:$0xff]  ;;  %v315_v2 = vld [vmem:[%s8009_s30 + $0x28] sm:$0xff]  ;;  %v316_v6 = vld [vmem:[%s8009_s30 + $0x30] sm:$0xff]  ;;  %vm333_vm1 = vcmask 261120   ;;  %v7945_v25 = vmov 0.0   ;;  %vm7946_vm2 = vmmov 0  }
  0x16   : > { %v309_v3 = vld [vmem:[%s8009_s30] sm:$0xff]  ;;  %v7232_v4 = vpack.c.bf16 %v315_v2, %v314_v1  ;;  %v310_v5 = vld [vmem:[%s8009_s30 + $0x8] sm:$0xff]  ;;  %v317_v7 = vld [vmem:[%s8009_s30 + $0x38] sm:$0xff]  ;;  %vm579_vm3 = vcmask 64512   ;;  %s7947_s12 = smov 120   ;;  %s7948_s13 = smov 112  }
  0x17   : > { %v7224_v8 = vpack.c.bf16 %v310_v5, %v309_v3  ;;  %v7236_v9 = vpack.c.bf16 %v317_v7, %v316_v6  ;;  %v311_v10 = vld [vmem:[%s8009_s30 + $0x10] sm:$0xff]  ;;  %v312_v11 = vld [vmem:[%s8009_s30 + $0x18] sm:$0xff]  ;;  %v8020_v12 = vld [vmem:[#allocation2] sm:$0xff]  ;;  %s7949_s14 = smov 104   ;;  %vm3147_vm5 = vcmask 523264   ;;  %p6245_p5 = scmp.ne.s32.totalorder %s8000_s25, 1 }
  0x18   : > { %7233 = vmatprep.subr.bf16.mxu1 %v7232_v4  ;;  %v7228_v13 = vpack.c.bf16 %v312_v11, %v311_v10  ;;  %v8025_v14 = vld [vmem:[%s9170_s2] sm:$0xff]  ;;  %v8027_v15 = vld [vmem:[#allocation2 + $0x8] sm:$0xff]  ;;  %v321_v22 = vld [vmem:[%s8009_s30 + $0x50] sm:$0xff]  ;;  %vm5719_vm6 = vcmask (!%p6245_p5), 89088   ;;  %vm6002_vm7 = vcmask (!%p6245_p5), 31744  }
  0x19   : > { %7235 = vmatpush3.bf16.msra.mxu1 %v7232_v4  ;;  %7225 = vmatprep.subr.bf16.mxu0 %v7224_v8  ;;  %v307_v16 = vadd.f32 %v8025_v14, %v8020_v12  ;;  %v8034_v17 = vld [vmem:[%s9170_s2 + $0x8] sm:$0xff]  ;;  %v319_v18 = vld [vmem:[%s8009_s30 + $0x40] sm:$0xff]  ;;  %v322_v23 = vld [vmem:[%s8009_s30 + $0x58] sm:$0xff] }
  0x1a   : > { %v320_v19 = vld [vmem:[%s8009_s30 + $0x48] sm:$0xff]  ;;  %7227 = vmatpush3.bf16.msra.mxu0 %v7224_v8  ;;  %7237 = vmatprep.subr.bf16.mxu1 %v7236_v9  ;;  %v308_v21 = vadd.f32 %v8034_v17, %v8027_v15  ;;  %v7244_v24 = vpack.c.bf16 %v322_v23, %v321_v22  ;;  %v6068_v26 = vld [vmem:[%s8009_s30 + $0x81] ss:$0 sm:$0xff]  ;;  %v6065_v27 = vld [vmem:[%s8009_s30 + $0x80] ss:$0 sm:$0xff] }
  0x1b   : > { %7229 = vmatprep.subr.bf16.mxu0 %v7228_v13  ;;  %6597 = vmatprep.mubr.msk.f32.mxu1 %vm333_vm1, %v307_v16  ;;  %v7240_v20 = vpack.c.bf16 %v320_v19, %v319_v18  ;;  %v6071_v36 = vld [vmem:[%s8009_s30 + $0x82] ss:$0 sm:$0xff]  ;;  %v8101_v62 = vld [vmem:[%s8009_s30 + $0x68] sm:$0xff]  ;;  %vm8364_vm4 = vmpackc.low %vm579_vm3, %vm579_vm3 }
  0x1c   : > { %6586 = vmatprep.mubr.msk.f32.mxu0 %vm333_vm1, %v307_v16  ;;  %v8107_v3 = vld [vmem:[%s8009_s30 + $0x60] sm:$0xff] }
  0x1d   : > { %7239 = vmatpush3.bf16.msra.mxu1 %v7236_v9 }
  0x1e   : > { %7231 = vmatpush3.bf16.msra.mxu0 %v7228_v13  ;;  %6616 = vmatprep.subr.mxu1 %v7945_v25 }
  0x1f   : > { %7241 = vmatprep.subr.bf16.mxu0 %v7240_v20 }
  0x20   : > { %6598 = vmatmul.mubr.msk.f32.vlgmr.msra.gmra.mrb[0].mxu1 %vm333_vm1, %v308_v21 }
  0x21   : > { %6587 = vmatmul.mubr.msk.f32.vlgmr.msra.gmra.mrb[0].mxu0 %vm333_vm1, %v308_v21  ;;  %6618 = vmatprep.mubr.msk.f32.mxu1 %vm7946_vm2, %v7945_v25 }
  0x22   : > { %7243 = vmatpush3.bf16.msra.mxu0 %v7240_v20  ;;  %6608 = vmatprep.mubr.msk.f32.mxu0 %vm333_vm1, %v8020_v12 }
  0x23   : > { %7245 = vmatprep.subr.bf16.mxu0 %v7244_v24 }
  0x26   : > { %7247 = vmatpush3.bf16.msra.mxu0 %v7244_v24 }
  0x27   : > { %6611 = vmatprep.subr.mxu0 %v7945_v25 }
  0x29   : > { %6609 = vmatmul.mubr.msk.f32.vlgmr.msra.gmra.mrb[2].mxu0 %vm333_vm1, %v8027_v15 }
  0x2a   : > { %6613 = vmatprep.mubr.msk.f32.mxu0 %vm7946_vm2, %v7945_v25 }
  0xf3   : > { %v6599_v28 = vpop.f32.mrb[0].mxu1 }
  0xf4   : > { %v8058_v29 = vadd.f32 %v6599_v28, %v6068_v26  ;;  %v485_v30 = vpop.f32.mrb[1].mxu1  ;;  %v6588_v31 = vpop.f32.mrb[0].mxu0 }
  0xf5   : > { %v486_v32 = vadd.f32 %v6068_v26, %v485_v30  ;;  %v8060_v33 = vadd.f32 %v6588_v31, %v6065_v27  ;;  %v406_v34 = vpop.f32.mrb[1].mxu0  ;;  %v8135_v30 = vld [vmem:[%s8009_s30 + $0x70] sm:$0xff] }
  0xf6   : > { %v8062_v35 = vadd.f32 %v6065_v27, %v406_v34 }
  0xf7   : > { %742 = vrot.lane.b32.xlu0 %v486_v32, %s7947_s12  ;;  %6612 = vmatpush3.xpose.msk.msra.mxu0 %vm579_vm3, %v486_v32 }
  0xf8   : > { %6621 = vmatprep.subr.mxu0 %v7945_v25 }
  0xfa   : > { %6614 = vmatmul.mubr.msk.f32.vlgmr.msra.gmra.mrb[4].mxu0 %vm579_vm3, %v8062_v35 }
  0xfb   : > { %740 = vrot.lane.b32.xlu0 %v8062_v35, %s7947_s12  ;;  %6623 = vmatprep.mubr.msk.f32.mxu0 %vm7946_vm2, %v7945_v25 }
  0xfc   : > { %v6610_v37 = vpop.f32.mrb[2].mxu0 }
  0xfd   : > { %v8074_v38 = vadd.f32 %v6610_v37, %v6071_v36  ;;  %v570_v39 = vpop.f32.mrb[3].mxu0 }
  0xfe   : > { %v8076_v40 = vadd.f32 %v6071_v36, %v570_v39 }
 0x100   : > { %6617 = vmatpush3.msra.mxu1 %v8076_v40 }
 0x101   : > { %6626 = vmatprep.subr.mxu1 %v7945_v25 }
 0x169   : > { %v743_v41 = vpop.permute.xlu0 %742 }
 0x16a   : > { %6622 = vmatpush3.xpose.msk.msra.mxu0 %vm579_vm3, %v743_v41 }
 0x16b   : > { %6631 = vmatprep.subr.mxu0 %v7945_v25 }
 0x16d   : > { %v741_v42 = vpop.permute.xlu0 %740 }
 0x16e   : > { %6624 = vmatmul.mubr.msk.f32.vlgmr.msra.gmra.mrb[6].mxu0 %vm579_vm3, %v741_v42 }
 0x16f   : > { %6633 = vmatprep.mubr.msk.f32.mxu0 %vm7946_vm2, %v7945_v25  ;;  %6632 = vmatpush3.msra.mxu0 %v8101_v62 }
 0x170   : > { %6641 = vmatprep.subr.mxu0 %v7945_v25 }
 0x1cd   : > { %v652_v43 = vpop.f32.mrb[4].mxu0 }
 0x1ce   : > { %v6615_v44 = vpop.f32.mrb[5].mxu0  ;;  %v656_v45 = vsel %vm579_vm3, %v652_v43, -inf }
 0x1cf   : > { %657 = vmax.xlane.f32.xlu1 %v656_v45 }
 0x241   : > { %v814_v46 = vpop.f32.mrb[6].mxu0 }
 0x242   : > { %v6625_v47 = vpop.f32.mrb[7].mxu0  ;;  %v818_v48 = vsel %vm579_vm3, %v814_v46, -inf }
 0x243   : > { %819 = vmax.xlane.f32.xlu1 %v818_v48 }
 0x25c   : > { %v658_v49 = vpop.xlane.xlu1 %657 }
 0x25d   : > { %v659_v50 = vsub.f32 %v652_v43, %v658_v49  ;;  %v8156_v49 = vld [vmem:[%s8009_s30 + $0x78] sm:$0xff] }
 0x25f   : > { %v660_v51 = vmul.f32 1.442695, %v659_v50 }
 0x261   : > { %7817 = vpow2.f32 %v660_v51 }
 0x26b   : > { %v7818_v52 = vpop.eup %7817 }
 0x26c   : > { %v662_v53 = vsel %vm579_vm3, %v7818_v52, 0.0 }
 0x26d   : > { %663 = vadd.xlane.f32.xlu0 %v662_v53 }
 0x283   : > { %1141 = vrot.lane.b32.xlu0 %v8076_v40, %s7948_s13 }
 0x287   : > { %1293 = vrot.lane.b32.xlu0 %v486_v32, %s7949_s14 }
 0x2d0   : > { %v820_v54 = vpop.xlane.xlu1 %819 }
 0x2d1   : > { %v821_v55 = vsub.f32 %v814_v46, %v820_v54 }
 0x2d3   : > { %v822_v56 = vmul.f32 1.442695, %v821_v55 }
 0x2d5   : > { %7819 = vpow2.f32 %v822_v56 }
 0x2df   : > { %v7820_v57 = vpop.eup %7819 }
 0x2e0   : > { %v824_v58 = vsel %vm579_vm3, %v7820_v57, 0.0 }
 0x2e1   : > { %825 = vadd.xlane.f32.xlu1 %v824_v58 }
 0x2f2   : > { %830 = vrot.lane.b32.xlu1 %v8076_v40, %s7947_s12 }
 0x2f6   : > { %1054 = vrot.lane.b32.xlu1 %v486_v32, %s7948_s13 }
 0x2fa   : > { %v664_v59 = vpop.xlane.xlu0 %663  ;;  %1052 = vrot.lane.b32.xlu1 %v8062_v35, %s7948_s13 }
 0x2fb   : > { %7821 = vrcp.f32 %v664_v59 }
 0x2fe   : > { %v1142_v5 = vpop.permute.xlu0 %1141 }
 0x302   : > { %v1294_v31 = vpop.permute.xlu0 %1293 }
 0x305   : > { %v7822_v60 = vpop.eup %7821 }
 0x306   : > { %v666_v61 = vmul.f32 %v7822_v60, %v7818_v52 }
 0x308   : > { %6619 = vmatmul.mubr.msk.f32.vlgmr.msra.gmra.mrb[2].mxu1 %vm579_vm3, %v666_v61 }
 0x309   : > { %6628 = vmatprep.mubr.msk.f32.mxu1 %vm7946_vm2, %v7945_v25 }
 0x36e   : > { %v826_v63 = vpop.xlane.xlu1 %825 }
 0x36f   : > { %7823 = vrcp.f32 %v826_v63 }
 0x372   : > { %v831_v0 = vpop.permute.xlu1 %830 }
 0x373   : > { %6627 = vmatpush3.msra.mxu1 %v831_v0 }
 0x374   : > { %6636 = vmatprep.subr.mxu1 %v7945_v25 }
 0x376   : > { %v1055_v7 = vpop.permute.xlu1 %1054 }
 0x379   : > { %v7824_v1 = vpop.eup %7823 }
 0x37a   : > { %v828_v2 = vmul.f32 %v7824_v1, %v7820_v57  ;;  %v1053_v10 = vpop.permute.xlu1 %1052 }
 0x37c   : > { %6629 = vmatmul.mubr.msk.f32.vlgmr.msra.gmra.mrb[4].mxu1 %vm579_vm3, %v828_v2 }
 0x37d   : > { %6637 = vmatpush3.msra.mxu1 %v8107_v3  ;;  %6638 = vmatprep.mubr.msk.f32.mxu1 %vm7946_vm2, %v7945_v25 }
 0x37e   : > { %6646 = vmatprep.subr.mxu1 %v7945_v25 }
 0x3db   : > { %v736_v4 = vpop.f32.mrb[2].mxu1 }
 0x3dc   : > { %v6620_v6 = vpop.f32.mrb[3].mxu1  ;;  %6639 = vmatmul.mubr.msk.f32.vlgmr.msra.gmra.mrb[6].mxu1 %vm579_vm3, %v736_v4 }
 0x3dd   : > { %6647 = vmatpush3.msra.mxu1 %v1142_v5  ;;  %6648 = vmatprep.mubr.msk.f32.mxu1 %vm7946_vm2, %v7945_v25 }
 0x3de   : > { %6656 = vmatprep.subr.mxu1 %v7945_v25 }
 0x44f   : > { %v902_v8 = vpop.f32.mrb[4].mxu1 }
 0x450   : > { %v6630_v9 = vpop.f32.mrb[5].mxu1  ;;  %6634 = vmatmul.mubr.msk.f32.vlgmr.msra.gmra.mrb[8].mxu0 %vm579_vm3, %v902_v8 }
 0x451   : > { %6642 = vmatpush3.xpose.msk.msra.mxu0 %vm579_vm3, %v1055_v7  ;;  %6643 = vmatprep.mubr.msk.f32.mxu0 %vm7946_vm2, %v7945_v25 }
 0x452   : > { %6651 = vmatprep.subr.mxu0 %v7945_v25 }
 0x454   : > { %6644 = vmatmul.mubr.msk.f32.vlgmr.msra.gmra.mrb[10].mxu0 %vm579_vm3, %v1053_v10 }
 0x455   : > { %6653 = vmatprep.mubr.msk.f32.mxu0 %vm7946_vm2, %v7945_v25  ;;  %6652 = vmatpush3.msra.mxu0 %v8135_v30 }
 0x456   : > { %6661 = vmatprep.subr.mxu0 %v7945_v25 }
 0x4af   : > { %v1048_v11 = vpop.f32.mrb[6].mxu1 }
 0x4b0   : > { %v6640_v13 = vpop.f32.mrb[7].mxu1 }
 0x523   : > { %v975_v16 = vpop.f32.mrb[8].mxu0 }
 0x524   : > { %v1049_v18 = vadd.f32 %v1048_v11, %v975_v16  ;;  %v6635_v19 = vpop.f32.mrb[9].mxu0 }
 0x527   : > { %v1126_v20 = vpop.f32.mrb[10].mxu0 }
 0x528   : > { %v6645_v21 = vpop.f32.mrb[11].mxu0  ;;  %v1130_v22 = vsel %vm579_vm3, %v1126_v20, -inf }
 0x529   : > { %1131 = vmax.xlane.f32.xlu1 %v1130_v22 }
 0x53a   : > { %1380 = vrot.lane.b32.xlu1 %v8076_v40, %s7949_s14 }
 0x53e   : > { %1692 = vrot.lane.b32.xlu1 %v8058_v29, %s7947_s12 }
 0x5b6   : > { %v1132_v23 = vpop.xlane.xlu1 %1131 }
 0x5b7   : > { %v1133_v24 = vsub.f32 %v1126_v20, %v1132_v23 }
 0x5b9   : > { %v1134_v26 = vmul.f32 1.442695, %v1133_v24 }
 0x5ba   : > { %v1381_v39 = vpop.permute.xlu1 %1380 }
 0x5bb   : > { %7825 = vpow2.f32 %v1134_v26 }
 0x5be   : > { %v1693_v53 = vpop.permute.xlu1 %1692 }
 0x5c5   : > { %v7826_v27 = vpop.eup %7825 }
 0x5c6   : > { %v1136_v28 = vsel %vm579_vm3, %v7826_v27, 0.0 }
 0x5c7   : > { %1137 = vadd.xlane.f32.xlu0 %v1136_v28 }
 0x5dd   : > { %1291 = vrot.lane.b32.xlu0 %v8062_v35, %s7949_s14 }
 0x654   : > { %v1138_v32 = vpop.xlane.xlu0 %1137 }
 0x655   : > { %7827 = vrcp.f32 %v1138_v32 }
 0x658   : > { %v1292_v35 = vpop.permute.xlu0 %1291 }
 0x65f   : > { %v7828_v34 = vpop.eup %7827 }
 0x660   : > { %v1140_v36 = vmul.f32 %v7828_v34, %v7826_v27 }
 0x662   : > { %6649 = vmatmul.mubr.msk.f32.vlgmr.msra.gmra.mrb[8].mxu1 %vm579_vm3, %v1140_v36 }
 0x663   : > { %6657 = vmatpush3.xpose.msk.msra.mxu1 %vm579_vm3, %v1294_v31  ;;  %6658 = vmatprep.mubr.msk.f32.mxu1 %vm7946_vm2, %v7945_v25 }
 0x664   : > { %6666 = vmatprep.subr.mxu1 %v7945_v25 }
 0x666   : > { %6659 = vmatmul.mubr.msk.f32.vlgmr.msra.gmra.mrb[10].mxu1 %vm579_vm3, %v1292_v35 }
 0x667   : > { %6668 = vmatprep.mubr.msk.f32.mxu1 %vm7946_vm2, %v7945_v25  ;;  %6667 = vmatpush3.msra.mxu1 %v8156_v49 }
 0x668   : > { %6676 = vmatprep.subr.mxu1 %v7945_v25 }
 0x735   : > { %v1213_v37 = vpop.f32.mrb[8].mxu1 }
 0x736   : > { %v6650_v40 = vpop.f32.mrb[9].mxu1  ;;  %6654 = vmatmul.mubr.msk.f32.vlgmr.msra.gmra.mrb[12].mxu0 %vm579_vm3, %v1213_v37 }
 0x737   : > { %6662 = vmatpush3.msra.mxu0 %v1381_v39  ;;  %6663 = vmatprep.mubr.msk.f32.mxu0 %vm7946_vm2, %v7945_v25 }
 0x738   : > { %6671 = vmatprep.subr.mxu0 %v7945_v25 }
 0x739   : > { %v1365_v41 = vpop.f32.mrb[10].mxu1 }
 0x73a   : > { %v6660_v42 = vpop.f32.mrb[11].mxu1  ;;  %v1369_v43 = vsel %vm579_vm3, %v1365_v41, -inf }
 0x73b   : > { %1370 = vmax.xlane.f32.xlu0 %v1369_v43 }
 0x7c8   : > { %v1371_v44 = vpop.xlane.xlu0 %1370 }
 0x7c9   : > { %v1372_v45 = vsub.f32 %v1365_v41, %v1371_v44 }
 0x7cb   : > { %v1373_v46 = vmul.f32 1.442695, %v1372_v45 }
 0x7cd   : > { %7829 = vpow2.f32 %v1373_v46 }
 0x7d7   : > { %v7830_v47 = vpop.eup %7829 }
 0x7d8   : > { %v1375_v48 = vsel %vm579_vm3, %v7830_v47, 0.0 }
 0x7d9   : > { %1376 = vadd.xlane.f32.xlu1 %v1375_v48 }
 0x7ea   : > { %1690 = vrot.lane.b32.xlu1 %v8060_v33, %s7947_s12 }
 0x809   : > { %v1286_v50 = vpop.f32.mrb[12].mxu0 }
 0x80a   : > { %v1290_v51 = vadd.f32 %v1286_v50, %v1049_v18  ;;  %v6655_v52 = vpop.f32.mrb[13].mxu0 }
 0x866   : > { %v1377_v54 = vpop.xlane.xlu1 %1376 }
 0x867   : > { %7831 = vrcp.f32 %v1377_v54 }
 0x86a   : > { %v1691_v57 = vpop.permute.xlu1 %1690 }
 0x871   : > { %v7832_v55 = vpop.eup %7831 }
 0x872   : > { %v1379_v56 = vmul.f32 %v7832_v55, %v7830_v47 }
 0x874   : > { %6664 = vmatmul.mubr.msk.f32.vlgmr.msra.gmra.mrb[14].mxu0 %vm579_vm3, %v1379_v56 }
 0x875   : > { %6672 = vmatpush3.xpose.msk.msra.mxu0 %vm579_vm3, %v8058_v29  ;;  %6673 = vmatprep.mubr.msk.f32.mxu0 %vm7946_vm2, %v7945_v25 }
 0x876   : > { %6681 = vmatprep.subr.mxu0 %v7945_v25 }
 0x878   : > { %6674 = vmatmul.mubr.msk.f32.vlgmr.msra.gmra.mrb[16].mxu0 %vm579_vm3, %v8060_v33 }
 0x879   : > { %6682 = vmatpush3.xpose.msk.msra.mxu0 %vm579_vm3, %v1693_v53  ;;  %6683 = vmatprep.mubr.msk.f32.mxu0 %vm7946_vm2, %v7945_v25 }
 0x87a   : > { %6691 = vmatprep.subr.mxu0 %v7945_v25 }
 0x87c   : > { %6684 = vmatmul.mubr.msk.f32.vlgmr.msra.gmra.mrb[18].mxu0 %vm579_vm3, %v1691_v57 }
 0x87d   : > { %6692 = vmatpush3.msra.mxu0 %v8101_v62  ;;  %6693 = vmatprep.mubr.msk.f32.mxu0 %vm7946_vm2, %v7945_v25 }
 0x87e   : > { %6701 = vmatprep.subr.mxu0 %v7945_v25 }
 0x947   : > { %v1452_v58 = vpop.f32.mrb[14].mxu0 }
 0x948   : > { %v6665_v59 = vpop.f32.mrb[15].mxu0  ;;  %6669 = vmatmul.mubr.msk.f32.vlgmr.msra.gmra.mrb[12].mxu1 %vm579_vm3, %v1452_v58 }
 0x949   : > { %6677 = vmatpush3.msra.mxu1 %v8074_v38  ;;  %6678 = vmatprep.mubr.msk.f32.mxu1 %vm7946_vm2, %v7945_v25 }
 0x94a   : > { %6686 = vmatprep.subr.mxu1 %v7945_v25 }
 0x94b   : > { %v1602_v60 = vpop.f32.mrb[16].mxu0 }
 0x94c   : > { %v6675_v61 = vpop.f32.mrb[17].mxu0  ;;  %v1606_v62 = vsel %vm579_vm3, %v1602_v60, -inf }
 0x94d   : > { %1607 = vmax.xlane.f32.xlu1 %v1606_v62  ;;  %v6106_v62 = vld [vmem:[%s8009_s30 + $0x83] ss:$0 sm:$0xff] }
 0x94f   : > { %v1764_v63 = vpop.f32.mrb[18].mxu0 }
 0x950   : > { %v6685_v0 = vpop.f32.mrb[19].mxu0  ;;  %v1768_v1 = vsel %vm579_vm3, %v1764_v63, -inf }
 0x951   : > { %1769 = vmax.xlane.f32.xlu0 %v1768_v1 }
 0x95e   : > { %2002 = vrot.lane.b32.xlu1 %v8060_v33, %s7948_s13 }
 0x9da   : > { %v1608_v2 = vpop.xlane.xlu1 %1607 }
 0x9db   : > { %v1609_v4 = vsub.f32 %v1602_v60, %v1608_v2 }
 0x9dd   : > { %v1610_v5 = vmul.f32 1.442695, %v1609_v4 }
 0x9de   : > { %v1770_v6 = vpop.xlane.xlu0 %1769 }
 0x9df   : > { %7833 = vpow2.f32 %v1610_v5  ;;  %v1771_v7 = vsub.f32 %v1764_v63, %v1770_v6 }
 0x9e1   : > { %v1772_v8 = vmul.f32 1.442695, %v1771_v7 }
 0x9e3   : > { %7835 = vpow2.f32 %v1772_v8 }
 0x9e9   : > { %v7834_v9 = vpop.eup %7833 }
 0x9ea   : > { %v1612_v10 = vsel %vm579_vm3, %v7834_v9, 0.0 }
 0x9eb   : > { %1613 = vadd.xlane.f32.xlu0 %v1612_v10 }
 0x9ed   : > { %v7836_v11 = vpop.eup %7835 }
 0x9ee   : > { %v1774_v13 = vsel %vm579_vm3, %v7836_v11, 0.0 }
 0x9ef   : > { %1775 = vadd.xlane.f32.xlu0 %v1774_v13 }
 0xa05   : > { %1780 = vrot.lane.b32.xlu0 %v8074_v38, %s7947_s12 }
 0xa09   : > { %2004 = vrot.lane.b32.xlu0 %v8058_v29, %s7948_s13 }
 0xa1b   : > { %v1525_v16 = vpop.f32.mrb[12].mxu1 }
 0xa1c   : > { %v8192_v18 = vadd.f32 %v1525_v16, %v1290_v51  ;;  %v6670_v19 = vpop.f32.mrb[13].mxu1 }
 0xa1e   : > { %v2484_v63 = vadd.f32 %v6106_v62, %v8192_v18 }
 0xa20   : > { %v2486_v2 = vadd.f32 %v2484_v63, %v8020_v12 }
 0xa22   : > { %v2490_v4 = vsel %vm333_vm1, %v2486_v2, 0.0 }
 0xa78   : > { %v1614_v20 = vpop.xlane.xlu0 %1613 }
 0xa79   : > { %7837 = vrcp.f32 %v1614_v20 }
 0xa7c   : > { %v1776_v21 = vpop.xlane.xlu0 %1775 }
 0xa7d   : > { %7839 = vrcp.f32 %v1776_v21 }
 0xa80   : > { %v1781_v24 = vpop.permute.xlu0 %1780 }
 0xa83   : > { %v7838_v22 = vpop.eup %7837 }
 0xa84   : > { %v1616_v23 = vmul.f32 %v7838_v22, %v7834_v9  ;;  %v2005_v34 = vpop.permute.xlu0 %2004  ;;  %v8248_v22 = vld [vmem:[%s8009_s30 + $0x84] ss:$0 sm:$0xff] }
 0xa86   : > { %6679 = vmatmul.mubr.msk.f32.vlgmr.msra.gmra.mrb[14].mxu1 %vm579_vm3, %v1616_v23 }
 0xa87   : > { %v7840_v26 = vpop.eup %7839  ;;  %6687 = vmatpush3.msra.mxu1 %v1781_v24  ;;  %6688 = vmatprep.mubr.msk.f32.mxu1 %vm7946_vm2, %v7945_v25  ;;  %v8251_v24 = vld [vmem:[%s8009_s30 + $0x85] ss:$0 sm:$0xff] }
 0xa88   : > { %v1778_v27 = vmul.f32 %v7840_v26, %v7836_v11  ;;  %6696 = vmatprep.subr.mxu1 %v7945_v25 }
 0xa8a   : > { %6689 = vmatmul.mubr.msk.f32.vlgmr.msra.gmra.mrb[16].mxu1 %vm579_vm3, %v1778_v27 }
 0xa8b   : > { %6697 = vmatpush3.msra.mxu1 %v8107_v3  ;;  %6698 = vmatprep.mubr.msk.f32.mxu1 %vm7946_vm2, %v7945_v25  ;;  %v2003_v3 = vpop.permute.xlu1 %2002 }
 0xa8c   : > { %6706 = vmatprep.subr.mxu1 %v7945_v25 }
 0xb59   : > { %v1686_v28 = vpop.f32.mrb[14].mxu1 }
 0xb5a   : > { %v6680_v31 = vpop.f32.mrb[15].mxu1  ;;  %6699 = vmatmul.mubr.msk.f32.vlgmr.msra.gmra.mrb[18].mxu1 %vm579_vm3, %v1686_v28 }
 0xb5b   : > { %6708 = vmatprep.mubr.msk.f32.mxu1 %vm7946_vm2, %v7945_v25 }
 0xb5d   : > { %v1852_v32 = vpop.f32.mrb[16].mxu1 }
 0xb5e   : > { %v6690_v36 = vpop.f32.mrb[17].mxu1  ;;  %6694 = vmatmul.mubr.msk.f32.vlgmr.msra.gmra.mrb[20].mxu0 %vm579_vm3, %v1852_v32 }
 0xb5f   : > { %6702 = vmatpush3.xpose.msk.msra.mxu0 %vm579_vm3, %v2005_v34  ;;  %6703 = vmatprep.mubr.msk.f32.mxu0 %vm7946_vm2, %v7945_v25 }
 0xb60   : > { %6711 = vmatprep.subr.mxu0 %v7945_v25 }
 0xb62   : > { %6704 = vmatmul.mubr.msk.f32.vlgmr.msra.gmra.mrb[22].mxu0 %vm579_vm3, %v2003_v3 }
 0xb63   : > { %6712 = vmatpush3.msra.mxu0 %v8135_v30  ;;  %6713 = vmatprep.mubr.msk.f32.mxu0 %vm7946_vm2, %v7945_v25 }
 0xb64   : > { %6721 = vmatprep.subr.mxu0 %v7945_v25 }
 0xc2d   : > { %v1998_v35 = vpop.f32.mrb[18].mxu1 }
 0xc2e   : > { %v6700_v37 = vpop.f32.mrb[19].mxu1 }
 0xc31   : > { %v1925_v39 = vpop.f32.mrb[20].mxu0 }
 0xc32   : > { %v1999_v40 = vadd.f32 %v1998_v35, %v1925_v39  ;;  %v6695_v41 = vpop.f32.mrb[21].mxu0 }
 0xc33   : > { %v2553_v41 = vld [vmem:[%s8009_s30 + $0xae] sm:$0xff] }
 0xc35   : > { %v2076_v42 = vpop.f32.mrb[22].mxu0 }
 0xc36   : > { %v6705_v43 = vpop.f32.mrb[23].mxu0  ;;  %v2080_v44 = vsel %vm579_vm3, %v2076_v42, -inf }
 0xc37   : > { %2081 = vmax.xlane.f32.xlu0 %v2080_v44  ;;  %v2555_v43 = vld [vmem:[%s8009_s30 + $0xbe] sm:$0xff] }
 0xc38   : > { %v8270_v44 = vld [vmem:[%s9168_s0] sm:$0xff] }
 0xc4d   : > { %2091 = vrot.lane.b32.xlu0 %v8074_v38, %s7948_s13 }
 0xc51   : > { %2241 = vrot.lane.b32.xlu0 %v8060_v33, %s7949_s14 }
 0xcc4   : > { %v2082_v30 = vpop.xlane.xlu0 %2081 }
 0xcc5   : > { %v2083_v45 = vsub.f32 %v2076_v42, %v2082_v30  ;;  %v2554_v42 = vld [vmem:[%s8009_s30 + $0xb6] sm:$0xff]  ;;  %v288_v30 = vld [vmem:[%s9169_s1] sm:$0xff] }
 0xcc7   : > { %v2084_v46 = vmul.f32 1.442695, %v2083_v45  ;;  %v7260_v45 = vpack.c.bf16 %v2555_v43, %v2554_v42  ;;  %v8404_v42 = vld [vmem:[%s9168_s0 + $0x50] sm:$0xff] }
 0xcc8   : > { %v2092_v47 = vpop.permute.xlu0 %2091 }
 0xcc9   : > { %7841 = vpow2.f32 %v2084_v46  ;;  %6707 = vmatpush3.msra.mxu1 %v2092_v47  ;;  %v8280_v46 = vld [vmem:[%s9168_s0 + $0x8] sm:$0xff] }
 0xcca   : > { %6716 = vmatprep.subr.mxu1 %v7945_v25  ;;  %v289_v47 = vld [vmem:[%s9169_s1 + $0x8] sm:$0xff] }
 0xccc   : > { %v2242_v54 = vpop.permute.xlu0 %2241 }
 0xcd3   : > { %v7842_v48 = vpop.eup %7841 }
 0xcd4   : > { %v2086_v50 = vsel %vm579_vm3, %v7842_v48, 0.0 }
 0xcd5   : > { %2087 = vadd.xlane.f32.xlu1 %v2086_v50  ;;  %v290_v50 = vld [vmem:[%s9169_s1 + $0x10] sm:$0xff] }
 0xce6   : > { %2243 = vrot.lane.b32.xlu1 %v8058_v29, %s7949_s14 }
 0xd62   : > { %v2088_v51 = vpop.xlane.xlu1 %2087 }
 0xd63   : > { %7843 = vrcp.f32 %v2088_v51  ;;  %v2532_v51 = vadd.f32 %v289_v47, %v8280_v46  ;;  %v8422_v47 = vld [vmem:[%s9168_s0 + $0x60] sm:$0xff] }
 0xd66   : > { %v2244_v33 = vpop.permute.xlu1 %2243 }
 0xd6d   : > { %v7844_v52 = vpop.eup %7843 }
 0xd6e   : > { %v2090_v53 = vmul.f32 %v7844_v52, %v7842_v48  ;;  %v8288_v48 = vld [vmem:[%s9168_s0 + $0x10] sm:$0xff] }
 0xd6f   : > { %v2533_v52 = vadd.f32 %v290_v50, %v8288_v48  ;;  %v300_v50 = vld [vmem:[%s9169_s1 + $0x60] sm:$0xff] }
 0xd70   : > { %6709 = vmatmul.mubr.msk.f32.vlgmr.msra.gmra.mrb[20].mxu1 %vm579_vm3, %v2090_v53  ;;  %v8298_v53 = vld [vmem:[%s9168_s0 + $0x18] sm:$0xff] }
 0xd71   : > { %6717 = vmatpush3.xpose.msk.msra.mxu1 %vm579_vm3, %v2244_v33  ;;  %6718 = vmatprep.mubr.msk.f32.mxu1 %vm7946_vm2, %v7945_v25  ;;  %v291_v33 = vld [vmem:[%s9169_s1 + $0x18] sm:$0xff] }
 0xd72   : > { %6726 = vmatprep.subr.mxu1 %v7945_v25 }
 0xd74   : > { %6719 = vmatmul.mubr.msk.f32.vlgmr.msra.gmra.mrb[22].mxu1 %vm579_vm3, %v2242_v54  ;;  %v2534_v54 = vadd.f32 %v291_v33, %v8298_v53  ;;  %v8435_v33 = vld [vmem:[%s9168_s0 + $0x68] sm:$0xff] }
 0xd75   : > { %6727 = vmatpush3.msra.mxu1 %v8156_v49  ;;  %6728 = vmatprep.mubr.msk.f32.mxu1 %vm7946_vm2, %v7945_v25 }
 0xe43   : > { %v2163_v29 = vpop.f32.mrb[20].mxu1 }
 0xe44   : > { %v6710_v55 = vpop.f32.mrb[21].mxu1  ;;  %6714 = vmatmul.mubr.msk.f32.vlgmr.msra.gmra.mrb[24].mxu0 %vm579_vm3, %v2163_v29 }
 0xe45   : > { %6723 = vmatprep.mubr.msk.f32.mxu0 %vm7946_vm2, %v7945_v25 }
 0xe47   : > { %v2315_v56 = vpop.f32.mrb[22].mxu1 }
 0xe48   : > { %v6720_v57 = vpop.f32.mrb[23].mxu1  ;;  %v2319_v58 = vsel %vm579_vm3, %v2315_v56, -inf }
 0xe49   : > { %2320 = vmax.xlane.f32.xlu0 %v2319_v58 }
 0xe5f   : > { %2330 = vrot.lane.b32.xlu0 %v8074_v38, %s7949_s14 }
 0xed6   : > { %v2321_v49 = vpop.xlane.xlu0 %2320 }
 0xed7   : > { %v2322_v59 = vsub.f32 %v2315_v56, %v2321_v49  ;;  %v8315_v49 = vld [vmem:[%s9168_s0 + $0x20] sm:$0xff] }
 0xed9   : > { %v2323_v60 = vmul.f32 1.442695, %v2322_v59  ;;  %v292_v59 = vld [vmem:[%s9169_s1 + $0x20] sm:$0xff] }
 0xeda   : > { %v2331_v61 = vpop.permute.xlu0 %2330 }
 0xedb   : > { %7845 = vpow2.f32 %v2323_v60  ;;  %6722 = vmatpush3.msra.mxu0 %v2331_v61  ;;  %v2535_v60 = vadd.f32 %v292_v59, %v8315_v49  ;;  %v8324_v61 = vld [vmem:[%s9168_s0 + $0x28] sm:$0xff] }
 0xee5   : > { %v7846_v0 = vpop.eup %7845 }
 0xee6   : > { %v2325_v1 = vsel %vm579_vm3, %v7846_v0, 0.0 }
 0xee7   : > { %2326 = vadd.xlane.f32.xlu1 %v2325_v1  ;;  %v294_v1 = vld [vmem:[%s9169_s1 + $0x30] sm:$0xff] }
 0xeeb   : > { %2491 = vadd.xlane.f32.xlu1 %v2490_v4  ;;  %v8344_v4 = vld [vmem:[%s9168_s0 + $0x38] sm:$0xff] }
 0xf17   : > { %v2236_v5 = vpop.f32.mrb[24].mxu0 }
 0xf18   : > { %v2240_v38 = vadd.f32 %v2236_v5, %v1999_v40  ;;  %v6715_v6 = vpop.f32.mrb[25].mxu0  ;;  %v2552_v40 = vld [vmem:[%s8009_s30 + $0xa6] sm:$0xff]  ;;  %v295_v5 = vld [vmem:[%s9169_s1 + $0x38] sm:$0xff] }
 0xf19   : > { %v2547_v6 = vld [vmem:[%s8009_s30 + $0x86] sm:$0xff] }
 0xf74   : > { %v2327_v7 = vpop.xlane.xlu1 %2326 }
 0xf75   : > { %7847 = vrcp.f32 %v2327_v7  ;;  %v2548_v7 = vld [vmem:[%s8009_s30 + $0x8e] sm:$0xff] }
 0xf78   : > { %v2492_v8 = vpop.xlane.xlu1 %2491 }
 0xf79   : > { %v2497_v9 = vmul.f32 0.03125, %v2492_v8  ;;  %v7248_v8 = vpack.c.bf16 %v2548_v7, %v2547_v6 }
 0xf7b   : > { %v2499_v10 = vsub.f32 %v2486_v2, %v2497_v9  ;;  %7249 = vmatprep.subr.bf16.mxu0 %v7248_v8  ;;  %v2549_v9 = vld [vmem:[%s8009_s30 + $0x96] sm:$0xff] }
 0xf7d   : > { %v2501_v11 = vmul.f32 %v2499_v10, %v2499_v10 }
 0xf7f   : > { %v7848_v13 = vpop.eup %7847  ;;  %v2503_v16 = vsel %vm333_vm1, %v2501_v11, 0.0 }
 0xf80   : > { %v2329_v18 = vmul.f32 %v7848_v13, %v7846_v0  ;;  %2504 = vadd.xlane.f32.xlu0 %v2503_v16  ;;  %v8335_v0 = vld [vmem:[%s9168_s0 + $0x30] sm:$0xff]  ;;  %v7950_v13 = vmov 0.0|0.0   ;;  %v8358_v16 = vld [vmem:[%s8009_s30 + $0x107] ss:$0 sm:$0xff] }
 0xf81   : > { %v2537_v2 = vadd.f32 %v294_v1, %v8335_v0 }
 0xf82   : > { %6724 = vmatmul.mubr.msk.f32.vlgmr.msra.gmra.mrb[26].mxu0 %vm579_vm3, %v2329_v18 }
 0xf83   : > { %7251 = vmatpush3.bf16.msra.mxu0 %v7248_v8 }
0x100d   : > { %v2505_v12 = vpop.xlane.xlu0 %2504 }
0x100e   : > { %v2509_v19 = vmul.f32 0.03125, %v2505_v12 }
0x1010   : > { %v2511_v20 = vadd.f32 1e-05, %v2509_v19 }
0x1012   : > { %7849 = vrsqrt.f32 %v2511_v20 }
0x101c   : > { %v7850_v21 = vpop.eup %7849 }
0x101d   : > { %v2515_v23 = vmul.f32 %v7850_v21, %v2499_v10  ;;  %v2550_v10 = vld [vmem:[%s8009_s30 + $0x9e] sm:$0xff]  ;;  %v9001_v21 = vld [vmem:[%s8009_s30 + $0x109] ss:$0 sm:$0xff] }
0x101e   : > { %v7252_v11 = vpack.c.bf16 %v2550_v10, %v2549_v9 }
0x101f   : > { %v2521_v26 = vmul.f32 %v8248_v22, %v2515_v23 }
0x1020   : > { %7253 = vmatprep.subr.bf16.mxu0 %v7252_v11 }
0x1021   : > { %v8255_v27 = vadd.f32 %v8251_v24, %v2521_v26  ;;  %7255 = vmatpush3.bf16.msra.mxu0 %v7252_v11 }
0x1023   : > { %v2529_v28 = vadd.f32 %v8255_v27, %v8025_v14  ;;  %v7256_v14 = vpack.c.bf16 %v2553_v41, %v2552_v40  ;;  %v297_v41 = vld [vmem:[%s9169_s1 + $0x48] sm:$0xff] }
0x1025   : > { %6739 = vmatprep.mubr.msk.f32.mxu0 %vm333_vm1, %v2529_v28  ;;  %7257 = vmatprep.subr.bf16.mxu1 %v7256_v14 }
0x1055   : > { %v2402_v31 = vpop.f32.mrb[26].mxu0 }
0x1056   : > { %v6725_v32 = vpop.f32.mrb[27].mxu0  ;;  %6729 = vmatmul.mubr.msk.f32.vlgmr.msra.gmra.mrb[24].mxu1 %vm579_vm3, %v2402_v31 }
0x1057   : > { %7259 = vmatpush3.bf16.msra.mxu1 %v7256_v14  ;;  %v298_v14 = vld [vmem:[%s9169_s1 + $0x50] sm:$0xff] }
0x1058   : > { %7261 = vmatprep.subr.bf16.mxu1 %v7260_v45 }
0x105b   : > { %7263 = vmatpush3.bf16.msra.mxu1 %v7260_v45  ;;  %v8414_v45 = vld [vmem:[%s9168_s0 + $0x58] sm:$0xff] }
0x105c   : > { %7272 = vmatprep.subr.bf16.mxu1 %v7950_v13 }
0x1129   : > { %v2475_v34 = vpop.f32.mrb[24].mxu1 }
0x112a   : > { %v2479_v36 = vadd.f32 %v2475_v34, %v2240_v38  ;;  %v6730_v3 = vpop.f32.mrb[25].mxu1  ;;  %v2538_v38 = vadd.f32 %v295_v5, %v8344_v4 }
0x112c   : > { %v2485_v35 = vadd.f32 %v6106_v62, %v2479_v36  ;;  %v293_v62 = vld [vmem:[%s9169_s1 + $0x28] sm:$0xff] }
0x112d   : > { %v2536_v63 = vadd.f32 %v293_v62, %v8324_v61 }
0x112e   : > { %v2487_v37 = vadd.f32 %v2485_v35, %v8027_v15  ;;  %v2531_v15 = vadd.f32 %v288_v30, %v8270_v44  ;;  %v8387_v35 = vld [vmem:[%s9168_s0 + $0x40] sm:$0xff]  ;;  %v2541_v30 = vadd.f32 %v298_v14, %v8404_v42 }
0x1130   : > { %v2493_v39 = vsel %vm333_vm1, %v2487_v37, 0.0  ;;  %6750 = vmatprep.mubr.msk.f32.mxu1 %vm333_vm1, %v2531_v15  ;;  %v299_v15 = vld [vmem:[%s9169_s1 + $0x58] sm:$0xff] }
0x1131   : > { %2494 = vadd.xlane.f32.xlu1 %v2493_v39  ;;  %6751 = vmatmul.mubr.msk.f32.vlgmr.msra.gmra.mrb[26].mxu1 %vm333_vm1, %v2532_v51  ;;  %v8395_v39 = vld [vmem:[%s9168_s0 + $0x48] sm:$0xff]  ;;  %v2542_v51 = vadd.f32 %v299_v15, %v8414_v45 }
0x1132   : > { %6753 = vmatprep.mubr.msk.f32.mxu1 %vm333_vm1, %v2533_v52  ;;  %v2540_v43 = vadd.f32 %v297_v41, %v8395_v39  ;;  %v2543_v52 = vadd.f32 %v300_v50, %v8422_v47 }
0x1135   : > { %6754 = vmatmul.mubr.msk.f32.gmra.mrb[28].mxu1 %vm333_vm1, %v2534_v54  ;;  %v301_v54 = vld [vmem:[%s9169_s1 + $0x68] sm:$0xff] }
0x1136   : > { %6756 = vmatprep.mubr.msk.f32.mxu1 %vm333_vm1, %v2535_v60 }
0x1139   : > { %6757 = vmatmul.mubr.msk.f32.gmra.mrb[30].mxu1 %vm333_vm1, %v2536_v63 }
0x113a   : > { %6759 = vmatprep.mubr.msk.f32.mxu1 %vm333_vm1, %v2537_v2 }
0x113d   : > { %6760 = vmatmul.mubr.msk.f32.gmra.mrb[32].mxu1 %vm333_vm1, %v2538_v38 }
0x11be   : > { %v2495_v29 = vpop.xlane.xlu1 %2494 }
0x11bf   : > { %v2498_v55 = vmul.f32 0.03125, %v2495_v29  ;;  %v8443_v29 = vld [vmem:[%s9168_s0 + $0x70] sm:$0xff] }
0x11c1   : > { %v8307_v56 = vsub.f32 %v2487_v37, %v2498_v55  ;;  %v296_v37 = vld [vmem:[%s9169_s1 + $0x40] sm:$0xff]  ;;  %v302_v55 = vld [vmem:[%s9169_s1 + $0x70] sm:$0xff] }
0x11c2   : > { %v2539_v40 = vadd.f32 %v296_v37, %v8387_v35 }
0x11c3   : > { %v2502_v57 = vmul.f32 %v8307_v56, %v8307_v56 }
0x11c4   : > { %6762 = vmatprep.mubr.msk.f32.mxu1 %vm333_vm1, %v2539_v40 }
0x11c5   : > { %v2506_v58 = vsel %vm333_vm1, %v2502_v57, 0.0  ;;  %6763 = vmatmul.mubr.msk.f32.gmra.mrb[34].mxu1 %vm333_vm1, %v2540_v43  ;;  %v2544_v57 = vadd.f32 %v301_v54, %v8435_v33 }
0x11c6   : > { %2507 = vadd.xlane.f32.xlu1 %v2506_v58  ;;  %6765 = vmatprep.mubr.msk.f32.mxu1 %vm333_vm1, %v2541_v30  ;;  %v2545_v58 = vadd.f32 %v302_v55, %v8443_v29 }
0x11c9   : > { %6766 = vmatmul.mubr.msk.f32.gmra.mrb[36].mxu1 %vm333_vm1, %v2542_v51 }
0x11ca   : > { %6768 = vmatprep.mubr.msk.f32.mxu1 %vm333_vm1, %v2543_v52 }
0x11cd   : > { %6769 = vmatmul.mubr.msk.f32.gmra.mrb[38].mxu1 %vm333_vm1, %v2544_v57 }
0x11ce   : > { %6771 = vmatprep.mubr.msk.f32.mxu1 %vm333_vm1, %v2545_v58 }
0x1204   : > { %v6752_v18 = vpop.f32.mrb[26].mxu1 }
0x1205   : > { %v2776_v12 = vadd.f32 %v6752_v18, %v8358_v16  ;;  %v2770_v19 = vpop.f32.mrb[27].mxu1 }
0x1206   : > { %v2771_v20 = vadd.f32 %v8358_v16, %v2770_v19  ;;  %v303_v19 = vld [vmem:[%s9169_s1 + $0x78] sm:$0xff] }
0x1208   : > { %v7273_v23 = vpack.c.bf16 %v2776_v12, %v2771_v20  ;;  %v8368_v26 = vpack.i.bf16 %v2776_v12, %v2771_v20  ;;  %v6755_v28 = vpop.f32.mrb[28].mxu1  ;;  %v287_v12 = vld [vmem:[%s9168_s0 + $0x78] sm:$0xff] }
0x1209   : > { %v2786_v31 = vadd.f32 %v6755_v28, %v8358_v16  ;;  %v2780_v32 = vpop.f32.mrb[29].mxu1  ;;  %v2546_v20 = vadd.f32 %v303_v19, %v287_v12  ;;  %v2558_v28 = vld [vmem:[%s8009_s30 + $0xce] sm:$0xff] }
0x120a   : > { %7578 = vrot.lane.b32.xlu1 %v8368_v26, %s7947_s12  ;;  %7275 = vmatpush3.bf16.xpose.msk.msra.mxu1 %vm8364_vm4, %v7273_v23  ;;  %v2781_v34 = vadd.f32 %v8358_v16, %v2780_v32  ;;  %v2557_v23 = vld [vmem:[%s8009_s30 + $0xc6] sm:$0xff]  ;;  %v2559_v32 = vld [vmem:[%s8009_s30 + $0xd6] sm:$0xff] }
0x120b   : > { %7276 = vmatprep.subr.bf16.mxu1 %v7950_v13  ;;  %6772 = vmatmul.mubr.msk.f32.gmra.mrb[40].mxu1 %vm333_vm1, %v2546_v20 }
0x120c   : > { %v8377_v36 = vpack.i.bf16 %v2786_v31, %v2781_v34  ;;  %v7277_v3 = vpack.c.bf16 %v2786_v31, %v2781_v34  ;;  %v6758_v6 = vpop.f32.mrb[30].mxu1  ;;  %6822 = vmatprep.mubr.msk.f32.mxu1 %vm7946_vm2, %v7945_v25  ;;  %v7264_v31 = vpack.c.bf16 %v2558_v28, %v2557_v23  ;;  %v2560_v34 = vld [vmem:[%s8009_s30 + $0xde] sm:$0xff] }
0x120d   : > { %v2796_v7 = vadd.f32 %v6758_v6, %v8358_v16  ;;  %v2790_v8 = vpop.f32.mrb[31].mxu1 }
0x120e   : > { %7583 = vrot.lane.b32.xlu1 %v8377_v36, %s7947_s12  ;;  %v2791_v9 = vadd.f32 %v8358_v16, %v2790_v8  ;;  %7265 = vmatprep.subr.bf16.mxu0 %v7264_v31 }
0x1210   : > { %v8466_v10 = vpack.i.bf16 %v2796_v7, %v2791_v9 }
0x1212   : > { %7279 = vmatpush3.bf16.xpose.msk.msra.mxu1 %vm8364_vm4, %v7277_v3  ;;  %7588 = vrot.lane.b32.xlu1 %v8466_v10, %s7947_s12  ;;  %v7268_v3 = vpack.c.bf16 %v2560_v34, %v2559_v32 }
0x1213   : > { %7280 = vmatprep.subr.bf16.mxu1 %v7950_v13 }
0x1253   : > { %v2508_v59 = vpop.xlane.xlu1 %2507 }
0x1254   : > { %v2510_v60 = vmul.f32 0.03125, %v2508_v59 }
0x1256   : > { %v2512_v62 = vadd.f32 1e-05, %v2510_v60 }
0x1258   : > { %7851 = vrsqrt.f32 %v2512_v62  ;;  %v3046_v62 = vlaneseq }
0x1262   : > { %v7852_v63 = vpop.eup %7851 }
0x1263   : > { %v2516_v1 = vmul.f32 %v7852_v63, %v8307_v56  ;;  %v7281_v56 = vpack.c.bf16 %v2796_v7, %v2791_v9 }
0x1265   : > { %v2522_v2 = vmul.f32 %v8248_v22, %v2516_v1  ;;  %7283 = vmatpush3.bf16.xpose.msk.msra.mxu1 %vm8364_vm4, %v7281_v56  ;;  %v8569_v1 = vshrl.u32 %v3046_v62, 7  ;;  %v8575_v56 = vld [vmem:[%s9171_s3] sm:$0x3] }
0x1266   : > { %7284 = vmatprep.subr.bf16.mxu1 %v7950_v13 }
0x1267   : > { %v8457_v5 = vadd.f32 %v8251_v24, %v2522_v2  ;;  %v3048_v8 = vsub.s32 0, %v8569_v1 }
0x1269   : > { %v2530_v38 = vadd.f32 %v8457_v5, %v8034_v17  ;;  %v6761_v17 = vpop.f32.mrb[32].mxu1 }
0x126a   : > { %v2806_v22 = vadd.f32 %v6761_v17, %v8358_v16  ;;  %v2800_v24 = vpop.f32.mrb[33].mxu1  ;;  %v8578_v17 = vrot.slane %v8575_v56, %v3048_v8 }
0x126b   : > { %6740 = vmatmul.mubr.msk.f32.vlgmr.msra.gmra.mrb[28].mxu0 %vm333_vm1, %v2530_v38 }
0x126c   : > { %6782 = vmatprep.mubr.msk.f32.mxu0 %vm333_vm1, %v8270_v44  ;;  %v2801_v44 = vadd.f32 %v8358_v16, %v2800_v24  ;;  %7267 = vmatpush3.bf16.msra.mxu0 %v7264_v31 }
0x126d   : > { %7269 = vmatprep.subr.bf16.mxu0 %v7268_v3 }
0x126e   : > { %v7285_v11 = vpack.c.bf16 %v2806_v22, %v2801_v44  ;;  %v8475_v18 = vpack.i.bf16 %v2806_v22, %v2801_v44 }
0x1270   : > { %7593 = vrot.lane.b32.xlu1 %v8475_v18, %s7947_s12  ;;  %7287 = vmatpush3.bf16.xpose.msk.msra.mxu1 %vm8364_vm4, %v7285_v11 }
0x1271   : > { %7300 = vmatprep.subr.bf16.mxu1 %v7950_v13  ;;  %7271 = vmatpush3.bf16.msra.mxu0 %v7268_v3 }
0x1272   : > { %7288 = vmatprep.subr.bf16.mxu0 %v7950_v13 }
0x1274   : > { %6783 = vmatmul.mubr.msk.f32.vlgmr.msra.gmra.mrb[30].mxu0 %vm333_vm1, %v8280_v46 }
0x1275   : > { %6785 = vmatprep.mubr.msk.f32.mxu0 %vm333_vm1, %v8288_v48 }
0x1278   : > { %6786 = vmatmul.mubr.msk.f32.gmra.mrb[32].mxu0 %vm333_vm1, %v8298_v53 }
0x1279   : > { %6788 = vmatprep.mubr.msk.f32.mxu0 %vm333_vm1, %v8315_v49 }
0x127c   : > { %6789 = vmatmul.mubr.msk.f32.gmra.mrb[34].mxu0 %vm333_vm1, %v8324_v61  ;;  %v7579_v49 = vpop.permute.xlu1 %7578 }
0x127d   : > { %6791 = vmatprep.mubr.msk.f32.mxu0 %vm333_vm1, %v8335_v0  ;;  %v7580_v37 = vunpack.i.l.bf16 %v7579_v49 }
0x1280   : > { %6792 = vmatmul.mubr.msk.f32.gmra.mrb[36].mxu0 %vm333_vm1, %v8344_v4  ;;  %v7584_v30 = vpop.permute.xlu1 %7583 }
0x1281   : > { %6794 = vmatprep.mubr.msk.f32.mxu0 %vm333_vm1, %v8387_v35  ;;  %v7581_v35 = vunpack.i.h.bf16 %v7579_v49  ;;  %v7585_v15 = vunpack.i.l.bf16 %v7584_v30 }
0x1283   : > { %v7301_v14 = vpack.c.bf16 %v7581_v35, %v7580_v37 }
0x1284   : > { %6795 = vmatmul.mubr.msk.f32.gmra.mrb[38].mxu0 %vm333_vm1, %v8395_v39  ;;  %v6109_v39 = vld [vmem:[%s8009_s30 + $0x106] ss:$0 sm:$0xff]  ;;  %v7589_v50 = vpop.permute.xlu1 %7588 }
0x1285   : > { %6797 = vmatprep.mubr.msk.f32.mxu0 %vm333_vm1, %v8404_v42  ;;  %v7591_v51 = vunpack.i.h.bf16 %v7589_v50  ;;  %v7590_v52 = vunpack.i.l.bf16 %v7589_v50 }
0x1288   : > { %6798 = vmatmul.mubr.msk.f32.gmra.mrb[40].mxu0 %vm333_vm1, %v8414_v45  ;;  %v7586_v45 = vunpack.i.h.bf16 %v7584_v30 }
0x1289   : > { %6800 = vmatprep.mubr.msk.f32.mxu0 %vm333_vm1, %v8422_v47 }
0x128a   : > { %v7305_v47 = vpack.c.bf16 %v7586_v45, %v7585_v15 }
0x128c   : > { %6801 = vmatmul.mubr.msk.f32.gmra.mrb[42].mxu0 %vm333_vm1, %v8435_v33  ;;  %v7309_v33 = vpack.c.bf16 %v7591_v51, %v7590_v52 }
0x128d   : > { %6803 = vmatprep.mubr.msk.f32.mxu0 %vm333_vm1, %v8443_v29 }
0x1290   : > { %6804 = vmatmul.mubr.msk.f32.gmra.mrb[44].mxu0 %vm333_vm1, %v287_v12  ;;  %v8583_v12 = vld [vmem:[%s8009_s30 + $0x108] ss:$0 sm:$0xff] }
0x1291   : > { %6841 = vmatprep.mubr.msk.f32.mxu0 %vm7946_vm2, %v7945_v25 }
0x1298   : > { %v8527_v46 = vpop.f32.mrb[34].mxu1 }
0x1299   : > { %v8529_v48 = vpop.f32.mrb[35].mxu1 }
0x129c   : > { %v8531_v53 = vpop.f32.mrb[36].mxu1 }
0x129d   : > { %v8533_v61 = vpop.f32.mrb[37].mxu1 }
0x12a0   : > { %v8535_v0 = vpop.f32.mrb[38].mxu1 }
0x12a1   : > { %v8537_v4 = vpop.f32.mrb[39].mxu1 }
0x12de   : > { %v8562_v58 = vpop.f32.mrb[40].mxu1 }
0x12df   : > { %v8564_v59 = vpop.f32.mrb[41].mxu1 }
0x12e2   : > { %v7594_v54 = vpop.permute.xlu1 %7593 }
0x12e3   : > { %v7596_v29 = vunpack.i.h.bf16 %v7594_v54  ;;  %v7595_v55 = vunpack.i.l.bf16 %v7594_v54 }
0x12e5   : > { %v7313_v57 = vpack.c.bf16 %v7596_v29, %v7595_v55 }
0x133e   : > { %v6741_v40 = vpop.f32.mrb[28].mxu0 }
0x133f   : > { %v8540_v41 = vadd.f32 %v6741_v40, %v6109_v39  ;;  %v2643_v42 = vpop.f32.mrb[29].mxu0 }
0x1340   : > { %v8542_v43 = vadd.f32 %v6109_v39, %v2643_v42 }
0x1342   : > { %3232 = vrot.lane.b32.xlu0 %v8542_v43, %s7947_s12  ;;  %6823 = vmatmul.mubr.msk.f32.vlgmr.msra.gmra.mrb[42].mxu1 %vm579_vm3, %v8542_v43 }
0x1343   : > { %7303 = vmatpush3.bf16.xpose.msk.msra.mxu1 %vm8364_vm4, %v7301_v14  ;;  %6860 = vmatprep.mubr.msk.f32.mxu1 %vm7946_vm2, %v7945_v25 }
0x1344   : > { %7304 = vmatprep.subr.bf16.mxu1 %v7950_v13 }
0x1347   : > { %v6784_v63 = vpop.f32.mrb[30].mxu0 }
0x1348   : > { %v2967_v2 = vpop.f32.mrb[31].mxu0  ;;  %v2973_v19 = vadd.f32 %v6784_v63, %v8583_v12 }
0x1349   : > { %v2968_v20 = vadd.f32 %v8583_v12, %v2967_v2 }
0x134b   : > { %7307 = vmatpush3.bf16.xpose.msk.msra.mxu1 %vm8364_vm4, %v7305_v47  ;;  %v6787_v38 = vpop.f32.mrb[32].mxu0  ;;  %v8589_v31 = vpack.i.bf16 %v2973_v19, %v2968_v20  ;;  %v7289_v49 = vpack.c.bf16 %v2973_v19, %v2968_v20 }
0x134c   : > { %7308 = vmatprep.subr.bf16.mxu1 %v7950_v13  ;;  %v2977_v6 = vpop.f32.mrb[33].mxu0  ;;  %v2983_v34 = vadd.f32 %v6787_v38, %v8583_v12 }
0x134d   : > { %v2978_v3 = vadd.f32 %v8583_v12, %v2977_v6  ;;  %7290 = vmatpush3.bf16.msra.mxu0 %v7289_v49 }
0x134e   : > { %7291 = vmatprep.subr.bf16.mxu0 %v7950_v13 }
0x134f   : > { %v6790_v7 = vpop.f32.mrb[34].mxu0  ;;  %v7292_v35 = vpack.c.bf16 %v2983_v34, %v2978_v3  ;;  %v8604_v30 = vpack.i.bf16 %v2983_v34, %v2978_v3 }
0x1350   : > { %v2987_v9 = vpop.f32.mrb[35].mxu0  ;;  %v2993_v23 = vadd.f32 %v6790_v7, %v8583_v12 }
0x1351   : > { %v2988_v28 = vadd.f32 %v8583_v12, %v2987_v9  ;;  %7293 = vmatpush3.bf16.msra.mxu0 %v7292_v35 }
0x1352   : > { %7294 = vmatprep.subr.bf16.mxu0 %v7950_v13 }
0x1353   : > { %7311 = vmatpush3.bf16.xpose.msk.msra.mxu1 %vm8364_vm4, %v7309_v33  ;;  %v8593_v32 = vpack.i.bf16 %v2993_v23, %v2988_v28  ;;  %v7295_v37 = vpack.c.bf16 %v2993_v23, %v2988_v28  ;;  %v6793_v50 = vpop.f32.mrb[36].mxu0 }
0x1354   : > { %7312 = vmatprep.subr.bf16.mxu1 %v7950_v13  ;;  %v3003_v51 = vadd.f32 %v6793_v50, %v8583_v12  ;;  %v2997_v52 = vpop.f32.mrb[37].mxu0 }
0x1355   : > { %7296 = vmatpush3.bf16.msra.mxu0 %v7295_v37  ;;  %v2998_v33 = vadd.f32 %v8583_v12, %v2997_v52 }
0x1356   : > { %7297 = vmatprep.subr.bf16.mxu0 %v7950_v13 }
0x1357   : > { %v8614_v54 = vpack.i.bf16 %v3003_v51, %v2998_v33 }
0x135b   : > { %7315 = vmatpush3.bf16.xpose.msk.msra.mxu1 %vm8364_vm4, %v7313_v57  ;;  %v7298_v57 = vpack.c.bf16 %v3003_v51, %v2998_v33 }
0x135c   : > { %7344 = vmatprep.subr.bf16.mxu1 %v7950_v13 }
0x135d   : > { %7299 = vmatpush3.bf16.msra.mxu0 %v7298_v57  ;;  %v8637_v57 = vld [vmem:[%s8009_s30 + $0xee] sm:$0xff] }
0x135e   : > { %7316 = vmatprep.subr.bf16.mxu0 %v7950_v13 }
0x13b4   : > { %v3233_v60 = vpop.permute.xlu0 %3232 }
0x13b5   : > { %6861 = vmatmul.mubr.msk.f32.vlgmr.msra.gmra.mrb[44].mxu1 %vm579_vm3, %v3233_v60 }
0x13b6   : > { %6927 = vmatprep.mubr.msk.f32.mxu1 %vm7946_vm2, %v7945_v25 }
0x1415   : > { %v3143_v22 = vpop.f32.mrb[42].mxu1 }
0x1416   : > { %v3144_v24 = vadd.f32 %v3143_v22, %v8578_v17  ;;  %v6824_v44 = vpop.f32.mrb[43].mxu1 }
0x1417   : > { %v6796_v44 = vpop.f32.mrb[38].mxu0 }
0x1418   : > { %v3148_v11 = vsel %vm3147_vm5, %v3144_v24, -inf  ;;  %v3007_v28 = vpop.f32.mrb[39].mxu0 }
0x1419   : > { %3149 = vmax.xlane.f32.xlu1 %v3148_v11  ;;  %v6799_v3 = vpop.f32.mrb[40].mxu0 }
0x141a   : > { %v3017_v49 = vpop.f32.mrb[41].mxu0 }
0x141b   : > { %v6802_v35 = vpop.f32.mrb[42].mxu0 }
0x142a   : > { %7598 = vrot.lane.b32.xlu1 %v8589_v31, %s7947_s12 }
0x142e   : > { %7608 = vrot.lane.b32.xlu1 %v8593_v32, %s7947_s12 }
0x1488   : > { %v3334_v39 = vpop.f32.mrb[44].mxu1 }
0x1489   : > { %v3335_v40 = vadd.f32 %v3334_v39, %v8578_v17  ;;  %v6862_v42 = vpop.f32.mrb[45].mxu1 }
0x148a   : > { %v3027_v42 = vpop.f32.mrb[43].mxu0 }
0x148b   : > { %v3338_v14 = vsel %vm3147_vm5, %v3335_v40, -inf }
0x148c   : > { %3339 = vmax.xlane.f32.xlu0 %v3338_v14  ;;  %v6805_v14 = vpop.f32.mrb[44].mxu0 }
0x14a2   : > { %7603 = vrot.lane.b32.xlu0 %v8604_v30, %s7947_s12 }
0x14a6   : > { %v3150_v45 = vpop.xlane.xlu1 %3149  ;;  %7623 = vrot.lane.b32.xlu0 %v8377_v36, %s7948_s13 }
0x14a7   : > { %v3151_v15 = vsub.f32 %v3144_v24, %v3150_v45  ;;  %v3037_v45 = vpop.f32.mrb[45].mxu0 }
0x14a9   : > { %v3152_v47 = vmul.f32 1.442695, %v3151_v15 }
0x14aa   : > { %7633 = vrot.lane.b32.xlu0 %v8475_v18, %s7948_s13  ;;  %v7599_v6 = vpop.permute.xlu1 %7598 }
0x14ab   : > { %7853 = vpow2.f32 %v3152_v47  ;;  %v7601_v9 = vunpack.i.h.bf16 %v7599_v6  ;;  %v7600_v22 = vunpack.i.l.bf16 %v7599_v6 }
0x14ad   : > { %v7317_v23 = vpack.c.bf16 %v7601_v9, %v7600_v22 }
0x14ae   : > { %v7609_v7 = vpop.permute.xlu1 %7608 }
0x14af   : > { %v7611_v39 = vunpack.i.h.bf16 %v7609_v7 }
0x14b5   : > { %v7854_v29 = vpop.eup %7853 }
0x14b6   : > { %v3154_v55 = vsel %vm3147_vm5, %v7854_v29, 0.0 }
0x14b7   : > { %3155 = vadd.xlane.f32.xlu1 %v3154_v55 }
0x1519   : > { %v3340_v60 = vpop.xlane.xlu0 %3339 }
0x151a   : > { %v3341_v62 = vsub.f32 %v3335_v40, %v3340_v60  ;;  %v7610_v40 = vunpack.i.l.bf16 %v7609_v7  ;;  %v8645_v60 = vadd.f32 %v6796_v44, %v8583_v12  ;;  %v8663_v7 = vadd.f32 %v6802_v35, %v8583_v12 }
0x151b   : > { %v8678_v44 = vadd.f32 %v8583_v12, %v3037_v45 }
0x151c   : > { %v3342_v63 = vmul.f32 1.442695, %v3341_v62  ;;  %v7323_v15 = vpack.c.bf16 %v7611_v39, %v7610_v40  ;;  %v8648_v62 = vadd.f32 %v8583_v12, %v3007_v28 }
0x151d   : > { %v7604_v24 = vpop.permute.xlu0 %7603 }
0x151e   : > { %7855 = vpow2.f32 %v3342_v63  ;;  %v7606_v19 = vunpack.i.h.bf16 %v7604_v24  ;;  %v7605_v20 = vunpack.i.l.bf16 %v7604_v24  ;;  %v8651_v63 = vadd.f32 %v6799_v3, %v8583_v12  ;;  %v8693_v3 = vld [vmem:[%s8009_s30 + $0xe6] sm:$0xff] }
0x151f   : > { %v8660_v6 = vpack.i.bf16 %v8645_v60, %v8648_v62  ;;  %v8675_v24 = vadd.f32 %v6805_v14, %v8583_v12 }
0x1520   : > { %v7320_v37 = vpack.c.bf16 %v7606_v19, %v7605_v20 }
0x1521   : > { %v7410_v20 = vpack.c.bf16 %v8675_v24, %v8678_v44 }
0x1528   : > { %v7856_v2 = vpop.eup %7855 }
0x1529   : > { %v3344_v38 = vsel %vm3147_vm5, %v7856_v2, 0.0 }
0x152a   : > { %3345 = vadd.xlane.f32.xlu1 %v3344_v38  ;;  %v7401_v38 = vpack.c.bf16 %v8645_v60, %v8648_v62 }
0x153b   : > { %7613 = vrot.lane.b32.xlu1 %v8614_v54, %s7947_s12 }
0x153f   : > { %7618 = vrot.lane.b32.xlu1 %v8368_v26, %s7948_s13 }
0x1543   : > { %7628 = vrot.lane.b32.xlu1 %v8466_v10, %s7948_s13 }
0x1544   : > { %v3156_v8 = vpop.xlane.xlu1 %3155 }
0x1545   : > { %7857 = vrcp.f32 %v3156_v8  ;;  %v8666_v8 = vadd.f32 %v8583_v12, %v3027_v42  ;;  %v7624_v42 = vpop.permute.xlu0 %7623 }
0x1546   : > { %v7626_v14 = vunpack.i.h.bf16 %v7624_v42  ;;  %v7625_v45 = vunpack.i.l.bf16 %v7624_v42 }
0x1547   : > { %3600 = vrot.lane.b32.xlu1 %v8542_v43, %s7948_s13  ;;  %v8684_v19 = vpack.i.bf16 %v8663_v7, %v8666_v8 }
0x154b   : > { %7643 = vrot.lane.b32.xlu1 %v8604_v30, %s7948_s13 }
0x154f   : > { %v7858_v11 = vpop.eup %7857 }
0x1550   : > { %v3158_v34 = vmul.f32 %v7858_v11, %v7854_v29  ;;  %v7407_v11 = vpack.c.bf16 %v8663_v7, %v8666_v8 }
0x1552   : > { %6842 = vmatmul.mubr.msk.f32.vlgmr.msra.gmra.mrb[46].mxu0 %vm3147_vm5, %v3158_v34 }
0x1553   : > { %7318 = vmatpush3.bf16.msra.mxu0 %v7317_v23  ;;  %6879 = vmatprep.mubr.msk.f32.mxu0 %vm7946_vm2, %v7945_v25  ;;  %v8690_v23 = vpack.i.bf16 %v8675_v24, %v8678_v44 }
0x1554   : > { %7319 = vmatprep.subr.bf16.mxu0 %v7950_v13 }
0x1557   : > { %7321 = vmatpush3.bf16.msra.mxu0 %v7320_v37 }
0x1558   : > { %7322 = vmatprep.subr.bf16.mxu0 %v7950_v13 }
0x155b   : > { %7324 = vmatpush3.bf16.msra.mxu0 %v7323_v15  ;;  %v7333_v15 = vpack.c.bf16 %v7626_v14, %v7625_v45 }
0x155c   : > { %7325 = vmatprep.subr.bf16.mxu0 %v7950_v13 }
0x15b7   : > { %v3346_v47 = vpop.xlane.xlu1 %3345 }
0x15b8   : > { %7859 = vrcp.f32 %v3346_v47 }
0x15bb   : > { %v7614_v50 = vpop.permute.xlu1 %7613 }
0x15bc   : > { %v7616_v51 = vunpack.i.h.bf16 %v7614_v50  ;;  %v7615_v52 = vunpack.i.l.bf16 %v7614_v50 }
0x15be   : > { %v7326_v33 = vpack.c.bf16 %v7616_v51, %v7615_v52 }
0x15c0   : > { %7327 = vmatpush3.bf16.msra.mxu0 %v7326_v33  ;;  %v7634_v33 = vpop.permute.xlu0 %7633 }
0x15c1   : > { %6882 = vmatprep.subr.mxu0 %v7945_v25 }
0x15c2   : > { %v7860_v29 = vpop.eup %7859 }
0x15c3   : > { %v3348_v55 = vmul.f32 %v7860_v29, %v7856_v2  ;;  %v8654_v2 = vadd.f32 %v8583_v12, %v3017_v49  ;;  %v7619_v12 = vpop.permute.xlu1 %7618  ;;  %v7636_v29 = vunpack.i.h.bf16 %v7634_v33 }
0x15c4   : > { %v7621_v37 = vunpack.i.h.bf16 %v7619_v12  ;;  %v7620_v39 = vunpack.i.l.bf16 %v7619_v12 }
0x15c5   : > { %6880 = vmatmul.mubr.msk.f32.vlgmr.msra.gmra.mrb[48].mxu0 %vm3147_vm5, %v3348_v55  ;;  %v7404_v9 = vpack.c.bf16 %v8651_v63, %v8654_v2  ;;  %v8672_v22 = vpack.i.bf16 %v8651_v63, %v8654_v2  ;;  %v7635_v55 = vunpack.i.l.bf16 %v7634_v33 }
0x15c6   : > { %6883 = vmatpush3.msra.mxu0 %v8637_v57  ;;  %6884 = vmatprep.mubr.msk.f32.mxu0 %vm7946_vm2, %v7945_v25  ;;  %v7329_v40 = vpack.c.bf16 %v7621_v37, %v7620_v39 }
0x15c7   : > { %6887 = vmatprep.subr.mxu0 %v7945_v25  ;;  %v7629_v47 = vpop.permute.xlu1 %7628 }
0x15c8   : > { %v7631_v50 = vunpack.i.h.bf16 %v7629_v47  ;;  %v7630_v51 = vunpack.i.l.bf16 %v7629_v47 }
0x15ca   : > { %v7337_v52 = vpack.c.bf16 %v7631_v50, %v7630_v51 }
0x1625   : > { %v3228_v28 = vpop.f32.mrb[46].mxu0 }
0x1626   : > { %v6843_v34 = vpop.f32.mrb[47].mxu0 }
0x1627   : > { %v3601_v34 = vpop.permute.xlu1 %3600 }
0x162b   : > { %v7644_v51 = vpop.permute.xlu1 %7643 }
0x1698   : > { %v3450_v49 = vpop.f32.mrb[48].mxu0 }
0x1699   : > { %v6881_v35 = vpop.f32.mrb[49].mxu0  ;;  %6885 = vmatmul.mubr.msk.f32.vlgmr.msra.gmra.mrb[50].mxu0 %vm579_vm3, %v3450_v49 }
0x169a   : > { %6888 = vmatpush3.msra.mxu0 %v8693_v3  ;;  %6889 = vmatprep.mubr.msk.f32.mxu0 %vm7946_vm2, %v7945_v25 }
0x169b   : > { %7328 = vmatprep.subr.bf16.mxu0 %v7950_v13 }
0x169d   : > { %6890 = vmatmul.mubr.msk.f32.vlgmr.msra.gmra.mrb[52].mxu0 %vm579_vm3, %v3228_v28  ;;  %v7341_v28 = vpack.c.bf16 %v7636_v29, %v7635_v55  ;;  %v7646_v55 = vunpack.i.h.bf16 %v7644_v51 }
0x169e   : > { %6908 = vmatprep.mubr.msk.f32.mxu0 %vm7946_vm2, %v7945_v25 }
0x16a1   : > { %7331 = vmatpush3.bf16.xpose.msk.msra.mxu0 %vm8364_vm4, %v7329_v40 }
0x16a2   : > { %7332 = vmatprep.subr.bf16.mxu0 %v7950_v13 }
0x16a9   : > { %7335 = vmatpush3.bf16.xpose.msk.msra.mxu0 %vm8364_vm4, %v7333_v15 }
0x16aa   : > { %7336 = vmatprep.subr.bf16.mxu0 %v7950_v13 }
0x16b1   : > { %7339 = vmatpush3.bf16.xpose.msk.msra.mxu0 %vm8364_vm4, %v7337_v52 }
0x16b2   : > { %7340 = vmatprep.subr.bf16.mxu0 %v7950_v13 }
0x16b9   : > { %7343 = vmatpush3.bf16.xpose.msk.msra.mxu0 %vm8364_vm4, %v7341_v28  ;;  %v7645_v28 = vunpack.i.l.bf16 %v7644_v51 }
0x16ba   : > { %7372 = vmatprep.subr.bf16.mxu0 %v7950_v13 }
0x16c0   : > { %6909 = vmatmul.mubr.msk.f32.vlgmr.msra.gmra.mrb[54].mxu0 %vm579_vm3, %v3601_v34 }
0x16c1   : > { %6970 = vmatprep.mubr.msk.f32.mxu0 %vm7946_vm2, %v7945_v25 }
0x176c   : > { %v3523_v12 = vpop.f32.mrb[50].mxu0 }
0x176d   : > { %v6886_v49 = vpop.f32.mrb[51].mxu0 }
0x1770   : > { %v3596_v35 = vpop.f32.mrb[52].mxu0 }
0x1771   : > { %v8718_v37 = vadd.f32 %v3596_v35, %v3523_v12  ;;  %v6891_v39 = vpop.f32.mrb[53].mxu0 }
0x1793   : > { %v3702_v40 = vpop.f32.mrb[54].mxu0 }
0x1794   : > { %v3703_v42 = vadd.f32 %v3702_v40, %v8578_v17  ;;  %v6910_v14 = vpop.f32.mrb[55].mxu0 }
0x1796   : > { %v3706_v45 = vsel %vm3147_vm5, %v3703_v42, -inf }
0x1797   : > { %3707 = vmax.xlane.f32.xlu0 %v3706_v45 }
0x17ad   : > { %7638 = vrot.lane.b32.xlu0 %v8589_v31, %s7948_s13 }
0x17b1   : > { %7648 = vrot.lane.b32.xlu0 %v8593_v32, %s7948_s13 }
0x17b5   : > { %7658 = vrot.lane.b32.xlu0 %v8368_v26, %s7949_s14 }
0x17b9   : > { %7668 = vrot.lane.b32.xlu0 %v8466_v10, %s7949_s14  ;;  %v7348_v10 = vpack.c.bf16 %v7646_v55, %v7645_v28 }
0x17bd   : > { %3888 = vrot.lane.b32.xlu0 %v8542_v43, %s7949_s14 }
0x17c1   : > { %7678 = vrot.lane.b32.xlu0 %v8589_v31, %s7949_s14 }
0x1824   : > { %v3708_v15 = vpop.xlane.xlu0 %3707 }
0x1825   : > { %v3709_v47 = vsub.f32 %v3703_v42, %v3708_v15 }
0x1827   : > { %v3710_v50 = vmul.f32 1.442695, %v3709_v47 }
0x1828   : > { %v7639_v52 = vpop.permute.xlu0 %7638 }
0x1829   : > { %7861 = vpow2.f32 %v3710_v50  ;;  %v7641_v33 = vunpack.i.h.bf16 %v7639_v52  ;;  %v7640_v29 = vunpack.i.l.bf16 %v7639_v52 }
0x182b   : > { %v7345_v26 = vpack.c.bf16 %v7641_v33, %v7640_v29 }
0x182c   : > { %v7649_v34 = vpop.permute.xlu0 %7648 }
0x182d   : > { %7346 = vmatpush3.bf16.msra.mxu1 %v7345_v26  ;;  %v7651_v43 = vunpack.i.h.bf16 %v7649_v34  ;;  %v7650_v12 = vunpack.i.l.bf16 %v7649_v34  ;;  %v8747_v26 = vld [vmem:[%s8009_s30 + $0xf6] sm:$0xff] }
0x182e   : > { %7347 = vmatprep.subr.bf16.mxu1 %v7950_v13 }
0x182f   : > { %v7351_v35 = vpack.c.bf16 %v7651_v43, %v7650_v12 }
0x1830   : > { %v7659_v49 = vpop.permute.xlu0 %7658 }
0x1831   : > { %7349 = vmatpush3.bf16.msra.mxu1 %v7348_v10 }
0x1832   : > { %7350 = vmatprep.subr.bf16.mxu1 %v7950_v13 }
0x1833   : > { %v7862_v31 = vpop.eup %7861 }
0x1834   : > { %v7669_v39 = vpop.permute.xlu0 %7668  ;;  %v3712_v40 = vsel %vm3147_vm5, %v7862_v31, 0.0 }
0x1835   : > { %3713 = vadd.xlane.f32.xlu1 %v3712_v40  ;;  %7352 = vmatpush3.bf16.msra.mxu1 %v7351_v35 }
0x1836   : > { %7353 = vmatprep.subr.bf16.mxu1 %v7950_v13 }
0x1838   : > { %v3889_v42 = vpop.permute.xlu0 %3888 }
0x183c   : > { %v7679_v14 = vpop.permute.xlu0 %7678 }
0x183d   : > { %v7681_v45 = vunpack.i.h.bf16 %v7679_v14  ;;  %v7680_v15 = vunpack.i.l.bf16 %v7679_v14  ;;  %v7670_v14 = vunpack.i.l.bf16 %v7669_v39 }
0x183f   : > { %v7373_v47 = vpack.c.bf16 %v7681_v45, %v7680_v15 }
0x1841   : > { %7374 = vmatpush3.bf16.msra.mxu0 %v7373_v47 }
0x1842   : > { %7375 = vmatprep.subr.bf16.mxu0 %v7950_v13 }
0x1846   : > { %7653 = vrot.lane.b32.xlu1 %v8614_v54, %s7948_s13 }
0x184a   : > { %7663 = vrot.lane.b32.xlu1 %v8377_v36, %s7949_s14  ;;  %v7661_v36 = vunpack.i.h.bf16 %v7659_v49 }
0x184e   : > { %7673 = vrot.lane.b32.xlu1 %v8475_v18, %s7949_s14  ;;  %v7660_v18 = vunpack.i.l.bf16 %v7659_v49  ;;  %v7671_v49 = vunpack.i.h.bf16 %v7669_v39 }
0x1850   : > { %v7357_v34 = vpack.c.bf16 %v7661_v36, %v7660_v18  ;;  %v7365_v45 = vpack.c.bf16 %v7671_v49, %v7670_v14  ;;  %v2826_v49 = vadd.f32 %v8531_v53, %v8358_v16  ;;  %v7893_v14 = vld [vmem:[%s8009_s30 + $0x107] ss:$0 sm:$0xff] }
0x1851   : > { %v2846_v53 = vadd.f32 %v7893_v14, %v8562_v58  ;;  %v4178_v58 = vsub.s32 1, %v8569_v1 }
0x18c2   : > { %v3714_v50 = vpop.xlane.xlu1 %3713 }
0x18c3   : > { %7863 = vrcp.f32 %v3714_v50 }
0x18c6   : > { %v7654_v51 = vpop.permute.xlu1 %7653 }
0x18c7   : > { %v7656_v52 = vunpack.i.h.bf16 %v7654_v51  ;;  %v7655_v33 = vunpack.i.l.bf16 %v7654_v51 }
0x18c9   : > { %v7354_v29 = vpack.c.bf16 %v7656_v52, %v7655_v33 }
0x18ca   : > { %v7664_v43 = vpop.permute.xlu1 %7663 }
0x18cb   : > { %7355 = vmatpush3.bf16.msra.mxu1 %v7354_v29  ;;  %v7665_v35 = vunpack.i.l.bf16 %v7664_v43 }
0x18cc   : > { %6930 = vmatprep.subr.mxu1 %v7945_v25 }
0x18cd   : > { %v7864_v55 = vpop.eup %7863 }
0x18ce   : > { %v3716_v28 = vmul.f32 %v7864_v55, %v7862_v31  ;;  %v7666_v31 = vunpack.i.h.bf16 %v7664_v43  ;;  %v7674_v15 = vpop.permute.xlu1 %7673  ;;  %v8804_v43 = vld [vmem:[%s8009_s30 + $0xfe] sm:$0xff] }
0x18cf   : > { %v7676_v47 = vunpack.i.h.bf16 %v7674_v15  ;;  %v7675_v50 = vunpack.i.l.bf16 %v7674_v15  ;;  %v2831_v15 = vadd.f32 %v7893_v14, %v8537_v4 }
0x18d0   : > { %6928 = vmatmul.mubr.msk.f32.vlgmr.msra.gmra.mrb[46].mxu1 %vm3147_vm5, %v3716_v28  ;;  %v7361_v40 = vpack.c.bf16 %v7666_v31, %v7665_v35 }
0x18d1   : > { %6931 = vmatpush3.msra.mxu1 %v8747_v26  ;;  %6932 = vmatprep.mubr.msk.f32.mxu1 %vm7946_vm2, %v7945_v25  ;;  %v7369_v51 = vpack.c.bf16 %v7676_v47, %v7675_v50 }
0x18d2   : > { %7356 = vmatprep.subr.bf16.mxu1 %v7950_v13 }
0x19a3   : > { %v3810_v10 = vpop.f32.mrb[46].mxu1 }
0x19a4   : > { %v6929_v12 = vpop.f32.mrb[47].mxu1  ;;  %6933 = vmatmul.mubr.msk.f32.vlgmr.msra.gmra.mrb[48].mxu1 %vm579_vm3, %v3810_v10 }
0x19a5   : > { %7359 = vmatpush3.bf16.xpose.msk.msra.mxu1 %vm8364_vm4, %v7357_v34  ;;  %6951 = vmatprep.mubr.msk.f32.mxu1 %vm7946_vm2, %v7945_v25  ;;  %v2811_v12 = vadd.f32 %v8358_v16, %v8529_v48 }
0x19a6   : > { %7360 = vmatprep.subr.bf16.mxu1 %v7950_v13 }
0x19ad   : > { %7363 = vmatpush3.bf16.xpose.msk.msra.mxu1 %vm8364_vm4, %v7361_v40 }
0x19ae   : > { %7364 = vmatprep.subr.bf16.mxu1 %v7950_v13 }
0x19b5   : > { %7367 = vmatpush3.bf16.xpose.msk.msra.mxu1 %vm8364_vm4, %v7365_v45  ;;  %v2836_v45 = vadd.f32 %v7893_v14, %v8535_v0 }
0x19b6   : > { %7368 = vmatprep.subr.bf16.mxu1 %v7950_v13 }
0x19b7   : > { %v7393_v47 = vpack.c.bf16 %v2836_v45, %v2831_v15 }
0x19bd   : > { %7371 = vmatpush3.bf16.xpose.msk.msra.mxu1 %vm8364_vm4, %v7369_v51 }
0x19be   : > { %7400 = vmatprep.subr.bf16.mxu1 %v7950_v13 }
0x19c4   : > { %6952 = vmatmul.mubr.msk.f32.vlgmr.msra.gmra.mrb[50].mxu1 %vm579_vm3, %v3889_v42 }
0x19c5   : > { %7402 = vmatpush3.bf16.msra.mxu1 %v7401_v38  ;;  %7013 = vmatprep.mubr.msk.f32.mxu1 %vm7946_vm2, %v7945_v25 }
0x19c6   : > { %7403 = vmatprep.subr.bf16.mxu1 %v7950_v13 }
0x19c9   : > { %7405 = vmatpush3.bf16.msra.mxu1 %v7404_v9 }
0x19ca   : > { %7406 = vmatprep.subr.bf16.mxu1 %v7950_v13 }
0x19cd   : > { %7408 = vmatpush3.bf16.msra.mxu1 %v7407_v11 }
0x19ce   : > { %7409 = vmatprep.subr.bf16.mxu1 %v7950_v13 }
0x19d1   : > { %7411 = vmatpush3.bf16.msra.mxu1 %v7410_v20 }
0x19d2   : > { %7412 = vmatprep.subr.bf16.mxu1 %v7950_v13 }
0x1a77   : > { %v3883_v60 = vpop.f32.mrb[48].mxu1 }
0x1a78   : > { %v8789_v62 = vadd.f32 %v3883_v60, %v8718_v37  ;;  %v6934_v63 = vpop.f32.mrb[49].mxu1 }
0x1a97   : > { %v3990_v2 = vpop.f32.mrb[50].mxu1 }
0x1a98   : > { %v3991_v38 = vadd.f32 %v3990_v2, %v8578_v17  ;;  %v6953_v9 = vpop.f32.mrb[51].mxu1 }
0x1a9a   : > { %v3994_v7 = vsel %vm3147_vm5, %v3991_v38, -inf }
0x1a9b   : > { %3995 = vmax.xlane.f32.xlu1 %v3994_v7 }
0x1aac   : > { %7683 = vrot.lane.b32.xlu1 %v8604_v30, %s7949_s14 }
0x1ab0   : > { %7688 = vrot.lane.b32.xlu1 %v8593_v32, %s7949_s14 }
0x1b28   : > { %v3996_v8 = vpop.xlane.xlu1 %3995 }
0x1b29   : > { %v3997_v24 = vsub.f32 %v3991_v38, %v3996_v8 }
0x1b2b   : > { %v3998_v44 = vmul.f32 1.442695, %v3997_v24 }
0x1b2c   : > { %v7684_v11 = vpop.permute.xlu1 %7683 }
0x1b2d   : > { %7865 = vpow2.f32 %v3998_v44  ;;  %v7686_v20 = vunpack.i.h.bf16 %v7684_v11  ;;  %v7685_v37 = vunpack.i.l.bf16 %v7684_v11 }
0x1b2f   : > { %v7376_v39 = vpack.c.bf16 %v7686_v20, %v7685_v37 }
0x1b30   : > { %v7689_v42 = vpop.permute.xlu1 %7688 }
0x1b31   : > { %v7691_v17 = vunpack.i.h.bf16 %v7689_v42  ;;  %v7690_v52 = vunpack.i.l.bf16 %v7689_v42  ;;  %7377 = vmatpush3.bf16.msra.mxu0 %v7376_v39 }
0x1b32   : > { %7378 = vmatprep.subr.bf16.mxu0 %v7950_v13 }
0x1b33   : > { %v7379_v33 = vpack.c.bf16 %v7691_v17, %v7690_v52 }
0x1b35   : > { %7380 = vmatpush3.bf16.msra.mxu0 %v7379_v33 }
0x1b36   : > { %7381 = vmatprep.subr.bf16.mxu0 %v7950_v13 }
0x1b37   : > { %v7866_v32 = vpop.eup %7865 }
0x1b38   : > { %v4000_v30 = vsel %vm3147_vm5, %v7866_v32, 0.0 }
0x1b39   : > { %4001 = vadd.xlane.f32.xlu0 %v4000_v30 }
0x1b4f   : > { %7693 = vrot.lane.b32.xlu0 %v8614_v54, %s7949_s14  ;;  %v2816_v54 = vadd.f32 %v8527_v46, %v8358_v16  ;;  %v2821_v46 = vadd.f32 %v8358_v16, %v8533_v61  ;;  %v2841_v16 = vadd.f32 %v7893_v14, %v8564_v59  ;;  %v8848_v59 = vrot.slane %v8575_v56, %v4178_v58 }
0x1b51   : > { %v7385_v31 = vpack.c.bf16 %v2816_v54, %v2811_v12  ;;  %v7389_v48 = vpack.c.bf16 %v2826_v49, %v2821_v46  ;;  %v7397_v61 = vpack.c.bf16 %v2846_v53, %v2841_v16  ;;  %v8852_v38 = vpack.i.bf16 %v2826_v49, %v2821_v46 }
0x1b52   : > { %v8865_v24 = vpack.i.bf16 %v2816_v54, %v2811_v12  ;;  %v8869_v44 = vpack.i.bf16 %v2846_v53, %v2841_v16 }
0x1bc6   : > { %v4002_v29 = vpop.xlane.xlu0 %4001 }
0x1bc7   : > { %7867 = vrcp.f32 %v4002_v29 }
0x1bca   : > { %v7694_v55 = vpop.permute.xlu0 %7693 }
0x1bcb   : > { %v7696_v28 = vunpack.i.h.bf16 %v7694_v55  ;;  %v7695_v36 = vunpack.i.l.bf16 %v7694_v55 }
0x1bcd   : > { %v7382_v18 = vpack.c.bf16 %v7696_v28, %v7695_v36 }
0x1bcf   : > { %7383 = vmatpush3.bf16.msra.mxu0 %v7382_v18 }
0x1bd0   : > { %6973 = vmatprep.subr.mxu0 %v7945_v25 }
0x1bd1   : > { %v7868_v34 = vpop.eup %7867 }
0x1bd2   : > { %v4004_v10 = vmul.f32 %v7868_v34, %v7866_v32 }
0x1bd4   : > { %6971 = vmatmul.mubr.msk.f32.vlgmr.msra.gmra.mrb[56].mxu0 %vm3147_vm5, %v4004_v10 }
0x1bd5   : > { %6974 = vmatpush3.msra.mxu0 %v8804_v43  ;;  %6975 = vmatprep.mubr.msk.f32.mxu0 %vm7946_vm2, %v7945_v25 }
0x1bd6   : > { %7384 = vmatprep.subr.bf16.mxu0 %v7950_v13 }
0x1ca7   : > { %v4098_v35 = vpop.f32.mrb[56].mxu0 }
0x1ca8   : > { %v6972_v40 = vpop.f32.mrb[57].mxu0  ;;  %6976 = vmatmul.mubr.msk.f32.vlgmr.msra.gmra.mrb[58].mxu0 %vm579_vm3, %v4098_v35 }
0x1ca9   : > { %7387 = vmatpush3.bf16.xpose.msk.msra.mxu0 %vm8364_vm4, %v7385_v31  ;;  %6994 = vmatprep.mubr.msk.f32.mxu0 %vm7946_vm2, %v7945_v25 }
0x1caa   : > { %7388 = vmatprep.subr.bf16.mxu0 %v7950_v13 }
0x1cb1   : > { %7391 = vmatpush3.bf16.xpose.msk.msra.mxu0 %vm8364_vm4, %v7389_v48 }
0x1cb2   : > { %7392 = vmatprep.subr.bf16.mxu0 %v7950_v13 }
0x1cb9   : > { %7395 = vmatpush3.bf16.xpose.msk.msra.mxu0 %vm8364_vm4, %v7393_v47 }
0x1cba   : > { %7396 = vmatprep.subr.bf16.mxu0 %v7950_v13 }
0x1cc1   : > { %7399 = vmatpush3.bf16.xpose.msk.msra.mxu0 %vm8364_vm4, %v7397_v61 }
0x1cc2   : > { %7428 = vmatprep.subr.bf16.mxu0 %v7950_v13 }
0x1cc8   : > { %6995 = vmatmul.mubr.msk.f32.vlgmr.msra.gmra.mrb[60].mxu0 %vm579_vm3, %v8540_v41 }
0x1cc9   : > { %7051 = vmatprep.mubr.msk.f32.mxu0 %vm7946_vm2, %v7945_v25 }
0x1d7b   : > { %v4171_v0 = vpop.f32.mrb[58].mxu0 }
0x1d7c   : > { %v8844_v4 = vadd.f32 %v4171_v0, %v8789_v62  ;;  %v6977_v50 = vpop.f32.mrb[59].mxu0  ;;  %v8856_v62 = vpack.i.bf16 %v2836_v45, %v2831_v15 }
0x1d9b   : > { %v4273_v51 = vpop.f32.mrb[60].mxu0 }
0x1d9c   : > { %v4274_v60 = vadd.f32 %v4273_v51, %v8848_v59  ;;  %v6996_v63 = vpop.f32.mrb[61].mxu0 }
0x1d9e   : > { %v4277_v2 = vsel %vm3147_vm5, %v4274_v60, -inf }
0x1d9f   : > { %4278 = vmax.xlane.f32.xlu1 %v4277_v2 }
0x1db0   : > { %7703 = vrot.lane.b32.xlu1 %v8852_v38, %s7947_s12 }
0x1db4   : > { %7708 = vrot.lane.b32.xlu1 %v8856_v62, %s7947_s12 }
0x1db8   : > { %4361 = vrot.lane.b32.xlu1 %v8540_v41, %s7947_s12 }
0x1dbc   : > { %7723 = vrot.lane.b32.xlu1 %v8672_v22, %s7947_s12 }
0x1e2c   : > { %v4279_v1 = vpop.xlane.xlu1 %4278 }
0x1e2d   : > { %v4280_v56 = vsub.f32 %v4274_v60, %v4279_v1 }
0x1e2f   : > { %v4281_v9 = vmul.f32 1.442695, %v4280_v56 }
0x1e30   : > { %v7704_v33 = vpop.permute.xlu1 %7703 }
0x1e31   : > { %7869 = vpow2.f32 %v4281_v9  ;;  %v7706_v32 = vunpack.i.h.bf16 %v7704_v33  ;;  %v7705_v30 = vunpack.i.l.bf16 %v7704_v33 }
0x1e33   : > { %v7417_v29 = vpack.c.bf16 %v7706_v32, %v7705_v30 }
0x1e34   : > { %v7709_v55 = vpop.permute.xlu1 %7708 }
0x1e35   : > { %v7711_v28 = vunpack.i.h.bf16 %v7709_v55  ;;  %v7710_v36 = vunpack.i.l.bf16 %v7709_v55 }
0x1e37   : > { %v7421_v18 = vpack.c.bf16 %v7711_v28, %v7710_v36 }
0x1e38   : > { %v4362_v31 = vpop.permute.xlu1 %4361 }
0x1e3b   : > { %v7870_v7 = vpop.eup %7869 }
0x1e3c   : > { %v4283_v8 = vsel %vm3147_vm5, %v7870_v7, 0.0  ;;  %v7724_v47 = vpop.permute.xlu1 %7723 }
0x1e3d   : > { %4284 = vadd.xlane.f32.xlu0 %v4283_v8  ;;  %v7726_v0 = vunpack.i.h.bf16 %v7724_v47  ;;  %v7725_v50 = vunpack.i.l.bf16 %v7724_v47 }
0x1e3f   : > { %v7432_v60 = vpack.c.bf16 %v7726_v0, %v7725_v50 }
0x1e53   : > { %7698 = vrot.lane.b32.xlu0 %v8865_v24, %s7947_s12 }
0x1e57   : > { %7713 = vrot.lane.b32.xlu0 %v8869_v44, %s7947_s12 }
0x1eca   : > { %v4285_v11 = vpop.xlane.xlu0 %4284 }
0x1ecb   : > { %7871 = vrcp.f32 %v4285_v11 }
0x1ece   : > { %v7699_v20 = vpop.permute.xlu0 %7698 }
0x1ecf   : > { %v7701_v37 = vunpack.i.h.bf16 %v7699_v20  ;;  %v7700_v39 = vunpack.i.l.bf16 %v7699_v20 }
0x1ed1   : > { %v7413_v52 = vpack.c.bf16 %v7701_v37, %v7700_v39 }
0x1ed2   : > { %v7714_v34 = vpop.permute.xlu0 %7713 }
0x1ed3   : > { %v7716_v10 = vunpack.i.h.bf16 %v7714_v34  ;;  %v7715_v54 = vunpack.i.l.bf16 %v7714_v34 }
0x1ed5   : > { %v7872_v42 = vpop.eup %7871  ;;  %v7425_v12 = vpack.c.bf16 %v7716_v10, %v7715_v54 }
0x1ed6   : > { %v4287_v17 = vmul.f32 %v7872_v42, %v7870_v7 }
0x1ed8   : > { %7014 = vmatmul.mubr.msk.f32.vlgmr.msra.gmra.mrb[52].mxu1 %vm3147_vm5, %v4287_v17 }
0x1ed9   : > { %7415 = vmatpush3.bf16.xpose.msk.msra.mxu1 %vm8364_vm4, %v7413_v52  ;;  %7032 = vmatprep.mubr.msk.f32.mxu1 %vm7946_vm2, %v7945_v25 }
0x1eda   : > { %7416 = vmatprep.subr.bf16.mxu1 %v7950_v13 }
0x1ee1   : > { %7419 = vmatpush3.bf16.xpose.msk.msra.mxu1 %vm8364_vm4, %v7417_v29 }
0x1ee2   : > { %7420 = vmatprep.subr.bf16.mxu1 %v7950_v13 }
0x1ee9   : > { %7423 = vmatpush3.bf16.xpose.msk.msra.mxu1 %vm8364_vm4, %v7421_v18 }
0x1eea   : > { %7424 = vmatprep.subr.bf16.mxu1 %v7950_v13 }
0x1ef1   : > { %7427 = vmatpush3.bf16.xpose.msk.msra.mxu1 %vm8364_vm4, %v7425_v12 }
0x1ef2   : > { %7059 = vmatprep.subr.mxu1 %v7945_v25 }
0x1ef8   : > { %7033 = vmatmul.mubr.msk.f32.vlgmr.msra.gmra.mrb[54].mxu1 %vm579_vm3, %v4362_v31 }
0x1ef9   : > { %7060 = vmatpush3.msra.mxu1 %v8693_v3  ;;  %7061 = vmatprep.mubr.msk.f32.mxu1 %vm7946_vm2, %v7945_v25 }
0x1efa   : > { %7456 = vmatprep.subr.bf16.mxu1 %v7950_v13 }
0x1fab   : > { %v4357_v35 = vpop.f32.mrb[52].mxu1 }
0x1fac   : > { %v7015_v40 = vpop.f32.mrb[53].mxu1  ;;  %7062 = vmatmul.mubr.msk.f32.vlgmr.msra.gmra.mrb[56].mxu1 %vm579_vm3, %v4357_v35 }
0x1fad   : > { %7099 = vmatprep.mubr.msk.f32.mxu1 %vm7946_vm2, %v7945_v25 }
0x1fcb   : > { %v4463_v49 = vpop.f32.mrb[54].mxu1 }
0x1fcc   : > { %v4464_v46 = vadd.f32 %v4463_v49, %v8848_v59  ;;  %v7034_v48 = vpop.f32.mrb[55].mxu1 }
0x1fce   : > { %v4467_v14 = vsel %vm3147_vm5, %v4464_v46, -inf }
0x1fcf   : > { %4468 = vmax.xlane.f32.xlu0 %v4467_v14 }
0x1fe5   : > { %7718 = vrot.lane.b32.xlu0 %v8660_v6, %s7947_s12 }
0x1fe9   : > { %7728 = vrot.lane.b32.xlu0 %v8684_v19, %s7947_s12 }
0x1fed   : > { %7738 = vrot.lane.b32.xlu0 %v8865_v24, %s7948_s13 }
0x1ff1   : > { %7748 = vrot.lane.b32.xlu0 %v8856_v62, %s7948_s13 }
0x1ff5   : > { %4729 = vrot.lane.b32.xlu0 %v8540_v41, %s7948_s13 }
0x1ff9   : > { %7758 = vrot.lane.b32.xlu0 %v8660_v6, %s7948_s13 }
0x205c   : > { %v4469_v3 = vpop.xlane.xlu0 %4468 }
0x205d   : > { %v4470_v45 = vsub.f32 %v4464_v46, %v4469_v3 }
0x205f   : > { %v4471_v15 = vmul.f32 1.442695, %v4470_v45 }
0x2060   : > { %v7719_v53 = vpop.permute.xlu0 %7718 }
0x2061   : > { %7873 = vpow2.f32 %v4471_v15  ;;  %v7721_v16 = vunpack.i.h.bf16 %v7719_v53  ;;  %v7720_v61 = vunpack.i.l.bf16 %v7719_v53 }
0x2063   : > { %v7429_v58 = vpack.c.bf16 %v7721_v16, %v7720_v61 }
0x2064   : > { %v7729_v51 = vpop.permute.xlu0 %7728 }
0x2065   : > { %7430 = vmatpush3.bf16.msra.mxu0 %v7429_v58  ;;  %v7731_v63 = vunpack.i.h.bf16 %v7729_v51  ;;  %v7730_v2 = vunpack.i.l.bf16 %v7729_v51 }
0x2066   : > { %7431 = vmatprep.subr.bf16.mxu0 %v7950_v13 }
0x2067   : > { %v7435_v9 = vpack.c.bf16 %v7731_v63, %v7730_v2 }
0x2068   : > { %v7739_v1 = vpop.permute.xlu0 %7738 }
0x2069   : > { %7433 = vmatpush3.bf16.msra.mxu0 %v7432_v60  ;;  %v7741_v18 = vunpack.i.h.bf16 %v7739_v1  ;;  %v7740_v34 = vunpack.i.l.bf16 %v7739_v1 }
0x206a   : > { %7434 = vmatprep.subr.bf16.mxu0 %v7950_v13 }
0x206b   : > { %v7874_v56 = vpop.eup %7873  ;;  %v7441_v10 = vpack.c.bf16 %v7741_v18, %v7740_v34 }
0x206c   : > { %v7749_v7 = vpop.permute.xlu0 %7748  ;;  %v4473_v8 = vsel %vm3147_vm5, %v7874_v56, 0.0 }
0x206d   : > { %4474 = vadd.xlane.f32.xlu1 %v4473_v8  ;;  %7436 = vmatpush3.bf16.msra.mxu0 %v7435_v9  ;;  %v7751_v49 = vunpack.i.h.bf16 %v7749_v7  ;;  %v7750_v46 = vunpack.i.l.bf16 %v7749_v7 }
0x206e   : > { %7437 = vmatprep.subr.bf16.mxu0 %v7950_v13 }
0x206f   : > { %v7449_v48 = vpack.c.bf16 %v7751_v49, %v7750_v46 }
0x2070   : > { %v4730_v11 = vpop.permute.xlu0 %4729 }
0x2074   : > { %v7759_v20 = vpop.permute.xlu0 %7758 }
0x2075   : > { %v7761_v37 = vunpack.i.h.bf16 %v7759_v20  ;;  %v7760_v39 = vunpack.i.l.bf16 %v7759_v20 }
0x2077   : > { %v7457_v42 = vpack.c.bf16 %v7761_v37, %v7760_v39 }
0x2079   : > { %7458 = vmatpush3.bf16.msra.mxu1 %v7457_v42 }
0x207a   : > { %7459 = vmatprep.subr.bf16.mxu1 %v7950_v13 }
0x207e   : > { %7733 = vrot.lane.b32.xlu1 %v8690_v23, %s7947_s12 }
0x207f   : > { %v4725_v17 = vpop.f32.mrb[56].mxu1 }
0x2080   : > { %v7063_v52 = vpop.f32.mrb[57].mxu1 }
0x2082   : > { %7743 = vrot.lane.b32.xlu1 %v8852_v38, %s7948_s13 }
0x2086   : > { %7753 = vrot.lane.b32.xlu1 %v8869_v44, %s7948_s13 }
0x20fa   : > { %v4475_v33 = vpop.xlane.xlu1 %4474 }
0x20fb   : > { %7875 = vrcp.f32 %v4475_v33 }
0x20fe   : > { %v7734_v32 = vpop.permute.xlu1 %7733 }
0x20ff   : > { %v7736_v30 = vunpack.i.h.bf16 %v7734_v32  ;;  %v7735_v29 = vunpack.i.l.bf16 %v7734_v32 }
0x2101   : > { %v7438_v55 = vpack.c.bf16 %v7736_v30, %v7735_v29 }
0x2102   : > { %v7744_v12 = vpop.permute.xlu1 %7743 }
0x2103   : > { %7439 = vmatpush3.bf16.msra.mxu0 %v7438_v55  ;;  %v7745_v35 = vunpack.i.l.bf16 %v7744_v12 }
0x2104   : > { %7054 = vmatprep.subr.mxu0 %v7945_v25 }
0x2105   : > { %v7876_v28 = vpop.eup %7875 }
0x2106   : > { %v4477_v36 = vmul.f32 %v7876_v28, %v7874_v56  ;;  %v7754_v14 = vpop.permute.xlu1 %7753 }
0x2107   : > { %v7756_v3 = vunpack.i.h.bf16 %v7754_v14  ;;  %v7755_v45 = vunpack.i.l.bf16 %v7754_v14 }
0x2108   : > { %7052 = vmatmul.mubr.msk.f32.vlgmr.msra.gmra.mrb[62].mxu0 %vm3147_vm5, %v4477_v36 }
0x2109   : > { %7055 = vmatpush3.msra.mxu0 %v8637_v57  ;;  %7056 = vmatprep.mubr.msk.f32.mxu0 %vm7946_vm2, %v7945_v25  ;;  %v7746_v57 = vunpack.i.h.bf16 %v7744_v12  ;;  %v7453_v15 = vpack.c.bf16 %v7756_v3, %v7755_v45 }
0x210a   : > { %7440 = vmatprep.subr.bf16.mxu0 %v7950_v13 }
0x210b   : > { %v7445_v40 = vpack.c.bf16 %v7746_v57, %v7745_v35 }
0x21db   : > { %v4579_v54 = vpop.f32.mrb[62].mxu0 }
0x21dc   : > { %v7053_v31 = vpop.f32.mrb[63].mxu0  ;;  %7057 = vmatmul.mubr.msk.f32.vlgmr.msra.gmra.mrb[64].mxu0 %vm579_vm3, %v4579_v54 }
0x21dd   : > { %7443 = vmatpush3.bf16.xpose.msk.msra.mxu0 %vm8364_vm4, %v7441_v10  ;;  %7080 = vmatprep.mubr.msk.f32.mxu0 %vm7946_vm2, %v7945_v25 }
0x21de   : > { %7444 = vmatprep.subr.bf16.mxu0 %v7950_v13 }
0x21e5   : > { %7447 = vmatpush3.bf16.xpose.msk.msra.mxu0 %vm8364_vm4, %v7445_v40 }
0x21e6   : > { %7448 = vmatprep.subr.bf16.mxu0 %v7950_v13 }
0x21ed   : > { %7451 = vmatpush3.bf16.xpose.msk.msra.mxu0 %vm8364_vm4, %v7449_v48 }
0x21ee   : > { %7452 = vmatprep.subr.bf16.mxu0 %v7950_v13 }
0x21f5   : > { %7455 = vmatpush3.bf16.xpose.msk.msra.mxu0 %vm8364_vm4, %v7453_v15 }
0x21f6   : > { %7484 = vmatprep.subr.bf16.mxu0 %v7950_v13 }
0x21fc   : > { %7081 = vmatmul.mubr.msk.f32.vlgmr.msra.gmra.mrb[66].mxu0 %vm579_vm3, %v4730_v11 }
0x21fd   : > { %7142 = vmatprep.mubr.msk.f32.mxu0 %vm7946_vm2, %v7945_v25 }
0x22af   : > { %v4652_v47 = vpop.f32.mrb[64].mxu0 }
0x22b0   : > { %v8945_v53 = vadd.f32 %v4725_v17, %v4652_v47  ;;  %v7058_v16 = vpop.f32.mrb[65].mxu0  ;;  %v5309_v47 = vadd.f32 %v9001_v21, %v8844_v4 }
0x22cf   : > { %v4831_v61 = vpop.f32.mrb[66].mxu0 }
0x22d0   : > { %v4832_v0 = vadd.f32 %v4831_v61, %v8848_v59  ;;  %v7082_v50 = vpop.f32.mrb[67].mxu0 }
0x22d2   : > { %v4835_v58 = vsel %vm3147_vm5, %v4832_v0, -inf }
0x22d3   : > { %4836 = vmax.xlane.f32.xlu1 %v4835_v58 }
0x22e4   : > { %7763 = vrot.lane.b32.xlu1 %v8672_v22, %s7948_s13 }
0x22e8   : > { %7768 = vrot.lane.b32.xlu1 %v8684_v19, %s7948_s13 }
0x22ec   : > { %7778 = vrot.lane.b32.xlu1 %v8865_v24, %s7949_s14 }
0x22f0   : > { %7788 = vrot.lane.b32.xlu1 %v8856_v62, %s7949_s14 }
0x22f4   : > { %5017 = vrot.lane.b32.xlu1 %v8540_v41, %s7949_s14 }
0x22f8   : > { %7803 = vrot.lane.b32.xlu1 %v8672_v22, %s7949_s14 }
0x2360   : > { %v4837_v51 = vpop.xlane.xlu1 %4836 }
0x2361   : > { %v4838_v60 = vsub.f32 %v4832_v0, %v4837_v51 }
0x2363   : > { %v4839_v63 = vmul.f32 1.442695, %v4838_v60 }
0x2364   : > { %v7764_v2 = vpop.permute.xlu1 %7763 }
0x2365   : > { %7877 = vpow2.f32 %v4839_v63  ;;  %v7766_v1 = vunpack.i.h.bf16 %v7764_v2  ;;  %v7765_v56 = vunpack.i.l.bf16 %v7764_v2 }
0x2367   : > { %v7460_v9 = vpack.c.bf16 %v7766_v1, %v7765_v56 }
0x2368   : > { %v7769_v7 = vpop.permute.xlu1 %7768 }
0x2369   : > { %v7771_v8 = vunpack.i.h.bf16 %v7769_v7  ;;  %v7770_v24 = vunpack.i.l.bf16 %v7769_v7  ;;  %7461 = vmatpush3.bf16.msra.mxu1 %v7460_v9 }
0x236a   : > { %7462 = vmatprep.subr.bf16.mxu1 %v7950_v13 }
0x236b   : > { %v7463_v62 = vpack.c.bf16 %v7771_v8, %v7770_v24 }
0x236d   : > { %7464 = vmatpush3.bf16.msra.mxu1 %v7463_v62 }
0x236e   : > { %7465 = vmatprep.subr.bf16.mxu1 %v7950_v13 }
0x236f   : > { %v7878_v41 = vpop.eup %7877 }
0x2370   : > { %v4841_v22 = vsel %vm3147_vm5, %v7878_v41, 0.0 }
0x2371   : > { %4842 = vadd.xlane.f32.xlu0 %v4841_v22 }
0x2387   : > { %7773 = vrot.lane.b32.xlu0 %v8690_v23, %s7948_s13 }
0x238b   : > { %7783 = vrot.lane.b32.xlu0 %v8852_v38, %s7949_s14  ;;  %v7779_v38 = vpop.permute.xlu1 %7778 }
0x238c   : > { %v7780_v33 = vunpack.i.l.bf16 %v7779_v38 }
0x238f   : > { %7793 = vrot.lane.b32.xlu0 %v8869_v44, %s7949_s14  ;;  %v7781_v44 = vunpack.i.h.bf16 %v7779_v38  ;;  %v7789_v18 = vpop.permute.xlu1 %7788 }
0x2390   : > { %v7791_v34 = vunpack.i.h.bf16 %v7789_v18  ;;  %v7790_v10 = vunpack.i.l.bf16 %v7789_v18 }
0x2391   : > { %v7469_v32 = vpack.c.bf16 %v7781_v44, %v7780_v33 }
0x2392   : > { %v7477_v54 = vpack.c.bf16 %v7791_v34, %v7790_v10 }
0x2393   : > { %v5018_v40 = vpop.permute.xlu1 %5017 }
0x2397   : > { %v7804_v50 = vpop.permute.xlu1 %7803 }
0x2398   : > { %v7806_v60 = vunpack.i.h.bf16 %v7804_v50 }
0x23fe   : > { %v4843_v11 = vpop.xlane.xlu0 %4842 }
0x23ff   : > { %7879 = vrcp.f32 %v4843_v11 }
0x2402   : > { %v7774_v20 = vpop.permute.xlu0 %7773 }
0x2403   : > { %v7776_v37 = vunpack.i.h.bf16 %v7774_v20  ;;  %v7775_v39 = vunpack.i.l.bf16 %v7774_v20 }
0x2405   : > { %v7466_v42 = vpack.c.bf16 %v7776_v37, %v7775_v39 }
0x2406   : > { %v7784_v29 = vpop.permute.xlu0 %7783 }
0x2407   : > { %7467 = vmatpush3.bf16.msra.mxu1 %v7466_v42  ;;  %v7785_v28 = vunpack.i.l.bf16 %v7784_v29 }
0x2408   : > { %7102 = vmatprep.subr.mxu1 %v7945_v25 }
0x2409   : > { %v7880_v17 = vpop.eup %7879 }
0x240a   : > { %v4845_v52 = vmul.f32 %v7880_v17, %v7878_v41  ;;  %v7794_v12 = vpop.permute.xlu0 %7793 }
0x240b   : > { %v7796_v31 = vunpack.i.h.bf16 %v7794_v12  ;;  %v7795_v57 = vunpack.i.l.bf16 %v7794_v12 }
0x240c   : > { %7100 = vmatmul.mubr.msk.f32.vlgmr.msra.gmra.mrb[58].mxu1 %vm3147_vm5, %v4845_v52 }
0x240d   : > { %7103 = vmatpush3.msra.mxu1 %v8747_v26  ;;  %7104 = vmatprep.mubr.msk.f32.mxu1 %vm7946_vm2, %v7945_v25  ;;  %v7786_v26 = vunpack.i.h.bf16 %v7784_v29  ;;  %v7481_v35 = vpack.c.bf16 %v7796_v31, %v7795_v57  ;;  %v6236_v29 = vld [vmem:[%s8009_s30 + $0x10b] ss:$0 sm:$0xff] }
0x240e   : > { %7468 = vmatprep.subr.bf16.mxu1 %v7950_v13 }
0x240f   : > { %v7473_v36 = vpack.c.bf16 %v7786_v26, %v7785_v28 }
0x24df   : > { %v4939_v30 = vpop.f32.mrb[58].mxu1 }
0x24e0   : > { %v7101_v55 = vpop.f32.mrb[59].mxu1  ;;  %7105 = vmatmul.mubr.msk.f32.vlgmr.msra.gmra.mrb[60].mxu1 %vm579_vm3, %v4939_v30 }
0x24e1   : > { %7471 = vmatpush3.bf16.xpose.msk.msra.mxu1 %vm8364_vm4, %v7469_v32  ;;  %7123 = vmatprep.mubr.msk.f32.mxu1 %vm7946_vm2, %v7945_v25  ;;  %v6235_v32 = vld [vmem:[%s8009_s30 + $0x10a] ss:$0 sm:$0xff] }
0x24e2   : > { %7472 = vmatprep.subr.bf16.mxu1 %v7950_v13 }
0x24e9   : > { %7475 = vmatpush3.bf16.xpose.msk.msra.mxu1 %vm8364_vm4, %v7473_v36 }
0x24ea   : > { %7476 = vmatprep.subr.bf16.mxu1 %v7950_v13 }
0x24f1   : > { %7479 = vmatpush3.bf16.xpose.msk.msra.mxu1 %vm8364_vm4, %v7477_v54 }
0x24f2   : > { %7480 = vmatprep.subr.bf16.mxu1 %v7950_v13 }
0x24f9   : > { %7483 = vmatpush3.bf16.xpose.msk.msra.mxu1 %vm8364_vm4, %v7481_v35 }
0x2500   : > { %7124 = vmatmul.mubr.msk.f32.vlgmr.msra.gmra.mrb[62].mxu1 %vm579_vm3, %v5018_v40  ;;  %v5353_v40 = vld [vmem:[%s8009_s30 + $0x10c] sm:$0xff] }
0x25b3   : > { %v5012_v49 = vpop.f32.mrb[60].mxu1 }
0x25b4   : > { %v8992_v46 = vadd.f32 %v5012_v49, %v8945_v53  ;;  %v7106_v48 = vpop.f32.mrb[61].mxu1  ;;  %v5311_v53 = vadd.f32 %v5309_v47, %v8255_v27  ;;  %v5354_v49 = vld [vmem:[%s8009_s30 + $0x114] sm:$0xff]  ;;  %v5448_v47 = vld [vmem:[%s8009_s30 + $0x145] sm:$0xff] }
0x25b5   : > { %v5356_v48 = vld [vmem:[%s8009_s30 + $0x124] sm:$0xff] }
0x25b6   : > { %v5315_v16 = vsel %vm333_vm1, %v5311_v53, 0.0 }
0x25d3   : > { %v5119_v14 = vpop.f32.mrb[62].mxu1 }
0x25d4   : > { %v5120_v3 = vadd.f32 %v5119_v14, %v8848_v59  ;;  %v7125_v45 = vpop.f32.mrb[63].mxu1 }
0x25d5   : > { %v5446_v45 = vld [vmem:[%s8009_s30 + $0x135] sm:$0xff] }
0x25d6   : > { %v5123_v15 = vsel %vm3147_vm5, %v5120_v3, -inf }
0x25d7   : > { %5124 = vmax.xlane.f32.xlu0 %v5123_v15  ;;  %v5447_v15 = vld [vmem:[%s8009_s30 + $0x13d] sm:$0xff] }
0x25ed   : > { %7798 = vrot.lane.b32.xlu0 %v8660_v6, %s7949_s14 }
0x25f1   : > { %7808 = vrot.lane.b32.xlu0 %v8684_v19, %s7949_s14  ;;  %v7805_v19 = vunpack.i.l.bf16 %v7804_v50 }
0x25f3   : > { %v7488_v4 = vpack.c.bf16 %v7806_v60, %v7805_v19 }
0x2610   : > { %5316 = vadd.xlane.f32.xlu0 %v5315_v16  ;;  %v5449_v16 = vld [vmem:[%s8009_s30 + $0x14d] sm:$0xff] }
0x2664   : > { %v5125_v59 = vpop.xlane.xlu0 %5124 }
0x2665   : > { %v5126_v61 = vsub.f32 %v5120_v3, %v5125_v59  ;;  %v5445_v3 = vld [vmem:[%s8009_s30 + $0x12d] sm:$0xff]  ;;  %v5450_v59 = vld [vmem:[%s8009_s30 + $0x155] sm:$0xff] }
0x2667   : > { %v5127_v0 = vmul.f32 1.442695, %v5126_v61  ;;  %v7512_v61 = vpack.c.bf16 %v5450_v59, %v5449_v16 }
0x2668   : > { %v7799_v58 = vpop.permute.xlu0 %7798 }
0x2669   : > { %7881 = vpow2.f32 %v5127_v0  ;;  %v7801_v6 = vunpack.i.h.bf16 %v7799_v58  ;;  %v7800_v51 = vunpack.i.l.bf16 %v7799_v58 }
0x266b   : > { %v7485_v63 = vpack.c.bf16 %v7801_v6, %v7800_v51 }
0x266c   : > { %v7809_v2 = vpop.permute.xlu0 %7808 }
0x266d   : > { %7486 = vmatpush3.bf16.msra.mxu0 %v7485_v63  ;;  %v7811_v27 = vunpack.i.h.bf16 %v7809_v2  ;;  %v7810_v1 = vunpack.i.l.bf16 %v7809_v2  ;;  %v5451_v63 = vld [vmem:[%s8009_s30 + $0x15d] sm:$0xff]  ;;  %v5452_v2 = vld [vmem:[%s8009_s30 + $0x165] sm:$0xff] }
0x266e   : > { %7487 = vmatprep.subr.bf16.mxu0 %v7950_v13 }
0x266f   : > { %v7491_v9 = vpack.c.bf16 %v7811_v27, %v7810_v1  ;;  %v6237_v27 = vld [vmem:[%s8009_s30 + $0x12c] ss:$0 sm:$0xff] }
0x2671   : > { %7489 = vmatpush3.bf16.msra.mxu0 %v7488_v4  ;;  %v7516_v4 = vpack.c.bf16 %v5452_v2, %v5451_v63 }
0x2672   : > { %7490 = vmatprep.subr.bf16.mxu0 %v7950_v13 }
0x2673   : > { %v7882_v56 = vpop.eup %7881 }
0x2674   : > { %v5129_v7 = vsel %vm3147_vm5, %v7882_v56, 0.0 }
0x2675   : > { %5130 = vadd.xlane.f32.xlu1 %v5129_v7  ;;  %7492 = vmatpush3.bf16.msra.mxu0 %v7491_v9 }
0x2676   : > { %7493 = vmatprep.subr.bf16.mxu0 %v7950_v13 }
0x2686   : > { %7813 = vrot.lane.b32.xlu1 %v8690_v23, %s7949_s14 }
0x269d   : > { %v5317_v8 = vpop.xlane.xlu0 %5316 }
0x269e   : > { %v5321_v24 = vmul.f32 0.03125, %v5317_v8 }
0x26a0   : > { %v5323_v62 = vsub.f32 %v5311_v53, %v5321_v24  ;;  %v7508_v53 = vpack.c.bf16 %v5448_v47, %v5447_v15 }
0x26a2   : > { %v5325_v41 = vmul.f32 %v5323_v62, %v5323_v62 }
0x26a4   : > { %v5327_v22 = vsel %vm333_vm1, %v5325_v41, 0.0  ;;  %v6242_v41 = vld [vmem:[%s8009_s30 + $0x16d] ss:$0 sm:$0xff] }
0x26a5   : > { %5328 = vadd.xlane.f32.xlu0 %v5327_v22 }
0x2702   : > { %v5131_v11 = vpop.xlane.xlu1 %5130 }
0x2703   : > { %7883 = vrcp.f32 %v5131_v11 }
0x2706   : > { %v7814_v20 = vpop.permute.xlu1 %7813 }
0x2707   : > { %v7816_v37 = vunpack.i.h.bf16 %v7814_v20  ;;  %v7815_v39 = vunpack.i.l.bf16 %v7814_v20 }
0x2709   : > { %v7494_v42 = vpack.c.bf16 %v7816_v37, %v7815_v39 }
0x270b   : > { %7495 = vmatpush3.bf16.msra.mxu0 %v7494_v42 }
0x270c   : > { %7145 = vmatprep.subr.mxu0 %v7945_v25 }
0x270d   : > { %v7884_v13 = vpop.eup %7883 }
0x270e   : > { %v5133_v23 = vmul.f32 %v7884_v13, %v7882_v56 }
0x2710   : > { %7143 = vmatmul.mubr.msk.f32.vlgmr.msra.gmra.mrb[68].mxu0 %vm3147_vm5, %v5133_v23 }
0x2711   : > { %7146 = vmatpush3.msra.mxu0 %v8804_v43  ;;  %7147 = vmatprep.mubr.msk.f32.mxu0 %vm7946_vm2, %v7945_v25 }
0x2732   : > { %v5329_v17 = vpop.xlane.xlu0 %5328 }
0x2733   : > { %v5333_v52 = vmul.f32 0.03125, %v5329_v17 }
0x2735   : > { %v5335_v38 = vadd.f32 1e-05, %v5333_v52 }
0x2737   : > { %7885 = vrsqrt.f32 %v5335_v38 }
0x2741   : > { %v7886_v44 = vpop.eup %7885 }
0x2742   : > { %v5339_v33 = vmul.f32 %v7886_v44, %v5323_v62 }
0x2744   : > { %v5345_v30 = vmul.f32 %v6235_v32, %v5339_v33 }
0x2746   : > { %v9021_v26 = vadd.f32 %v6236_v29, %v5345_v30 }
0x27e3   : > { %v5227_v55 = vpop.f32.mrb[68].mxu0 }
0x27e4   : > { %v7144_v28 = vpop.f32.mrb[69].mxu0  ;;  %7148 = vmatmul.mubr.msk.f32.vlgmr.msra.gmra.mrb[70].mxu0 %vm579_vm3, %v5227_v55 }
0x27e5   : > { %7158 = vmatprep.mubr.msk.f32.mxu0 %vm333_vm1, %v9021_v26 }
0x28b7   : > { %v5300_v25 = vpop.f32.mrb[70].mxu0 }
0x28b8   : > { %v5304_v43 = vadd.f32 %v5300_v25, %v8992_v46  ;;  %v7149_v36 = vpop.f32.mrb[71].mxu0  ;;  %v7496_v46 = vpack.c.bf16 %v5354_v49, %v5353_v40 }
0x28ba   : > { %v5310_v18 = vadd.f32 %v9001_v21, %v5304_v43  ;;  %7497 = vmatprep.subr.bf16.mxu0 %v7496_v46  ;;  %v7504_v21 = vpack.c.bf16 %v5446_v45, %v5445_v3 }
0x28bb   : > { %7499 = vmatpush3.bf16.msra.mxu0 %v7496_v46 }
0x28bc   : > { %v5312_v34 = vadd.f32 %v5310_v18, %v8457_v5  ;;  %v5355_v5 = vld [vmem:[%s8009_s30 + $0x11c] sm:$0xff]  ;;  %7505 = vmatprep.subr.bf16.mxu1 %v7504_v21 }
0x28bd   : > { %v7500_v14 = vpack.c.bf16 %v5356_v48, %v5355_v5  ;;  %7507 = vmatpush3.bf16.msra.mxu1 %v7504_v21 }
0x28be   : > { %v5318_v10 = vsel %vm333_vm1, %v5312_v34, 0.0  ;;  %7509 = vmatprep.subr.bf16.mxu1 %v7508_v53 }
0x28bf   : > { %5319 = vadd.xlane.f32.xlu1 %v5318_v10  ;;  %7501 = vmatprep.subr.bf16.mxu0 %v7500_v14  ;;  %v6243_v10 = vld [vmem:[%s8009_s30 + $0x16e] ss:$0 sm:$0xff] }
0x28c0   : > { %7503 = vmatpush3.bf16.msra.mxu0 %v7500_v14 }
0x28c1   : > { %7511 = vmatpush3.bf16.msra.mxu1 %v7508_v53 }
0x28c2   : > { %7513 = vmatprep.subr.bf16.mxu1 %v7512_v61 }
0x28c5   : > { %7515 = vmatpush3.bf16.msra.mxu1 %v7512_v61 }
0x28c6   : > { %7517 = vmatprep.subr.bf16.mxu1 %v7516_v4 }
0x28c9   : > { %7519 = vmatpush3.bf16.msra.mxu1 %v7516_v4  ;;  %v5724_v4 = vld [vmem:[%s9173_s5 + $0x33] sm:$0xff] (!%p6245_p5) }
0x294c   : > { %v5320_v54 = vpop.xlane.xlu1 %5319 }
0x294d   : > { %v5322_v12 = vmul.f32 0.03125, %v5320_v54 }
0x294f   : > { %v5324_v31 = vsub.f32 %v5312_v34, %v5322_v12 }
0x2951   : > { %v5326_v57 = vmul.f32 %v5324_v31, %v5324_v31 }
0x2953   : > { %v5330_v35 = vsel %vm333_vm1, %v5326_v57, 0.0 }
0x2954   : > { %5331 = vadd.xlane.f32.xlu0 %v5330_v35 }
0x29e1   : > { %v5332_v0 = vpop.xlane.xlu0 %5331 }
0x29e2   : > { %v5334_v50 = vmul.f32 0.03125, %v5332_v0  ;;  %v5629_v0 = vld [vmem:[%s9173_s5 + $0x2] sm:$0xff] (!%p6245_p5) }
0x29e4   : > { %v5336_v58 = vadd.f32 1e-05, %v5334_v50  ;;  %v5630_v50 = vld [vmem:[%s9173_s5 + $0xa] sm:$0xff] (!%p6245_p5) }
0x29e6   : > { %7887 = vrsqrt.f32 %v5336_v58  ;;  %v5722_v58 = vld [vmem:[%s9173_s5 + $0x23] sm:$0xff] (!%p6245_p5) }
0x29f0   : > { %v7888_v6 = vpop.eup %7887 }
0x29f1   : > { %v5340_v51 = vmul.f32 %v7888_v6, %v5324_v31  ;;  %v6244_v31 = vld [vmem:[%s8009_s30 + $0x16f] ss:$0 sm:$0xff]  ;;  %v7520_v6 = vpack.c.bf16 (!%p6245_p5), %v5630_v50, %v5629_v0 }
0x29f3   : > { %v5346_v60 = vmul.f32 %v6235_v32, %v5340_v51  ;;  %v5723_v51 = vld [vmem:[%s9173_s5 + $0x2b] sm:$0xff] (!%p6245_p5)  ;;  %7521 = vmatprep.subr.bf16.mxu0 (!%p6245_p5), %v7520_v6 }
0x29f4   : > { %v7528_v63 = vpack.c.bf16 (!%p6245_p5), %v5723_v51, %v5722_v58 }
0x29f5   : > { %v5352_v19 = vadd.f32 %v6236_v29, %v5346_v60  ;;  %v5631_v60 = vld [vmem:[%s9173_s5 + $0x12] sm:$0xff] (!%p6245_p5) }
0x29f6   : > { %7529 = vmatprep.subr.bf16.mxu1 (!%p6245_p5), %v7528_v63 }
0x29f7   : > { %7159 = vmatmul.mubr.msk.f32.vlgmr.msra.gmra.mrb[72].mxu0 %vm333_vm1, %v5352_v19 }
0x29f8   : > { %7523 = vmatpush3.bf16.msra.mxu0 (!%p6245_p5), %v7520_v6 }
0x2aca   : > { %v7160_v1 = vpop.f32.mrb[72].mxu0 }
0x2acb   : > { %v5440_v56 = vadd.f32 %v7160_v1, %v6237_v27  ;;  %v5434_v9 = vpop.f32.mrb[73].mxu0 }
0x2acc   : > { %v5435_v7 = vadd.f32 %v6237_v27, %v5434_v9  ;;  %v5725_v27 = vld [vmem:[%s9173_s5 + $0x3b] sm:$0xff] (!%p6245_p5)  ;;  %v5809_v9 = vld [vmem:[%s9173_s5 + $0x4c] sm:$0xff] (!%p6245_p5) }
0x2acd   : > { %v5444_v24 = vmax.f32 %v5440_v56, 0.0  ;;  %v7532_v1 = vpack.c.bf16 (!%p6245_p5), %v5725_v27, %v5724_v4  ;;  %v5808_v56 = vld [vmem:[%s9173_s5 + $0x44] sm:$0xff] (!%p6245_p5) }
0x2ace   : > { %v5443_v8 = vmax.f32 %v5435_v7, 0.0  ;;  %v7536_v7 = vpack.c.bf16 (!%p6245_p5), %v5809_v9, %v5808_v56 }
0x2ad0   : > { %7177 = vmatprep.mubr.msk.f32.mxu1 %vm3147_vm5, %v5443_v8 }
0x2ad1   : > { %7178 = vmatmul.mubr.msk.f32.vlgmr.msra.gmra.mrb[64].mxu1 %vm3147_vm5, %v5444_v24 }
0x2ad2   : > { %7531 = vmatpush3.bf16.msra.mxu1 (!%p6245_p5), %v7528_v63 }
0x2ad3   : > { %7533 = vmatprep.subr.bf16.mxu1 (!%p6245_p5), %v7532_v1 }
0x2ad6   : > { %7535 = vmatpush3.bf16.msra.mxu1 (!%p6245_p5), %v7532_v1 }
0x2ba4   : > { %v7179_v62 = vpop.f32.mrb[64].mxu1 }
0x2ba5   : > { %v5535_v22 = vadd.f32 %v7179_v62, %v5352_v19  ;;  %v5525_v11 = vpop.f32.mrb[65].mxu1  ;;  %v5632_v19 = vld [vmem:[%s9173_s5 + $0x1a] sm:$0xff] (!%p6245_p5) }
0x2ba6   : > { %v5534_v20 = vadd.f32 %v5525_v11, %v9021_v26  ;;  %v7524_v2 = vpack.c.bf16 (!%p6245_p5), %v5632_v19, %v5631_v60 }
0x2ba7   : > { %v5542_v37 = vadd.f32 %v6242_v41, %v5535_v22 }
0x2ba8   : > { %v5541_v39 = vadd.f32 %v6242_v41, %v5534_v20  ;;  %7525 = vmatprep.subr.bf16.mxu0 (!%p6245_p5), %v7524_v2 }
0x2ba9   : > { %v5548_v42 = vsel %vm333_vm1, %v5542_v37, 0.0  ;;  %7527 = vmatpush3.bf16.msra.mxu0 (!%p6245_p5), %v7524_v2 }
0x2baa   : > { %5549 = vadd.xlane.f32.xlu0 %v5548_v42  ;;  %v5545_v13 = vsel %vm333_vm1, %v5541_v39, 0.0  ;;  %7537 = vmatprep.subr.bf16.mxu0 (!%p6245_p5), %v7536_v7  ;;  %v6247_v42 = vld [vmem:[%s9173_s5 + $0x1] ss:$0 sm:$0xff] (!%p6245_p5) }
0x2bab   : > { %5546 = vadd.xlane.f32.xlu1 %v5545_v13 }
0x2c37   : > { %v5550_v23 = vpop.xlane.xlu0 %5549 }
0x2c38   : > { %v5552_v17 = vmul.f32 0.03125, %v5550_v23  ;;  %v5547_v52 = vpop.xlane.xlu1 %5546 }
0x2c39   : > { %v5551_v38 = vmul.f32 0.03125, %v5547_v52 }
0x2c3a   : > { %v5554_v44 = vsub.f32 %v5542_v37, %v5552_v17  ;;  %v6246_v37 = vld [vmem:[%s9173_s5] ss:$0 sm:$0xff] (!%p6245_p5) }
0x2c3b   : > { %v5553_v33 = vsub.f32 %v5541_v39, %v5551_v38 }
0x2c3c   : > { %v5556_v32 = vmul.f32 %v5554_v44, %v5554_v44 }
0x2c3d   : > { %v5555_v30 = vmul.f32 %v5553_v33, %v5553_v33 }
0x2c3e   : > { %v5560_v29 = vsel %vm333_vm1, %v5556_v32, 0.0  ;;  %v5811_v32 = vld [vmem:[%s9173_s5 + $0x5c] sm:$0xff] (!%p6245_p5) }
0x2c3f   : > { %5561 = vadd.xlane.f32.xlu0 %v5560_v29  ;;  %v5557_v55 = vsel %vm333_vm1, %v5555_v30, 0.0  ;;  %v5900_v29 = vld [vmem:[%s9173_s5 + $0x65] sm:$0xff] (!%p6245_p5) }
0x2c40   : > { %5558 = vadd.xlane.f32.xlu1 %v5557_v55  ;;  %v5901_v55 = vld [vmem:[%s9173_s5 + $0x6d] sm:$0xff] (!%p6245_p5) }
0x2ccc   : > { %v5562_v26 = vpop.xlane.xlu0 %5561 }
0x2ccd   : > { %v5564_v28 = vmul.f32 0.03125, %v5562_v26  ;;  %v5559_v25 = vpop.xlane.xlu1 %5558  ;;  %v7544_v26 = vpack.c.bf16 (!%p6245_p5), %v5901_v55, %v5900_v29 }
0x2cce   : > { %v5563_v43 = vmul.f32 0.03125, %v5559_v25  ;;  %v6251_v25 = vld [vmem:[%s9173_s5 + $0x43] ss:$0 sm:$0xff] (!%p6245_p5) }
0x2ccf   : > { %v5566_v36 = vadd.f32 1e-05, %v5564_v28  ;;  %7545 = vmatprep.subr.bf16.mxu1 (!%p6245_p5), %v7544_v26  ;;  %v6248_v28 = vld [vmem:[%s9173_s5 + $0x22] ss:$0 sm:$0xff] (!%p6245_p5) }
0x2cd0   : > { %v5565_v18 = vadd.f32 1e-05, %v5563_v43 }
0x2cd1   : > { %7889 = vrsqrt.f32 %v5566_v36 }
0x2cd2   : > { %7891 = vrsqrt.f32 %v5565_v18 }
0x2cdb   : > { %v7890_v34 = vpop.eup %7889 }
0x2cdc   : > { %v7892_v54 = vpop.eup %7891  ;;  %v5570_v12 = vmul.f32 %v7890_v34, %v5554_v44 }
0x2cdd   : > { %v5569_v57 = vmul.f32 %v7892_v54, %v5553_v33  ;;  %5588 = sbr.rel (%p6245_p5) target bundleno = 12486 (0x30c6), region = 52  ;;  %v5810_v33 = vld [vmem:[%s9173_s5 + $0x54] sm:$0xff] (!%p6245_p5) }
0x2cde   : > { %v5576_v35 = vmul.f32 %v6243_v10, %v5570_v12  ;;  %v7540_v30 = vpack.c.bf16 (!%p6245_p5), %v5811_v32, %v5810_v33 }
0x2cdf   : > { %v5575_v40 = vmul.f32 %v6243_v10, %v5569_v57 }
0x2ce0   : > { %v5582_v49 = vadd.f32 %v6244_v31, %v5576_v35 }
0x2ce1   : > { %v5581_v46 = vadd.f32 %v6244_v31, %v5575_v40  ;;  %v5902_v40 = vld [vmem:[%s9173_s5 + $0x75] sm:$0xff] (!%p6245_p5) }
0x2ce2   : > { %5584 = vst.msk [vmem:[#allocation2 + $0x8] sm:$0xff] %vm333_vm1, %v5582_v49  ;;  %v5594_v48 = vsel (!%p6245_p5), %vm333_vm1, %v5582_v49, 0.0 }
0x2ce3   : > { %5583 = vst.msk [vmem:[#allocation2] sm:$0xff] %vm333_vm1, %v5581_v46  ;;  %v5591_v5 = vsel (!%p6245_p5), %vm333_vm1, %v5581_v46, 0.0 }
0x2ce4   : > { %5592 = vadd.xlane.f32.xlu0 %v5591_v5  ;;  %v6254_v5 = vld [vmem:[%s9173_s5 + $0x64] ss:$0 sm:$0xff] }
0x2ce8   : > { %5595 = vadd.xlane.f32.xlu0 %v5594_v48 }
0x2d71   : > { %v5593_v14 = vpop.xlane.xlu0 %5592 }
0x2d72   : > { %v5597_v3 = vmul.f32 0.03125, %v5593_v14 }
0x2d74   : > { %v5599_v45 = vsub.f32 %v5581_v46, %v5597_v3 }
0x2d75   : > { %v5596_v15 = vpop.xlane.xlu0 %5595 }
0x2d76   : > { %v5598_v21 = vmul.f32 0.03125, %v5596_v15  ;;  %v5601_v47 = vmul.f32 %v5599_v45, %v5599_v45 }
0x2d78   : > { %v5600_v53 = vsub.f32 %v5582_v49, %v5598_v21  ;;  %v5603_v16 = vsel %vm333_vm1, %v5601_v47, 0.0  ;;  %v5903_v49 = vld [vmem:[%s9173_s5 + $0x7d] sm:$0xff]  ;;  %v6257_v47 = vld [vmem:[%s9173_s5 + $0x85] ss:$0 sm:$0xff] }
0x2d79   : > { %5604 = vadd.xlane.f32.xlu1 %v5603_v16  ;;  %v7548_v46 = vpack.c.bf16 %v5903_v49, %v5902_v40 }
0x2d7a   : > { %v5602_v59 = vmul.f32 %v5600_v53, %v5600_v53 }
0x2d7c   : > { %v5606_v61 = vsel %vm333_vm1, %v5602_v59, 0.0 }
0x2d7d   : > { %5607 = vadd.xlane.f32.xlu1 %v5606_v61 }
0x2e06   : > { %v5605_v8 = vpop.xlane.xlu1 %5604 }
0x2e07   : > { %v5609_v24 = vmul.f32 0.03125, %v5605_v8 }
0x2e09   : > { %v5611_v62 = vadd.f32 1e-05, %v5609_v24 }
0x2e0a   : > { %v5608_v41 = vpop.xlane.xlu1 %5607 }
0x2e0b   : > { %7894 = vrsqrt.f32 %v5611_v62  ;;  %v5610_v22 = vmul.f32 0.03125, %v5608_v41 }
0x2e0d   : > { %v5612_v11 = vadd.f32 1e-05, %v5610_v22 }
0x2e0f   : > { %7896 = vrsqrt.f32 %v5612_v11 }
0x2e15   : > { %v7895_v20 = vpop.eup %7894 }
0x2e16   : > { %v5615_v39 = vmul.f32 %v7895_v20, %v5599_v45 }
0x2e18   : > { %v5621_v13 = vmul.f32 %v6246_v37, %v5615_v39 }
0x2e19   : > { %v7897_v23 = vpop.eup %7896 }
0x2e1a   : > { %v5616_v17 = vmul.f32 %v7897_v23, %v5600_v53  ;;  %v5627_v52 = vadd.f32 %v6247_v42, %v5621_v13 }
0x2e1c   : > { %v5622_v38 = vmul.f32 %v6246_v37, %v5616_v17  ;;  %7188 = vmatprep.mubr.msk.f32.mxu0 %vm333_vm1, %v5627_v52  ;;  %7199 = vmatprep.mubr.msk.f32.mxu1 %vm333_vm1, %v5627_v52 }
0x2e1e   : > { %v5628_v44 = vadd.f32 %v6247_v42, %v5622_v38 }
0x2e20   : > { %7189 = vmatmul.mubr.msk.f32.vlgmr.msra.gmra.mrb[0].mxu0 %vm333_vm1, %v5628_v44  ;;  %7200 = vmatmul.mubr.msk.f32.vlgmr.msra.gmra.mrb[0].mxu1 %vm333_vm1, %v5628_v44 }
0x2e21   : > { %7539 = vmatpush3.bf16.msra.mxu0 %v7536_v7  ;;  %7547 = vmatpush3.bf16.msra.mxu1 %v7544_v26 }
0x2e22   : > { %7541 = vmatprep.subr.bf16.mxu0 %v7540_v30  ;;  %7549 = vmatprep.subr.bf16.mxu1 %v7548_v46 }
0x2e25   : > { %7543 = vmatpush3.bf16.msra.mxu0 %v7540_v30  ;;  %7551 = vmatpush3.bf16.msra.mxu1 %v7548_v46 }
0x2ef3   : > { %v7190_v43 = vpop.f32.mrb[0].mxu0  ;;  %v7201_v36 = vpop.f32.mrb[0].mxu1 }
0x2ef4   : > { %v5716_v18 = vadd.f32 %v7190_v43, %v6248_v28  ;;  %v5803_v34 = vadd.f32 %v7201_v36, %v6251_v25  ;;  %v5710_v10 = vpop.f32.mrb[1].mxu0  ;;  %v5797_v54 = vpop.f32.mrb[1].mxu1 }
0x2ef5   : > { %v5711_v12 = vadd.f32 %v6248_v28, %v5710_v10  ;;  %v5798_v31 = vadd.f32 %v6251_v25, %v5797_v54 }
0x2ef6   : > { %5721 = vst.msk [vmem:[#allocation3 + $0x8] sm:$0xff] %vm5719_vm6, %v5716_v18  ;;  %v5807_v35 = vmax.f32 %v5803_v34, 0.0 }
0x2ef7   : > { %5720 = vst.msk [vmem:[#allocation3] sm:$0xff] %vm5719_vm6, %v5711_v12  ;;  %v5806_v57 = vmax.f32 %v5798_v31, 0.0 }
0x2ef9   : > { %7210 = vmatprep.mubr.msk.f32.mxu0 %vm333_vm1, %v5806_v57 }
0x2efa   : > { %7211 = vmatmul.mubr.msk.f32.vlgmr.msra.gmra.mrb[2].mxu0 %vm333_vm1, %v5807_v35 }
0x2fcd   : > { %v7212_v48 = vpop.f32.mrb[2].mxu0 }
0x2fce   : > { %v5895_v14 = vadd.f32 %v7212_v48, %v6254_v5  ;;  %v5889_v3 = vpop.f32.mrb[3].mxu0 }
0x2fcf   : > { %v5890_v45 = vadd.f32 %v6254_v5, %v5889_v3 }
0x2fd0   : > { %v5899_v21 = vmax.f32 %v5895_v14, 0.0 }
0x2fd1   : > { %v5898_v15 = vmax.f32 %v5890_v45, 0.0 }
0x2fd3   : > { %7221 = vmatprep.mubr.msk.f32.mxu1 %vm333_vm1, %v5898_v15 }
0x2fd4   : > { %7222 = vmatmul.mubr.msk.f32.vlgmr.msra.gmra.mrb[2].mxu1 %vm333_vm1, %v5899_v21 }
0x30a7   : > { %v7223_v53 = vpop.f32.mrb[2].mxu1 }
0x30a8   : > { %v5987_v16 = vadd.f32 %v7223_v53, %v6257_v47  ;;  %v5981_v59 = vpop.f32.mrb[3].mxu1 }
0x30a9   : > { %v5982_v61 = vadd.f32 %v6257_v47, %v5981_v59 }
0x30aa   : > { %v6261_v0 = vmul.f32 -1.442695, %v5987_v16 }
0x30ab   : > { %v6260_v50 = vmul.f32 -1.442695, %v5982_v61 }
0x30ac   : > { %7898 = vpow2.f32 %v6261_v0 }
0x30ad   : > { %7900 = vpow2.f32 %v6260_v50 }
0x30b6   : > { %v7899_v58 = vpop.eup %7898 }
0x30b7   : > { %v7901_v6 = vpop.eup %7900  ;;  %v5997_v51 = vadd.f32 1.0, %v7899_v58 }
0x30b8   : > { %v5996_v60 = vadd.f32 1.0, %v7901_v6 }
0x30b9   : > { %7902 = vrcp.f32 %v5997_v51 }
0x30ba   : > { %7904 = vrcp.f32 %v5996_v60 }
0x30c3   : > { %v7903_v19 = vpop.eup %7902 }
0x30c4   : > { %v7905_v63 = vpop.eup %7904  ;;  %6004 = vst.msk [vmem:[%s9175_s7 + $0x8] sm:$0xff] %vm6002_vm7, %v7903_v19 }
0x30c5   : > { %6003 = vst.msk [vmem:[%s9175_s7] sm:$0xff] %vm6002_vm7, %v7905_v63 }
0x30c6 PF: > { %p7557_p6 = scmp.eq.s32.totalorder %s8000_s25, 1  ;;  %s7951_s15 = smov [#allocation3]  }
0x30c7   : > { %s6011_s16 = sshll.u32 %s7951_s15, 4  ;;  %s6012_s16 = int_to_ptr.vmem [resolvable:$true] %s6011_s16 }
0x30c8   : > { %s7906_s17 = scalar_lea.vmem %s6012_s16, 256  ;;  %p7913_p10 = scmp.lt.s32.totalorder %s6012_s16, %s6012_s16 }
0x30c9   : > { %p7907_p7 = scmp.ne.s32.totalorder %s6012_s16, %s7906_s17  ;;  %p7914_p11 = scmp.lt.s32.totalorder %s7906_s17, %s7906_s17 }
0x30cb   : > { %p7908_p8 = pnand %p7907_p7, %p7557_p6  ;;  %p7915_p12 = por %p7914_p11, %p7913_p10 }
0x30cd   : > { %p7909_p9 = pneg %p7908_p8 }
0x30cf   : > { %p7916_p13 = pnand %p7915_p12, %p7909_p9 }
0x30d1   : > { %7919 = shalt.err (!%p7916_p13)
}
0x30d2   : > { %s7920_s20 = scalar_lea.hbm %s9174_s6, 256 }
0x30d3   : > { %p7921_p0 = scmp.ne.s32.totalorder %s9174_s6, %s7920_s20  ;;  %p7926_p3 = scmp.lt.u32.totalorder %s7920_s20, %s9174_s6 }
0x30d5   : > { %p7922_p1 = pnand %p7921_p0, %p7557_p6 }
0x30d7   : > { %p7923_p2 = pneg %p7922_p1 }
0x30d9   : > { %p7928_p4 = pnand %p7926_p3, %p7923_p2 }
0x30db   : > { %7931 = shalt.err (!%p7928_p4)
}
0x30dc   : > { %s7952_s27 = smov 128   ;;  %s7953_s28 = smov 8  }
0x30dd   : > { %7554 = dma.vmem_to_hbm [thread:$0]  (%p7557_p6), %s6012_s16, 256, %s9174_s6, [#allocation4], %s7952_s27, %s7952_s27, %s7953_s28  }
0x30de   : > { %7937 = dma.done.wait (%p7557_p6), [#allocation4], 256  }
0x30df   : > { %7939 = vsyncadd (%p7557_p6), [#allocation4], 4294967040 }
0x30e0 PF: > { %s19_s24 = sadd.s32 1, %s7942_s24  }
0x30e1   : > { %p16_p5 = scmp.ge.s32.totalorder %s19_s24, 4  }
0x30e3   :  { %18 = sbr.rel (!%p16_p5) target bundleno = 1 (0x1), region = 87 }
0x30ea   :  { %6033 = vsyncpa [#allocation4], 1 }
0x30eb   :  { %6035 = vsyncpa [#allocation4 + $0x1], 1 }

// kernel: detr_forward.2
= control target key start
LH: loop header
LB: loop body
LE: loop exit
PB: predicated region body
PF: predicated region fallthrough
CT: control target
= control target key end

     0   :  { %s9367_s18 = smov 0   ;;  %s12027_s0 = inlined_call_operand.vmem [shape: f32[128,48], index: 0, kind: input, shape index: {}]   ;;  %s12028_s1 = inlined_call_operand.vmem [shape: f32[128,32], index: 1, kind: input, shape index: {}]   ;;  %s12029_s2 = inlined_call_operand.vmem [shape: f32[2,64], index: 2, kind: input, shape index: {}]   ;;  %s12030_s3 = inlined_call_operand.vmem [shape: f32[120,64], index: 3, kind: input, shape index: {}]   ;;  %s12031_s4 = inlined_call_operand.vmem [shape: f32[2,240,64], index: 4, kind: input, shape index: {}]   ;;  %s12032_s5 = inlined_call_operand.vmem [shape: f32[128,32], index: 5, kind: output, shape index: {}]  }
   0x1 LB: > { %s6615_s19 = sadd.s32 4294967295, %s9332_s18   ;;  %p6618_p0 = scmp.ge.s32.totalorder %s9332_s18, 1  ;;  %s9332_s18 = sphi %s9367_s18, %s15_s18  }
   0x2   : > { %p182_p1 = scmp.lt.s32.totalorder %s9332_s18, 3 }
   0x4   : > { %p183_p2 = pnand %p6618_p0, %p182_p1 }
   0x6   : > { %186 = sbr.rel (%p183_p2) target bundleno = 4703 (0x125f), region = 40 }
   0xd   : > { %p205_p3 = scmp.lt.s32.totalorder %s6615_s19, 1  ;;  %p6620_p4 = scmp.ne.s32.totalorder %s6615_s19, 0 }
   0xe   : > { %v214_v0 = vld [vmem:[%s12030_s3] sm:$0xff] (!%p6620_p4)  ;;  %v215_v1 = vld [vmem:[%s12030_s3 + $0x8] sm:$0xff] (!%p6620_p4)  ;;  %v216_v2 = vld [vmem:[%s12030_s3 + $0x10] sm:$0xff] (!%p6620_p4)  ;;  %vm250_vm0 = vcmask (!%p6620_p4), 392192   ;;  %vm464_vm1 = vcmask (!%p6620_p4), 523264   ;;  %vm658_vm2 = vcmask (!%p6620_p4), 261120  }
   0xf   : > { %s206_s20 = scalar_select %p205_p3, %s6615_s19, 1 }
  0x10   : > { %213 = sbr.rel (%p6620_p4) target bundleno = 492 (0x1ec), region = 44  ;;  %v8285_v3 = vpack.c.bf16 (!%p6620_p4), %v215_v1, %v214_v0  ;;  %v217_v4 = vld [vmem:[%s12030_s3 + $0x18] sm:$0xff] (!%p6620_p4)  ;;  %v218_v6 = vld [vmem:[%s12030_s3 + $0x20] sm:$0xff] (!%p6620_p4)  ;;  %v219_v7 = vld [vmem:[%s12030_s3 + $0x28] sm:$0xff] (!%p6620_p4) }
  0x11   : > { %s8733_s21 = smul.u32 240, %s206_s20  ;;  %v8289_v5 = vpack.c.bf16 (!%p6620_p4), %v217_v4, %v216_v2  ;;  %v230_v8 = vld [vmem:[%s12027_s0] sm:$0xff] (!%p6620_p4)  ;;  %v8293_v9 = vpack.c.bf16 (!%p6620_p4), %v219_v7, %v218_v6  ;;  %v221_v10 = vld [vmem:[%s12030_s3 + $0x31] sm:$0xff] (!%p6620_p4)  ;;  %v224_v14 = vld [vmem:[%s12030_s3 + $0x49] sm:$0xff] (!%p6620_p4) }
  0x12   : > { %8286 = vmatprep.subr.bf16.mxu0 (!%p6620_p4), %v8285_v3  ;;  %7493 = vmatprep.mubr.msk.f32.mxu0 (!%p6620_p4), %vm250_vm0, %v230_v8  ;;  %v222_v11 = vld [vmem:[%s12030_s3 + $0x39] sm:$0xff] (!%p6620_p4)  ;;  %v223_v13 = vld [vmem:[%s12030_s3 + $0x41] sm:$0xff] (!%p6620_p4)  ;;  %v225_v16 = vld [vmem:[%s12030_s3 + $0x51] sm:$0xff] (!%p6620_p4) }
  0x13   : > { %s9378_s24 = scalar_lea.vmem %s12031_s4, %s8733_s21  ;;  %8288 = vmatpush3.bf16.msra.mxu0 (!%p6620_p4), %v8285_v3  ;;  %v8297_v12 = vpack.c.bf16 (!%p6620_p4), %v222_v11, %v221_v10  ;;  %v8301_v15 = vpack.c.bf16 (!%p6620_p4), %v224_v14, %v223_v13  ;;  %v226_v17 = vld [vmem:[%s12030_s3 + $0x59] sm:$0xff] (!%p6620_p4)  ;;  %v231_v18 = vld [vmem:[%s12027_s0 + $0x8] sm:$0xff] (!%p6620_p4)  ;;  %v232_v20 = vld [vmem:[%s12027_s0 + $0x10] sm:$0xff] (!%p6620_p4) }
  0x14   : > { %8290 = vmatprep.subr.bf16.mxu0 (!%p6620_p4), %v8289_v5  ;;  %v8305_v19 = vpack.c.bf16 (!%p6620_p4), %v226_v17, %v225_v16  ;;  %v233_v21 = vld [vmem:[%s12027_s0 + $0x18] sm:$0xff] (!%p6620_p4)  ;;  %v234_v22 = vld [vmem:[%s12027_s0 + $0x20] sm:$0xff] (!%p6620_p4)  ;;  %v235_v23 = vld [vmem:[%s12027_s0 + $0x28] sm:$0xff] (!%p6620_p4) }
  0x15   : > { %8298 = vmatprep.subr.bf16.mxu1 (!%p6620_p4), %v8297_v12  ;;  %v236_v24 = vld [vmem:[%s12027_s0 + $0x30] sm:$0xff] (!%p6620_p4)  ;;  %v237_v25 = vld [vmem:[%s12027_s0 + $0x38] sm:$0xff] (!%p6620_p4)  ;;  %v238_v26 = vld [vmem:[%s12027_s0 + $0x40] sm:$0xff] (!%p6620_p4) }
  0x16   : > { %8300 = vmatpush3.bf16.msra.mxu1 (!%p6620_p4), %v8297_v12  ;;  %v239_v27 = vld [vmem:[%s12027_s0 + $0x48] sm:$0xff] (!%p6620_p4)  ;;  %v240_v28 = vld [vmem:[%s12027_s0 + $0x50] sm:$0xff] (!%p6620_p4)  ;;  %v241_v29 = vld [vmem:[%s12027_s0 + $0x58] sm:$0xff] (!%p6620_p4) }
  0x17   : > { %8292 = vmatpush3.bf16.msra.mxu0 %v8289_v5  ;;  %8302 = vmatprep.subr.bf16.mxu1 %v8301_v15  ;;  %v242_v30 = vld [vmem:[%s12027_s0 + $0x60] sm:$0xff]  ;;  %v243_v31 = vld [vmem:[%s12027_s0 + $0x68] sm:$0xff]  ;;  %v244_v32 = vld [vmem:[%s12027_s0 + $0x70] sm:$0xff] }
  0x18   : > { %8294 = vmatprep.subr.bf16.mxu0 %v8293_v9  ;;  %v245_v33 = vld [vmem:[%s12027_s0 + $0x78] sm:$0xff]  ;;  %v227_v34 = vld [vmem:[%s12030_s3 + $0x61] sm:$0xff]  ;;  %v228_v35 = vld [vmem:[%s12030_s3 + $0x69] sm:$0xff] }
  0x19   : > { %v8309_v36 = vpack.c.bf16 %v228_v35, %v227_v34  ;;  %v6621_v37 = vld [vmem:[%s12030_s3 + $0x30] ss:$0 sm:$0xff] }
  0x1a   : > { %8304 = vmatpush3.bf16.msra.mxu1 %v8301_v15 }
  0x1b   : > { %8296 = vmatpush3.bf16.msra.mxu0 %v8293_v9  ;;  %8306 = vmatprep.subr.bf16.mxu1 %v8305_v19 }
  0x1e   : > { %7494 = vmatmul.mubr.msk.f32.vlgmr.msra.gmra.mrb[0].mxu0 %vm250_vm0, %v231_v18  ;;  %8308 = vmatpush3.bf16.msra.mxu1 %v8305_v19 }
  0x1f   : > { %7496 = vmatprep.mubr.msk.f32.mxu0 %vm250_vm0, %v232_v20  ;;  %8310 = vmatprep.subr.bf16.mxu1 %v8309_v36 }
  0x22   : > { %7497 = vmatmul.mubr.msk.f32.gmra.mrb[2].mxu0 %vm250_vm0, %v233_v21  ;;  %8312 = vmatpush3.bf16.msra.mxu1 %v8309_v36 }
  0x23   : > { %7499 = vmatprep.mubr.msk.f32.mxu0 %vm250_vm0, %v234_v22  ;;  %v6638_v22 = vld [vmem:[%s12030_s3 + $0x71] ss:$0 sm:$0xff] }
  0x26   : > { %7500 = vmatmul.mubr.msk.f32.gmra.mrb[4].mxu0 %vm250_vm0, %v235_v23 }
  0x27   : > { %7502 = vmatprep.mubr.msk.f32.mxu0 %vm250_vm0, %v236_v24 }
  0x2a   : > { %7503 = vmatmul.mubr.msk.f32.gmra.mrb[6].mxu0 %vm250_vm0, %v237_v25 }
  0x2b   : > { %7505 = vmatprep.mubr.msk.f32.mxu0 %vm250_vm0, %v238_v26 }
  0x2e   : > { %7506 = vmatmul.mubr.msk.f32.gmra.mrb[8].mxu0 %vm250_vm0, %v239_v27 }
  0x2f   : > { %7508 = vmatprep.mubr.msk.f32.mxu0 %vm250_vm0, %v240_v28 }
  0x32   : > { %7509 = vmatmul.mubr.msk.f32.gmra.mrb[10].mxu0 %vm250_vm0, %v241_v29 }
  0x33   : > { %7511 = vmatprep.mubr.msk.f32.mxu0 %vm250_vm0, %v242_v30 }
  0x36   : > { %7512 = vmatmul.mubr.msk.f32.gmra.mrb[12].mxu0 %vm250_vm0, %v243_v31 }
  0x37   : > { %7514 = vmatprep.mubr.msk.f32.mxu0 %vm250_vm0, %v244_v32 }
  0x3a   : > { %7515 = vmatmul.mubr.msk.f32.gmra.mrb[14].mxu0 %vm250_vm0, %v245_v33 }
  0xf1   : > { %v7495_v38 = vpop.f32.mrb[0].mxu0 }
  0xf2   : > { %v371_v39 = vadd.f32 %v7495_v38, %v6621_v37  ;;  %v365_v40 = vpop.f32.mrb[1].mxu0 }
  0xf3   : > { %v366_v41 = vadd.f32 %v6621_v37, %v365_v40 }
  0xf4   : > { %v445_v44 = vmax.f32 %v371_v39, 0.0 }
  0xf5   : > { %v444_v42 = vmax.f32 %v366_v41, 0.0  ;;  %v7498_v43 = vpop.f32.mrb[2].mxu0 }
  0xf6   : > { %v381_v45 = vadd.f32 %v7498_v43, %v6621_v37  ;;  %v375_v46 = vpop.f32.mrb[3].mxu0 }
  0xf7   : > { %v376_v47 = vadd.f32 %v6621_v37, %v375_v46  ;;  %7533 = vmatprep.mubr.msk.f32.mxu1 %vm464_vm1, %v444_v42 }
  0xf8   : > { %7534 = vmatmul.mubr.msk.f32.vlgmr.msra.gmra.mrb[0].mxu1 %vm464_vm1, %v445_v44  ;;  %v447_v50 = vmax.f32 %v381_v45, 0.0 }
  0xf9   : > { %v446_v48 = vmax.f32 %v376_v47, 0.0  ;;  %v7501_v49 = vpop.f32.mrb[4].mxu0 }
  0xfa   : > { %v391_v51 = vadd.f32 %v7501_v49, %v6621_v37  ;;  %v385_v52 = vpop.f32.mrb[5].mxu0 }
  0xfb   : > { %v386_v53 = vadd.f32 %v6621_v37, %v385_v52  ;;  %7536 = vmatprep.mubr.msk.f32.mxu1 %vm464_vm1, %v446_v48 }
  0xfc   : > { %7537 = vmatmul.mubr.msk.f32.gmra.mrb[2].mxu1 %vm464_vm1, %v447_v50  ;;  %v449_v56 = vmax.f32 %v391_v51, 0.0 }
  0xfd   : > { %v448_v54 = vmax.f32 %v386_v53, 0.0  ;;  %v7504_v55 = vpop.f32.mrb[6].mxu0 }
  0xfe   : > { %v401_v57 = vadd.f32 %v7504_v55, %v6621_v37  ;;  %v395_v58 = vpop.f32.mrb[7].mxu0 }
  0xff   : > { %v396_v59 = vadd.f32 %v6621_v37, %v395_v58  ;;  %7539 = vmatprep.mubr.msk.f32.mxu1 %vm464_vm1, %v448_v54 }
 0x100   : > { %7540 = vmatmul.mubr.msk.f32.gmra.mrb[4].mxu1 %vm464_vm1, %v449_v56  ;;  %v451_v62 = vmax.f32 %v401_v57, 0.0 }
 0x101   : > { %v450_v60 = vmax.f32 %v396_v59, 0.0  ;;  %v7507_v61 = vpop.f32.mrb[8].mxu0 }
 0x102   : > { %v411_v63 = vadd.f32 %v7507_v61, %v6621_v37  ;;  %v405_v0 = vpop.f32.mrb[9].mxu0 }
 0x103   : > { %v406_v1 = vadd.f32 %v6621_v37, %v405_v0  ;;  %7542 = vmatprep.mubr.msk.f32.mxu1 %vm464_vm1, %v450_v60 }
 0x104   : > { %7543 = vmatmul.mubr.msk.f32.gmra.mrb[6].mxu1 %vm464_vm1, %v451_v62  ;;  %v453_v4 = vmax.f32 %v411_v63, 0.0 }
 0x105   : > { %v452_v2 = vmax.f32 %v406_v1, 0.0  ;;  %v7510_v3 = vpop.f32.mrb[10].mxu0 }
 0x106   : > { %v421_v5 = vadd.f32 %v7510_v3, %v6621_v37  ;;  %v415_v6 = vpop.f32.mrb[11].mxu0 }
 0x107   : > { %v416_v7 = vadd.f32 %v6621_v37, %v415_v6  ;;  %7545 = vmatprep.mubr.msk.f32.mxu1 %vm464_vm1, %v452_v2 }
 0x108   : > { %7546 = vmatmul.mubr.msk.f32.gmra.mrb[8].mxu1 %vm464_vm1, %v453_v4  ;;  %v455_v10 = vmax.f32 %v421_v5, 0.0 }
 0x109   : > { %v454_v8 = vmax.f32 %v416_v7, 0.0  ;;  %v7513_v9 = vpop.f32.mrb[12].mxu0 }
 0x10a   : > { %v431_v11 = vadd.f32 %v7513_v9, %v6621_v37  ;;  %v425_v12 = vpop.f32.mrb[13].mxu0 }
 0x10b   : > { %v426_v13 = vadd.f32 %v6621_v37, %v425_v12  ;;  %7548 = vmatprep.mubr.msk.f32.mxu1 %vm464_vm1, %v454_v8 }
 0x10c   : > { %7549 = vmatmul.mubr.msk.f32.gmra.mrb[10].mxu1 %vm464_vm1, %v455_v10  ;;  %v457_v16 = vmax.f32 %v431_v11, 0.0 }
 0x10d   : > { %v456_v14 = vmax.f32 %v426_v13, 0.0  ;;  %v7516_v15 = vpop.f32.mrb[14].mxu0 }
 0x10e   : > { %v441_v17 = vadd.f32 %v7516_v15, %v6621_v37  ;;  %v435_v18 = vpop.f32.mrb[15].mxu0 }
 0x10f   : > { %v436_v19 = vadd.f32 %v6621_v37, %v435_v18  ;;  %7551 = vmatprep.mubr.msk.f32.mxu1 %vm464_vm1, %v456_v14 }
 0x110   : > { %7552 = vmatmul.mubr.msk.f32.gmra.mrb[12].mxu1 %vm464_vm1, %v457_v16  ;;  %v459_v21 = vmax.f32 %v441_v17, 0.0 }
 0x111   : > { %v458_v20 = vmax.f32 %v436_v19, 0.0 }
 0x113   : > { %7554 = vmatprep.mubr.msk.f32.mxu1 %vm464_vm1, %v458_v20 }
 0x114   : > { %7555 = vmatmul.mubr.msk.f32.gmra.mrb[14].mxu1 %vm464_vm1, %v459_v21 }
 0x1cb   : > { %v7535_v23 = vpop.f32.mrb[0].mxu1 }
 0x1cc   : > { %v585_v24 = vadd.f32 %v7535_v23, %v6638_v22  ;;  %v579_v25 = vpop.f32.mrb[1].mxu1 }
 0x1cd   : > { %v580_v26 = vadd.f32 %v6638_v22, %v579_v25 }
 0x1ce   : > { %660 = vst.msk [vmem:[%s12032_s5 + $0x8] sm:$0xff] %vm658_vm2, %v585_v24 }
 0x1cf   : > { %659 = vst.msk [vmem:[%s12032_s5] sm:$0xff] %vm658_vm2, %v580_v26  ;;  %v7538_v27 = vpop.f32.mrb[2].mxu1 }
 0x1d0   : > { %v595_v28 = vadd.f32 %v7538_v27, %v6638_v22  ;;  %v589_v29 = vpop.f32.mrb[3].mxu1 }
 0x1d1   : > { %v590_v30 = vadd.f32 %v6638_v22, %v589_v29 }
 0x1d2   : > { %662 = vst.msk [vmem:[%s12032_s5 + $0x18] sm:$0xff] %vm658_vm2, %v595_v28 }
 0x1d3   : > { %661 = vst.msk [vmem:[%s12032_s5 + $0x10] sm:$0xff] %vm658_vm2, %v590_v30  ;;  %v7541_v31 = vpop.f32.mrb[4].mxu1 }
 0x1d4   : > { %v605_v32 = vadd.f32 %v7541_v31, %v6638_v22  ;;  %v599_v33 = vpop.f32.mrb[5].mxu1 }
 0x1d5   : > { %v600_v34 = vadd.f32 %v6638_v22, %v599_v33 }
 0x1d6   : > { %664 = vst.msk [vmem:[%s12032_s5 + $0x28] sm:$0xff] %vm658_vm2, %v605_v32 }
 0x1d7   : > { %663 = vst.msk [vmem:[%s12032_s5 + $0x20] sm:$0xff] %vm658_vm2, %v600_v34  ;;  %v7544_v35 = vpop.f32.mrb[6].mxu1 }
 0x1d8   : > { %v615_v36 = vadd.f32 %v7544_v35, %v6638_v22  ;;  %v609_v37 = vpop.f32.mrb[7].mxu1 }
 0x1d9   : > { %v610_v38 = vadd.f32 %v6638_v22, %v609_v37 }
 0x1da   : > { %666 = vst.msk [vmem:[%s12032_s5 + $0x38] sm:$0xff] %vm658_vm2, %v615_v36 }
 0x1db   : > { %665 = vst.msk [vmem:[%s12032_s5 + $0x30] sm:$0xff] %vm658_vm2, %v610_v38  ;;  %v7547_v39 = vpop.f32.mrb[8].mxu1 }
 0x1dc   : > { %v625_v40 = vadd.f32 %v7547_v39, %v6638_v22  ;;  %v619_v41 = vpop.f32.mrb[9].mxu1 }
 0x1dd   : > { %v620_v42 = vadd.f32 %v6638_v22, %v619_v41 }
 0x1de   : > { %668 = vst.msk [vmem:[%s12032_s5 + $0x48] sm:$0xff] %vm658_vm2, %v625_v40 }
 0x1df   : > { %667 = vst.msk [vmem:[%s12032_s5 + $0x40] sm:$0xff] %vm658_vm2, %v620_v42  ;;  %v7550_v43 = vpop.f32.mrb[10].mxu1 }
 0x1e0   : > { %v635_v44 = vadd.f32 %v7550_v43, %v6638_v22  ;;  %v629_v45 = vpop.f32.mrb[11].mxu1 }
 0x1e1   : > { %v630_v46 = vadd.f32 %v6638_v22, %v629_v45 }
 0x1e2   : > { %670 = vst.msk [vmem:[%s12032_s5 + $0x58] sm:$0xff] %vm658_vm2, %v635_v44 }
 0x1e3   : > { %669 = vst.msk [vmem:[%s12032_s5 + $0x50] sm:$0xff] %vm658_vm2, %v630_v46  ;;  %v7553_v47 = vpop.f32.mrb[12].mxu1 }
 0x1e4   : > { %v645_v48 = vadd.f32 %v7553_v47, %v6638_v22  ;;  %v639_v49 = vpop.f32.mrb[13].mxu1 }
 0x1e5   : > { %v640_v50 = vadd.f32 %v6638_v22, %v639_v49 }
 0x1e6   : > { %672 = vst.msk [vmem:[%s12032_s5 + $0x68] sm:$0xff] %vm658_vm2, %v645_v48 }
 0x1e7   : > { %671 = vst.msk [vmem:[%s12032_s5 + $0x60] sm:$0xff] %vm658_vm2, %v640_v50  ;;  %v7556_v51 = vpop.f32.mrb[14].mxu1 }
 0x1e8   : > { %v655_v52 = vadd.f32 %v7556_v51, %v6638_v22  ;;  %v649_v53 = vpop.f32.mrb[15].mxu1 }
 0x1e9   : > { %v650_v54 = vadd.f32 %v6638_v22, %v649_v53 }
 0x1ea   : > { %674 = vst.msk [vmem:[%s12032_s5 + $0x78] sm:$0xff] %vm658_vm2, %v655_v52 }
 0x1eb   : > { %673 = vst.msk [vmem:[%s12032_s5 + $0x70] sm:$0xff] %vm658_vm2, %v650_v54 }
 0x1ec PF: > { %v724_v55 = vld [vmem:[%s9378_s24] sm:$0xff]  ;;  %v725_v56 = vld [vmem:[%s9378_s24 + $0x8] sm:$0xff]  ;;  %v726_v57 = vld [vmem:[%s9378_s24 + $0x10] sm:$0xff]  ;;  %vm748_vm3 = vcmask 261120   ;;  %vm1292_vm4 = vcmask 64512   ;;  %s9334_s23 = smov 120  }
 0x1ed   : > { %v8313_v58 = vpack.c.bf16 %v725_v56, %v724_v55  ;;  %v727_v59 = vld [vmem:[%s9378_s24 + $0x18] sm:$0xff]  ;;  %v9579_v60 = vld [vmem:[%s12032_s5 + $0x40] sm:$0xff]  ;;  %v730_v1 = vld [vmem:[%s9378_s24 + $0x28] sm:$0xff]  ;;  %vm1446_vm6 = vcmask 523264   ;;  %s9335_s27 = smov 112   ;;  %s9336_s28 = smov 104  }
 0x1ee   : > { %v699_v61 = vld [vmem:[%s12028_s1 + $0x40] sm:$0xff]  ;;  %v8317_v62 = vpack.c.bf16 %v727_v59, %v726_v57  ;;  %v9594_v2 = vld [vmem:[%s12032_s5 + $0x48] sm:$0xff]  ;;  %v9602_v5 = vld [vmem:[%s12032_s5 + $0x50] sm:$0xff] }
 0x1ef   : > { %v9585_v63 = vadd.f32 %v699_v61, %v9579_v60  ;;  %v729_v0 = vld [vmem:[%s9378_s24 + $0x20] sm:$0xff]  ;;  %8681 = vmatprep.subr.bf16.mxu1 %v8313_v58  ;;  %8314 = vmatprep.subr.bf16.mxu0 %v8313_v58  ;;  %v700_v3 = vld [vmem:[%s12028_s1 + $0x48] sm:$0xff]  ;;  %v701_v6 = vld [vmem:[%s12028_s1 + $0x50] sm:$0xff] }
 0x1f0   : > { %8683 = vmatpush3.bf16.msra.mxu1 %v8313_v58  ;;  %v8321_v4 = vpack.c.bf16 %v730_v1, %v729_v0  ;;  %8316 = vmatpush3.bf16.msra.mxu0 %v8313_v58  ;;  %v9610_v7 = vld [vmem:[%s12032_s5 + $0x58] sm:$0xff]  ;;  %v731_v8 = vld [vmem:[%s9378_s24 + $0x30] sm:$0xff]  ;;  %v9615_v10 = vadd.f32 %v700_v3, %v9594_v2  ;;  %v9623_v12 = vld [vmem:[%s12032_s5 + $0x60] sm:$0xff]  ;;  %v9629_v14 = vadd.f32 %v701_v6, %v9602_v5 }
 0x1f1   : > { %7577 = vmatprep.mubr.msk.f32.mxu1 %vm748_vm3, %v9585_v63  ;;  %8682 = vmatprep.subr.bf16.mxu1 %v8317_v62  ;;  %v732_v9 = vld [vmem:[%s9378_s24 + $0x38] sm:$0xff]  ;;  %v703_v13 = vld [vmem:[%s12028_s1 + $0x60] sm:$0xff]  ;;  %v9640_v17 = vld [vmem:[%s12032_s5 + $0x8] sm:$0xff] }
 0x1f2   : > { %8318 = vmatprep.subr.bf16.mxu0 %v8317_v62  ;;  %v702_v11 = vld [vmem:[%s12028_s1 + $0x58] sm:$0xff]  ;;  %v675_v15 = vld [vmem:[%s12032_s5] sm:$0xff]  ;;  %v8325_v18 = vpack.c.bf16 %v732_v9, %v731_v8  ;;  %v692_v20 = vld [vmem:[%s12028_s1 + $0x8] sm:$0xff]  ;;  %v720_v27 = vadd.f32 %v703_v13, %v9623_v12 }
 0x1f3   : > { %v691_v16 = vld [vmem:[%s12028_s1] sm:$0xff]  ;;  %v9648_v21 = vld [vmem:[%s12032_s5 + $0x10] sm:$0xff]  ;;  %v719_v23 = vadd.f32 %v702_v11, %v9610_v7  ;;  %v9659_v24 = vld [vmem:[%s12032_s5 + $0x68] sm:$0xff]  ;;  %v709_v26 = vadd.f32 %v692_v20, %v9640_v17 }
 0x1f4   : > { %8684 = vmatpush3.bf16.msra.mxu1 %v8317_v62  ;;  %v708_v19 = vadd.f32 %v691_v16, %v675_v15  ;;  %v693_v22 = vld [vmem:[%s12028_s1 + $0x10] sm:$0xff]  ;;  %8320 = vmatpush3.bf16.msra.mxu0 %v8317_v62  ;;  %v704_v25 = vld [vmem:[%s12028_s1 + $0x68] sm:$0xff]  ;;  %v9678_v30 = vld [vmem:[%s12032_s5 + $0x18] sm:$0xff] }
 0x1f5   : > { %8322 = vmatprep.subr.bf16.mxu1 %v8321_v4  ;;  %v9672_v28 = vld [vmem:[%s12032_s5 + $0x70] sm:$0xff]  ;;  %v710_v29 = vadd.f32 %v693_v22, %v9648_v21  ;;  %v694_v31 = vld [vmem:[%s12028_s1 + $0x18] sm:$0xff]  ;;  %v679_v33 = vld [vmem:[%s12032_s5 + $0x20] sm:$0xff]  ;;  %v721_v35 = vadd.f32 %v704_v25, %v9659_v24 }
 0x1f6   : > { %7565 = vmatprep.mubr.msk.f32.mxu0 %vm748_vm3, %v708_v19  ;;  %v705_v32 = vld [vmem:[%s12028_s1 + $0x70] sm:$0xff]  ;;  %v695_v34 = vld [vmem:[%s12028_s1 + $0x20] sm:$0xff]  ;;  %v9699_v36 = vld [vmem:[%s12032_s5 + $0x78] sm:$0xff]  ;;  %v711_v37 = vadd.f32 %v694_v31, %v9678_v30 }
 0x1f7   : > { %7578 = vmatmul.mubr.msk.f32.vlgmr.msra.gmra.mrb[0].mxu1 %vm748_vm3, %v9615_v10  ;;  %7566 = vmatmul.mubr.msk.f32.vlgmr.msra.gmra.mrb[0].mxu0 %vm748_vm3, %v709_v26  ;;  %v722_v38 = vadd.f32 %v705_v32, %v9672_v28  ;;  %v706_v39 = vld [vmem:[%s12028_s1 + $0x78] sm:$0xff]  ;;  %v712_v40 = vadd.f32 %v695_v34, %v679_v33  ;;  %v680_v41 = vld [vmem:[%s12032_s5 + $0x28] sm:$0xff]  ;;  %v681_v43 = vld [vmem:[%s12032_s5 + $0x30] sm:$0xff] }
 0x1f8   : > { %8324 = vmatpush3.bf16.msra.mxu1 %v8321_v4  ;;  %7580 = vmatprep.mubr.msk.f32.mxu1 %vm748_vm3, %v9629_v14  ;;  %v696_v42 = vld [vmem:[%s12028_s1 + $0x28] sm:$0xff]  ;;  %v697_v44 = vld [vmem:[%s12028_s1 + $0x30] sm:$0xff]  ;;  %v723_v45 = vadd.f32 %v706_v39, %v9699_v36  ;;  %v682_v48 = vld [vmem:[%s12032_s5 + $0x38] sm:$0xff] }
 0x1f9   : > { %8326 = vmatprep.subr.bf16.mxu1 %v8325_v18  ;;  %7568 = vmatprep.mubr.msk.f32.mxu0 %vm748_vm3, %v710_v29  ;;  %v713_v46 = vadd.f32 %v696_v42, %v680_v41  ;;  %v714_v47 = vadd.f32 %v697_v44, %v681_v43  ;;  %v698_v49 = vld [vmem:[%s12028_s1 + $0x38] sm:$0xff]  ;;  %v734_v51 = vld [vmem:[%s9378_s24 + $0x40] sm:$0xff]  ;;  %v735_v52 = vld [vmem:[%s9378_s24 + $0x48] sm:$0xff] }
 0x1fa   : > { %v715_v50 = vadd.f32 %v698_v49, %v682_v48  ;;  %v8329_v53 = vpack.c.bf16 %v735_v52, %v734_v51  ;;  %v736_v54 = vld [vmem:[%s9378_s24 + $0x50] sm:$0xff]  ;;  %v737_v55 = vld [vmem:[%s9378_s24 + $0x58] sm:$0xff]  ;;  %v9785_v57 = vld [vmem:[%s9378_s24 + $0x80] ss:$0 sm:$0xff] }
 0x1fb   : > { %7581 = vmatmul.mubr.msk.f32.gmra.mrb[2].mxu1 %vm748_vm3, %v719_v23  ;;  %7569 = vmatmul.mubr.msk.f32.gmra.mrb[2].mxu0 %vm748_vm3, %v711_v37  ;;  %v8333_v56 = vpack.c.bf16 %v737_v55, %v736_v54  ;;  %vm9823_vm5 = vmpackc.low %vm1292_vm4, %vm1292_vm4 }
 0x1fc   : > { %7583 = vmatprep.mubr.msk.f32.mxu1 %vm748_vm3, %v720_v27  ;;  %8328 = vmatpush3.bf16.msra.mxu1 %v8325_v18 }
 0x1fd   : > { %7571 = vmatprep.mubr.msk.f32.mxu0 %vm748_vm3, %v712_v40  ;;  %8330 = vmatprep.subr.bf16.mxu0 %v8329_v53 }
 0x1fe   : > { %8332 = vmatpush3.bf16.msra.mxu0 %v8329_v53 }
 0x1ff   : > { %7584 = vmatmul.mubr.msk.f32.gmra.mrb[4].mxu1 %vm748_vm3, %v721_v35  ;;  %7572 = vmatmul.mubr.msk.f32.gmra.mrb[4].mxu0 %vm748_vm3, %v713_v46 }
 0x200   : > { %7586 = vmatprep.mubr.msk.f32.mxu1 %vm748_vm3, %v722_v38  ;;  %7574 = vmatprep.mubr.msk.f32.mxu0 %vm748_vm3, %v714_v47 }
 0x201   : > { %8334 = vmatprep.subr.bf16.mxu0 %v8333_v56 }
 0x202   : > { %8336 = vmatpush3.bf16.msra.mxu0 %v8333_v56 }
 0x203   : > { %7587 = vmatmul.mubr.msk.f32.gmra.mrb[6].mxu1 %vm748_vm3, %v723_v45  ;;  %7575 = vmatmul.mubr.msk.f32.gmra.mrb[6].mxu0 %vm748_vm3, %v715_v50 }
 0x204   : > { %7597 = vmatprep.mubr.msk.f32.mxu1 %vm748_vm3, %v708_v19  ;;  %7629 = vmatprep.mubr.msk.f32.mxu0 %vm748_vm3, %v675_v15 }
 0x207   : > { %7598 = vmatmul.mubr.msk.f32.vlgmr.msra.gmra.mrb[8].mxu1 %vm748_vm3, %v709_v26  ;;  %7630 = vmatmul.mubr.msk.f32.vlgmr.msra.gmra.mrb[8].mxu0 %vm748_vm3, %v9640_v17  ;;  %v9817_v17 = vld [vmem:[%s9378_s24 + $0x81] ss:$0 sm:$0xff] }
 0x208   : > { %7600 = vmatprep.mubr.msk.f32.mxu1 %vm748_vm3, %v710_v29  ;;  %7632 = vmatprep.mubr.msk.f32.mxu0 %vm748_vm3, %v9648_v21 }
 0x20b   : > { %7601 = vmatmul.mubr.msk.f32.gmra.mrb[10].mxu1 %vm748_vm3, %v711_v37  ;;  %7633 = vmatmul.mubr.msk.f32.gmra.mrb[10].mxu0 %vm748_vm3, %v9678_v30 }
 0x20c   : > { %7603 = vmatprep.mubr.msk.f32.mxu1 %vm748_vm3, %v712_v40  ;;  %7635 = vmatprep.mubr.msk.f32.mxu0 %vm748_vm3, %v679_v33 }
 0x20f   : > { %7604 = vmatmul.mubr.msk.f32.gmra.mrb[12].mxu1 %vm748_vm3, %v713_v46  ;;  %7636 = vmatmul.mubr.msk.f32.gmra.mrb[12].mxu0 %vm748_vm3, %v680_v41 }
 0x210   : > { %7606 = vmatprep.mubr.msk.f32.mxu1 %vm748_vm3, %v714_v47  ;;  %7638 = vmatprep.mubr.msk.f32.mxu0 %vm748_vm3, %v681_v43 }
 0x213   : > { %7607 = vmatmul.mubr.msk.f32.gmra.mrb[14].mxu1 %vm748_vm3, %v715_v50  ;;  %7639 = vmatmul.mubr.msk.f32.gmra.mrb[14].mxu0 %vm748_vm3, %v682_v48 }
 0x214   : > { %7609 = vmatprep.mubr.msk.f32.mxu1 %vm748_vm3, %v9585_v63  ;;  %7641 = vmatprep.mubr.msk.f32.mxu0 %vm748_vm3, %v9579_v60 }
 0x217   : > { %7610 = vmatmul.mubr.msk.f32.gmra.mrb[16].mxu1 %vm748_vm3, %v9615_v10  ;;  %7642 = vmatmul.mubr.msk.f32.gmra.mrb[16].mxu0 %vm748_vm3, %v9594_v2 }
 0x218   : > { %7612 = vmatprep.mubr.msk.f32.mxu1 %vm748_vm3, %v9629_v14  ;;  %7644 = vmatprep.mubr.msk.f32.mxu0 %vm748_vm3, %v9602_v5 }
 0x21b   : > { %7613 = vmatmul.mubr.msk.f32.gmra.mrb[18].mxu1 %vm748_vm3, %v719_v23  ;;  %7645 = vmatmul.mubr.msk.f32.gmra.mrb[18].mxu0 %vm748_vm3, %v9610_v7 }
 0x21c   : > { %7615 = vmatprep.mubr.msk.f32.mxu1 %vm748_vm3, %v720_v27  ;;  %7647 = vmatprep.mubr.msk.f32.mxu0 %vm748_vm3, %v9623_v12 }
 0x21f   : > { %7616 = vmatmul.mubr.msk.f32.gmra.mrb[20].mxu1 %vm748_vm3, %v721_v35  ;;  %7648 = vmatmul.mubr.msk.f32.gmra.mrb[20].mxu0 %vm748_vm3, %v9659_v24 }
 0x220   : > { %7618 = vmatprep.mubr.msk.f32.mxu1 %vm748_vm3, %v722_v38  ;;  %7650 = vmatprep.mubr.msk.f32.mxu0 %vm748_vm3, %v9672_v28 }
 0x223   : > { %7619 = vmatmul.mubr.msk.f32.gmra.mrb[22].mxu1 %vm748_vm3, %v723_v45  ;;  %7651 = vmatmul.mubr.msk.f32.gmra.mrb[22].mxu0 %vm748_vm3, %v9699_v36 }
 0x2ca   : > { %v7579_v58 = vpop.f32.mrb[0].mxu1  ;;  %v7567_v62 = vpop.f32.mrb[0].mxu0 }
 0x2cb   : > { %v9788_v59 = vadd.f32 %v7579_v58, %v9785_v57  ;;  %v903_v60 = vpop.f32.mrb[1].mxu1  ;;  %v863_v63 = vpop.f32.mrb[1].mxu0  ;;  %v9867_v46 = vadd.f32 %v7567_v62, %v9785_v57 }
 0x2cc   : > { %v9791_v61 = vadd.f32 %v9785_v57, %v903_v60  ;;  %v9794_v1 = vadd.f32 %v9785_v57, %v863_v63 }
 0x2ce   : > { %v7582_v0 = vpop.f32.mrb[2].mxu1  ;;  %v7570_v5 = vpop.f32.mrb[2].mxu0  ;;  %7669 = vmatprep.mubr.msk.f32.mxu1 %vm1292_vm4, %v9794_v1 }
 0x2cf   : > { %v9797_v2 = vadd.f32 %v7582_v0, %v9785_v57  ;;  %v913_v3 = vpop.f32.mrb[3].mxu1  ;;  %v873_v6 = vpop.f32.mrb[3].mxu0  ;;  %v9881_v48 = vadd.f32 %v7570_v5, %v9785_v57 }
 0x2d0   : > { %v9800_v4 = vadd.f32 %v9785_v57, %v913_v3  ;;  %v9856_v43 = vadd.f32 %v9785_v57, %v873_v6 }
 0x2d2   : > { %v7585_v7 = vpop.f32.mrb[4].mxu1  ;;  %v7573_v11 = vpop.f32.mrb[4].mxu0 }
 0x2d3   : > { %v9805_v8 = vadd.f32 %v7585_v7, %v9785_v57  ;;  %v923_v9 = vpop.f32.mrb[5].mxu1  ;;  %v883_v12 = vpop.f32.mrb[5].mxu0  ;;  %v9891_v50 = vadd.f32 %v7573_v11, %v9785_v57  ;;  %v9941_v11 = vld [vmem:[%s9378_s24 + $0x82] ss:$0 sm:$0xff] }
 0x2d4   : > { %v9808_v10 = vadd.f32 %v9785_v57, %v923_v9  ;;  %v9870_v47 = vadd.f32 %v9785_v57, %v883_v12 }
 0x2d6   : > { %v7588_v13 = vpop.f32.mrb[6].mxu1  ;;  %v7576_v18 = vpop.f32.mrb[6].mxu0 }
 0x2d7   : > { %v9811_v14 = vadd.f32 %v7588_v13, %v9785_v57  ;;  %v933_v15 = vpop.f32.mrb[7].mxu1  ;;  %v893_v19 = vpop.f32.mrb[7].mxu0  ;;  %v9898_v51 = vadd.f32 %v7576_v18, %v9785_v57 }
 0x2d8   : > { %v9814_v16 = vadd.f32 %v9785_v57, %v933_v15  ;;  %v9884_v49 = vadd.f32 %v9785_v57, %v893_v19 }
 0x2da   : > { %v7599_v20 = vpop.f32.mrb[8].mxu1  ;;  %v7631_v12 = vpop.f32.mrb[8].mxu0 }
 0x2db   : > { %v1018_v21 = vadd.f32 %v7599_v20, %v9817_v17  ;;  %v1012_v22 = vpop.f32.mrb[9].mxu1  ;;  %v1215_v13 = vadd.f32 %v7631_v12, %v9941_v11  ;;  %v1209_v15 = vpop.f32.mrb[9].mxu0 }
 0x2dc   : > { %v1013_v23 = vadd.f32 %v9817_v17, %v1012_v22  ;;  %v1210_v18 = vadd.f32 %v9941_v11, %v1209_v15 }
 0x2de   : > { %v9827_v25 = vpack.i.bf16 %v1018_v21, %v1013_v23  ;;  %v8337_v26 = vpack.c.bf16 %v1018_v21, %v1013_v23  ;;  %v7602_v27 = vpop.f32.mrb[10].mxu1  ;;  %v9945_v19 = vpack.i.bf16 %v1215_v13, %v1210_v18 }
 0x2df   : > { %v1028_v28 = vadd.f32 %v7602_v27, %v9817_v17  ;;  %v1022_v29 = vpop.f32.mrb[11].mxu1 }
 0x2e0   : > { %8746 = vrot.lane.b32.xlu0 %v9827_v25, %s9334_s23  ;;  %8339 = vmatprep.subr.msk.bf16.mxu1 %vm9823_vm5, %v8337_v26  ;;  %v1023_v30 = vadd.f32 %v9817_v17, %v1022_v29 }
 0x2e1   : > { %8342 = vmatpush3.bf16.xpose.msk.msra.mxu1 %vm9823_vm5, %v8337_v26 }
 0x2e2   : > { %v9837_v31 = vpack.i.bf16 %v1028_v28, %v1023_v30  ;;  %v8343_v32 = vpack.c.bf16 %v1028_v28, %v1023_v30  ;;  %v7605_v33 = vpop.f32.mrb[12].mxu1 }
 0x2e3   : > { %v1038_v34 = vadd.f32 %v7605_v33, %v9817_v17  ;;  %v1032_v35 = vpop.f32.mrb[13].mxu1 }
 0x2e4   : > { %8751 = vrot.lane.b32.xlu0 %v9837_v31, %s9334_s23  ;;  %8345 = vmatprep.subr.msk.bf16.mxu1 %vm9823_vm5, %v8343_v32  ;;  %v1033_v36 = vadd.f32 %v9817_v17, %v1032_v35 }
 0x2e6   : > { %v9845_v37 = vpack.i.bf16 %v1038_v34, %v1033_v36  ;;  %v8349_v38 = vpack.c.bf16 %v1038_v34, %v1033_v36  ;;  %v7608_v39 = vpop.f32.mrb[14].mxu1 }
 0x2e7   : > { %v1048_v40 = vadd.f32 %v7608_v39, %v9817_v17  ;;  %v1042_v41 = vpop.f32.mrb[15].mxu1 }
 0x2e8   : > { %8756 = vrot.lane.b32.xlu1 %v9845_v37, %s9334_s23  ;;  %v1043_v42 = vadd.f32 %v9817_v17, %v1042_v41  ;;  %1664 = vrot.lane.b32.xlu0 %v9794_v1, %s9334_s23  ;;  %v7634_v41 = vpop.f32.mrb[10].mxu0 }
 0x2e9   : > { %8348 = vmatpush3.bf16.xpose.msk.msra.mxu1 %vm9823_vm5, %v8343_v32 }
 0x2ea   : > { %8351 = vmatprep.subr.msk.bf16.mxu1 %vm9823_vm5, %v8349_v38  ;;  %v9860_v44 = vpack.i.bf16 %v1048_v40, %v1043_v42  ;;  %v8355_v45 = vpack.c.bf16 %v1048_v40, %v1043_v42  ;;  %v7611_v52 = vpop.f32.mrb[16].mxu1  ;;  %v8361_v40 = vpack.c.bf16 %v1215_v13, %v1210_v18  ;;  %v9965_v42 = vadd.f32 %v7634_v41, %v9941_v11 }
 0x2eb   : > { %v9909_v53 = vadd.f32 %v7611_v52, %v9817_v17  ;;  %v1052_v54 = vpop.f32.mrb[17].mxu1 }
 0x2ec   : > { %8761 = vrot.lane.b32.xlu1 %v9860_v44, %s9334_s23  ;;  %1668 = vrot.lane.b32.xlu0 %v9856_v43, %s9334_s23  ;;  %v9914_v55 = vadd.f32 %v9817_v17, %v1052_v54 }
 0x2ee   : > { %v7614_v56 = vpop.f32.mrb[18].mxu1 }
 0x2ef   : > { %v9917_v57 = vadd.f32 %v7614_v56, %v9817_v17  ;;  %v1062_v58 = vpop.f32.mrb[19].mxu1 }
 0x2f0   : > { %1666 = vrot.lane.b32.xlu1 %v9867_v46, %s9334_s23  ;;  %1672 = vrot.lane.b32.xlu0 %v9870_v47, %s9334_s23  ;;  %v9920_v60 = vadd.f32 %v9817_v17, %v1062_v58 }
 0x2f1   : > { %8354 = vmatpush3.bf16.xpose.msk.msra.mxu1 %vm9823_vm5, %v8349_v38 }
 0x2f2   : > { %8357 = vmatprep.subr.msk.bf16.mxu1 %vm9823_vm5, %v8355_v45  ;;  %v7617_v62 = vpop.f32.mrb[20].mxu1  ;;  %v10011_v41 = vpack.i.bf16 %v9917_v57, %v9920_v60 }
 0x2f3   : > { %v9925_v63 = vadd.f32 %v7617_v62, %v9817_v17  ;;  %v1072_v0 = vpop.f32.mrb[21].mxu1 }
 0x2f4   : > { %1670 = vrot.lane.b32.xlu1 %v9881_v48, %s9334_s23  ;;  %1676 = vrot.lane.b32.xlu0 %v9884_v49, %s9334_s23  ;;  %v9930_v3 = vadd.f32 %v9817_v17, %v1072_v0  ;;  %12049 = vst [vmem:[#allocation2_spill] sm:$0xff] %v10011_v41 }
 0x2f6   : > { %v7620_v5 = vpop.f32.mrb[22].mxu1 }
 0x2f7   : > { %v9933_v6 = vadd.f32 %v7620_v5, %v9817_v17  ;;  %v1082_v7 = vpop.f32.mrb[23].mxu1 }
 0x2f8   : > { %1674 = vrot.lane.b32.xlu1 %v9891_v50, %s9334_s23  ;;  %v9936_v9 = vadd.f32 %v9817_v17, %v1082_v7 }
 0x2f9   : > { %8360 = vmatpush3.bf16.xpose.msk.msra.mxu1 %vm9823_vm5, %v8355_v45  ;;  %v1219_v45 = vpop.f32.mrb[11].mxu0 }
 0x2fa   : > { %8362 = vmatprep.subr.bf16.mxu1 %v8361_v40  ;;  %v9968_v52 = vadd.f32 %v9941_v11, %v1219_v45  ;;  %v7637_v54 = vpop.f32.mrb[12].mxu0  ;;  %v10015_v45 = vpack.c.bf16 %v9925_v63, %v9930_v3 }
 0x2fb   : > { %v9971_v56 = vadd.f32 %v7637_v54, %v9941_v11  ;;  %v1229_v58 = vpop.f32.mrb[13].mxu0  ;;  %v10019_v54 = vpack.i.bf16 %v9925_v63, %v9930_v3  ;;  %v1288_v3 = vlaneseq }
 0x2fc   : > { %1678 = vrot.lane.b32.xlu1 %v9898_v51, %s9334_s23  ;;  %v9974_v62 = vadd.f32 %v9941_v11, %v1229_v58  ;;  %v8365_v0 = vpack.c.bf16 %v9965_v42, %v9968_v52  ;;  %v7640_v5 = vpop.f32.mrb[14].mxu0 }
 0x2fd   : > { %v9979_v7 = vadd.f32 %v7640_v5, %v9941_v11  ;;  %v1239_v12 = vpop.f32.mrb[15].mxu0  ;;  %12050 = vst [vmem:[#allocation3_spill] sm:$0xff] %v10019_v54 }
 0x2fe   : > { %v9982_v13 = vadd.f32 %v9941_v11, %v1239_v12  ;;  %v8369_v15 = vpack.c.bf16 %v9971_v56, %v9974_v62  ;;  %v7643_v18 = vpop.f32.mrb[16].mxu0 }
 0x2ff   : > { %v1255_v58 = vadd.f32 %v7643_v18, %v9941_v11 }
 0x300   : > { %7670 = vmatmul.mubr.msk.f32.vlgmr.msra.gmra.mrb[24].mxu1 %vm1292_vm4, %v9867_v46  ;;  %8766 = vrot.lane.b32.xlu1 %v9945_v19, %s9334_s23 }
 0x301   : > { %7672 = vmatprep.mubr.msk.f32.mxu1 %vm1292_vm4, %v9856_v43  ;;  %8364 = vmatpush3.bf16.msra.mxu1 %v8361_v40  ;;  %v10007_v40 = vpack.c.bf16 %v9917_v57, %v9920_v60  ;;  %v10029_v57 = vpack.i.bf16 %v9933_v6, %v9936_v9 }
 0x302   : > { %8366 = vmatprep.subr.bf16.mxu1 %v8365_v0 }
 0x303   : > { %12051 = vst [vmem:[#allocation4_spill] sm:$0xff] %v10029_v57 }
 0x304   : > { %7673 = vmatmul.mubr.msk.f32.gmra.mrb[26].mxu1 %vm1292_vm4, %v9881_v48 }
 0x305   : > { %7675 = vmatprep.mubr.msk.f32.mxu1 %vm1292_vm4, %v9870_v47  ;;  %8368 = vmatpush3.bf16.msra.mxu1 %v8365_v0 }
 0x306   : > { %8370 = vmatprep.subr.bf16.mxu1 %v8369_v15 }
 0x308   : > { %7676 = vmatmul.mubr.msk.f32.gmra.mrb[28].mxu1 %vm1292_vm4, %v9891_v50 }
 0x309   : > { %7678 = vmatprep.mubr.msk.f32.mxu1 %vm1292_vm4, %v9884_v49  ;;  %8372 = vmatpush3.bf16.msra.mxu1 %v8369_v15 }
 0x30c   : > { %7679 = vmatmul.mubr.msk.f32.gmra.mrb[30].mxu1 %vm1292_vm4, %v9898_v51 }
 0x352   : > { %v8747_v20 = vpop.permute.xlu0 %8746 }
 0x353   : > { %v8749_v21 = vunpack.i.h.bf16 %v8747_v20  ;;  %v8748_v17 = vunpack.i.l.bf16 %v8747_v20  ;;  %v1249_v20 = vpop.f32.mrb[17].mxu0 }
 0x355   : > { %v8377_v22 = vpack.c.bf16 %v8749_v21, %v8748_v17  ;;  %v8373_v17 = vpack.c.bf16 %v9979_v7, %v9982_v13 }
 0x356   : > { %v8752_v23 = vpop.permute.xlu0 %8751 }
 0x357   : > { %8379 = vmatprep.subr.msk.bf16.mxu0 %vm9823_vm5, %v8377_v22  ;;  %v8754_v26 = vunpack.i.h.bf16 %v8752_v23  ;;  %v8753_v27 = vunpack.i.l.bf16 %v8752_v23  ;;  %8374 = vmatprep.subr.bf16.mxu1 %v8373_v17 }
 0x358   : > { %8382 = vmatpush3.bf16.xpose.msk.msra.mxu0 %vm9823_vm5, %v8377_v22  ;;  %v7646_v22 = vpop.f32.mrb[18].mxu0  ;;  %8376 = vmatpush3.bf16.msra.mxu1 %v8373_v17 }
 0x359   : > { %v8383_v28 = vpack.c.bf16 %v8754_v26, %v8753_v27  ;;  %v1259_v26 = vpop.f32.mrb[19].mxu0  ;;  %v1265_v60 = vadd.f32 %v7646_v22, %v9941_v11 }
 0x35a   : > { %v8757_v29 = vpop.permute.xlu1 %8756  ;;  %v1665_v30 = vpop.permute.xlu0 %1664  ;;  %v1260_v5 = vadd.f32 %v9941_v11, %v1259_v26 }
 0x35b   : > { %8385 = vmatprep.subr.msk.bf16.mxu0 %vm9823_vm5, %v8383_v28  ;;  %v8759_v32 = vunpack.i.h.bf16 %v8757_v29  ;;  %v8758_v33 = vunpack.i.l.bf16 %v8757_v29  ;;  %7725 = vmatprep.mubr.msk.f32.mxu0 %vm1292_vm4, %v1665_v30  ;;  %v7649_v27 = vpop.f32.mrb[20].mxu0 }
 0x35c   : > { %v1275_v12 = vadd.f32 %v7649_v27, %v9941_v11  ;;  %v10039_v18 = vpack.i.bf16 %v1265_v60, %v1260_v5 }
 0x35d   : > { %v8389_v34 = vpack.c.bf16 %v8759_v32, %v8758_v33 }
 0x35e   : > { %v8762_v35 = vpop.permute.xlu1 %8761  ;;  %v1669_v23 = vpop.permute.xlu0 %1668  ;;  %12054 = vst [vmem:[#allocation7_spill] sm:$0xff] %v10039_v18 }
 0x35f   : > { %v8764_v36 = vunpack.i.h.bf16 %v8762_v35  ;;  %v8763_v38 = vunpack.i.l.bf16 %v8762_v35 }
 0x360   : > { %8388 = vmatpush3.bf16.xpose.msk.msra.mxu0 %vm9823_vm5, %v8383_v28  ;;  %v1269_v28 = vpop.f32.mrb[21].mxu0 }
 0x361   : > { %8391 = vmatprep.subr.msk.bf16.mxu0 %vm9823_vm5, %v8389_v34  ;;  %v8395_v39 = vpack.c.bf16 %v8764_v36, %v8763_v38  ;;  %v7652_v29 = vpop.f32.mrb[22].mxu0  ;;  %v9999_v38 = vpack.c.bf16 %v9909_v53, %v9914_v55  ;;  %v1270_v15 = vadd.f32 %v9941_v11, %v1269_v28  ;;  %v707_v28 = vld [vmem:[%s12029_s2] sm:$0x3] }
 0x362   : > { %v1667_v21 = vpop.permute.xlu1 %1666  ;;  %v1279_v30 = vpop.f32.mrb[23].mxu0 }
 0x363   : > { %v1673_v33 = vpop.permute.xlu0 %1672  ;;  %v10047_v17 = vpack.i.bf16 %v1275_v12, %v1270_v15  ;;  %v10049_v22 = vpack.c.bf16 %v1275_v12, %v1270_v15 }
 0x365   : > { %12057 = vst [vmem:[#allocation10_spill] sm:$0xff] %v10047_v17  ;;  %12058 = vst [vmem:[#allocation11_spill] sm:$0xff] %v10049_v22 }
 0x366   : > { %v1671_v32 = vpop.permute.xlu1 %1670 }
 0x367   : > { %v1677_v35 = vpop.permute.xlu0 %1676 }
 0x368   : > { %8394 = vmatpush3.bf16.xpose.msk.msra.mxu0 %vm9823_vm5, %v8389_v34 }
 0x369   : > { %8397 = vmatprep.subr.msk.bf16.mxu0 %vm9823_vm5, %v8395_v39 }
 0x36a   : > { %v1675_v34 = vpop.permute.xlu1 %1674 }
 0x36e   : > { %v1679_v36 = vpop.permute.xlu1 %1678 }
 0x370   : > { %8400 = vmatpush3.bf16.xpose.msk.msra.mxu0 %vm9823_vm5, %v8395_v39  ;;  %v10003_v39 = vpack.i.bf16 %v9909_v53, %v9914_v55  ;;  %v1250_v53 = vadd.f32 %v9941_v11, %v1249_v20  ;;  %v10025_v55 = vpack.c.bf16 %v9933_v6, %v9936_v9  ;;  %v10041_v20 = vpack.c.bf16 %v1265_v60, %v1260_v5 }
 0x371   : > { %v1285_v6 = vadd.f32 %v7652_v29, %v9941_v11  ;;  %v1280_v9 = vadd.f32 %v9941_v11, %v1279_v30 }
 0x372   : > { %v10032_v0 = vpack.c.bf16 %v1255_v58, %v1250_v53  ;;  %v10035_v63 = vpack.i.bf16 %v1255_v58, %v1250_v53  ;;  %12055 = vst [vmem:[#allocation8_spill] sm:$0xff] %v10041_v20 }
 0x373   : > { %v10052_v26 = vpack.i.bf16 %v1285_v6, %v1280_v9  ;;  %v10054_v27 = vpack.c.bf16 %v1285_v6, %v1280_v9 }
 0x374   : > { %12052 = vst [vmem:[#allocation5_spill] sm:$0xff] %v10032_v0  ;;  %12053 = vst [vmem:[#allocation6_spill] sm:$0xff] %v10035_v63 }
 0x375   : > { %12059 = vst [vmem:[#allocation12_spill] sm:$0xff] %v10052_v26  ;;  %12060 = vst [vmem:[#allocation13_spill] sm:$0xff] %v10054_v27 }
 0x377   : > { %7726 = vmatmul.mubr.msk.f32.vlgmr.msra.gmra.mrb[24].mxu0 %vm1292_vm4, %v1667_v21  ;;  %v10043_v21 = vshrl.u32 %v1288_v3, 7 }
 0x378   : > { %7728 = vmatprep.mubr.msk.f32.mxu0 %vm1292_vm4, %v1669_v23 }
 0x379   : > { %12056 = vst [vmem:[#allocation9_spill] sm:$0xff] %v10043_v21  ;;  %v1290_v23 = vsub.s32 0, %v10043_v21 }
 0x37b   : > { %7729 = vmatmul.mubr.msk.f32.gmra.mrb[26].mxu0 %vm1292_vm4, %v1671_v32  ;;  %v10059_v32 = vrot.slane %v707_v28, %v1290_v23 }
 0x37c   : > { %7731 = vmatprep.mubr.msk.f32.mxu0 %vm1292_vm4, %v1673_v33 }
 0x37f   : > { %7732 = vmatmul.mubr.msk.f32.gmra.mrb[28].mxu0 %vm1292_vm4, %v1675_v34 }
 0x380   : > { %7734 = vmatprep.mubr.msk.f32.mxu0 %vm1292_vm4, %v1677_v35 }
 0x383   : > { %7735 = vmatmul.mubr.msk.f32.gmra.mrb[30].mxu0 %vm1292_vm4, %v1679_v36 }
 0x3d3   : > { %v7671_v33 = vpop.f32.mrb[24].mxu1 }
 0x3d4   : > { %v10062_v11 = vadd.f32 %v7671_v33, %v10059_v32  ;;  %v1407_v29 = vpop.f32.mrb[25].mxu1 }
 0x3d5   : > { %v10065_v30 = vadd.f32 %v1407_v29, %v10059_v32 }
 0x3d6   : > { %v1450_v34 = vsel %vm1446_vm6, %v10062_v11, -inf }
 0x3d7   : > { %1451 = vmax.xlane.f32.xlu1 %v1450_v34  ;;  %v7674_v35 = vpop.f32.mrb[26].mxu1  ;;  %v1447_v36 = vsel %vm1446_vm6, %v10065_v30, -inf }
 0x3d8   : > { %v10072_v58 = vadd.f32 %v7674_v35, %v10059_v32  ;;  %1448 = vmax.xlane.f32.xlu0 %v1447_v36  ;;  %v1417_v53 = vpop.f32.mrb[27].mxu1 }
 0x3d9   : > { %v10077_v5 = vadd.f32 %v1417_v53, %v10059_v32 }
 0x3da   : > { %v1456_v60 = vsel %vm1446_vm6, %v10072_v58, -inf }
 0x3db   : > { %v7677_v3 = vpop.f32.mrb[28].mxu1  ;;  %v1453_v28 = vsel %vm1446_vm6, %v10077_v5, -inf }
 0x3dc   : > { %v1427_v12 = vpop.f32.mrb[29].mxu1  ;;  %1457 = vmax.xlane.f32.xlu0 %v1456_v60  ;;  %v10083_v6 = vadd.f32 %v7677_v3, %v10059_v32  ;;  %v8767_v60 = vpop.permute.xlu1 %8766 }
 0x3dd   : > { %v10080_v15 = vadd.f32 %v1427_v12, %v10059_v32  ;;  %v8769_v3 = vunpack.i.h.bf16 %v8767_v60  ;;  %v8768_v12 = vunpack.i.l.bf16 %v8767_v60 }
 0x3de   : > { %v1462_v36 = vsel %vm1446_vm6, %v10083_v6, -inf }
 0x3df   : > { %v7680_v9 = vpop.f32.mrb[30].mxu1  ;;  %v1459_v23 = vsel %vm1446_vm6, %v10080_v15, -inf }
 0x3e0   : > { %v1437_v33 = vpop.f32.mrb[31].mxu1  ;;  %1460 = vmax.xlane.f32.xlu1 %v1459_v23  ;;  %1454 = vmax.xlane.f32.xlu0 %v1453_v28  ;;  %v10090_v29 = vadd.f32 %v7680_v9, %v10059_v32  ;;  %v10101_v9 = vpack.c.bf16 %v8769_v3, %v8768_v12 }
 0x3e1   : > { %v10093_v34 = vadd.f32 %v1437_v33, %v10059_v32 }
 0x3e2   : > { %v1468_v53 = vsel %vm1446_vm6, %v10090_v29, -inf  ;;  %8402 = vmatprep.subr.bf16.mxu1 %v10101_v9 }
 0x3e3   : > { %v1465_v35 = vsel %vm1446_vm6, %v10093_v34, -inf }
 0x3e4   : > { %1466 = vmax.xlane.f32.xlu1 %v1465_v35  ;;  %1463 = vmax.xlane.f32.xlu0 %v1462_v36 }
 0x3e8   : > { %1469 = vmax.xlane.f32.xlu0 %v1468_v53 }
 0x44a   : > { %v7727_v23 = vpop.f32.mrb[24].mxu0 }
 0x44b   : > { %v10105_v28 = vadd.f32 %v7727_v23, %v10059_v32  ;;  %v1794_v33 = vpop.f32.mrb[25].mxu0 }
 0x44c   : > { %v10108_v27 = vadd.f32 %v1794_v33, %v10059_v32 }
 0x44d   : > { %v1836_v35 = vsel %vm1446_vm6, %v10105_v28, -inf }
 0x44e   : > { %v7730_v36 = vpop.f32.mrb[26].mxu0  ;;  %1837 = vmax.xlane.f32.xlu0 %v1836_v35  ;;  %v1833_v53 = vsel %vm1446_vm6, %v10108_v27, -inf }
 0x44f   : > { %v10115_v60 = vadd.f32 %v7730_v36, %v10059_v32  ;;  %v1804_v3 = vpop.f32.mrb[27].mxu0  ;;  %1834 = vmax.xlane.f32.xlu1 %v1833_v53 }
 0x450   : > { %v10118_v12 = vadd.f32 %v1804_v3, %v10059_v32 }
 0x451   : > { %v1842_v23 = vsel %vm1446_vm6, %v10115_v60, -inf }
 0x452   : > { %v7733_v33 = vpop.f32.mrb[28].mxu0  ;;  %1843 = vmax.xlane.f32.xlu0 %v1842_v23  ;;  %v1839_v22 = vsel %vm1446_vm6, %v10118_v12, -inf }
 0x453   : > { %v10125_v35 = vadd.f32 %v7733_v33, %v10059_v32  ;;  %v1814_v20 = vpop.f32.mrb[29].mxu0  ;;  %1840 = vmax.xlane.f32.xlu1 %v1839_v22 }
 0x454   : > { %v10128_v36 = vadd.f32 %v1814_v20, %v10059_v32  ;;  %v10141_v20 = vpack.i.bf16 %v9971_v56, %v9974_v62 }
 0x455   : > { %v1848_v53 = vsel %vm1446_vm6, %v10125_v35, -inf }
 0x456   : > { %v7736_v3 = vpop.f32.mrb[30].mxu0  ;;  %1849 = vmax.xlane.f32.xlu0 %v1848_v53  ;;  %v1845_v18 = vsel %vm1446_vm6, %v10128_v36, -inf  ;;  %v10147_v53 = vpack.i.bf16 %v9979_v7, %v9982_v13 }
 0x457   : > { %v10135_v23 = vadd.f32 %v7736_v3, %v10059_v32  ;;  %1846 = vmax.xlane.f32.xlu1 %v1845_v18  ;;  %v1824_v26 = vpop.f32.mrb[31].mxu0  ;;  %v10153_v18 = vpack.i.bf16 %v9965_v42, %v9968_v52 }
 0x459   : > { %v1854_v33 = vsel %vm1446_vm6, %v10135_v23, -inf  ;;  %12061 = vst [vmem:[#allocation14_spill] sm:$0xff] %v10153_v18 }
 0x45a   : > { %1855 = vmax.xlane.f32.xlu0 %v1854_v33 }
 0x464   : > { %v1452_v56 = vpop.xlane.xlu1 %1451 }
 0x465   : > { %v1449_v22 = vpop.xlane.xlu0 %1448  ;;  %v1472_v33 = vsub.f32 %v10062_v11, %v1452_v56 }
 0x466   : > { %v1471_v13 = vsub.f32 %v10065_v30, %v1449_v22 }
 0x467   : > { %v1481_v63 = vmul.f32 1.442695, %v1472_v33 }
 0x468   : > { %8776 = vrot.lane.b32.xlu1 %v10141_v20, %s9334_s23  ;;  %v1479_v52 = vmul.f32 1.442695, %v1471_v13 }
 0x469   : > { %v1458_v3 = vpop.xlane.xlu0 %1457  ;;  %8985 = vpow2.f32 %v1481_v63 }
 0x46a   : > { %v1474_v7 = vsub.f32 %v10072_v58, %v1458_v3 }
 0x46c   : > { %8781 = vrot.lane.b32.xlu1 %v10147_v53, %s9334_s23  ;;  %v1485_v0 = vmul.f32 1.442695, %v1474_v7 }
 0x46d   : > { %v1455_v62 = vpop.xlane.xlu0 %1454  ;;  %v1461_v21 = vpop.xlane.xlu1 %1460 }
 0x46e   : > { %v1473_v54 = vsub.f32 %v10077_v5, %v1455_v62  ;;  %8987 = vpow2.f32 %v1485_v0  ;;  %v1475_v11 = vsub.f32 %v10080_v15, %v1461_v21  ;;  %v10168_v5 = vadd.f32 %v1824_v26, %v10059_v32 }
 0x46f   : > { %8989 = vpow2.f32 %v1479_v52 }
 0x470   : > { %8771 = vrot.lane.b32.xlu0 %v10153_v18, %s9334_s23  ;;  %v1483_v56 = vmul.f32 1.442695, %v1473_v54  ;;  %v1487_v63 = vmul.f32 1.442695, %v1475_v11 }
 0x471   : > { %v1464_v17 = vpop.xlane.xlu0 %1463  ;;  %v1467_v58 = vpop.xlane.xlu1 %1466 }
 0x472   : > { %v1476_v42 = vsub.f32 %v10083_v6, %v1464_v17  ;;  %v1477_v22 = vsub.f32 %v10093_v34, %v1467_v58 }
 0x473   : > { %v10165_v17 = vpop.eup %8985 }
 0x474   : > { %v1489_v18 = vmul.f32 1.442695, %v1476_v42  ;;  %v1491_v0 = vmul.f32 1.442695, %v1477_v22 }
 0x475   : > { %v1470_v57 = vpop.xlane.xlu0 %1469 }
 0x476   : > { %v1478_v41 = vsub.f32 %v10090_v29, %v1470_v57  ;;  %8991 = vpow2.f32 %v1489_v18  ;;  %v1498_v57 = vsel %vm1446_vm6, %v10165_v17, 0.0 }
 0x477   : > { %8993 = vpow2.f32 %v1483_v56 }
 0x478   : > { %v1493_v30 = vmul.f32 1.442695, %v1478_v41  ;;  %v10172_v21 = vpop.eup %8987  ;;  %v1851_v41 = vsel %vm1446_vm6, %v10168_v5, -inf }
 0x479   : > { %v10176_v54 = vpop.eup %8989  ;;  %v1504_v26 = vsel %vm1446_vm6, %v10172_v21, 0.0 }
 0x47a   : > { %8995 = vpow2.f32 %v1493_v30  ;;  %v1495_v6 = vsel %vm1446_vm6, %v10176_v54, 0.0 }
 0x47b   : > { %8997 = vpow2.f32 %v1487_v63 }
 0x47c   : > { %8999 = vpow2.f32 %v1491_v0 }
 0x480   : > { %v10180_v15 = vpop.eup %8991 }
 0x481   : > { %v10184_v29 = vpop.eup %8993  ;;  %v1510_v34 = vsel %vm1446_vm6, %v10180_v15, 0.0 }
 0x482   : > { %v1501_v3 = vsel %vm1446_vm6, %v10184_v29, 0.0 }
 0x484   : > { %v10188_v18 = vpop.eup %8995 }
 0x485   : > { %v10192_v62 = vpop.eup %8997  ;;  %v1516_v33 = vsel %vm1446_vm6, %v10188_v18, 0.0 }
 0x486   : > { %v1507_v7 = vsel %vm1446_vm6, %v10192_v62, 0.0  ;;  %v10198_v13 = vpop.eup %8999 }
 0x487   : > { %v1513_v42 = vsel %vm1446_vm6, %v10198_v13, 0.0 }
 0x48f   : > { %1499 = vadd.xlane.f32.xlu0 %v1498_v57 }
 0x490   : > { %1852 = vmax.xlane.f32.xlu1 %v1851_v41 }
 0x493   : > { %1505 = vadd.xlane.f32.xlu0 %v1504_v26 }
 0x494   : > { %1496 = vadd.xlane.f32.xlu1 %v1495_v6 }
 0x497   : > { %1511 = vadd.xlane.f32.xlu0 %v1510_v34 }
 0x498   : > { %1502 = vadd.xlane.f32.xlu1 %v1501_v3 }
 0x49b   : > { %1517 = vadd.xlane.f32.xlu0 %v1516_v33 }
 0x49c   : > { %1508 = vadd.xlane.f32.xlu1 %v1507_v7 }
 0x4a0   : > { %1514 = vadd.xlane.f32.xlu1 %v1513_v42 }
 0x4db   : > { %v1838_v52 = vpop.xlane.xlu0 %1837 }
 0x4dc   : > { %v1858_v11 = vsub.f32 %v10105_v28, %v1838_v52  ;;  %v1835_v56 = vpop.xlane.xlu1 %1834 }
 0x4dd   : > { %v1857_v58 = vsub.f32 %v10108_v27, %v1835_v56 }
 0x4de   : > { %v1867_v30 = vmul.f32 1.442695, %v1858_v11 }
 0x4df   : > { %v1865_v63 = vmul.f32 1.442695, %v1857_v58  ;;  %v1844_v22 = vpop.xlane.xlu0 %1843 }
 0x4e0   : > { %9001 = vpow2.f32 %v1867_v30  ;;  %v1841_v0 = vpop.xlane.xlu1 %1840 }
 0x4e1   : > { %9003 = vpow2.f32 %v1865_v63  ;;  %v1859_v57 = vsub.f32 %v10118_v12, %v1841_v0 }
 0x4e3   : > { %v1869_v41 = vmul.f32 1.442695, %v1859_v57  ;;  %v1850_v26 = vpop.xlane.xlu0 %1849 }
 0x4e4   : > { %v1862_v6 = vsub.f32 %v10125_v35, %v1850_v26  ;;  %v1847_v34 = vpop.xlane.xlu1 %1846 }
 0x4e5   : > { %9005 = vpow2.f32 %v1869_v41  ;;  %v1861_v3 = vsub.f32 %v10128_v36, %v1847_v34  ;;  %v1860_v41 = vsub.f32 %v10115_v60, %v1844_v22 }
 0x4e6   : > { %v1875_v28 = vmul.f32 1.442695, %v1862_v6 }
 0x4e7   : > { %v1873_v33 = vmul.f32 1.442695, %v1861_v3  ;;  %v1856_v7 = vpop.xlane.xlu0 %1855  ;;  %v1871_v26 = vmul.f32 1.442695, %v1860_v41 }
 0x4e8   : > { %9007 = vpow2.f32 %v1875_v28  ;;  %v1864_v27 = vsub.f32 %v10135_v23, %v1856_v7  ;;  %v8777_v6 = vpop.permute.xlu1 %8776 }
 0x4e9   : > { %9009 = vpow2.f32 %v1873_v33 }
 0x4ea   : > { %v10208_v42 = vpop.eup %9001  ;;  %v1879_v12 = vmul.f32 1.442695, %v1864_v27 }
 0x4eb   : > { %v10210_v52 = vpop.eup %9003  ;;  %v1884_v11 = vsel %vm1446_vm6, %v10208_v42, 0.0  ;;  %v8772_v34 = vpop.permute.xlu0 %8771 }
 0x4ec   : > { %1885 = vadd.xlane.f32.xlu0 %v1884_v11  ;;  %v1881_v35 = vsel %vm1446_vm6, %v10210_v52, 0.0  ;;  %9011 = vpow2.f32 %v1879_v12  ;;  %v8782_v3 = vpop.permute.xlu1 %8781 }
 0x4ed   : > { %1882 = vadd.xlane.f32.xlu1 %v1881_v35  ;;  %9013 = vpow2.f32 %v1871_v26  ;;  %v8774_v26 = vunpack.i.h.bf16 %v8772_v34 }
 0x4ef   : > { %v10216_v36 = vpop.eup %9005 }
 0x4f0   : > { %v1887_v23 = vsel %vm1446_vm6, %v10216_v36, 0.0 }
 0x4f1   : > { %1888 = vadd.xlane.f32.xlu0 %v1887_v23 }
 0x4f2   : > { %v10220_v56 = vpop.eup %9007 }
 0x4f3   : > { %v1896_v58 = vsel %vm1446_vm6, %v10220_v56, 0.0  ;;  %v10224_v30 = vpop.eup %9009 }
 0x4f4   : > { %v1893_v63 = vsel %vm1446_vm6, %v10224_v30, 0.0 }
 0x4f5   : > { %1897 = vadd.xlane.f32.xlu0 %v1896_v58 }
 0x4f6   : > { %v10228_v0 = vpop.eup %9011 }
 0x4f7   : > { %v1902_v57 = vsel %vm1446_vm6, %v10228_v0, 0.0  ;;  %v10235_v7 = vpop.eup %9013 }
 0x4f8   : > { %v1890_v23 = vsel %vm1446_vm6, %v10235_v7, 0.0 }
 0x4f9   : > { %1894 = vadd.xlane.f32.xlu0 %v1893_v63 }
 0x4fd   : > { %1903 = vadd.xlane.f32.xlu0 %v1902_v57 }
 0x4fe   : > { %8786 = vrot.lane.b32.xlu1 %v9827_v25, %s9335_s27 }
 0x51c   : > { %v1500_v28 = vpop.xlane.xlu0 %1499 }
 0x51d   : > { %v1853_v33 = vpop.xlane.xlu1 %1852  ;;  %9015 = vrcp.f32 %v1500_v28  ;;  %v8773_v28 = vunpack.i.l.bf16 %v8772_v34 }
 0x51e   : > { %v1863_v27 = vsub.f32 %v10168_v5, %v1853_v33 }
 0x51f   : > { %v8405_v34 = vpack.c.bf16 %v8774_v26, %v8773_v28 }
 0x520   : > { %v1877_v12 = vmul.f32 1.442695, %v1863_v27  ;;  %v1506_v11 = vpop.xlane.xlu0 %1505 }
 0x521   : > { %v1497_v35 = vpop.xlane.xlu1 %1496 }
 0x522   : > { %9017 = vpow2.f32 %v1877_v12  ;;  %1891 = vadd.xlane.f32.xlu1 %v1890_v23 }
 0x523   : > { %9019 = vrcp.f32 %v1497_v35 }
 0x524   : > { %v1512_v60 = vpop.xlane.xlu0 %1511  ;;  %9021 = vrcp.f32 %v1506_v11 }
 0x525   : > { %v1503_v22 = vpop.xlane.xlu1 %1502 }
 0x526   : > { %9023 = vrcp.f32 %v1503_v22  ;;  %v8778_v22 = vunpack.i.l.bf16 %v8777_v6 }
 0x527   : > { %9025 = vrcp.f32 %v1512_v60  ;;  %v9016_v57 = vpop.eup %9015  ;;  %v8779_v60 = vunpack.i.h.bf16 %v8777_v6 }
 0x528   : > { %v1518_v63 = vpop.xlane.xlu0 %1517  ;;  %v1528_v35 = vmul.f32 %v9016_v57, %v10165_v17  ;;  %v8784_v57 = vunpack.i.h.bf16 %v8782_v3 }
 0x529   : > { %v1509_v58 = vpop.xlane.xlu1 %1508  ;;  %v8409_v6 = vpack.c.bf16 %v8779_v60, %v8778_v22 }
 0x52a   : > { %9027 = vrcp.f32 %v1509_v58 }
 0x52b   : > { %9029 = vrcp.f32 %v1518_v63 }
 0x52c   : > { %v10240_v5 = vpop.eup %9017 }
 0x52d   : > { %v9020_v41 = vpop.eup %9019  ;;  %v1515_v33 = vpop.xlane.xlu1 %1514  ;;  %v1899_v27 = vsel %vm1446_vm6, %v10240_v5, 0.0 }
 0x52e   : > { %9031 = vrcp.f32 %v1515_v33  ;;  %1900 = vadd.xlane.f32.xlu0 %v1899_v27  ;;  %v1527_v12 = vmul.f32 %v9020_v41, %v10176_v54  ;;  %v9022_v11 = vpop.eup %9021  ;;  %v8783_v41 = vunpack.i.l.bf16 %v8782_v3 }
 0x52f   : > { %v1530_v54 = vmul.f32 %v9022_v11, %v10172_v21 }
 0x530   : > { %v9024_v23 = vpop.eup %9023  ;;  %7697 = vmatprep.mubr.msk.f32.mxu1 %vm1446_vm6, %v1527_v12  ;;  %v8413_v21 = vpack.c.bf16 %v8784_v57, %v8783_v41 }
 0x531   : > { %7698 = vmatmul.mubr.msk.f32.vlgmr.msra.gmra.mrb[32].mxu1 %vm1446_vm6, %v1528_v35  ;;  %v1529_v58 = vmul.f32 %v9024_v23, %v10184_v29  ;;  %v9026_v63 = vpop.eup %9025 }
 0x532   : > { %8404 = vmatpush3.bf16.msra.mxu1 %v10101_v9  ;;  %v1532_v9 = vmul.f32 %v9026_v63, %v10180_v15 }
 0x533   : > { %8406 = vmatprep.subr.bf16.mxu1 %v8405_v34  ;;  %8796 = vrot.lane.b32.xlu1 %v9845_v37, %s9335_s27 }
 0x534   : > { %v9028_v17 = vpop.eup %9027  ;;  %7700 = vmatprep.mubr.msk.f32.mxu1 %vm1446_vm6, %v1529_v58 }
 0x535   : > { %7701 = vmatmul.mubr.msk.f32.gmra.mrb[34].mxu1 %vm1446_vm6, %v1530_v54  ;;  %v1531_v26 = vmul.f32 %v9028_v17, %v10192_v62  ;;  %v9030_v29 = vpop.eup %9029 }
 0x536   : > { %8408 = vmatpush3.bf16.msra.mxu1 %v8405_v34  ;;  %v1534_v62 = vmul.f32 %v9030_v29, %v10188_v18 }
 0x537   : > { %8410 = vmatprep.subr.bf16.mxu1 %v8409_v6  ;;  %8801 = vrot.lane.b32.xlu1 %v9860_v44, %s9335_s27 }
 0x538   : > { %v9032_v28 = vpop.eup %9031  ;;  %7703 = vmatprep.mubr.msk.f32.mxu1 %vm1446_vm6, %v1531_v26 }
 0x539   : > { %7704 = vmatmul.mubr.msk.f32.gmra.mrb[36].mxu1 %vm1446_vm6, %v1532_v9  ;;  %v1533_v3 = vmul.f32 %v9032_v28, %v10198_v13 }
 0x53a   : > { %8412 = vmatpush3.bf16.msra.mxu1 %v8409_v6 }
 0x53b   : > { %8414 = vmatprep.subr.bf16.mxu1 %v8413_v21  ;;  %2340 = vrot.lane.b32.xlu1 %v9794_v1, %s9335_s27 }
 0x53c   : > { %7706 = vmatprep.mubr.msk.f32.mxu1 %vm1446_vm6, %v1533_v3 }
 0x53d   : > { %7707 = vmatmul.mubr.msk.f32.gmra.mrb[38].mxu1 %vm1446_vm6, %v1534_v62 }
 0x53e   : > { %8416 = vmatpush3.bf16.msra.mxu1 %v8413_v21 }
 0x53f   : > { %2342 = vrot.lane.b32.xlu1 %v9867_v46, %s9335_s27 }
 0x543   : > { %2346 = vrot.lane.b32.xlu1 %v9881_v48, %s9335_s27 }
 0x544   : > { %8791 = vrot.lane.b32.xlu0 %v9837_v31, %s9335_s27 }
 0x547   : > { %2350 = vrot.lane.b32.xlu1 %v9891_v50, %s9335_s27 }
 0x548   : > { %2344 = vrot.lane.b32.xlu0 %v9856_v43, %s9335_s27 }
 0x54b   : > { %2354 = vrot.lane.b32.xlu1 %v9898_v51, %s9335_s27 }
 0x54c   : > { %2348 = vrot.lane.b32.xlu0 %v9870_v47, %s9335_s27 }
 0x54f   : > { %8811 = vrot.lane.b32.xlu1 %v9837_v31, %s9336_s28 }
 0x550   : > { %2352 = vrot.lane.b32.xlu0 %v9884_v49, %s9335_s27 }
 0x553   : > { %8821 = vrot.lane.b32.xlu1 %v9860_v44, %s9336_s28 }
 0x554   : > { %8806 = vrot.lane.b32.xlu0 %v9827_v25, %s9336_s28 }
 0x557   : > { %2889 = vrot.lane.b32.xlu1 %v9867_v46, %s9336_s28 }
 0x558   : > { %8816 = vrot.lane.b32.xlu0 %v9845_v37, %s9336_s28 }
 0x55b   : > { %2893 = vrot.lane.b32.xlu1 %v9881_v48, %s9336_s28 }
 0x55c   : > { %2887 = vrot.lane.b32.xlu0 %v9794_v1, %s9336_s28 }
 0x55f   : > { %2897 = vrot.lane.b32.xlu1 %v9891_v50, %s9336_s28 }
 0x560   : > { %2891 = vrot.lane.b32.xlu0 %v9856_v43, %s9336_s28 }
 0x563   : > { %2901 = vrot.lane.b32.xlu1 %v9898_v51, %s9336_s28 }
 0x564   : > { %2895 = vrot.lane.b32.xlu0 %v9870_v47, %s9336_s28 }
 0x568   : > { %2899 = vrot.lane.b32.xlu0 %v9884_v49, %s9336_s28 }
 0x579   : > { %v1886_v25 = vpop.xlane.xlu0 %1885 }
 0x57a   : > { %9033 = vrcp.f32 %v1886_v25  ;;  %v1883_v31 = vpop.xlane.xlu1 %1882 }
 0x57b   : > { %9035 = vrcp.f32 %v1883_v31 }
 0x57e   : > { %v8787_v1 = vpop.permute.xlu1 %8786  ;;  %v1889_v37 = vpop.xlane.xlu0 %1888 }
 0x57f   : > { %v8789_v44 = vunpack.i.h.bf16 %v8787_v1  ;;  %v8788_v46 = vunpack.i.l.bf16 %v8787_v1  ;;  %9037 = vrcp.f32 %v1889_v37 }
 0x581   : > { %v8417_v48 = vpack.c.bf16 %v8789_v44, %v8788_v46 }
 0x582   : > { %v1898_v18 = vpop.xlane.xlu0 %1897 }
 0x583   : > { %8419 = vmatprep.subr.msk.bf16.mxu1 %vm9823_vm5, %v8417_v48 }
 0x584   : > { %v9034_v43 = vpop.eup %9033 }
 0x585   : > { %v9036_v50 = vpop.eup %9035  ;;  %v1914_v51 = vmul.f32 %v9034_v43, %v10208_v42 }
 0x586   : > { %v1913_v47 = vmul.f32 %v9036_v50, %v10210_v52  ;;  %v1895_v13 = vpop.xlane.xlu0 %1894 }
 0x587   : > { %9039 = vrcp.f32 %v1895_v13 }
 0x588   : > { %7753 = vmatprep.mubr.msk.f32.mxu1 %vm1446_vm6, %v1913_v47 }
 0x589   : > { %v9038_v49 = vpop.eup %9037  ;;  %7754 = vmatmul.mubr.msk.f32.vlgmr.msra.gmra.mrb[40].mxu1 %vm1446_vm6, %v1914_v51 }
 0x58a   : > { %8422 = vmatpush3.bf16.xpose.msk.msra.mxu1 %vm9823_vm5, %v8417_v48  ;;  %v1915_v15 = vmul.f32 %v9038_v49, %v10216_v36  ;;  %v1904_v42 = vpop.xlane.xlu0 %1903  ;;  %v740_v49 = vld [vmem:[%s9378_s24 + $0x68] sm:$0xff] }
 0x58b   : > { %7765 = vmatprep.subr.mxu0 %v740_v49 }
 0x58c   : > { %7756 = vmatprep.mubr.msk.f32.mxu1 %vm1446_vm6, %v1915_v15  ;;  %7766 = vmatpush3.msra.mxu0 %v740_v49 }
 0x591   : > { %v9040_v12 = vpop.eup %9039 }
 0x592   : > { %v1917_v36 = vmul.f32 %v9040_v12, %v10224_v30 }
 0x5af   : > { %v1892_v33 = vpop.xlane.xlu1 %1891 }
 0x5b0   : > { %9041 = vrcp.f32 %v1892_v33 }
 0x5b1   : > { %9043 = vrcp.f32 %v1898_v18 }
 0x5b2   : > { %9045 = vrcp.f32 %v1904_v42 }
 0x5b3   : > { %v8797_v52 = vpop.permute.xlu1 %8796 }
 0x5b4   : > { %v8799_v54 = vunpack.i.h.bf16 %v8797_v52  ;;  %v8798_v17 = vunpack.i.l.bf16 %v8797_v52 }
 0x5b6   : > { %v8429_v29 = vpack.c.bf16 %v8799_v54, %v8798_v17 }
 0x5b7   : > { %v8802_v27 = vpop.permute.xlu1 %8801 }
 0x5b8   : > { %v8804_v21 = vunpack.i.h.bf16 %v8802_v27  ;;  %v8803_v3 = vunpack.i.l.bf16 %v8802_v27 }
 0x5ba   : > { %v9042_v11 = vpop.eup %9041  ;;  %v8435_v1 = vpack.c.bf16 %v8804_v21, %v8803_v3 }
 0x5bb   : > { %v2341_v35 = vpop.permute.xlu1 %2340  ;;  %v1901_v23 = vpop.xlane.xlu0 %1900  ;;  %v1916_v60 = vmul.f32 %v9042_v11, %v10235_v7 }
 0x5bc   : > { %v9044_v22 = vpop.eup %9043  ;;  %9047 = vrcp.f32 %v1901_v23 }
 0x5bd   : > { %7757 = vmatmul.mubr.msk.f32.gmra.mrb[42].mxu1 %vm1446_vm6, %v1916_v60  ;;  %v1918_v63 = vmul.f32 %v9044_v22, %v10220_v56  ;;  %v9046_v30 = vpop.eup %9045 }
 0x5be   : > { %7759 = vmatprep.mubr.msk.f32.mxu1 %vm1446_vm6, %v1917_v36  ;;  %v1920_v62 = vmul.f32 %v9046_v30, %v10228_v0 }
 0x5bf   : > { %v2343_v34 = vpop.permute.xlu1 %2342  ;;  %v8792_v58 = vpop.permute.xlu0 %8791 }
 0x5c0   : > { %v8794_v57 = vunpack.i.h.bf16 %v8792_v58  ;;  %v8793_v41 = vunpack.i.l.bf16 %v8792_v58 }
 0x5c1   : > { %7760 = vmatmul.mubr.msk.f32.gmra.mrb[44].mxu1 %vm1446_vm6, %v1918_v63 }
 0x5c2   : > { %v8423_v6 = vpack.c.bf16 %v8794_v57, %v8793_v41 }
 0x5c3   : > { %v2347_v7 = vpop.permute.xlu1 %2346  ;;  %v2345_v26 = vpop.permute.xlu0 %2344 }
 0x5c4   : > { %8425 = vmatprep.subr.msk.bf16.mxu1 %vm9823_vm5, %v8423_v6 }
 0x5c5   : > { %8428 = vmatpush3.bf16.xpose.msk.msra.mxu1 %vm9823_vm5, %v8423_v6 }
 0x5c6   : > { %v9048_v9 = vpop.eup %9047  ;;  %8431 = vmatprep.subr.msk.bf16.mxu1 %vm9823_vm5, %v8429_v29 }
 0x5c7   : > { %v2349_v56 = vpop.permute.xlu0 %2348  ;;  %v1919_v28 = vmul.f32 %v9048_v9, %v10240_v5  ;;  %v2351_v25 = vpop.permute.xlu1 %2350 }
 0x5c9   : > { %7762 = vmatprep.mubr.msk.f32.mxu1 %vm1446_vm6, %v1919_v28 }
 0x5ca   : > { %7763 = vmatmul.mubr.msk.f32.gmra.mrb[46].mxu1 %vm1446_vm6, %v1920_v62 }
 0x5cb   : > { %v2353_v31 = vpop.permute.xlu0 %2352  ;;  %7809 = vmatprep.mubr.msk.f32.mxu1 %vm1292_vm4, %v2341_v35  ;;  %v2355_v5 = vpop.permute.xlu1 %2354 }
 0x5cd   : > { %8434 = vmatpush3.bf16.xpose.msk.msra.mxu1 %vm9823_vm5, %v8429_v29 }
 0x5ce   : > { %8437 = vmatprep.subr.msk.bf16.mxu1 %vm9823_vm5, %v8435_v1 }
 0x5cf   : > { %v8807_v37 = vpop.permute.xlu0 %8806  ;;  %v8812_v48 = vpop.permute.xlu1 %8811 }
 0x5d0   : > { %v8809_v44 = vunpack.i.h.bf16 %v8807_v37  ;;  %v8808_v0 = vunpack.i.l.bf16 %v8807_v37  ;;  %v8814_v43 = vunpack.i.h.bf16 %v8812_v48  ;;  %v8813_v50 = vunpack.i.l.bf16 %v8812_v48 }
 0x5d2   : > { %v8457_v46 = vpack.c.bf16 %v8809_v44, %v8808_v0  ;;  %v8463_v47 = vpack.c.bf16 %v8814_v43, %v8813_v50 }
 0x5d3   : > { %v8817_v51 = vpop.permute.xlu0 %8816  ;;  %v8822_v33 = vpop.permute.xlu1 %8821 }
 0x5d4   : > { %v8819_v15 = vunpack.i.h.bf16 %v8817_v51  ;;  %v8818_v18 = vunpack.i.l.bf16 %v8817_v51  ;;  %v8824_v52 = vunpack.i.h.bf16 %v8822_v33  ;;  %v8823_v42 = vunpack.i.l.bf16 %v8822_v33 }
 0x5d5   : > { %8440 = vmatpush3.bf16.xpose.msk.msra.mxu1 %vm9823_vm5, %v8435_v1 }
 0x5d6   : > { %8459 = vmatprep.subr.msk.bf16.mxu1 %vm9823_vm5, %v8457_v46  ;;  %v8469_v13 = vpack.c.bf16 %v8819_v15, %v8818_v18  ;;  %v8475_v12 = vpack.c.bf16 %v8824_v52, %v8823_v42 }
 0x5d7   : > { %v2888_v27 = vpop.permute.xlu0 %2887  ;;  %v2890_v11 = vpop.permute.xlu1 %2889 }
 0x5db   : > { %v2892_v35 = vpop.permute.xlu0 %2891  ;;  %v2894_v23 = vpop.permute.xlu1 %2893 }
 0x5dc   : > { %7810 = vmatmul.mubr.msk.f32.vlgmr.msra.gmra.mrb[48].mxu1 %vm1292_vm4, %v2343_v34 }
 0x5dd   : > { %7812 = vmatprep.mubr.msk.f32.mxu1 %vm1292_vm4, %v2345_v26  ;;  %8462 = vmatpush3.bf16.xpose.msk.msra.mxu1 %vm9823_vm5, %v8457_v46 }
 0x5de   : > { %8465 = vmatprep.subr.msk.bf16.mxu1 %vm9823_vm5, %v8463_v47 }
 0x5df   : > { %v2896_v60 = vpop.permute.xlu0 %2895  ;;  %v2898_v22 = vpop.permute.xlu1 %2897 }
 0x5e0   : > { %7813 = vmatmul.mubr.msk.f32.gmra.mrb[50].mxu1 %vm1292_vm4, %v2347_v7 }
 0x5e1   : > { %7815 = vmatprep.mubr.msk.f32.mxu1 %vm1292_vm4, %v2349_v56 }
 0x5e3   : > { %v2900_v36 = vpop.permute.xlu0 %2899 }
 0x5e4   : > { %7816 = vmatmul.mubr.msk.f32.gmra.mrb[52].mxu1 %vm1292_vm4, %v2351_v25 }
 0x5e5   : > { %7818 = vmatprep.mubr.msk.f32.mxu1 %vm1292_vm4, %v2353_v31  ;;  %8468 = vmatpush3.bf16.xpose.msk.msra.mxu1 %vm9823_vm5, %v8463_v47 }
 0x5e6   : > { %8471 = vmatprep.subr.msk.bf16.mxu1 %vm9823_vm5, %v8469_v13 }
 0x5e8   : > { %7819 = vmatmul.mubr.msk.f32.gmra.mrb[54].mxu1 %vm1292_vm4, %v2355_v5 }
 0x5e9   : > { %7879 = vmatprep.mubr.msk.f32.mxu1 %vm1292_vm4, %v2888_v27 }
 0x5ed   : > { %8474 = vmatpush3.bf16.xpose.msk.msra.mxu1 %vm9823_vm5, %v8469_v13 }
 0x5ee   : > { %8477 = vmatprep.subr.msk.bf16.mxu1 %vm9823_vm5, %v8475_v12 }
 0x5f5   : > { %8480 = vmatpush3.bf16.xpose.msk.msra.mxu1 %vm9823_vm5, %v8475_v12 }
 0x5f6   : > { %8499 = vmatprep.subr.msk.bf16.mxu1 %vm9823_vm5, %v9999_v38 }
 0x5fc   : > { %7880 = vmatmul.mubr.msk.f32.vlgmr.msra.gmra.mrb[56].mxu1 %vm1292_vm4, %v2890_v11 }
 0x5fd   : > { %7882 = vmatprep.mubr.msk.f32.mxu1 %vm1292_vm4, %v2892_v35  ;;  %8502 = vmatpush3.bf16.xpose.msk.msra.mxu1 %vm9823_vm5, %v9999_v38  ;;  %v2902_v38 = vpop.permute.xlu1 %2901 }
 0x5fe   : > { %8505 = vmatprep.subr.msk.bf16.mxu1 %vm9823_vm5, %v10007_v40 }
 0x600   : > { %7883 = vmatmul.mubr.msk.f32.gmra.mrb[58].mxu1 %vm1292_vm4, %v2894_v23 }
 0x601   : > { %7885 = vmatprep.mubr.msk.f32.mxu1 %vm1292_vm4, %v2896_v60 }
 0x604   : > { %v7699_v34 = vpop.f32.mrb[32].mxu1  ;;  %7886 = vmatmul.mubr.msk.f32.gmra.mrb[60].mxu1 %vm1292_vm4, %v2898_v22 }
 0x605   : > { %v1625_v58 = vpop.f32.mrb[33].mxu1  ;;  %7888 = vmatprep.mubr.msk.f32.mxu1 %vm1292_vm4, %v2900_v36  ;;  %8508 = vmatpush3.bf16.xpose.msk.msra.mxu1 %vm9823_vm5, %v10007_v40 }
 0x606   : > { %8511 = vmatprep.subr.msk.bf16.mxu1 %vm9823_vm5, %v10015_v45 }
 0x608   : > { %v7702_v63 = vpop.f32.mrb[34].mxu1  ;;  %7889 = vmatmul.mubr.msk.f32.gmra.mrb[62].mxu1 %vm1292_vm4, %v2902_v38 }
 0x609   : > { %v1635_v54 = vpop.f32.mrb[35].mxu1  ;;  %7949 = vmatprep.mubr.msk.f32.mxu1 %vm1292_vm4, %v9791_v61 }
 0x60c   : > { %v7705_v17 = vpop.f32.mrb[36].mxu1 }
 0x60d   : > { %v1645_v57 = vpop.f32.mrb[37].mxu1  ;;  %8514 = vmatpush3.bf16.xpose.msk.msra.mxu1 %vm9823_vm5, %v10015_v45  ;;  %v739_v45 = vld [vmem:[%s9378_s24 + $0x60] sm:$0xff] }
 0x60e   : > { %8517 = vmatprep.subr.msk.bf16.mxu1 %vm9823_vm5, %v10025_v55  ;;  %7779 = vmatprep.subr.mxu0 %v739_v45 }
 0x610   : > { %v7708_v40 = vpop.f32.mrb[38].mxu1 }
 0x611   : > { %v1655_v41 = vpop.f32.mrb[39].mxu1 }
 0x615   : > { %8520 = vmatpush3.bf16.xpose.msk.msra.mxu1 %vm9823_vm5, %v10025_v55 }
 0x61c   : > { %7950 = vmatmul.mubr.msk.f32.vlgmr.msra.gmra.mrb[64].mxu1 %vm1292_vm4, %v9788_v59 }
 0x61d   : > { %7952 = vmatprep.mubr.msk.f32.mxu1 %vm1292_vm4, %v9800_v4 }
 0x620   : > { %7953 = vmatmul.mubr.msk.f32.gmra.mrb[66].mxu1 %vm1292_vm4, %v9797_v2 }
 0x621   : > { %7955 = vmatprep.mubr.msk.f32.mxu1 %vm1292_vm4, %v9808_v10 }
 0x624   : > { %7956 = vmatmul.mubr.msk.f32.gmra.mrb[68].mxu1 %vm1292_vm4, %v9805_v8 }
 0x625   : > { %7958 = vmatprep.mubr.msk.f32.mxu1 %vm1292_vm4, %v9814_v16 }
 0x628   : > { %7959 = vmatmul.mubr.msk.f32.gmra.mrb[70].mxu1 %vm1292_vm4, %v9811_v14 }
 0x65c   : > { %v7755_v55 = vpop.f32.mrb[40].mxu1 }
 0x65d   : > { %v2043_v6 = vpop.f32.mrb[41].mxu1 }
 0x65e   : > { %7767 = vmatprep.mubr.msk.f32.mxu0 %vm1292_vm4, %v2043_v6 }
 0x65f   : > { %7768 = vmatmul.mubr.msk.f32.vlgmr.msra.gmra.mrb[32].mxu0 %vm1292_vm4, %v7755_v55 }
 0x660   : > { %7780 = vmatpush3.msra.mxu0 %v739_v45 }
 0x690   : > { %v7758_v7 = vpop.f32.mrb[42].mxu1 }
 0x691   : > { %v2053_v26 = vpop.f32.mrb[43].mxu1 }
 0x692   : > { %7770 = vmatprep.mubr.msk.f32.mxu0 %vm1292_vm4, %v2053_v26 }
 0x693   : > { %7771 = vmatmul.mubr.msk.f32.gmra.mrb[34].mxu0 %vm1292_vm4, %v7758_v7 }
 0x694   : > { %v7761_v29 = vpop.f32.mrb[44].mxu1 }
 0x695   : > { %v2063_v30 = vpop.f32.mrb[45].mxu1 }
 0x696   : > { %7773 = vmatprep.mubr.msk.f32.mxu0 %vm1292_vm4, %v2063_v30 }
 0x697   : > { %7774 = vmatmul.mubr.msk.f32.gmra.mrb[36].mxu0 %vm1292_vm4, %v7761_v29 }
 0x69d   : > { %v7764_v9 = vpop.f32.mrb[46].mxu1 }
 0x69e   : > { %v2073_v56 = vpop.f32.mrb[47].mxu1 }
 0x69f   : > { %7776 = vmatprep.mubr.msk.f32.mxu0 %vm1292_vm4, %v2073_v56 }
 0x6a0   : > { %7777 = vmatmul.mubr.msk.f32.gmra.mrb[38].mxu0 %vm1292_vm4, %v7764_v9 }
 0x6a1   : > { %7781 = vmatprep.mubr.msk.f32.mxu0 %vm1292_vm4, %v1625_v58 }
 0x6a4   : > { %7782 = vmatmul.mubr.msk.f32.vlgmr.msra.gmra.mrb[32].mxu0 %vm1292_vm4, %v7699_v34 }
 0x6a5   : > { %7784 = vmatprep.mubr.msk.f32.mxu0 %vm1292_vm4, %v1635_v54 }
 0x6a8   : > { %7785 = vmatmul.mubr.msk.f32.gmra.mrb[34].mxu0 %vm1292_vm4, %v7702_v63 }
 0x6a9   : > { %7787 = vmatprep.mubr.msk.f32.mxu0 %vm1292_vm4, %v1645_v57 }
 0x6ac   : > { %7788 = vmatmul.mubr.msk.f32.gmra.mrb[36].mxu0 %vm1292_vm4, %v7705_v17 }
 0x6ad   : > { %7790 = vmatprep.mubr.msk.f32.mxu0 %vm1292_vm4, %v1655_v41 }
 0x6af   : > { %v7811_v28 = vpop.f32.mrb[48].mxu1 }
 0x6b0   : > { %v2476_v21 = vadd.f32 %v7811_v28, %v10059_v32  ;;  %7791 = vmatmul.mubr.msk.f32.gmra.mrb[38].mxu0 %vm1292_vm4, %v7708_v40  ;;  %v2470_v3 = vpop.f32.mrb[49].mxu1 }
 0x6b1   : > { %v2471_v62 = vadd.f32 %v2470_v3, %v10059_v32 }
 0x6b2   : > { %v2512_v25 = vsel %vm1446_vm6, %v2476_v21, -inf }
 0x6b3   : > { %2513 = vmax.xlane.f32.xlu1 %v2512_v25  ;;  %v7814_v31 = vpop.f32.mrb[50].mxu1  ;;  %v2509_v1 = vsel %vm1446_vm6, %v2471_v62, -inf }
 0x6b4   : > { %v2480_v5 = vpop.f32.mrb[51].mxu1  ;;  %2510 = vmax.xlane.f32.xlu0 %v2509_v1  ;;  %v2486_v44 = vadd.f32 %v7814_v31, %v10059_v32 }
 0x6b5   : > { %v2481_v37 = vadd.f32 %v2480_v5, %v10059_v32 }
 0x6b6   : > { %v2518_v49 = vsel %vm1446_vm6, %v2486_v44, -inf }
 0x6b7   : > { %v7817_v0 = vpop.f32.mrb[52].mxu1  ;;  %v2515_v46 = vsel %vm1446_vm6, %v2481_v37, -inf }
 0x6b8   : > { %v2490_v48 = vpop.f32.mrb[53].mxu1  ;;  %2516 = vmax.xlane.f32.xlu0 %v2515_v46  ;;  %v2496_v50 = vadd.f32 %v7817_v0, %v10059_v32 }
 0x6b9   : > { %v2491_v43 = vadd.f32 %v2490_v48, %v10059_v32 }
 0x6ba   : > { %v2524_v52 = vsel %vm1446_vm6, %v2496_v50, -inf }
 0x6bb   : > { %v7820_v47 = vpop.f32.mrb[54].mxu1  ;;  %v2521_v51 = vsel %vm1446_vm6, %v2491_v43, -inf }
 0x6bc   : > { %v2500_v15 = vpop.f32.mrb[55].mxu1  ;;  %2522 = vmax.xlane.f32.xlu1 %v2521_v51  ;;  %2519 = vmax.xlane.f32.xlu0 %v2518_v49  ;;  %v2506_v13 = vadd.f32 %v7820_v47, %v10059_v32 }
 0x6bd   : > { %v10441_v18 = vadd.f32 %v2500_v15, %v10059_v32 }
 0x6be   : > { %v2530_v42 = vsel %vm1446_vm6, %v2506_v13, -inf }
 0x6bf   : > { %v2527_v33 = vsel %vm1446_vm6, %v10441_v18, -inf }
 0x6c0   : > { %2528 = vmax.xlane.f32.xlu1 %v2527_v33  ;;  %2525 = vmax.xlane.f32.xlu0 %v2524_v52 }
 0x6c4   : > { %2531 = vmax.xlane.f32.xlu0 %v2530_v42 }
 0x6cf   : > { %v10448_v27 = vpop.f32.mrb[56].mxu1 }
 0x6d0   : > { %v10450_v12 = vpop.f32.mrb[57].mxu1 }
 0x6d1   : > { %8826 = vrot.lane.b32.xlu1 %v9945_v19, %s9335_s27 }
 0x6d3   : > { %v10454_v11 = vpop.f32.mrb[58].mxu1 }
 0x6d4   : > { %v10456_v35 = vpop.f32.mrb[59].mxu1 }
 0x6d7   : > { %v10458_v23 = vpop.f32.mrb[60].mxu1 }
 0x6d8   : > { %v10460_v60 = vpop.f32.mrb[61].mxu1 }
 0x6db   : > { %v10462_v22 = vpop.f32.mrb[62].mxu1 }
 0x6dc   : > { %v10464_v36 = vpop.f32.mrb[63].mxu1 }
 0x6ef   : > { %v10466_v34 = vpop.f32.mrb[64].mxu1 }
 0x6f0   : > { %v10468_v58 = vpop.f32.mrb[65].mxu1 }
 0x6f3   : > { %v10470_v38 = vpop.f32.mrb[66].mxu1 }
 0x6f4   : > { %v10472_v63 = vpop.f32.mrb[67].mxu1 }
 0x6f7   : > { %v10474_v54 = vpop.f32.mrb[68].mxu1 }
 0x6f8   : > { %v10476_v17 = vpop.f32.mrb[69].mxu1 }
 0x6fb   : > { %v10478_v57 = vpop.f32.mrb[70].mxu1 }
 0x6fc   : > { %v10480_v40 = vpop.f32.mrb[71].mxu1 }
 0x740   : > { %v2514_v41 = vpop.xlane.xlu1 %2513 }
 0x741   : > { %v2534_v45 = vsub.f32 %v2476_v21, %v2514_v41  ;;  %v2511_v55 = vpop.xlane.xlu0 %2510 }
 0x742   : > { %v2533_v6 = vsub.f32 %v2471_v62, %v2511_v55 }
 0x743   : > { %v2543_v7 = vmul.f32 1.442695, %v2534_v45 }
 0x744   : > { %v2541_v26 = vmul.f32 1.442695, %v2533_v6 }
 0x745   : > { %9049 = vpow2.f32 %v2543_v7  ;;  %v2517_v29 = vpop.xlane.xlu0 %2516 }
 0x746   : > { %9051 = vpow2.f32 %v2541_v26  ;;  %v2535_v30 = vsub.f32 %v2481_v37, %v2517_v29 }
 0x748   : > { %v2545_v9 = vmul.f32 1.442695, %v2535_v30 }
 0x749   : > { %v2523_v56 = vpop.xlane.xlu1 %2522  ;;  %v2520_v28 = vpop.xlane.xlu0 %2519 }
 0x74a   : > { %9053 = vpow2.f32 %v2545_v9  ;;  %v2537_v3 = vsub.f32 %v2491_v43, %v2523_v56  ;;  %v2536_v25 = vsub.f32 %v2486_v44, %v2520_v28  ;;  %v12062_v28 = vld [vmem:[#allocation2_spill] sm:$0xff] }
 0x74c   : > { %v2549_v31 = vmul.f32 1.442695, %v2537_v3  ;;  %v2547_v1 = vmul.f32 1.442695, %v2536_v25  ;;  %v12063_v3 = vld [vmem:[#allocation4_spill] sm:$0xff]  ;;  %v12064_v25 = vld [vmem:[#allocation14_spill] sm:$0xff] }
 0x74d   : > { %v2529_v5 = vpop.xlane.xlu1 %2528  ;;  %v2526_v0 = vpop.xlane.xlu0 %2525 }
 0x74e   : > { %9055 = vpow2.f32 %v2549_v31  ;;  %v2538_v21 = vsub.f32 %v2496_v50, %v2526_v0  ;;  %v2539_v47 = vsub.f32 %v10441_v18, %v2529_v5  ;;  %v12065_v31 = vld [vmem:[#allocation3_spill] sm:$0xff]  ;;  %v10551_v5 = vadd.f32 %v10450_v12, %v10059_v32 }
 0x74f   : > { %v10482_v46 = vpop.eup %9049  ;;  %9057 = vpow2.f32 %v2547_v1  ;;  %v10547_v1 = vadd.f32 %v10448_v27, %v10059_v32  ;;  %v10555_v0 = vadd.f32 %v10460_v60, %v10059_v32  ;;  %v10567_v12 = vadd.f32 %v10464_v36, %v10059_v32 }
 0x750   : > { %v10484_v62 = vpop.eup %9051  ;;  %v2551_v48 = vmul.f32 1.442695, %v2538_v21  ;;  %v2560_v37 = vsel %vm1446_vm6, %v10482_v46, 0.0  ;;  %v2553_v41 = vmul.f32 1.442695, %v2539_v47  ;;  %v3056_v27 = vsel %vm1446_vm6, %v10551_v5, -inf }
 0x751   : > { %v8827_v51 = vpop.permute.xlu1 %8826  ;;  %2561 = vadd.xlane.f32.xlu0 %v2560_v37  ;;  %v2532_v44 = vpop.xlane.xlu0 %2531  ;;  %v2557_v43 = vsel %vm1446_vm6, %v10484_v62, 0.0  ;;  %v3059_v21 = vsel %vm1446_vm6, %v10547_v1, -inf  ;;  %v3068_v60 = vsel %vm1446_vm6, %v10555_v0, -inf  ;;  %v10573_v37 = vadd.f32 %v10454_v11, %v10059_v32 }
 0x752   : > { %v8829_v49 = vunpack.i.h.bf16 %v8827_v51  ;;  %v8828_v15 = vunpack.i.l.bf16 %v8827_v51  ;;  %v2540_v50 = vsub.f32 %v2506_v13, %v2532_v44  ;;  %2558 = vadd.xlane.f32.xlu1 %v2557_v43  ;;  %9059 = vpow2.f32 %v2551_v48 }
 0x753   : > { %v10561_v48 = vadd.f32 %v10456_v35, %v10059_v32  ;;  %v3074_v47 = vsel %vm1446_vm6, %v10567_v12, -inf  ;;  %v10581_v51 = vadd.f32 %v10458_v23, %v10059_v32  ;;  %v3065_v36 = vsel %vm1446_vm6, %v10573_v37, -inf }
 0x754   : > { %v10491_v33 = vpop.eup %9053  ;;  %v2555_v52 = vmul.f32 1.442695, %v2540_v50  ;;  %v8441_v42 = vpack.c.bf16 %v8829_v49, %v8828_v15  ;;  %v10587_v11 = vadd.f32 %v10462_v22, %v10059_v32 }
 0x755   : > { %v2563_v45 = vsel %vm1446_vm6, %v10491_v33, 0.0  ;;  %v3062_v35 = vsel %vm1446_vm6, %v10561_v48, -inf  ;;  %v3071_v44 = vsel %vm1446_vm6, %v10581_v51, -inf }
 0x756   : > { %9061 = vpow2.f32 %v2555_v52  ;;  %8442 = vmatprep.subr.bf16.mxu0 %v8441_v42  ;;  %2564 = vadd.xlane.f32.xlu1 %v2563_v45  ;;  %v3077_v43 = vsel %vm1446_vm6, %v10587_v11, -inf }
 0x757   : > { %8444 = vmatpush3.bf16.msra.mxu0 %v8441_v42  ;;  %9063 = vpow2.f32 %v2553_v41 }
 0x758   : > { %v10495_v18 = vpop.eup %9055 }
 0x759   : > { %v10497_v55 = vpop.eup %9057  ;;  %v2569_v13 = vsel %vm1446_vm6, %v10495_v18, 0.0 }
 0x75a   : > { %2570 = vadd.xlane.f32.xlu1 %v2569_v13  ;;  %v2566_v6 = vsel %vm1446_vm6, %v10497_v55, 0.0 }
 0x75b   : > { %2567 = vadd.xlane.f32.xlu0 %v2566_v6 }
 0x75c   : > { %v10503_v7 = vpop.eup %9059 }
 0x75d   : > { %v2572_v26 = vsel %vm1446_vm6, %v10503_v7, 0.0 }
 0x75f   : > { %2573 = vadd.xlane.f32.xlu0 %v2572_v26 }
 0x760   : > { %v10507_v29 = vpop.eup %9061 }
 0x761   : > { %v2578_v30 = vsel %vm1446_vm6, %v10507_v29, 0.0  ;;  %v10511_v9 = vpop.eup %9063 }
 0x762   : > { %v2575_v56 = vsel %vm1446_vm6, %v10511_v9, 0.0 }
 0x763   : > { %2579 = vadd.xlane.f32.xlu0 %v2578_v30 }
 0x767   : > { %2576 = vadd.xlane.f32.xlu0 %v2575_v56 }
 0x76b   : > { %8836 = vrot.lane.b32.xlu1 %v10141_v20, %s9335_s27 }
 0x76f   : > { %8841 = vrot.lane.b32.xlu1 %v10147_v53, %s9335_s27 }
 0x773   : > { %8846 = vrot.lane.b32.xlu1 %v10003_v39, %s9334_s23 }
 0x777   : > { %8851 = vrot.lane.b32.xlu1 %v12062_v28, %s9334_s23 }
 0x77b   : > { %8861 = vrot.lane.b32.xlu1 %v12063_v3, %s9334_s23 }
 0x77d   : > { %8831 = vrot.lane.b32.xlu0 %v12064_v25, %s9335_s27 }
 0x77f   : > { %3810 = vrot.lane.b32.xlu1 %v9788_v59, %s9334_s23 }
 0x781   : > { %8856 = vrot.lane.b32.xlu0 %v12065_v31, %s9334_s23 }
 0x783   : > { %3814 = vrot.lane.b32.xlu1 %v9797_v2, %s9334_s23 }
 0x785   : > { %3808 = vrot.lane.b32.xlu0 %v9791_v61, %s9334_s23 }
 0x787   : > { %3818 = vrot.lane.b32.xlu1 %v9805_v8, %s9334_s23 }
 0x789   : > { %3812 = vrot.lane.b32.xlu0 %v9800_v4, %s9334_s23 }
 0x78b   : > { %3822 = vrot.lane.b32.xlu1 %v9811_v14, %s9334_s23 }
 0x78d   : > { %3816 = vrot.lane.b32.xlu0 %v9808_v10, %s9334_s23 }
 0x791   : > { %3820 = vrot.lane.b32.xlu0 %v9814_v16, %s9334_s23 }
 0x7af   : > { %3060 = vmax.xlane.f32.xlu1 %v3059_v21 }
 0x7b0   : > { %3057 = vmax.xlane.f32.xlu0 %v3056_v27 }
 0x7b3   : > { %3069 = vmax.xlane.f32.xlu1 %v3068_v60 }
 0x7b4   : > { %3063 = vmax.xlane.f32.xlu0 %v3062_v35 }
 0x7b7   : > { %3075 = vmax.xlane.f32.xlu1 %v3074_v47 }
 0x7b8   : > { %3066 = vmax.xlane.f32.xlu0 %v3065_v36 }
 0x7bc   : > { %3072 = vmax.xlane.f32.xlu0 %v3071_v44 }
 0x7c0   : > { %3078 = vmax.xlane.f32.xlu0 %v3077_v43 }
 0x7c8   : > { %8866 = vrot.lane.b32.xlu1 %v9945_v19, %s9336_s28 }
 0x7de   : > { %v2562_v15 = vpop.xlane.xlu0 %2561 }
 0x7df   : > { %v2559_v23 = vpop.xlane.xlu1 %2558 }
 0x7e0   : > { %9065 = vrcp.f32 %v2559_v23 }
 0x7e1   : > { %9067 = vrcp.f32 %v2562_v15 }
 0x7e3   : > { %v2565_v49 = vpop.xlane.xlu1 %2564 }
 0x7e4   : > { %9069 = vrcp.f32 %v2565_v49 }
 0x7e7   : > { %v2571_v50 = vpop.xlane.xlu1 %2570 }
 0x7e8   : > { %v2568_v52 = vpop.xlane.xlu0 %2567 }
 0x7e9   : > { %9071 = vrcp.f32 %v2568_v52 }
 0x7ea   : > { %v9066_v42 = vpop.eup %9065  ;;  %9073 = vrcp.f32 %v2571_v50 }
 0x7eb   : > { %v8837_v32 = vpop.permute.xlu1 %8836  ;;  %v2589_v22 = vmul.f32 %v9066_v42, %v10484_v62  ;;  %v9068_v52 = vpop.eup %9067 }
 0x7ec   : > { %v2574_v41 = vpop.xlane.xlu0 %2573  ;;  %v8839_v27 = vunpack.i.h.bf16 %v8837_v32  ;;  %v8838_v60 = vunpack.i.l.bf16 %v8837_v32 }
 0x7ed   : > { %7837 = vmatprep.mubr.msk.f32.mxu0 %vm1446_vm6, %v2589_v22  ;;  %9075 = vrcp.f32 %v2574_v41 }
 0x7ee   : > { %v8449_v32 = vpack.c.bf16 %v8839_v27, %v8838_v60  ;;  %v741_v27 = vld [vmem:[%s9378_s24 + $0x70] sm:$0xff]  ;;  %v9070_v60 = vpop.eup %9069 }
 0x7ef   : > { %v8842_v45 = vpop.permute.xlu1 %8841  ;;  %v2591_v41 = vmul.f32 %v9070_v60, %v10491_v33 }
 0x7f0   : > { %v2580_v13 = vpop.xlane.xlu0 %2579  ;;  %v8844_v22 = vunpack.i.h.bf16 %v8842_v45 }
 0x7f3   : > { %v8847_v6 = vpop.permute.xlu1 %8846 }
 0x7f4   : > { %v8849_v26 = vunpack.i.h.bf16 %v8847_v6  ;;  %v8848_v30 = vunpack.i.l.bf16 %v8847_v6  ;;  %v2577_v56 = vpop.xlane.xlu0 %2576  ;;  %v8843_v6 = vunpack.i.l.bf16 %v8842_v45 }
 0x7f5   : > { %9077 = vrcp.f32 %v2577_v56 }
 0x7f6   : > { %v8537_v19 = vpack.c.bf16 %v8849_v26, %v8848_v30  ;;  %v8453_v49 = vpack.c.bf16 %v8844_v22, %v8843_v6  ;;  %9079 = vrcp.f32 %v2580_v13 }
 0x7f7   : > { %v8852_v21 = vpop.permute.xlu1 %8851 }
 0x7f8   : > { %v8854_v35 = vunpack.i.h.bf16 %v8852_v21  ;;  %v8853_v47 = vunpack.i.l.bf16 %v8852_v21  ;;  %v8832_v36 = vpop.permute.xlu0 %8831  ;;  %8539 = vmatprep.subr.msk.bf16.mxu1 %vm9823_vm5, %v8537_v19 }
 0x7f9   : > { %v8834_v62 = vunpack.i.h.bf16 %v8832_v36  ;;  %v8833_v44 = vunpack.i.l.bf16 %v8832_v36  ;;  %8542 = vmatpush3.bf16.xpose.msk.msra.mxu1 %vm9823_vm5, %v8537_v19 }
 0x7fa   : > { %v8543_v43 = vpack.c.bf16 %v8854_v35, %v8853_v47  ;;  %v2590_v35 = vmul.f32 %v9068_v52, %v10482_v46  ;;  %v9072_v47 = vpop.eup %9071 }
 0x7fb   : > { %v8445_v23 = vpack.c.bf16 %v8834_v62, %v8833_v44  ;;  %v8862_v21 = vpop.permute.xlu1 %8861  ;;  %v9074_v62 = vpop.eup %9073  ;;  %v2592_v13 = vmul.f32 %v9072_v47, %v10497_v55 }
 0x7fc   : > { %v8857_v42 = vpop.permute.xlu0 %8856  ;;  %8545 = vmatprep.subr.msk.bf16.mxu1 %vm9823_vm5, %v8543_v43  ;;  %v8864_v50 = vunpack.i.h.bf16 %v8862_v21  ;;  %v8863_v45 = vunpack.i.l.bf16 %v8862_v21  ;;  %v9076_v46 = vpop.eup %9075  ;;  %v2593_v56 = vmul.f32 %v9074_v62, %v10495_v18 }
 0x7fd   : > { %v8859_v26 = vunpack.i.h.bf16 %v8857_v42  ;;  %v8858_v30 = vunpack.i.l.bf16 %v8857_v42  ;;  %8446 = vmatprep.subr.bf16.mxu0 %v8445_v23  ;;  %v2594_v33 = vmul.f32 %v9076_v46, %v10503_v7 }
 0x7fe   : > { %8448 = vmatpush3.bf16.msra.mxu0 %v8445_v23  ;;  %v8555_v36 = vpack.c.bf16 %v8864_v50, %v8863_v45 }
 0x7ff   : > { %8450 = vmatprep.subr.bf16.mxu0 %v8449_v32  ;;  %v8549_v19 = vpack.c.bf16 %v8859_v26, %v8858_v30  ;;  %v9078_v44 = vpop.eup %9077  ;;  %v3811_v42 = vpop.permute.xlu1 %3810 }
 0x800   : > { %v3809_v15 = vpop.permute.xlu0 %3808  ;;  %v2595_v23 = vmul.f32 %v9078_v44, %v10511_v9 }
 0x801   : > { %8005 = vmatprep.mubr.msk.f32.mxu1 %vm1292_vm4, %v3809_v15  ;;  %8548 = vmatpush3.bf16.xpose.msk.msra.mxu1 %vm9823_vm5, %v8543_v43  ;;  %v9080_v43 = vpop.eup %9079 }
 0x802   : > { %8452 = vmatpush3.bf16.msra.mxu0 %v8449_v32  ;;  %8551 = vmatprep.subr.msk.bf16.mxu1 %vm9823_vm5, %v8549_v19  ;;  %v2596_v18 = vmul.f32 %v9080_v43, %v10507_v29 }
 0x803   : > { %8454 = vmatprep.subr.bf16.mxu0 %v8453_v49  ;;  %v3815_v32 = vpop.permute.xlu1 %3814 }
 0x804   : > { %v3813_v55 = vpop.permute.xlu0 %3812 }
 0x806   : > { %8456 = vmatpush3.bf16.msra.mxu0 %v8453_v49 }
 0x807   : > { %7849 = vmatprep.subr.mxu0 %v741_v27  ;;  %v3819_v9 = vpop.permute.xlu1 %3818 }
 0x808   : > { %v3817_v7 = vpop.permute.xlu0 %3816 }
 0x809   : > { %7838 = vmatmul.mubr.msk.f32.vlgmr.msra.gmra.mrb[40].mxu0 %vm1446_vm6, %v2590_v35  ;;  %8554 = vmatpush3.bf16.xpose.msk.msra.mxu1 %vm9823_vm5, %v8549_v19 }
 0x80a   : > { %7840 = vmatprep.mubr.msk.f32.mxu0 %vm1446_vm6, %v2591_v41  ;;  %8557 = vmatprep.subr.msk.bf16.mxu1 %vm9823_vm5, %v8555_v36 }
 0x80b   : > { %7850 = vmatpush3.msra.mxu0 %v741_v27  ;;  %v3823_v29 = vpop.permute.xlu1 %3822 }
 0x80c   : > { %v3821_v22 = vpop.permute.xlu0 %3820 }
 0x80d   : > { %7841 = vmatmul.mubr.msk.f32.gmra.mrb[42].mxu0 %vm1446_vm6, %v2592_v13 }
 0x80e   : > { %7843 = vmatprep.mubr.msk.f32.mxu0 %vm1446_vm6, %v2593_v56 }
 0x811   : > { %7844 = vmatmul.mubr.msk.f32.gmra.mrb[44].mxu0 %vm1446_vm6, %v2594_v33  ;;  %8560 = vmatpush3.bf16.xpose.msk.msra.mxu1 %vm9823_vm5, %v8555_v36 }
 0x812   : > { %7846 = vmatprep.mubr.msk.f32.mxu0 %vm1446_vm6, %v2595_v23 }
 0x815   : > { %7847 = vmatmul.mubr.msk.f32.gmra.mrb[46].mxu0 %vm1446_vm6, %v2596_v18 }
 0x818   : > { %8006 = vmatmul.mubr.msk.f32.vlgmr.msra.gmra.mrb[72].mxu1 %vm1292_vm4, %v3811_v42 }
 0x819   : > { %8008 = vmatprep.mubr.msk.f32.mxu1 %vm1292_vm4, %v3813_v55 }
 0x81c   : > { %8009 = vmatmul.mubr.msk.f32.gmra.mrb[74].mxu1 %vm1292_vm4, %v3815_v32 }
 0x81d   : > { %8011 = vmatprep.mubr.msk.f32.mxu1 %vm1292_vm4, %v3817_v7 }
 0x820   : > { %8012 = vmatmul.mubr.msk.f32.gmra.mrb[76].mxu1 %vm1292_vm4, %v3819_v9 }
 0x821   : > { %8014 = vmatprep.mubr.msk.f32.mxu1 %vm1292_vm4, %v3821_v22 }
 0x824   : > { %8015 = vmatmul.mubr.msk.f32.gmra.mrb[78].mxu1 %vm1292_vm4, %v3823_v29 }
 0x83c   : > { %v3061_v6 = vpop.xlane.xlu1 %3060 }
 0x83d   : > { %v3081_v26 = vsub.f32 %v10547_v1, %v3061_v6  ;;  %v3058_v30 = vpop.xlane.xlu0 %3057 }
 0x83e   : > { %v3080_v19 = vsub.f32 %v10551_v5, %v3058_v30 }
 0x83f   : > { %v3090_v15 = vmul.f32 1.442695, %v3081_v26 }
 0x840   : > { %v3088_v21 = vmul.f32 1.442695, %v3080_v19  ;;  %v3070_v49 = vpop.xlane.xlu1 %3069 }
 0x841   : > { %9081 = vpow2.f32 %v3090_v15  ;;  %v3084_v52 = vsub.f32 %v10555_v0, %v3070_v49  ;;  %v3064_v50 = vpop.xlane.xlu0 %3063 }
 0x842   : > { %9083 = vpow2.f32 %v3088_v21  ;;  %v3082_v45 = vsub.f32 %v10561_v48, %v3064_v50 }
 0x843   : > { %v3096_v27 = vmul.f32 1.442695, %v3084_v52 }
 0x844   : > { %v3092_v60 = vmul.f32 1.442695, %v3082_v45  ;;  %v3076_v35 = vpop.xlane.xlu1 %3075 }
 0x845   : > { %v3067_v47 = vpop.xlane.xlu0 %3066  ;;  %v3086_v44 = vsub.f32 %v10567_v12, %v3076_v35 }
 0x846   : > { %9085 = vpow2.f32 %v3092_v60  ;;  %v3083_v1 = vsub.f32 %v10573_v37, %v3067_v47 }
 0x847   : > { %9087 = vpow2.f32 %v3096_v27  ;;  %v3100_v18 = vmul.f32 1.442695, %v3086_v44 }
 0x848   : > { %v3094_v36 = vmul.f32 1.442695, %v3083_v1  ;;  %v8867_v5 = vpop.permute.xlu1 %8866 }
 0x849   : > { %v8869_v41 = vunpack.i.h.bf16 %v8867_v5  ;;  %v8868_v62 = vunpack.i.l.bf16 %v8867_v5  ;;  %v3073_v13 = vpop.xlane.xlu0 %3072 }
 0x84a   : > { %9089 = vpow2.f32 %v3094_v36  ;;  %v3085_v0 = vsub.f32 %v10581_v51, %v3073_v13 }
 0x84b   : > { %v10642_v46 = vpop.eup %9081  ;;  %v10644_v56 = vpack.c.bf16 %v8869_v41, %v8868_v62 }
 0x84c   : > { %v10646_v48 = vpop.eup %9083  ;;  %v3098_v33 = vmul.f32 1.442695, %v3085_v0  ;;  %v3107_v37 = vsel %vm1446_vm6, %v10642_v46, 0.0 }
 0x84d   : > { %v3079_v43 = vpop.xlane.xlu0 %3078  ;;  %3108 = vadd.xlane.f32.xlu0 %v3107_v37  ;;  %v3104_v23 = vsel %vm1446_vm6, %v10646_v48, 0.0  ;;  %8482 = vmatprep.subr.bf16.mxu0 %v10644_v56 }
 0x84e   : > { %9091 = vpow2.f32 %v3098_v33  ;;  %v3087_v51 = vsub.f32 %v10587_v11, %v3079_v43  ;;  %3105 = vadd.xlane.f32.xlu1 %v3104_v23 }
 0x850   : > { %v10655_v42 = vpop.eup %9085  ;;  %v3102_v55 = vmul.f32 1.442695, %v3087_v51 }
 0x851   : > { %v3110_v12 = vsel %vm1446_vm6, %v10655_v42, 0.0  ;;  %v10659_v32 = vpop.eup %9087 }
 0x852   : > { %9093 = vpow2.f32 %v3102_v55  ;;  %3111 = vadd.xlane.f32.xlu1 %v3110_v12  ;;  %v3116_v9 = vsel %vm1446_vm6, %v10659_v32, 0.0 }
 0x853   : > { %9095 = vpow2.f32 %v3100_v18 }
 0x854   : > { %v10661_v7 = vpop.eup %9089 }
 0x855   : > { %v3113_v11 = vsel %vm1446_vm6, %v10661_v7, 0.0 }
 0x856   : > { %3117 = vadd.xlane.f32.xlu1 %v3116_v9  ;;  %3114 = vadd.xlane.f32.xlu0 %v3113_v11 }
 0x858   : > { %v10667_v22 = vpop.eup %9091 }
 0x859   : > { %v3119_v29 = vsel %vm1446_vm6, %v10667_v22, 0.0 }
 0x85a   : > { %3120 = vadd.xlane.f32.xlu0 %v3119_v29 }
 0x85c   : > { %v10671_v6 = vpop.eup %9093 }
 0x85d   : > { %v3125_v26 = vsel %vm1446_vm6, %v10671_v6, 0.0  ;;  %v10675_v30 = vpop.eup %9095 }
 0x85e   : > { %3126 = vadd.xlane.f32.xlu0 %v3125_v26  ;;  %v3122_v19 = vsel %vm1446_vm6, %v10675_v30, 0.0 }
 0x862   : > { %3123 = vadd.xlane.f32.xlu0 %v3122_v19 }
 0x867   : > { %8876 = vrot.lane.b32.xlu1 %v10141_v20, %s9336_s28  ;;  %v12066_v20 = vld [vmem:[#allocation9_spill] sm:$0xff] }
 0x86b   : > { %8881 = vrot.lane.b32.xlu1 %v10147_v53, %s9336_s28  ;;  %v3436_v53 = vsub.s32 1, %v12066_v20 }
 0x86f   : > { %8886 = vrot.lane.b32.xlu1 %v10003_v39, %s9335_s27 }
 0x873   : > { %8891 = vrot.lane.b32.xlu1 %v12062_v28, %s9335_s27 }
 0x877   : > { %8901 = vrot.lane.b32.xlu1 %v12063_v3, %s9335_s27 }
 0x878   : > { %8871 = vrot.lane.b32.xlu0 %v12064_v25, %s9336_s28  ;;  %v9305_v25 = vld [vmem:[%s12029_s2] sm:$0x3] }
 0x879   : > { %v10713_v15 = vrot.slane %v9305_v25, %v3436_v53 }
 0x87b   : > { %4486 = vrot.lane.b32.xlu1 %v9788_v59, %s9335_s27  ;;  %v10717_v21 = vadd.f32 %v10468_v58, %v10713_v15  ;;  %v10721_v49 = vadd.f32 %v10472_v63, %v10713_v15  ;;  %v10727_v50 = vadd.f32 %v10466_v34, %v10713_v15  ;;  %v10731_v45 = vadd.f32 %v10476_v17, %v10713_v15 }
 0x87c   : > { %8896 = vrot.lane.b32.xlu0 %v12065_v31, %s9335_s27  ;;  %v10737_v63 = vadd.f32 %v10470_v38, %v10713_v15  ;;  %v10741_v27 = vadd.f32 %v10480_v40, %v10713_v15  ;;  %v10749_v17 = vadd.f32 %v10474_v54, %v10713_v15  ;;  %v10757_v40 = vadd.f32 %v10478_v57, %v10713_v15 }
 0x87d   : > { %v3591_v52 = vsel %vm1446_vm6, %v10717_v21, -inf  ;;  %v3597_v58 = vsel %vm1446_vm6, %v10721_v49, -inf  ;;  %v3603_v34 = vsel %vm1446_vm6, %v10731_v45, -inf  ;;  %v3594_v60 = vsel %vm1446_vm6, %v10727_v50, -inf }
 0x87e   : > { %v3609_v38 = vsel %vm1446_vm6, %v10741_v27, -inf  ;;  %v3600_v35 = vsel %vm1446_vm6, %v10737_v63, -inf  ;;  %v3606_v47 = vsel %vm1446_vm6, %v10749_v17, -inf  ;;  %v3612_v54 = vsel %vm1446_vm6, %v10757_v40, -inf }
 0x87f   : > { %4490 = vrot.lane.b32.xlu1 %v9797_v2, %s9335_s27 }
 0x880   : > { %4484 = vrot.lane.b32.xlu0 %v9791_v61, %s9335_s27 }
 0x883   : > { %4494 = vrot.lane.b32.xlu1 %v9805_v8, %s9335_s27 }
 0x884   : > { %4488 = vrot.lane.b32.xlu0 %v9800_v4, %s9335_s27 }
 0x888   : > { %4492 = vrot.lane.b32.xlu0 %v9808_v10, %s9335_s27 }
 0x88c   : > { %4496 = vrot.lane.b32.xlu0 %v9814_v16, %s9335_s27 }
 0x890   : > { %4498 = vrot.lane.b32.xlu0 %v9811_v14, %s9335_s27 }
 0x8a7   : > { %3592 = vmax.xlane.f32.xlu1 %v3591_v52 }
 0x8ab   : > { %3598 = vmax.xlane.f32.xlu1 %v3597_v58 }
 0x8af   : > { %3604 = vmax.xlane.f32.xlu1 %v3603_v34  ;;  %3595 = vmax.xlane.f32.xlu0 %v3594_v60 }
 0x8b3   : > { %3610 = vmax.xlane.f32.xlu1 %v3609_v38  ;;  %3601 = vmax.xlane.f32.xlu0 %v3600_v35 }
 0x8b7   : > { %3607 = vmax.xlane.f32.xlu0 %v3606_v47 }
 0x8bb   : > { %3613 = vmax.xlane.f32.xlu0 %v3612_v54 }
 0x8da   : > { %v3109_v41 = vpop.xlane.xlu0 %3108 }
 0x8db   : > { %v3106_v1 = vpop.xlane.xlu1 %3105 }
 0x8dc   : > { %v7839_v36 = vpop.f32.mrb[40].mxu0  ;;  %9097 = vrcp.f32 %v3106_v1 }
 0x8dd   : > { %v2711_v5 = vpop.f32.mrb[41].mxu0  ;;  %9099 = vrcp.f32 %v3109_v41 }
 0x8de   : > { %7851 = vmatprep.mubr.msk.f32.mxu0 %vm1292_vm4, %v2711_v5 }
 0x8df   : > { %v3112_v62 = vpop.xlane.xlu1 %3111  ;;  %7852 = vmatmul.mubr.msk.f32.vlgmr.msra.gmra.mrb[32].mxu0 %vm1292_vm4, %v7839_v36 }
 0x8e0   : > { %8484 = vmatpush3.bf16.msra.mxu0 %v10644_v56  ;;  %v7842_v57 = vpop.f32.mrb[42].mxu0  ;;  %9101 = vrcp.f32 %v3112_v62 }
 0x8e1   : > { %v2721_v13 = vpop.f32.mrb[43].mxu0 }
 0x8e2   : > { %7854 = vmatprep.mubr.msk.f32.mxu0 %vm1292_vm4, %v2721_v13 }
 0x8e3   : > { %v10767_v0 = vpop.xlane.xlu1 %3117  ;;  %v10769_v44 = vpop.xlane.xlu0 %3114  ;;  %7855 = vmatmul.mubr.msk.f32.gmra.mrb[34].mxu0 %vm1292_vm4, %v7842_v57 }
 0x8e4   : > { %v7845_v33 = vpop.f32.mrb[44].mxu0  ;;  %9103 = vrcp.f32 %v10769_v44 }
 0x8e5   : > { %v2731_v37 = vpop.f32.mrb[45].mxu0  ;;  %9105 = vrcp.f32 %v10767_v0 }
 0x8e6   : > { %7857 = vmatprep.mubr.msk.f32.mxu0 %vm1292_vm4, %v2731_v37  ;;  %v9098_v43 = vpop.eup %9097 }
 0x8e7   : > { %v8877_v23 = vpop.permute.xlu1 %8876  ;;  %v10773_v51 = vpop.xlane.xlu0 %3120  ;;  %7858 = vmatmul.mubr.msk.f32.gmra.mrb[36].mxu0 %vm1292_vm4, %v7845_v33  ;;  %v3136_v55 = vmul.f32 %v9098_v43, %v10646_v48 }
 0x8e8   : > { %v7848_v56 = vpop.f32.mrb[46].mxu0  ;;  %v8879_v54 = vunpack.i.h.bf16 %v8877_v23  ;;  %v8878_v1 = vunpack.i.l.bf16 %v8877_v23  ;;  %9107 = vrcp.f32 %v10773_v51 }
 0x8e9   : > { %v2741_v18 = vpop.f32.mrb[47].mxu0 }
 0x8ea   : > { %7860 = vmatprep.mubr.msk.f32.mxu0 %vm1292_vm4, %v2741_v18 }
 0x8eb   : > { %v10778_v12 = vpop.permute.xlu1 %8881  ;;  %v10780_v9 = vpop.xlane.xlu0 %3126  ;;  %7861 = vmatmul.mubr.msk.f32.gmra.mrb[38].mxu0 %vm1292_vm4, %v7848_v56 }
 0x8ec   : > { %7907 = vmatprep.mubr.msk.f32.mxu0 %vm1446_vm6, %v3136_v55  ;;  %v8007_v11 = vpop.f32.mrb[72].mxu1 }
 0x8ed   : > { %v10785_v29 = vadd.f32 %v8007_v11, %v10713_v15  ;;  %v3938_v26 = vpop.f32.mrb[73].mxu1 }
 0x8ee   : > { %v10788_v19 = vadd.f32 %v3938_v26, %v10713_v15 }
 0x8ef   : > { %v8887_v20 = vpop.permute.xlu1 %8886  ;;  %v10790_v53 = vpop.xlane.xlu0 %3123  ;;  %v3980_v48 = vsel %vm1446_vm6, %v10785_v29, -inf }
 0x8f0   : > { %v8889_v25 = vunpack.i.h.bf16 %v8887_v20  ;;  %v8888_v52 = vunpack.i.l.bf16 %v8887_v20  ;;  %3981 = vmax.xlane.f32.xlu0 %v3980_v48  ;;  %v8010_v58 = vpop.f32.mrb[74].mxu1  ;;  %v3977_v34 = vsel %vm1446_vm6, %v10788_v19, -inf  ;;  %9109 = vrcp.f32 %v10790_v53 }
 0x8f1   : > { %v10797_v60 = vadd.f32 %v8010_v58, %v10713_v15  ;;  %v3948_v38 = vpop.f32.mrb[75].mxu1  ;;  %3978 = vmax.xlane.f32.xlu1 %v3977_v34  ;;  %v8883_v58 = vunpack.i.l.bf16 %v10778_v12  ;;  %v8489_v34 = vpack.c.bf16 %v8879_v54, %v8878_v1  ;;  %9111 = vrcp.f32 %v10780_v9 }
 0x8f2   : > { %v8577_v35 = vpack.c.bf16 %v8889_v25, %v8888_v52  ;;  %v10800_v47 = vadd.f32 %v3948_v38, %v10713_v15  ;;  %v8884_v52 = vunpack.i.h.bf16 %v10778_v12 }
 0x8f3   : > { %v8892_v36 = vpop.permute.xlu1 %8891  ;;  %v8872_v5 = vpop.permute.xlu0 %8871  ;;  %v3986_v57 = vsel %vm1446_vm6, %v10797_v60, -inf }
 0x8f4   : > { %v8894_v13 = vunpack.i.h.bf16 %v8892_v36  ;;  %v8893_v33 = vunpack.i.l.bf16 %v8892_v36  ;;  %v8874_v37 = vunpack.i.h.bf16 %v8872_v5  ;;  %v8873_v43 = vunpack.i.l.bf16 %v8872_v5  ;;  %8579 = vmatprep.subr.msk.bf16.mxu1 %vm9823_vm5, %v8577_v35  ;;  %3987 = vmax.xlane.f32.xlu0 %v3986_v57  ;;  %v8013_v56 = vpop.f32.mrb[76].mxu1 }
 0x8f5   : > { %v10807_v18 = vadd.f32 %v8013_v56, %v10713_v15  ;;  %v3958_v55 = vpop.f32.mrb[77].mxu1  ;;  %8582 = vmatpush3.bf16.xpose.msk.msra.mxu1 %vm9823_vm5, %v8577_v35  ;;  %v3983_v23 = vsel %vm1446_vm6, %v10800_v47, -inf }
 0x8f6   : > { %v8583_v11 = vpack.c.bf16 %v8894_v13, %v8893_v33  ;;  %v10814_v26 = vadd.f32 %v3958_v55, %v10713_v15  ;;  %3984 = vmax.xlane.f32.xlu1 %v3983_v23  ;;  %v8485_v20 = vpack.c.bf16 %v8874_v37, %v8873_v43  ;;  %v8493_v13 = vpack.c.bf16 %v8884_v52, %v8883_v58  ;;  %v9100_v33 = vpop.eup %9099  ;;  %v742_v37 = vld [vmem:[%s9378_s24 + $0x78] sm:$0xff] }
 0x8f7   : > { %v8897_v48 = vpop.permute.xlu0 %8896  ;;  %v3992_v25 = vsel %vm1446_vm6, %v10807_v18, -inf  ;;  %v8016_v41 = vpop.f32.mrb[78].mxu1  ;;  %v3137_v23 = vmul.f32 %v9100_v33, %v10642_v46 }
 0x8f8   : > { %8585 = vmatprep.subr.msk.bf16.mxu1 %vm9823_vm5, %v8583_v11  ;;  %3993 = vmax.xlane.f32.xlu0 %v3992_v25  ;;  %v8899_v38 = vunpack.i.h.bf16 %v8897_v48  ;;  %v8898_v35 = vunpack.i.l.bf16 %v8897_v48  ;;  %v10823_v36 = vadd.f32 %v8016_v41, %v10713_v15  ;;  %v3968_v62 = vpop.f32.mrb[79].mxu1  ;;  %v3989_v5 = vsel %vm1446_vm6, %v10814_v26, -inf  ;;  %v8902_v0 = vpop.permute.xlu1 %8901  ;;  %v12067_v48 = vld [vmem:[#allocation5_spill] sm:$0xff] }
 0x8f9   : > { %8486 = vmatprep.subr.bf16.mxu0 %v8485_v20  ;;  %v10829_v12 = vadd.f32 %v3968_v62, %v10713_v15  ;;  %v9102_v43 = vpop.eup %9101  ;;  %v8904_v56 = vunpack.i.h.bf16 %v8902_v0  ;;  %v8903_v55 = vunpack.i.l.bf16 %v8902_v0 }
 0x8fa   : > { %3990 = vmax.xlane.f32.xlu1 %v3989_v5  ;;  %8488 = vmatpush3.bf16.msra.mxu0 %v8485_v20  ;;  %v3998_v1 = vsel %vm1446_vm6, %v10823_v36, -inf  ;;  %v8589_v44 = vpack.c.bf16 %v8899_v38, %v8898_v35  ;;  %v9104_v51 = vpop.eup %9103 }
 0x8fb   : > { %8490 = vmatprep.subr.bf16.mxu0 %v8489_v34  ;;  %v4485_v54 = vpop.permute.xlu0 %4484  ;;  %v3995_v57 = vsel %vm1446_vm6, %v10829_v12, -inf  ;;  %v9106_v20 = vpop.eup %9105  ;;  %v8595_v53 = vpack.c.bf16 %v8904_v56, %v8903_v55  ;;  %v3139_v46 = vmul.f32 %v9104_v51, %v10661_v7 }
 0x8fc   : > { %8089 = vmatprep.mubr.msk.f32.mxu1 %vm1292_vm4, %v4485_v54  ;;  %3999 = vmax.xlane.f32.xlu0 %v3998_v1  ;;  %v9108_v9 = vpop.eup %9107  ;;  %v4487_v7 = vpop.permute.xlu1 %4486 }
 0x8fd   : > { %8588 = vmatpush3.bf16.xpose.msk.msra.mxu1 %vm9823_vm5, %v8583_v11  ;;  %v3138_v11 = vmul.f32 %v9102_v43, %v10655_v42  ;;  %v3140_v42 = vmul.f32 %v9106_v20, %v10659_v32  ;;  %v9110_v25 = vpop.eup %9109  ;;  %v3141_v52 = vmul.f32 %v9108_v9, %v10667_v22  ;;  %v12068_v32 = vld [vmem:[#allocation6_spill] sm:$0xff] }
 0x8fe   : > { %3996 = vmax.xlane.f32.xlu1 %v3995_v57  ;;  %8492 = vmatpush3.bf16.msra.mxu0 %v8489_v34  ;;  %v9112_v58 = vpop.eup %9111  ;;  %v3142_v41 = vmul.f32 %v9110_v25, %v10675_v30 }
 0x8ff   : > { %8494 = vmatprep.subr.bf16.mxu0 %v8493_v13  ;;  %8591 = vmatprep.subr.msk.bf16.mxu1 %vm9823_vm5, %v8589_v44  ;;  %v4489_v34 = vpop.permute.xlu0 %4488  ;;  %v3143_v38 = vmul.f32 %v9112_v58, %v10671_v6 }
 0x900   : > { %v4491_v30 = vpop.permute.xlu1 %4490 }
 0x902   : > { %8496 = vmatpush3.bf16.msra.mxu0 %v8493_v13 }
 0x903   : > { %7919 = vmatprep.subr.mxu0 %v742_v37  ;;  %v4493_v22 = vpop.permute.xlu0 %4492 }
 0x904   : > { %v4495_v62 = vpop.permute.xlu1 %4494 }
 0x905   : > { %7908 = vmatmul.mubr.msk.f32.vlgmr.msra.gmra.mrb[48].mxu0 %vm1446_vm6, %v3137_v23  ;;  %8594 = vmatpush3.bf16.xpose.msk.msra.mxu1 %vm9823_vm5, %v8589_v44 }
 0x906   : > { %7910 = vmatprep.mubr.msk.f32.mxu0 %vm1446_vm6, %v3138_v11  ;;  %7920 = vmatpush3.msra.mxu0 %v742_v37 }
 0x907   : > { %8522 = vmatprep.subr.bf16.mxu0 %v12067_v48  ;;  %8597 = vmatprep.subr.msk.bf16.mxu1 %vm9823_vm5, %v8595_v53  ;;  %v4497_v35 = vpop.permute.xlu0 %4496 }
 0x909   : > { %7911 = vmatmul.mubr.msk.f32.gmra.mrb[50].mxu0 %vm1446_vm6, %v3139_v46 }
 0x90a   : > { %7913 = vmatprep.mubr.msk.f32.mxu0 %vm1446_vm6, %v3140_v42 }
 0x90b   : > { %v4499_v5 = vpop.permute.xlu0 %4498 }
 0x90d   : > { %7914 = vmatmul.mubr.msk.f32.gmra.mrb[52].mxu0 %vm1446_vm6, %v3141_v52  ;;  %8600 = vmatpush3.bf16.xpose.msk.msra.mxu1 %vm9823_vm5, %v8595_v53 }
 0x90e   : > { %7916 = vmatprep.mubr.msk.f32.mxu0 %vm1446_vm6, %v3142_v41 }
 0x90f   : > { %8906 = vrot.lane.b32.xlu1 %v12068_v32, %s9334_s23 }
 0x911   : > { %7917 = vmatmul.mubr.msk.f32.gmra.mrb[54].mxu0 %vm1446_vm6, %v3143_v38 }
 0x914   : > { %8090 = vmatmul.mubr.msk.f32.vlgmr.msra.gmra.mrb[80].mxu1 %vm1292_vm4, %v4487_v7 }
 0x915   : > { %8092 = vmatprep.mubr.msk.f32.mxu1 %vm1292_vm4, %v4489_v34 }
 0x918   : > { %8093 = vmatmul.mubr.msk.f32.gmra.mrb[82].mxu1 %vm1292_vm4, %v4491_v30 }
 0x919   : > { %8095 = vmatprep.mubr.msk.f32.mxu1 %vm1292_vm4, %v4493_v22 }
 0x91c   : > { %8096 = vmatmul.mubr.msk.f32.gmra.mrb[84].mxu1 %vm1292_vm4, %v4495_v62 }
 0x91d   : > { %8098 = vmatprep.mubr.msk.f32.mxu1 %vm1292_vm4, %v4497_v35 }
 0x920   : > { %8099 = vmatmul.mubr.msk.f32.gmra.mrb[86].mxu1 %vm1292_vm4, %v4499_v5 }
 0x934   : > { %v3593_v6 = vpop.xlane.xlu1 %3592 }
 0x935   : > { %v3615_v54 = vsub.f32 %v10717_v21, %v3593_v6 }
 0x937   : > { %v3623_v1 = vmul.f32 1.442695, %v3615_v54 }
 0x938   : > { %v3599_v57 = vpop.xlane.xlu1 %3598 }
 0x939   : > { %9113 = vpow2.f32 %v3623_v1  ;;  %v3617_v44 = vsub.f32 %v10721_v49, %v3599_v57 }
 0x93b   : > { %v3627_v13 = vmul.f32 1.442695, %v3617_v44 }
 0x93c   : > { %v3605_v0 = vpop.xlane.xlu1 %3604  ;;  %v3596_v33 = vpop.xlane.xlu0 %3595 }
 0x93d   : > { %9115 = vpow2.f32 %v3627_v13  ;;  %v3619_v37 = vsub.f32 %v10731_v45, %v3605_v0  ;;  %v3616_v43 = vsub.f32 %v10727_v50, %v3596_v33 }
 0x93f   : > { %v3631_v56 = vmul.f32 1.442695, %v3619_v37  ;;  %v3625_v55 = vmul.f32 1.442695, %v3616_v43 }
 0x940   : > { %v3611_v23 = vpop.xlane.xlu1 %3610  ;;  %v3602_v51 = vpop.xlane.xlu0 %3601 }
 0x941   : > { %9117 = vpow2.f32 %v3631_v56  ;;  %v3621_v21 = vsub.f32 %v10741_v27, %v3611_v23  ;;  %v3618_v11 = vsub.f32 %v10737_v63, %v3602_v51 }
 0x942   : > { %9119 = vpow2.f32 %v3625_v55 }
 0x943   : > { %v10881_v20 = vpop.eup %9113  ;;  %v3635_v49 = vmul.f32 1.442695, %v3621_v21  ;;  %v3629_v53 = vmul.f32 1.442695, %v3618_v11 }
 0x944   : > { %v3608_v46 = vpop.xlane.xlu0 %3607  ;;  %v3639_v45 = vsel %vm1446_vm6, %v10881_v20, 0.0 }
 0x945   : > { %9121 = vpow2.f32 %v3635_v49  ;;  %v3620_v50 = vsub.f32 %v10749_v17, %v3608_v46  ;;  %3640 = vadd.xlane.f32.xlu1 %v3639_v45 }
 0x946   : > { %9123 = vpow2.f32 %v3629_v53 }
 0x947   : > { %v10886_v9 = vpop.eup %9115  ;;  %v3633_v42 = vmul.f32 1.442695, %v3620_v50 }
 0x948   : > { %v3614_v27 = vpop.xlane.xlu0 %3613  ;;  %v3645_v63 = vsel %vm1446_vm6, %v10886_v9, 0.0 }
 0x949   : > { %9125 = vpow2.f32 %v3633_v42  ;;  %v3622_v25 = vsub.f32 %v10757_v40, %v3614_v27  ;;  %3646 = vadd.xlane.f32.xlu1 %v3645_v63 }
 0x94b   : > { %v10891_v52 = vpop.eup %9117  ;;  %v3637_v58 = vmul.f32 1.442695, %v3622_v25 }
 0x94c   : > { %v10893_v41 = vpop.eup %9119  ;;  %v3651_v17 = vsel %vm1446_vm6, %v10891_v52, 0.0 }
 0x94d   : > { %9127 = vpow2.f32 %v3637_v58  ;;  %v3642_v34 = vsel %vm1446_vm6, %v10893_v41, 0.0  ;;  %3652 = vadd.xlane.f32.xlu1 %v3651_v17 }
 0x94e   : > { %3643 = vadd.xlane.f32.xlu0 %v3642_v34 }
 0x94f   : > { %v10899_v7 = vpop.eup %9121 }
 0x950   : > { %v10901_v38 = vpop.eup %9123  ;;  %v3657_v40 = vsel %vm1446_vm6, %v10899_v7, 0.0 }
 0x951   : > { %v3648_v22 = vsel %vm1446_vm6, %v10901_v38, 0.0  ;;  %3658 = vadd.xlane.f32.xlu1 %v3657_v40 }
 0x952   : > { %3649 = vadd.xlane.f32.xlu0 %v3648_v22 }
 0x953   : > { %v10907_v30 = vpop.eup %9125 }
 0x954   : > { %v3654_v35 = vsel %vm1446_vm6, %v10907_v30, 0.0 }
 0x956   : > { %3655 = vadd.xlane.f32.xlu0 %v3654_v35 }
 0x957   : > { %v10911_v62 = vpop.eup %9127 }
 0x958   : > { %v3660_v5 = vsel %vm1446_vm6, %v10911_v62, 0.0 }
 0x95a   : > { %3661 = vadd.xlane.f32.xlu0 %v3660_v5 }
 0x97d   : > { %v3982_v6 = vpop.xlane.xlu0 %3981 }
 0x97e   : > { %v4002_v54 = vsub.f32 %v10785_v29, %v3982_v6  ;;  %v3979_v1 = vpop.xlane.xlu1 %3978  ;;  %v12069_v6 = vld [vmem:[#allocation10_spill] sm:$0xff] }
 0x97f   : > { %v4001_v57 = vsub.f32 %v10788_v19, %v3979_v1  ;;  %v12071_v1 = vld [vmem:[#allocation7_spill] sm:$0xff] }
 0x980   : > { %v4011_v44 = vmul.f32 1.442695, %v4002_v54  ;;  %v12070_v54 = vld [vmem:[#allocation12_spill] sm:$0xff] }
 0x981   : > { %v4009_v13 = vmul.f32 1.442695, %v4001_v57  ;;  %v3988_v0 = vpop.xlane.xlu0 %3987  ;;  %v12073_v57 = vld [vmem:[#allocation11_spill] sm:$0xff] }
 0x982   : > { %9129 = vpow2.f32 %v4011_v44  ;;  %v4004_v33 = vsub.f32 %v10797_v60, %v3988_v0 }
 0x983   : > { %9131 = vpow2.f32 %v4009_v13  ;;  %v3985_v37 = vpop.xlane.xlu1 %3984 }
 0x984   : > { %v4015_v43 = vmul.f32 1.442695, %v4004_v33  ;;  %v4003_v56 = vsub.f32 %v10800_v47, %v3985_v37 }
 0x985   : > { %v3994_v55 = vpop.xlane.xlu0 %3993 }
 0x986   : > { %9133 = vpow2.f32 %v4015_v43  ;;  %v4013_v23 = vmul.f32 1.442695, %v4003_v56  ;;  %v4006_v51 = vsub.f32 %v10807_v18, %v3994_v55  ;;  %v12074_v56 = vld [vmem:[#allocation13_spill] sm:$0xff] }
 0x987   : > { %v3991_v29 = vpop.xlane.xlu1 %3990 }
 0x988   : > { %9135 = vpow2.f32 %v4013_v23  ;;  %v4019_v21 = vmul.f32 1.442695, %v4006_v51  ;;  %v4005_v19 = vsub.f32 %v10814_v26, %v3991_v29 }
 0x989   : > { %v4000_v11 = vpop.xlane.xlu0 %3999 }
 0x98a   : > { %9137 = vpow2.f32 %v4019_v21  ;;  %v4017_v49 = vmul.f32 1.442695, %v4005_v19  ;;  %v4008_v60 = vsub.f32 %v10823_v36, %v4000_v11 }
 0x98b   : > { %v3997_v53 = vpop.xlane.xlu1 %3996 }
 0x98c   : > { %v10922_v46 = vpop.eup %9129  ;;  %9139 = vpow2.f32 %v4017_v49  ;;  %v4023_v47 = vmul.f32 1.442695, %v4008_v60  ;;  %v4007_v45 = vsub.f32 %v10829_v12, %v3997_v53 }
 0x98d   : > { %v10925_v50 = vpop.eup %9131  ;;  %v4028_v18 = vsel %vm1446_vm6, %v10922_v46, 0.0 }
 0x98e   : > { %9141 = vpow2.f32 %v4023_v47  ;;  %v4021_v42 = vmul.f32 1.442695, %v4007_v45  ;;  %4029 = vadd.xlane.f32.xlu0 %v4028_v18  ;;  %v4025_v26 = vsel %vm1446_vm6, %v10925_v50, 0.0 }
 0x98f   : > { %4026 = vadd.xlane.f32.xlu1 %v4025_v26 }
 0x990   : > { %v10931_v36 = vpop.eup %9133  ;;  %9143 = vpow2.f32 %v4021_v42 }
 0x991   : > { %v4034_v27 = vsel %vm1446_vm6, %v10931_v36, 0.0 }
 0x992   : > { %v10935_v63 = vpop.eup %9135  ;;  %4035 = vadd.xlane.f32.xlu0 %v4034_v27 }
 0x993   : > { %v4031_v12 = vsel %vm1446_vm6, %v10935_v63, 0.0 }
 0x994   : > { %v10939_v25 = vpop.eup %9137  ;;  %4032 = vadd.xlane.f32.xlu1 %v4031_v12 }
 0x995   : > { %v4040_v58 = vsel %vm1446_vm6, %v10939_v25, 0.0 }
 0x996   : > { %v10943_v17 = vpop.eup %9139  ;;  %4041 = vadd.xlane.f32.xlu0 %v4040_v58 }
 0x997   : > { %v4037_v34 = vsel %vm1446_vm6, %v10943_v17, 0.0 }
 0x998   : > { %v10947_v40 = vpop.eup %9141  ;;  %4038 = vadd.xlane.f32.xlu1 %v4037_v34 }
 0x999   : > { %v4046_v22 = vsel %vm1446_vm6, %v10947_v40, 0.0 }
 0x99a   : > { %v10951_v35 = vpop.eup %9143  ;;  %4047 = vadd.xlane.f32.xlu0 %v4046_v22 }
 0x99b   : > { %v4043_v5 = vsel %vm1446_vm6, %v10951_v35, 0.0 }
 0x99e   : > { %4044 = vadd.xlane.f32.xlu0 %v4043_v5 }
 0x9a9   : > { %8916 = vrot.lane.b32.xlu1 %v12069_v6, %s9334_s23 }
 0x9ad   : > { %8921 = vrot.lane.b32.xlu1 %v12070_v54, %s9334_s23 }
 0x9b1   : > { %8926 = vrot.lane.b32.xlu1 %v10003_v39, %s9336_s28 }
 0x9b4   : > { %8911 = vrot.lane.b32.xlu0 %v12071_v1, %s9334_s23 }
 0x9b5   : > { %8931 = vrot.lane.b32.xlu1 %v12062_v28, %s9336_s28 }
 0x9b8   : > { %8936 = vrot.lane.b32.xlu0 %v12065_v31, %s9336_s28 }
 0x9b9   : > { %8941 = vrot.lane.b32.xlu1 %v12063_v3, %s9336_s28 }
 0x9bc   : > { %5031 = vrot.lane.b32.xlu0 %v9791_v61, %s9336_s28  ;;  %v8907_v61 = vpop.permute.xlu1 %8906 }
 0x9bd   : > { %5033 = vrot.lane.b32.xlu1 %v9788_v59, %s9336_s28  ;;  %v8909_v0 = vunpack.i.h.bf16 %v8907_v61  ;;  %v8908_v33 = vunpack.i.l.bf16 %v8907_v61 }
 0x9bf   : > { %v8561_v19 = vpack.c.bf16 %v8909_v0, %v8908_v33 }
 0x9c0   : > { %5035 = vrot.lane.b32.xlu0 %v9800_v4, %s9336_s28 }
 0x9c1   : > { %5037 = vrot.lane.b32.xlu1 %v9797_v2, %s9336_s28 }
 0x9c4   : > { %5039 = vrot.lane.b32.xlu0 %v9808_v10, %s9336_s28 }
 0x9c5   : > { %5041 = vrot.lane.b32.xlu1 %v9805_v8, %s9336_s28 }
 0x9c8   : > { %5043 = vrot.lane.b32.xlu0 %v9814_v16, %s9336_s28  ;;  %v12072_v16 = vld [vmem:[#allocation8_spill] sm:$0xff] }
 0x9c9   : > { %5045 = vrot.lane.b32.xlu1 %v9811_v14, %s9336_s28 }
 0x9d2   : > { %v3641_v59 = vpop.xlane.xlu1 %3640 }
 0x9d3   : > { %9145 = vrcp.f32 %v3641_v59 }
 0x9d6   : > { %v3647_v39 = vpop.xlane.xlu1 %3646 }
 0x9d8   : > { %v7909_v28 = vpop.f32.mrb[48].mxu0 }
 0x9d9   : > { %v3258_v4 = vpop.f32.mrb[49].mxu0 }
 0x9da   : > { %7921 = vmatprep.mubr.msk.f32.mxu0 %vm1292_vm4, %v3258_v4  ;;  %v3653_v10 = vpop.xlane.xlu1 %3652 }
 0x9db   : > { %v3644_v2 = vpop.xlane.xlu0 %3643  ;;  %7922 = vmatmul.mubr.msk.f32.vlgmr.msra.gmra.mrb[32].mxu0 %vm1292_vm4, %v7909_v28 }
 0x9dc   : > { %9147 = vrcp.f32 %v3644_v2  ;;  %8524 = vmatpush3.bf16.msra.mxu0 %v12067_v48  ;;  %v7912_v8 = vpop.f32.mrb[50].mxu0 }
 0x9dd   : > { %9149 = vrcp.f32 %v3647_v39  ;;  %8526 = vmatprep.subr.bf16.mxu0 %v12072_v16  ;;  %v3268_v14 = vpop.f32.mrb[51].mxu0  ;;  %v9146_v48 = vpop.eup %9145 }
 0x9de   : > { %7924 = vmatprep.mubr.msk.f32.mxu0 %vm1292_vm4, %v3268_v14  ;;  %v3659_v13 = vpop.xlane.xlu1 %3658  ;;  %v3671_v51 = vmul.f32 %v9146_v48, %v10881_v20 }
 0x9df   : > { %v3650_v3 = vpop.xlane.xlu0 %3649  ;;  %7925 = vmatmul.mubr.msk.f32.gmra.mrb[34].mxu0 %vm1292_vm4, %v7912_v8 }
 0x9e0   : > { %9151 = vrcp.f32 %v3650_v3  ;;  %8528 = vmatpush3.bf16.msra.mxu0 %v12072_v16  ;;  %v7915_v31 = vpop.f32.mrb[52].mxu0 }
 0x9e1   : > { %9153 = vrcp.f32 %v3653_v10  ;;  %8530 = vmatprep.subr.bf16.mxu0 %v12073_v57  ;;  %v3278_v44 = vpop.f32.mrb[53].mxu0 }
 0x9e2   : > { %7927 = vmatprep.mubr.msk.f32.mxu0 %vm1292_vm4, %v3278_v44 }
 0x9e3   : > { %v3656_v37 = vpop.xlane.xlu0 %3655  ;;  %7928 = vmatmul.mubr.msk.f32.gmra.mrb[36].mxu0 %vm1292_vm4, %v7915_v31 }
 0x9e4   : > { %9155 = vrcp.f32 %v3656_v37  ;;  %8532 = vmatpush3.bf16.msra.mxu0 %v12073_v57  ;;  %v7918_v43 = vpop.f32.mrb[54].mxu0 }
 0x9e5   : > { %9157 = vrcp.f32 %v3659_v13  ;;  %8534 = vmatprep.subr.bf16.mxu0 %v12074_v56  ;;  %v3288_v55 = vpop.f32.mrb[55].mxu0 }
 0x9e6   : > { %v9148_v23 = vpop.eup %9147  ;;  %7930 = vmatprep.mubr.msk.f32.mxu0 %vm1292_vm4, %v3288_v55 }
 0x9e7   : > { %v9150_v29 = vpop.eup %9149  ;;  %v3662_v21 = vpop.xlane.xlu0 %3661  ;;  %7931 = vmatmul.mubr.msk.f32.gmra.mrb[38].mxu0 %vm1292_vm4, %v7918_v43  ;;  %v3672_v53 = vmul.f32 %v9148_v23, %v10893_v41 }
 0x9e8   : > { %v8091_v11 = vpop.f32.mrb[80].mxu1  ;;  %9159 = vrcp.f32 %v3662_v21  ;;  %8536 = vmatpush3.bf16.msra.mxu0 %v12074_v56  ;;  %7977 = vmatprep.mubr.msk.f32.mxu0 %vm1446_vm6, %v3671_v51  ;;  %v3673_v45 = vmul.f32 %v9150_v29, %v10886_v9 }
 0x9e9   : > { %v11003_v49 = vadd.f32 %v8091_v11, %v10713_v15  ;;  %v4614_v60 = vpop.f32.mrb[81].mxu1  ;;  %8562 = vmatprep.subr.bf16.mxu0 %v8561_v19 }
 0x9ea   : > { %v11007_v20 = vadd.f32 %v4614_v60, %v10713_v15  ;;  %v9152_v47 = vpop.eup %9151 }
 0x9eb   : > { %v4656_v18 = vsel %vm1446_vm6, %v11003_v49, -inf  ;;  %v9154_v42 = vpop.eup %9153  ;;  %7978 = vmatmul.mubr.msk.f32.vlgmr.msra.gmra.mrb[56].mxu0 %vm1446_vm6, %v3672_v53  ;;  %v8094_v26 = vpop.f32.mrb[82].mxu1  ;;  %v3674_v9 = vmul.f32 %v9152_v47, %v10901_v38 }
 0x9ec   : > { %v4653_v27 = vsel %vm1446_vm6, %v11007_v20, -inf  ;;  %8564 = vmatpush3.bf16.msra.mxu0 %v8561_v19  ;;  %7980 = vmatprep.mubr.msk.f32.mxu0 %vm1446_vm6, %v3673_v45  ;;  %v4624_v41 = vpop.f32.mrb[83].mxu1  ;;  %v3675_v34 = vmul.f32 %v9154_v42, %v10891_v52  ;;  %v11025_v59 = vadd.f32 %v8094_v26, %v10713_v15 }
 0x9ed   : > { %v11017_v12 = vadd.f32 %v4624_v41, %v10713_v15  ;;  %4657 = vmax.xlane.f32.xlu1 %v4656_v18  ;;  %4654 = vmax.xlane.f32.xlu0 %v4653_v27 }
 0x9ee   : > { %v9156_v58 = vpop.eup %9155  ;;  %v4662_v14 = vsel %vm1446_vm6, %v11025_v59, -inf }
 0x9ef   : > { %v9158_v22 = vpop.eup %9157  ;;  %7981 = vmatmul.mubr.msk.f32.gmra.mrb[58].mxu0 %vm1446_vm6, %v3674_v9  ;;  %v8097_v5 = vpop.f32.mrb[84].mxu1  ;;  %v4659_v61 = vsel %vm1446_vm6, %v11017_v12, -inf  ;;  %v3676_v38 = vmul.f32 %v9156_v58, %v10907_v30 }
 0x9f0   : > { %7983 = vmatprep.mubr.msk.f32.mxu0 %vm1446_vm6, %v3675_v34  ;;  %v4634_v39 = vpop.f32.mrb[85].mxu1  ;;  %v3677_v4 = vmul.f32 %v9158_v22, %v10899_v7  ;;  %v11037_v8 = vadd.f32 %v8097_v5, %v10713_v15 }
 0x9f1   : > { %v11029_v28 = vadd.f32 %v4634_v39, %v10713_v15  ;;  %4660 = vmax.xlane.f32.xlu0 %v4659_v61 }
 0x9f2   : > { %v9160_v52 = vpop.eup %9159  ;;  %v4668_v57 = vsel %vm1446_vm6, %v11037_v8, -inf }
 0x9f3   : > { %7984 = vmatmul.mubr.msk.f32.gmra.mrb[60].mxu0 %vm1446_vm6, %v3676_v38  ;;  %v8100_v2 = vpop.f32.mrb[86].mxu1  ;;  %v4665_v10 = vsel %vm1446_vm6, %v11029_v28, -inf  ;;  %v3678_v7 = vmul.f32 %v9160_v52, %v10911_v62 }
 0x9f4   : > { %7986 = vmatprep.mubr.msk.f32.mxu0 %vm1446_vm6, %v3677_v4  ;;  %v4644_v16 = vpop.f32.mrb[87].mxu1  ;;  %4666 = vmax.xlane.f32.xlu1 %v4665_v10  ;;  %v11050_v31 = vadd.f32 %v8100_v2, %v10713_v15 }
 0x9f5   : > { %v11043_v30 = vadd.f32 %v4644_v16, %v10713_v15  ;;  %4663 = vmax.xlane.f32.xlu0 %v4662_v14  ;;  %v9306_v14 = vld [vmem:[%s9378_s24 + $0x68] sm:$0xff] }
 0x9f6   : > { %v4674_v44 = vsel %vm1446_vm6, %v11050_v31, -inf }
 0x9f7   : > { %7987 = vmatmul.mubr.msk.f32.gmra.mrb[62].mxu0 %vm1446_vm6, %v3678_v7  ;;  %v4671_v3 = vsel %vm1446_vm6, %v11043_v30, -inf }
 0x9f8   : > { %4672 = vmax.xlane.f32.xlu1 %v4671_v3 }
 0x9f9   : > { %4669 = vmax.xlane.f32.xlu0 %v4668_v57 }
 0x9fd   : > { %4675 = vmax.xlane.f32.xlu0 %v4674_v44 }
 0xa09   : > { %8946 = vrot.lane.b32.xlu1 %v12068_v32, %s9335_s27 }
 0xa1b   : > { %v4030_v62 = vpop.xlane.xlu0 %4029 }
 0xa1c   : > { %v4027_v13 = vpop.xlane.xlu1 %4026 }
 0xa1d   : > { %9161 = vrcp.f32 %v4027_v13 }
 0xa1e   : > { %9163 = vrcp.f32 %v4030_v62 }
 0xa1f   : > { %v4036_v48 = vpop.xlane.xlu0 %4035 }
 0xa21   : > { %v4033_v0 = vpop.xlane.xlu1 %4032 }
 0xa22   : > { %9165 = vrcp.f32 %v4033_v0 }
 0xa23   : > { %v4042_v33 = vpop.xlane.xlu0 %4041  ;;  %9167 = vrcp.f32 %v4036_v48  ;;  %v11078_v48 = vld [vmem:[%s9378_s24 + $0x60] sm:$0xff] }
 0xa25   : > { %v4039_v37 = vpop.xlane.xlu1 %4038 }
 0xa26   : > { %9169 = vrcp.f32 %v4039_v37 }
 0xa27   : > { %v9162_v43 = vpop.eup %9161  ;;  %v4048_v56 = vpop.xlane.xlu0 %4047  ;;  %9171 = vrcp.f32 %v4042_v33 }
 0xa28   : > { %v4057_v55 = vmul.f32 %v9162_v43, %v10925_v50  ;;  %v9164_v4 = vpop.eup %9163 }
 0xa29   : > { %v8917_v23 = vpop.permute.xlu1 %8916  ;;  %v4058_v10 = vmul.f32 %v9164_v4, %v10922_v46 }
 0xa2a   : > { %8033 = vmatprep.mubr.msk.f32.mxu0 %vm1446_vm6, %v4057_v55  ;;  %v8919_v19 = vunpack.i.h.bf16 %v8917_v23  ;;  %v8918_v11 = vunpack.i.l.bf16 %v8917_v23 }
 0xa2b   : > { %v4045_v51 = vpop.xlane.xlu0 %4044 }
 0xa2c   : > { %v8569_v9 = vpack.c.bf16 %v8919_v19, %v8918_v11  ;;  %9173 = vrcp.f32 %v4045_v51  ;;  %v9166_v2 = vpop.eup %9165 }
 0xa2d   : > { %v8922_v29 = vpop.permute.xlu1 %8921  ;;  %9175 = vrcp.f32 %v4048_v56  ;;  %v9168_v7 = vpop.eup %9167  ;;  %v4059_v57 = vmul.f32 %v9166_v2, %v10935_v63 }
 0xa2e   : > { %v8924_v27 = vunpack.i.h.bf16 %v8922_v29  ;;  %v8923_v41 = vunpack.i.l.bf16 %v8922_v29  ;;  %v4060_v13 = vmul.f32 %v9168_v7, %v10931_v36 }
 0xa2f   : > { %v8912_v21 = vpop.permute.xlu0 %8911 }
 0xa30   : > { %v8914_v60 = vunpack.i.h.bf16 %v8912_v21  ;;  %v8913_v53 = vunpack.i.l.bf16 %v8912_v21  ;;  %v8573_v39 = vpack.c.bf16 %v8924_v27, %v8923_v41  ;;  %v9170_v44 = vpop.eup %9169 }
 0xa31   : > { %v8927_v47 = vpop.permute.xlu1 %8926  ;;  %v9172_v0 = vpop.eup %9171  ;;  %v4061_v63 = vmul.f32 %v9170_v44, %v10943_v17 }
 0xa32   : > { %v8929_v45 = vunpack.i.h.bf16 %v8927_v47  ;;  %v8928_v18 = vunpack.i.l.bf16 %v8927_v47  ;;  %v8565_v42 = vpack.c.bf16 %v8914_v60, %v8913_v53  ;;  %v4062_v43 = vmul.f32 %v9172_v0, %v10939_v25 }
 0xa33   : > { %v8937_v26 = vpop.permute.xlu0 %8936 }
 0xa34   : > { %v8617_v50 = vpack.c.bf16 %v8929_v45, %v8928_v18  ;;  %8566 = vmatprep.subr.bf16.mxu0 %v8565_v42  ;;  %v8939_v38 = vunpack.i.h.bf16 %v8937_v26  ;;  %v8938_v52 = vunpack.i.l.bf16 %v8937_v26 }
 0xa35   : > { %v8932_v58 = vpop.permute.xlu1 %8931  ;;  %8568 = vmatpush3.bf16.msra.mxu0 %v8565_v42 }
 0xa36   : > { %v8934_v34 = vunpack.i.h.bf16 %v8932_v58  ;;  %v8933_v22 = vunpack.i.l.bf16 %v8932_v58  ;;  %8619 = vmatprep.subr.msk.bf16.mxu1 %vm9823_vm5, %v8617_v50  ;;  %8570 = vmatprep.subr.bf16.mxu0 %v8569_v9  ;;  %v8629_v16 = vpack.c.bf16 %v8939_v38, %v8938_v52  ;;  %v9174_v33 = vpop.eup %9173 }
 0xa37   : > { %8622 = vmatpush3.bf16.xpose.msk.msra.mxu1 %vm9823_vm5, %v8617_v50  ;;  %v5032_v5 = vpop.permute.xlu0 %5031  ;;  %v9176_v56 = vpop.eup %9175  ;;  %v4063_v36 = vmul.f32 %v9174_v33, %v10951_v35 }
 0xa38   : > { %v8623_v61 = vpack.c.bf16 %v8934_v34, %v8933_v22  ;;  %8159 = vmatprep.mubr.msk.f32.mxu1 %vm1292_vm4, %v5032_v5  ;;  %v4064_v17 = vmul.f32 %v9176_v56, %v10947_v40 }
 0xa39   : > { %8572 = vmatpush3.bf16.msra.mxu0 %v8569_v9  ;;  %v8942_v3 = vpop.permute.xlu1 %8941 }
 0xa3a   : > { %8625 = vmatprep.subr.msk.bf16.mxu1 %vm9823_vm5, %v8623_v61  ;;  %8574 = vmatprep.subr.bf16.mxu0 %v8573_v39  ;;  %v8944_v46 = vunpack.i.h.bf16 %v8942_v3  ;;  %v8943_v62 = vunpack.i.l.bf16 %v8942_v3 }
 0xa3b   : > { %v5036_v25 = vpop.permute.xlu0 %5035 }
 0xa3c   : > { %v8635_v37 = vpack.c.bf16 %v8944_v46, %v8943_v62 }
 0xa3d   : > { %8576 = vmatpush3.bf16.msra.mxu0 %v8573_v39  ;;  %v5034_v55 = vpop.permute.xlu1 %5033 }
 0xa3e   : > { %8045 = vmatprep.subr.mxu0 %v9306_v14 }
 0xa3f   : > { %8628 = vmatpush3.bf16.xpose.msk.msra.mxu1 %vm9823_vm5, %v8623_v61  ;;  %v5040_v35 = vpop.permute.xlu0 %5039 }
 0xa40   : > { %8631 = vmatprep.subr.msk.bf16.mxu1 %vm9823_vm5, %v8629_v16  ;;  %8034 = vmatmul.mubr.msk.f32.vlgmr.msra.gmra.mrb[64].mxu0 %vm1446_vm6, %v4058_v10 }
 0xa41   : > { %8036 = vmatprep.mubr.msk.f32.mxu0 %vm1446_vm6, %v4059_v57  ;;  %8046 = vmatpush3.msra.mxu0 %v9306_v14  ;;  %v5038_v23 = vpop.permute.xlu1 %5037 }
 0xa42   : > { %8059 = vmatprep.subr.mxu0 %v11078_v48 }
 0xa43   : > { %v5044_v29 = vpop.permute.xlu0 %5043 }
 0xa44   : > { %8037 = vmatmul.mubr.msk.f32.gmra.mrb[66].mxu0 %vm1446_vm6, %v4060_v13 }
 0xa45   : > { %8039 = vmatprep.mubr.msk.f32.mxu0 %vm1446_vm6, %v4061_v63  ;;  %v5042_v51 = vpop.permute.xlu1 %5041 }
 0xa47   : > { %8634 = vmatpush3.bf16.xpose.msk.msra.mxu1 %vm9823_vm5, %v8629_v16 }
 0xa48   : > { %8637 = vmatprep.subr.msk.bf16.mxu1 %vm9823_vm5, %v8635_v37  ;;  %8040 = vmatmul.mubr.msk.f32.gmra.mrb[68].mxu0 %vm1446_vm6, %v4062_v43 }
 0xa49   : > { %8042 = vmatprep.mubr.msk.f32.mxu0 %vm1446_vm6, %v4063_v36  ;;  %v5046_v40 = vpop.permute.xlu1 %5045 }
 0xa4c   : > { %8043 = vmatmul.mubr.msk.f32.gmra.mrb[70].mxu0 %vm1446_vm6, %v4064_v17 }
 0xa4f   : > { %8640 = vmatpush3.bf16.xpose.msk.msra.mxu1 %vm9823_vm5, %v8635_v37 }
 0xa56   : > { %8160 = vmatmul.mubr.msk.f32.vlgmr.msra.gmra.mrb[88].mxu1 %vm1292_vm4, %v5034_v55 }
 0xa57   : > { %8162 = vmatprep.mubr.msk.f32.mxu1 %vm1292_vm4, %v5036_v25 }
 0xa5a   : > { %8163 = vmatmul.mubr.msk.f32.gmra.mrb[90].mxu1 %vm1292_vm4, %v5038_v23 }
 0xa5b   : > { %8165 = vmatprep.mubr.msk.f32.mxu1 %vm1292_vm4, %v5040_v35 }
 0xa5e   : > { %8166 = vmatmul.mubr.msk.f32.gmra.mrb[92].mxu1 %vm1292_vm4, %v5042_v51 }
 0xa5f   : > { %8168 = vmatprep.mubr.msk.f32.mxu1 %vm1292_vm4, %v5044_v29 }
 0xa62   : > { %8169 = vmatmul.mubr.msk.f32.gmra.mrb[94].mxu1 %vm1292_vm4, %v5046_v40 }
 0xa7a   : > { %v4655_v24 = vpop.xlane.xlu0 %4654  ;;  %v4658_v21 = vpop.xlane.xlu1 %4657 }
 0xa7b   : > { %v4677_v19 = vsub.f32 %v11007_v20, %v4655_v24  ;;  %v4678_v11 = vsub.f32 %v11003_v49, %v4658_v21 }
 0xa7d   : > { %v4685_v60 = vmul.f32 1.442695, %v4677_v19  ;;  %v4687_v53 = vmul.f32 1.442695, %v4678_v11 }
 0xa7e   : > { %v4661_v47 = vpop.xlane.xlu0 %4660 }
 0xa7f   : > { %9177 = vpow2.f32 %v4685_v60  ;;  %v4679_v45 = vsub.f32 %v11017_v12, %v4661_v47 }
 0xa80   : > { %9179 = vpow2.f32 %v4687_v53 }
 0xa81   : > { %v4689_v18 = vmul.f32 1.442695, %v4679_v45  ;;  %v4667_v42 = vpop.xlane.xlu1 %4666 }
 0xa82   : > { %v4664_v26 = vpop.xlane.xlu0 %4663  ;;  %v4681_v27 = vsub.f32 %v11029_v28, %v4667_v42 }
 0xa83   : > { %9181 = vpow2.f32 %v4689_v18  ;;  %v4680_v41 = vsub.f32 %v11025_v59, %v4664_v26 }
 0xa84   : > { %v4693_v50 = vmul.f32 1.442695, %v4681_v27 }
 0xa85   : > { %v4691_v9 = vmul.f32 1.442695, %v4680_v41  ;;  %v4673_v49 = vpop.xlane.xlu1 %4672 }
 0xa86   : > { %9183 = vpow2.f32 %v4693_v50  ;;  %v4670_v20 = vpop.xlane.xlu0 %4669  ;;  %v4683_v22 = vsub.f32 %v11043_v30, %v4673_v49 }
 0xa87   : > { %9185 = vpow2.f32 %v4691_v9  ;;  %v4682_v58 = vsub.f32 %v11037_v8, %v4670_v20 }
 0xa88   : > { %v4697_v38 = vmul.f32 1.442695, %v4683_v22 }
 0xa89   : > { %v11109_v34 = vpop.eup %9177  ;;  %v4695_v12 = vmul.f32 1.442695, %v4682_v58  ;;  %v8947_v29 = vpop.permute.xlu1 %8946 }
 0xa8a   : > { %v11112_v5 = vpop.eup %9179  ;;  %v4676_v61 = vpop.xlane.xlu0 %4675  ;;  %v4701_v28 = vsel %vm1446_vm6, %v11109_v34, 0.0  ;;  %v8949_v40 = vunpack.i.h.bf16 %v8947_v29  ;;  %v8948_v24 = vunpack.i.l.bf16 %v8947_v29 }
 0xa8b   : > { %9187 = vpow2.f32 %v4695_v12  ;;  %v4684_v59 = vsub.f32 %v11050_v31, %v4676_v61  ;;  %4702 = vadd.xlane.f32.xlu1 %v4701_v28  ;;  %v4704_v39 = vsel %vm1446_vm6, %v11112_v5, 0.0 }
 0xa8c   : > { %4705 = vadd.xlane.f32.xlu0 %v4704_v39  ;;  %v8601_v11 = vpack.c.bf16 %v8949_v40, %v8948_v24 }
 0xa8d   : > { %v11119_v8 = vpop.eup %9181  ;;  %v4699_v52 = vmul.f32 1.442695, %v4684_v59 }
 0xa8e   : > { %v4707_v30 = vsel %vm1446_vm6, %v11119_v8, 0.0 }
 0xa8f   : > { %9189 = vpow2.f32 %v4699_v52  ;;  %4708 = vadd.xlane.f32.xlu1 %v4707_v30 }
 0xa90   : > { %v11123_v4 = vpop.eup %9183  ;;  %9191 = vpow2.f32 %v4697_v38 }
 0xa91   : > { %v11125_v2 = vpop.eup %9185  ;;  %v4713_v31 = vsel %vm1446_vm6, %v11123_v4, 0.0 }
 0xa92   : > { %v4710_v10 = vsel %vm1446_vm6, %v11125_v2, 0.0 }
 0xa93   : > { %4711 = vadd.xlane.f32.xlu0 %v4710_v10  ;;  %4714 = vadd.xlane.f32.xlu1 %v4713_v31 }
 0xa95   : > { %v11131_v16 = vpop.eup %9187 }
 0xa96   : > { %v4716_v14 = vsel %vm1446_vm6, %v11131_v16, 0.0 }
 0xa97   : > { %4717 = vadd.xlane.f32.xlu0 %v4716_v14 }
 0xa99   : > { %v11135_v7 = vpop.eup %9189 }
 0xa9a   : > { %v4722_v3 = vsel %vm1446_vm6, %v11135_v7, 0.0  ;;  %v11139_v57 = vpop.eup %9191 }
 0xa9b   : > { %4723 = vadd.xlane.f32.xlu0 %v4722_v3  ;;  %v4719_v44 = vsel %vm1446_vm6, %v11139_v57, 0.0 }
 0xa9f   : > { %4720 = vadd.xlane.f32.xlu0 %v4719_v44 }
 0xaa4   : > { %8956 = vrot.lane.b32.xlu1 %v12069_v6, %s9335_s27 }
 0xaa8   : > { %8961 = vrot.lane.b32.xlu1 %v12070_v54, %s9335_s27 }
 0xaae   : > { %v11147_v46 = vpop.f32.mrb[32].mxu0 }
 0xaaf   : > { %v11149_v62 = vpop.f32.mrb[33].mxu0 }
 0xab2   : > { %v11151_v13 = vpop.f32.mrb[34].mxu0 }
 0xab3   : > { %v11153_v0 = vpop.f32.mrb[35].mxu0 }
 0xab5   : > { %8951 = vrot.lane.b32.xlu0 %v12071_v1, %s9335_s27 }
 0xab6   : > { %v11157_v63 = vpop.f32.mrb[36].mxu0 }
 0xab7   : > { %v11159_v33 = vpop.f32.mrb[37].mxu0 }
 0xaba   : > { %v11161_v37 = vpop.f32.mrb[38].mxu0 }
 0xabb   : > { %v11163_v43 = vpop.f32.mrb[39].mxu0 }
 0xabe   : > { %v7979_v56 = vpop.f32.mrb[56].mxu0 }
 0xabf   : > { %v3769_v36 = vpop.f32.mrb[57].mxu0 }
 0xac2   : > { %v7982_v17 = vpop.f32.mrb[58].mxu0 }
 0xac3   : > { %v3779_v55 = vpop.f32.mrb[59].mxu0 }
 0xac6   : > { %v7985_v25 = vpop.f32.mrb[60].mxu0 }
 0xac7   : > { %v3789_v23 = vpop.f32.mrb[61].mxu0 }
 0xaca   : > { %v11165_v35 = vpop.f32.mrb[62].mxu0 }
 0xacb   : > { %v3799_v51 = vpop.f32.mrb[63].mxu0 }
 0xb13   : > { %v8035_v21 = vpop.f32.mrb[64].mxu0 }
 0xb14   : > { %v4187_v19 = vpop.f32.mrb[65].mxu0 }
 0xb15   : > { %8047 = vmatprep.mubr.msk.f32.mxu0 %vm1292_vm4, %v4187_v19 }
 0xb16   : > { %8048 = vmatmul.mubr.msk.f32.vlgmr.msra.gmra.mrb[72].mxu0 %vm1292_vm4, %v8035_v21 }
 0xb17   : > { %8060 = vmatpush3.msra.mxu0 %v11078_v48  ;;  %v8038_v60 = vpop.f32.mrb[66].mxu0 }
 0xb18   : > { %8602 = vmatprep.subr.bf16.mxu0 %v8601_v11  ;;  %v4197_v53 = vpop.f32.mrb[67].mxu0  ;;  %v4703_v47 = vpop.xlane.xlu1 %4702 }
 0xb19   : > { %8050 = vmatprep.mubr.msk.f32.mxu0 %vm1292_vm4, %v4197_v53  ;;  %v4706_v18 = vpop.xlane.xlu0 %4705  ;;  %9193 = vrcp.f32 %v4703_v47 }
 0xb1a   : > { %8051 = vmatmul.mubr.msk.f32.gmra.mrb[74].mxu0 %vm1292_vm4, %v8038_v60  ;;  %9195 = vrcp.f32 %v4706_v18 }
 0xb1b   : > { %v8041_v45 = vpop.f32.mrb[68].mxu0 }
 0xb1c   : > { %v4207_v42 = vpop.f32.mrb[69].mxu0  ;;  %v4709_v27 = vpop.xlane.xlu1 %4708 }
 0xb1d   : > { %8053 = vmatprep.mubr.msk.f32.mxu0 %vm1292_vm4, %v4207_v42  ;;  %9197 = vrcp.f32 %v4709_v27 }
 0xb1e   : > { %8054 = vmatmul.mubr.msk.f32.gmra.mrb[76].mxu0 %vm1292_vm4, %v8041_v45 }
 0xb1f   : > { %v8044_v26 = vpop.f32.mrb[70].mxu0 }
 0xb20   : > { %v4712_v41 = vpop.xlane.xlu0 %4711  ;;  %v4217_v50 = vpop.f32.mrb[71].mxu0 }
 0xb21   : > { %8056 = vmatprep.mubr.msk.f32.mxu0 %vm1292_vm4, %v4217_v50  ;;  %v4715_v9 = vpop.xlane.xlu1 %4714  ;;  %9199 = vrcp.f32 %v4712_v41 }
 0xb22   : > { %8057 = vmatmul.mubr.msk.f32.gmra.mrb[78].mxu0 %vm1292_vm4, %v8044_v26  ;;  %9201 = vrcp.f32 %v4715_v9  ;;  %v9308_v9 = vld [vmem:[%s9378_s24 + $0x70] sm:$0xff] }
 0xb23   : > { %8061 = vmatprep.mubr.msk.f32.mxu0 %vm1292_vm4, %v3769_v36  ;;  %v9194_v31 = vpop.eup %9193 }
 0xb24   : > { %v11176_v48 = vpop.xlane.xlu0 %4717  ;;  %v9196_v41 = vpop.eup %9195 }
 0xb25   : > { %v8957_v61 = vpop.permute.xlu1 %8956  ;;  %9203 = vrcp.f32 %v11176_v48 }
 0xb26   : > { %8062 = vmatmul.mubr.msk.f32.vlgmr.msra.gmra.mrb[72].mxu0 %vm1292_vm4, %v7979_v56  ;;  %v8959_v14 = vunpack.i.h.bf16 %v8957_v61  ;;  %v8958_v56 = vunpack.i.l.bf16 %v8957_v61 }
 0xb27   : > { %8604 = vmatpush3.bf16.msra.mxu0 %v8601_v11  ;;  %8064 = vmatprep.mubr.msk.f32.mxu0 %vm1292_vm4, %v3779_v55  ;;  %v9198_v50 = vpop.eup %9197 }
 0xb28   : > { %v11180_v20 = vpop.xlane.xlu0 %4723  ;;  %v8609_v11 = vpack.c.bf16 %v8959_v14, %v8958_v56 }
 0xb29   : > { %v8161_v49 = vpop.f32.mrb[88].mxu1  ;;  %v8962_v29 = vpop.permute.xlu1 %8961 }
 0xb2a   : > { %v11184_v58 = vadd.f32 %v8161_v49, %v10713_v15  ;;  %v5161_v12 = vpop.f32.mrb[89].mxu1  ;;  %8065 = vmatmul.mubr.msk.f32.gmra.mrb[74].mxu0 %vm1292_vm4, %v7982_v17  ;;  %v8964_v60 = vunpack.i.h.bf16 %v8962_v29  ;;  %v8963_v53 = vunpack.i.l.bf16 %v8962_v29 }
 0xb2b   : > { %v11187_v22 = vadd.f32 %v5161_v12, %v10713_v15  ;;  %8067 = vmatprep.mubr.msk.f32.mxu0 %vm1292_vm4, %v3789_v23  ;;  %v9200_v49 = vpop.eup %9199  ;;  %v4735_v12 = vmul.f32 %v9198_v50, %v11119_v8 }
 0xb2c   : > { %v4721_v28 = vpop.xlane.xlu0 %4720  ;;  %v5203_v59 = vsel %vm1446_vm6, %v11184_v58, -inf  ;;  %v8613_v26 = vpack.c.bf16 %v8964_v60, %v8963_v53  ;;  %v9202_v61 = vpop.eup %9201  ;;  %v4736_v48 = vmul.f32 %v9200_v49, %v11125_v2 }
 0xb2d   : > { %5204 = vmax.xlane.f32.xlu0 %v5203_v59  ;;  %v8164_v39 = vpop.f32.mrb[90].mxu1  ;;  %v5200_v38 = vsel %vm1446_vm6, %v11187_v22, -inf  ;;  %9205 = vrcp.f32 %v4721_v28  ;;  %v4737_v59 = vmul.f32 %v9202_v61, %v11123_v4  ;;  %v11297_v61 = vld [vmem:[%s9378_s24 + $0x83] ss:$0 sm:$0xff] }
 0xb2e   : > { %v11196_v52 = vadd.f32 %v8164_v39, %v10713_v15  ;;  %v5171_v30 = vpop.f32.mrb[91].mxu1  ;;  %5201 = vmax.xlane.f32.xlu1 %v5200_v38  ;;  %8068 = vmatmul.mubr.msk.f32.gmra.mrb[76].mxu0 %vm1292_vm4, %v7985_v25  ;;  %9207 = vrcp.f32 %v11180_v20 }
 0xb2f   : > { %v11199_v10 = vadd.f32 %v5171_v30, %v10713_v15  ;;  %8070 = vmatprep.mubr.msk.f32.mxu0 %vm1292_vm4, %v3799_v51  ;;  %v4733_v51 = vmul.f32 %v9194_v31, %v11109_v34  ;;  %v9204_v28 = vpop.eup %9203 }
 0xb30   : > { %v8952_v3 = vpop.permute.xlu0 %8951  ;;  %v5209_v44 = vsel %vm1446_vm6, %v11196_v52, -inf }
 0xb31   : > { %v8954_v36 = vunpack.i.h.bf16 %v8952_v3  ;;  %v8953_v17 = vunpack.i.l.bf16 %v8952_v3  ;;  %5210 = vmax.xlane.f32.xlu0 %v5209_v44  ;;  %v8167_v55 = vpop.f32.mrb[92].mxu1  ;;  %v5206_v23 = vsel %vm1446_vm6, %v11199_v10, -inf }
 0xb32   : > { %v11208_v40 = vadd.f32 %v8167_v55, %v10713_v15  ;;  %v5181_v25 = vpop.f32.mrb[93].mxu1  ;;  %5207 = vmax.xlane.f32.xlu1 %v5206_v23  ;;  %8071 = vmatmul.mubr.msk.f32.gmra.mrb[78].mxu0 %vm1292_vm4, %v11165_v35 }
 0xb33   : > { %v8605_v24 = vpack.c.bf16 %v8954_v36, %v8953_v17  ;;  %v11212_v21 = vadd.f32 %v5181_v25, %v10713_v15  ;;  %8117 = vmatprep.mubr.msk.f32.mxu0 %vm1446_vm6, %v4733_v51 }
 0xb34   : > { %v5215_v19 = vsel %vm1446_vm6, %v11208_v40, -inf }
 0xb35   : > { %5216 = vmax.xlane.f32.xlu0 %v5215_v19  ;;  %8606 = vmatprep.subr.bf16.mxu0 %v8605_v24  ;;  %v8170_v47 = vpop.f32.mrb[94].mxu1  ;;  %v5212_v34 = vsel %vm1446_vm6, %v11212_v21, -inf }
 0xb36   : > { %v11222_v45 = vadd.f32 %v8170_v47, %v10713_v15  ;;  %v5191_v18 = vpop.f32.mrb[95].mxu1  ;;  %5213 = vmax.xlane.f32.xlu1 %v5212_v34  ;;  %8608 = vmatpush3.bf16.msra.mxu0 %v8605_v24 }
 0xb37   : > { %v11225_v35 = vadd.f32 %v5191_v18, %v10713_v15  ;;  %8610 = vmatprep.subr.bf16.mxu0 %v8609_v11  ;;  %v4734_v15 = vmul.f32 %v9196_v41, %v11112_v5  ;;  %v9206_v20 = vpop.eup %9205  ;;  %v4738_v5 = vmul.f32 %v9204_v28, %v11131_v16  ;;  %v5583_v28 = vadd.f32 %v11147_v46, %v11297_v61  ;;  %v9311_v46 = vld [vmem:[%s12032_s5 + $0x10] sm:$0xff] }
 0xb38   : > { %v5221_v42 = vsel %vm1446_vm6, %v11222_v45, -inf  ;;  %v9208_v39 = vpop.eup %9207  ;;  %v4739_v8 = vmul.f32 %v9206_v20, %v11139_v57 }
 0xb39   : > { %5222 = vmax.xlane.f32.xlu0 %v5221_v42  ;;  %v5218_v27 = vsel %vm1446_vm6, %v11225_v35, -inf  ;;  %v4740_v2 = vmul.f32 %v9208_v39, %v11135_v7  ;;  %v5586_v39 = vadd.f32 %v11297_v61, %v11159_v33  ;;  %v9313_v33 = vld [vmem:[%s12032_s5 + $0x20] sm:$0xff] }
 0xb3a   : > { %5219 = vmax.xlane.f32.xlu1 %v5218_v27  ;;  %8612 = vmatpush3.bf16.msra.mxu0 %v8609_v11 }
 0xb3b   : > { %8614 = vmatprep.subr.bf16.mxu0 %v8613_v26 }
 0xb3e   : > { %8616 = vmatpush3.bf16.msra.mxu0 %v8613_v26 }
 0xb3f   : > { %8129 = vmatprep.subr.mxu0 %v9308_v9 }
 0xb41   : > { %8118 = vmatmul.mubr.msk.f32.vlgmr.msra.gmra.mrb[80].mxu0 %vm1446_vm6, %v4734_v15 }
 0xb42   : > { %8120 = vmatprep.mubr.msk.f32.mxu0 %vm1446_vm6, %v4735_v12  ;;  %8130 = vmatpush3.msra.mxu0 %v9308_v9 }
 0xb45   : > { %8121 = vmatmul.mubr.msk.f32.gmra.mrb[82].mxu0 %vm1446_vm6, %v4736_v48  ;;  %v5582_v48 = vadd.f32 %v11297_v61, %v11149_v62  ;;  %v5585_v62 = vadd.f32 %v11151_v13, %v11297_v61  ;;  %v5587_v13 = vadd.f32 %v11157_v63, %v11297_v61  ;;  %v9314_v63 = vld [vmem:[%s12032_s5 + $0x28] sm:$0xff] }
 0xb46   : > { %8123 = vmatprep.mubr.msk.f32.mxu0 %vm1446_vm6, %v4737_v59  ;;  %v9309_v59 = vld [vmem:[%s12032_s5] sm:$0xff] }
 0xb47   : > { %v11306_v20 = vadd.f32 %v9309_v59, %v5582_v48 }
 0xb49   : > { %8124 = vmatmul.mubr.msk.f32.gmra.mrb[84].mxu0 %vm1446_vm6, %v4738_v5 }
 0xb4a   : > { %8126 = vmatprep.mubr.msk.f32.mxu0 %vm1446_vm6, %v4739_v8  ;;  %v9312_v8 = vld [vmem:[%s12032_s5 + $0x18] sm:$0xff] }
 0xb4b   : > { %8966 = vrot.lane.b32.xlu1 %v12068_v32, %s9336_s28 }
 0xb4d   : > { %8127 = vmatmul.mubr.msk.f32.gmra.mrb[86].mxu0 %vm1446_vm6, %v4740_v2  ;;  %v11329_v2 = vadd.f32 %v9312_v8, %v5585_v62  ;;  %v9317_v8 = vld [vmem:[%s9378_s24 + $0x78] sm:$0xff] }
 0xbba   : > { %v5205_v4 = vpop.xlane.xlu0 %5204 }
 0xbbb   : > { %v5225_v38 = vsub.f32 %v11184_v58, %v5205_v4  ;;  %v5202_v30 = vpop.xlane.xlu1 %5201 }
 0xbbc   : > { %v5224_v16 = vsub.f32 %v11187_v22, %v5202_v30  ;;  %v5588_v30 = vadd.f32 %v11297_v61, %v11163_v43  ;;  %v9315_v43 = vld [vmem:[%s12032_s5 + $0x30] sm:$0xff] }
 0xbbd   : > { %v5234_v31 = vmul.f32 1.442695, %v5225_v38  ;;  %v11338_v38 = vadd.f32 %v9313_v33, %v5586_v39 }
 0xbbe   : > { %v5232_v14 = vmul.f32 1.442695, %v5224_v16  ;;  %v5211_v57 = vpop.xlane.xlu0 %5210 }
 0xbbf   : > { %9209 = vpow2.f32 %v5234_v31  ;;  %v5227_v3 = vsub.f32 %v11196_v52, %v5211_v57  ;;  %v5208_v44 = vpop.xlane.xlu1 %5207  ;;  %v11347_v31 = vadd.f32 %v9314_v63, %v5587_v13  ;;  %v5625_v57 = vsel %vm748_vm3, %v11329_v2, 0.0 }
 0xbc0   : > { %9211 = vpow2.f32 %v5232_v14  ;;  %v5226_v32 = vsub.f32 %v11199_v10, %v5208_v44  ;;  %v5589_v14 = vadd.f32 %v11161_v37, %v11297_v61  ;;  %v9316_v37 = vld [vmem:[%s12032_s5 + $0x38] sm:$0xff] }
 0xbc1   : > { %v5238_v56 = vmul.f32 1.442695, %v5227_v3  ;;  %v11356_v3 = vadd.f32 %v9315_v43, %v5588_v30 }
 0xbc2   : > { %v5236_v7 = vmul.f32 1.442695, %v5226_v32  ;;  %v5217_v36 = vpop.xlane.xlu0 %5216  ;;  %v5628_v32 = vsel %vm748_vm3, %v11338_v38, 0.0 }
 0xbc3   : > { %9213 = vpow2.f32 %v5238_v56  ;;  %v5229_v17 = vsub.f32 %v11208_v40, %v5217_v36  ;;  %v5214_v58 = vpop.xlane.xlu1 %5213  ;;  %v5631_v36 = vsel %vm748_vm3, %v11347_v31, 0.0 }
 0xbc4   : > { %9215 = vpow2.f32 %v5236_v7  ;;  %v5228_v22 = vsub.f32 %v11212_v21, %v5214_v58  ;;  %v11364_v7 = vadd.f32 %v9316_v37, %v5589_v14  ;;  %v5634_v58 = vsel %vm748_vm3, %v11356_v3, 0.0 }
 0xbc5   : > { %v5242_v55 = vmul.f32 1.442695, %v5229_v17 }
 0xbc6   : > { %v5240_v23 = vmul.f32 1.442695, %v5228_v22  ;;  %v5223_v29 = vpop.xlane.xlu0 %5222 }
 0xbc7   : > { %9217 = vpow2.f32 %v5242_v55  ;;  %v5231_v52 = vsub.f32 %v11222_v45, %v5223_v29  ;;  %v5220_v25 = vpop.xlane.xlu1 %5219  ;;  %v5637_v55 = vsel %vm748_vm3, %v11364_v7, 0.0 }
 0xbc8   : > { %9219 = vpow2.f32 %v5240_v23  ;;  %v5230_v10 = vsub.f32 %v11225_v35, %v5220_v25 }
 0xbc9   : > { %v11258_v51 = vpop.eup %9209  ;;  %v5246_v24 = vmul.f32 1.442695, %v5231_v52 }
 0xbca   : > { %v11260_v19 = vpop.eup %9211  ;;  %v5244_v40 = vmul.f32 1.442695, %v5230_v10  ;;  %v5251_v11 = vsel %vm1446_vm6, %v11258_v51, 0.0 }
 0xbcb   : > { %9221 = vpow2.f32 %v5246_v24  ;;  %5252 = vadd.xlane.f32.xlu0 %v5251_v11  ;;  %v8967_v21 = vpop.permute.xlu1 %8966  ;;  %v5248_v60 = vsel %vm1446_vm6, %v11260_v19, 0.0 }
 0xbcc   : > { %v8969_v53 = vunpack.i.h.bf16 %v8967_v21  ;;  %v8968_v47 = vunpack.i.l.bf16 %v8967_v21  ;;  %5249 = vadd.xlane.f32.xlu1 %v5248_v60  ;;  %9223 = vpow2.f32 %v5244_v40 }
 0xbcd   : > { %v11266_v34 = vpop.eup %9213 }
 0xbce   : > { %v11268_v45 = vpop.eup %9215  ;;  %v8641_v18 = vpack.c.bf16 %v8969_v53, %v8968_v47  ;;  %v5257_v35 = vsel %vm1446_vm6, %v11266_v34, 0.0 }
 0xbcf   : > { %5258 = vadd.xlane.f32.xlu0 %v5257_v35  ;;  %v5254_v42 = vsel %vm1446_vm6, %v11268_v45, 0.0 }
 0xbd0   : > { %5255 = vadd.xlane.f32.xlu1 %v5254_v42  ;;  %8642 = vmatprep.subr.bf16.mxu0 %v8641_v18 }
 0xbd1   : > { %v11274_v26 = vpop.eup %9217 }
 0xbd2   : > { %v11276_v27 = vpop.eup %9219  ;;  %v5263_v41 = vsel %vm1446_vm6, %v11274_v26, 0.0 }
 0xbd3   : > { %5264 = vadd.xlane.f32.xlu0 %v5263_v41  ;;  %v5260_v50 = vsel %vm1446_vm6, %v11276_v27, 0.0 }
 0xbd4   : > { %5261 = vadd.xlane.f32.xlu1 %v5260_v50 }
 0xbd5   : > { %v11282_v15 = vpop.eup %9221 }
 0xbd6   : > { %v5269_v9 = vsel %vm1446_vm6, %v11282_v15, 0.0  ;;  %v11286_v49 = vpop.eup %9223 }
 0xbd7   : > { %5270 = vadd.xlane.f32.xlu0 %v5269_v9  ;;  %v5266_v12 = vsel %vm1446_vm6, %v11286_v49, 0.0 }
 0xbdb   : > { %5267 = vadd.xlane.f32.xlu0 %v5266_v12 }
 0xbe5   : > { %8976 = vrot.lane.b32.xlu1 %v12069_v6, %s9336_s28  ;;  %v5584_v6 = vadd.f32 %v11297_v61, %v11153_v0  ;;  %v5616_v0 = vsel %vm748_vm3, %v11306_v20, 0.0 }
 0xbe7   : > { %v11320_v5 = vadd.f32 %v9311_v46, %v5584_v6 }
 0xbe9   : > { %8981 = vrot.lane.b32.xlu1 %v12070_v54, %s9336_s28  ;;  %v9310_v54 = vld [vmem:[%s12032_s5 + $0x8] sm:$0xff]  ;;  %v5622_v16 = vsel %vm748_vm3, %v11320_v5, 0.0 }
 0xbf1   : > { %8971 = vrot.lane.b32.xlu0 %v12071_v1, %s9336_s28  ;;  %v11313_v1 = vadd.f32 %v9310_v54, %v5583_v28 }
 0xbf3   : > { %v5619_v4 = vsel %vm748_vm3, %v11313_v1, 0.0 }
 0xc0d   : > { %5617 = vadd.xlane.f32.xlu1 %v5616_v0 }
 0xc10   : > { %5620 = vadd.xlane.f32.xlu0 %v5619_v4 }
 0xc11   : > { %5623 = vadd.xlane.f32.xlu1 %v5622_v16 }
 0xc14   : > { %5626 = vadd.xlane.f32.xlu0 %v5625_v57  ;;  %v8119_v44 = vpop.f32.mrb[80].mxu0 }
 0xc15   : > { %5629 = vadd.xlane.f32.xlu1 %v5628_v32  ;;  %v4855_v56 = vpop.f32.mrb[81].mxu0 }
 0xc16   : > { %8131 = vmatprep.mubr.msk.f32.mxu0 %vm1292_vm4, %v4855_v56 }
 0xc17   : > { %8132 = vmatmul.mubr.msk.f32.vlgmr.msra.gmra.mrb[72].mxu0 %vm1292_vm4, %v8119_v44 }
 0xc18   : > { %8644 = vmatpush3.bf16.msra.mxu0 %v8641_v18  ;;  %5632 = vadd.xlane.f32.xlu0 %v5631_v36  ;;  %v8122_v17 = vpop.f32.mrb[82].mxu0 }
 0xc19   : > { %5635 = vadd.xlane.f32.xlu1 %v5634_v58  ;;  %v4865_v22 = vpop.f32.mrb[83].mxu0 }
 0xc1a   : > { %8134 = vmatprep.mubr.msk.f32.mxu0 %vm1292_vm4, %v4865_v22 }
 0xc1b   : > { %8135 = vmatmul.mubr.msk.f32.gmra.mrb[74].mxu0 %vm1292_vm4, %v8122_v17 }
 0xc1c   : > { %5638 = vadd.xlane.f32.xlu0 %v5637_v55  ;;  %v8125_v23 = vpop.f32.mrb[84].mxu0 }
 0xc1d   : > { %v4875_v29 = vpop.f32.mrb[85].mxu0 }
 0xc1e   : > { %8137 = vmatprep.mubr.msk.f32.mxu0 %vm1292_vm4, %v4875_v29 }
 0xc1f   : > { %8138 = vmatmul.mubr.msk.f32.gmra.mrb[76].mxu0 %vm1292_vm4, %v8125_v23  ;;  %v9318_v23 = vld [vmem:[%s12032_s5 + $0x48] sm:$0xff] }
 0xc20   : > { %v8128_v52 = vpop.f32.mrb[86].mxu0 }
 0xc21   : > { %v4885_v25 = vpop.f32.mrb[87].mxu0 }
 0xc22   : > { %8140 = vmatprep.mubr.msk.f32.mxu0 %vm1292_vm4, %v4885_v25 }
 0xc23   : > { %8141 = vmatmul.mubr.msk.f32.gmra.mrb[78].mxu0 %vm1292_vm4, %v8128_v52  ;;  %v9319_v52 = vld [vmem:[%s12032_s5 + $0x40] sm:$0xff] }
 0xc58   : > { %v5253_v10 = vpop.xlane.xlu0 %5252 }
 0xc59   : > { %v5250_v24 = vpop.xlane.xlu1 %5249 }
 0xc5a   : > { %9225 = vrcp.f32 %v5250_v24 }
 0xc5b   : > { %9227 = vrcp.f32 %v5253_v10 }
 0xc5c   : > { %v5259_v40 = vpop.xlane.xlu0 %5258 }
 0xc5d   : > { %v5256_v11 = vpop.xlane.xlu1 %5255 }
 0xc5e   : > { %9229 = vrcp.f32 %v5256_v11 }
 0xc5f   : > { %9231 = vrcp.f32 %v5259_v40 }
 0xc60   : > { %v5265_v21 = vpop.xlane.xlu0 %5264 }
 0xc61   : > { %v5262_v60 = vpop.xlane.xlu1 %5261 }
 0xc62   : > { %9233 = vrcp.f32 %v5262_v60 }
 0xc63   : > { %9235 = vrcp.f32 %v5265_v21 }
 0xc64   : > { %v9226_v53 = vpop.eup %9225  ;;  %v5271_v47 = vpop.xlane.xlu0 %5270 }
 0xc65   : > { %v5280_v18 = vmul.f32 %v9226_v53, %v11260_v19  ;;  %v8977_v35 = vpop.permute.xlu1 %8976  ;;  %v9228_v46 = vpop.eup %9227 }
 0xc66   : > { %v8979_v50 = vunpack.i.h.bf16 %v8977_v35  ;;  %v8978_v9 = vunpack.i.l.bf16 %v8977_v35  ;;  %v5281_v0 = vmul.f32 %v9228_v46, %v11258_v51 }
 0xc67   : > { %8187 = vmatprep.mubr.msk.f32.mxu0 %vm1446_vm6, %v5280_v18  ;;  %v9320_v18 = vld [vmem:[%s12032_s5 + $0x58] sm:$0xff] }
 0xc68   : > { %v5268_v42 = vpop.xlane.xlu0 %5267  ;;  %v8649_v6 = vpack.c.bf16 %v8979_v50, %v8978_v9  ;;  %v9230_v39 = vpop.eup %9229 }
 0xc69   : > { %v8982_v28 = vpop.permute.xlu1 %8981  ;;  %9237 = vrcp.f32 %v5268_v42  ;;  %v9232_v13 = vpop.eup %9231  ;;  %v5282_v4 = vmul.f32 %v9230_v39, %v11268_v45  ;;  %v9321_v42 = vld [vmem:[%s12032_s5 + $0x50] sm:$0xff]  ;;  %v9323_v39 = vld [vmem:[%s12032_s5 + $0x60] sm:$0xff] }
 0xc6a   : > { %v8984_v54 = vunpack.i.h.bf16 %v8982_v28  ;;  %v8983_v62 = vunpack.i.l.bf16 %v8982_v28  ;;  %9239 = vrcp.f32 %v5271_v47  ;;  %v5283_v30 = vmul.f32 %v9232_v13, %v11266_v34 }
 0xc6c   : > { %v8972_v41 = vpop.permute.xlu0 %8971  ;;  %v8653_v19 = vpack.c.bf16 %v8984_v54, %v8983_v62  ;;  %v9234_v33 = vpop.eup %9233  ;;  %v9322_v62 = vld [vmem:[%s12032_s5 + $0x68] sm:$0xff] }
 0xc6d   : > { %v8974_v12 = vunpack.i.h.bf16 %v8972_v41  ;;  %v8973_v48 = vunpack.i.l.bf16 %v8972_v41  ;;  %v9236_v16 = vpop.eup %9235  ;;  %v5284_v63 = vmul.f32 %v9234_v33, %v11276_v27 }
 0xc6e   : > { %v5285_v51 = vmul.f32 %v9236_v16, %v11274_v26 }
 0xc6f   : > { %v8645_v59 = vpack.c.bf16 %v8974_v12, %v8973_v48 }
 0xc71   : > { %8646 = vmatprep.subr.bf16.mxu0 %v8645_v59 }
 0xc72   : > { %8648 = vmatpush3.bf16.msra.mxu0 %v8645_v59 }
 0xc73   : > { %8650 = vmatprep.subr.bf16.mxu0 %v8649_v6  ;;  %v9238_v14 = vpop.eup %9237 }
 0xc74   : > { %v9240_v57 = vpop.eup %9239  ;;  %v5286_v45 = vmul.f32 %v9238_v14, %v11286_v49 }
 0xc75   : > { %v5287_v43 = vmul.f32 %v9240_v57, %v11282_v15 }
 0xc76   : > { %8652 = vmatpush3.bf16.msra.mxu0 %v8649_v6 }
 0xc77   : > { %8654 = vmatprep.subr.bf16.mxu0 %v8653_v19 }
 0xc7a   : > { %8656 = vmatpush3.bf16.msra.mxu0 %v8653_v19 }
 0xc7b   : > { %8199 = vmatprep.subr.mxu0 %v9317_v8 }
 0xc7d   : > { %8188 = vmatmul.mubr.msk.f32.vlgmr.msra.gmra.mrb[88].mxu0 %vm1446_vm6, %v5281_v0 }
 0xc7e   : > { %8190 = vmatprep.mubr.msk.f32.mxu0 %vm1446_vm6, %v5282_v4  ;;  %8200 = vmatpush3.msra.mxu0 %v9317_v8 }
 0xc81   : > { %8191 = vmatmul.mubr.msk.f32.gmra.mrb[90].mxu0 %vm1446_vm6, %v5283_v30 }
 0xc82   : > { %8193 = vmatprep.mubr.msk.f32.mxu0 %vm1446_vm6, %v5284_v63 }
 0xc85   : > { %8194 = vmatmul.mubr.msk.f32.gmra.mrb[92].mxu0 %vm1446_vm6, %v5285_v51 }
 0xc86   : > { %8196 = vmatprep.mubr.msk.f32.mxu0 %vm1446_vm6, %v5286_v45 }
 0xc89   : > { %8197 = vmatmul.mubr.msk.f32.gmra.mrb[94].mxu0 %vm1446_vm6, %v5287_v43 }
 0xc9a   : > { %v5618_v17 = vpop.xlane.xlu1 %5617 }
 0xc9b   : > { %v5665_v59 = vmul.f32 0.03125, %v5618_v17 }
 0xc9d   : > { %v5621_v37 = vpop.xlane.xlu0 %5620  ;;  %v11455_v14 = vsub.f32 %v11306_v20, %v5665_v59 }
 0xc9e   : > { %v5624_v47 = vpop.xlane.xlu1 %5623  ;;  %v5666_v9 = vmul.f32 0.03125, %v5621_v37 }
 0xc9f   : > { %v5667_v51 = vmul.f32 0.03125, %v5624_v47 }
 0xca0   : > { %v11449_v13 = vsub.f32 %v11313_v1, %v5666_v9  ;;  %v9324_v1 = vld [vmem:[%s12032_s5 + $0x78] sm:$0xff] }
 0xca1   : > { %v5627_v21 = vpop.xlane.xlu0 %5626  ;;  %v5867_v9 = vld [vmem:[%s9378_s24 + $0x96] sm:$0xff] }
 0xca2   : > { %v5668_v4 = vmul.f32 0.03125, %v5627_v21  ;;  %v5630_v33 = vpop.xlane.xlu1 %5629 }
 0xca5   : > { %v5633_v46 = vpop.xlane.xlu0 %5632 }
 0xca6   : > { %v5636_v37 = vpop.xlane.xlu1 %5635 }
 0xd50   : > { %v8189_v34 = vpop.f32.mrb[88].mxu0 }
 0xd51   : > { %v5402_v27 = vpop.f32.mrb[89].mxu0 }
 0xd52   : > { %8201 = vmatprep.mubr.msk.f32.mxu0 %vm1292_vm4, %v5402_v27  ;;  %v11471_v27 = vsub.f32 %v11329_v2, %v5668_v4  ;;  %v5697_v2 = vmul.f32 %v11455_v14, %v11455_v14 }
 0xd53   : > { %8202 = vmatmul.mubr.msk.f32.vlgmr.msra.gmra.mrb[72].mxu0 %vm1292_vm4, %v8189_v34  ;;  %v9325_v34 = vld [vmem:[%s12032_s5 + $0x70] sm:$0xff] }
 0xd54   : > { %v8192_v44 = vpop.f32.mrb[90].mxu0 }
 0xd55   : > { %v5412_v32 = vpop.f32.mrb[91].mxu0 }
 0xd56   : > { %8204 = vmatprep.mubr.msk.f32.mxu0 %vm1292_vm4, %v5412_v32  ;;  %v5698_v32 = vmul.f32 %v11449_v13, %v11449_v13 }
 0xd57   : > { %8205 = vmatmul.mubr.msk.f32.gmra.mrb[74].mxu0 %vm1292_vm4, %v8192_v44 }
 0xd58   : > { %v8195_v26 = vpop.f32.mrb[92].mxu0 }
 0xd59   : > { %v5422_v49 = vpop.f32.mrb[93].mxu0 }
 0xd5a   : > { %8207 = vmatprep.mubr.msk.f32.mxu0 %vm1292_vm4, %v5422_v49  ;;  %v5669_v49 = vmul.f32 0.03125, %v5630_v33 }
 0xd5b   : > { %8208 = vmatmul.mubr.msk.f32.gmra.mrb[76].mxu0 %vm1292_vm4, %v8195_v26  ;;  %v11478_v26 = vsub.f32 %v11320_v5, %v5667_v51  ;;  %v5700_v5 = vmul.f32 %v11471_v27, %v11471_v27 }
 0xd5c   : > { %v8198_v15 = vpop.f32.mrb[94].mxu0 }
 0xd5d   : > { %v5432_v56 = vpop.f32.mrb[95].mxu0 }
 0xd5e   : > { %8210 = vmatprep.mubr.msk.f32.mxu0 %vm1292_vm4, %v5432_v56 }
 0xd5f   : > { %8211 = vmatmul.mubr.msk.f32.gmra.mrb[78].mxu0 %vm1292_vm4, %v8198_v15  ;;  %v5639_v15 = vpop.xlane.xlu0 %5638 }
 0xd60   : > { %v5672_v17 = vmul.f32 0.03125, %v5639_v15 }
 0xe26   : > { %v8203_v36 = vpop.f32.mrb[72].mxu0 }
 0xe27   : > { %v5591_v58 = vadd.f32 %v8203_v36, %v11297_v61  ;;  %v5531_v22 = vpop.f32.mrb[73].mxu0 }
 0xe28   : > { %v5590_v55 = vadd.f32 %v11297_v61, %v5531_v22  ;;  %v11491_v22 = vsub.f32 %v11338_v38, %v5669_v49 }
 0xe29   : > { %v11409_v29 = vadd.f32 %v9318_v23, %v5591_v58  ;;  %v5716_v58 = vsel %vm748_vm3, %v5698_v32, 0.0  ;;  %v5713_v23 = vsel %vm748_vm3, %v5697_v2, 0.0 }
 0xe2a   : > { %v11414_v25 = vadd.f32 %v9319_v52, %v5590_v55  ;;  %v8206_v10 = vpop.f32.mrb[74].mxu0  ;;  %v5671_v55 = vmul.f32 0.03125, %v5636_v37  ;;  %v5699_v52 = vmul.f32 %v11478_v26, %v11478_v26 }
 0xe2b   : > { %v5593_v24 = vadd.f32 %v8206_v10, %v11297_v61  ;;  %v5541_v40 = vpop.f32.mrb[75].mxu0  ;;  %v5643_v11 = vsel %vm748_vm3, %v11409_v29, 0.0  ;;  %v5722_v10 = vsel %vm748_vm3, %v5700_v5, 0.0 }
 0xe2c   : > { %v5592_v60 = vadd.f32 %v11297_v61, %v5541_v40  ;;  %5644 = vadd.xlane.f32.xlu0 %v5643_v11  ;;  %v5640_v53 = vsel %vm748_vm3, %v11414_v25, 0.0  ;;  %v11503_v38 = vsub.f32 %v11356_v3, %v5671_v55  ;;  %v5719_v40 = vsel %vm748_vm3, %v5699_v52, 0.0 }
 0xe2d   : > { %v11425_v35 = vadd.f32 %v9320_v18, %v5593_v24  ;;  %5641 = vadd.xlane.f32.xlu1 %v5640_v53  ;;  %v5701_v11 = vmul.f32 %v11491_v22, %v11491_v22  ;;  %v5865_v18 = vld [vmem:[%s9378_s24 + $0x86] sm:$0xff] }
 0xe2e   : > { %v11430_v41 = vadd.f32 %v9321_v42, %v5592_v60  ;;  %v8209_v50 = vpop.f32.mrb[76].mxu0  ;;  %v5703_v3 = vmul.f32 %v11503_v38, %v11503_v38  ;;  %v5866_v42 = vld [vmem:[%s9378_s24 + $0x8e] sm:$0xff] }
 0xe2f   : > { %v5595_v12 = vadd.f32 %v8209_v50, %v11297_v61  ;;  %v5551_v48 = vpop.f32.mrb[77].mxu0  ;;  %v5649_v28 = vsel %vm748_vm3, %v11425_v35, 0.0  ;;  %v5725_v60 = vsel %vm748_vm3, %v5701_v11, 0.0  ;;  %v8657_v50 = vpack.c.bf16 %v5866_v42, %v5865_v18 }
 0xe30   : > { %v5594_v6 = vadd.f32 %v11297_v61, %v5551_v48  ;;  %5650 = vadd.xlane.f32.xlu0 %v5649_v28  ;;  %v5646_v54 = vsel %vm748_vm3, %v11430_v41, 0.0  ;;  %v5731_v47 = vsel %vm748_vm3, %v5703_v3, 0.0 }
 0xe31   : > { %v11441_v19 = vadd.f32 %v9322_v62, %v5595_v12  ;;  %5647 = vadd.xlane.f32.xlu1 %v5646_v54  ;;  %8658 = vmatprep.subr.bf16.mxu1 %v8657_v50  ;;  %v5868_v12 = vld [vmem:[%s9378_s24 + $0x9e] sm:$0xff] }
 0xe32   : > { %v11446_v0 = vadd.f32 %v9323_v39, %v5594_v6  ;;  %v8212_v8 = vpop.f32.mrb[78].mxu0  ;;  %8660 = vmatpush3.bf16.msra.mxu1 %v8657_v50  ;;  %v8661_v48 = vpack.c.bf16 %v5868_v12, %v5867_v9 }
 0xe33   : > { %v5597_v30 = vadd.f32 %v8212_v8, %v11297_v61  ;;  %v5561_v16 = vpop.f32.mrb[79].mxu0  ;;  %v5655_v63 = vsel %vm748_vm3, %v11441_v19, 0.0 }
 0xe34   : > { %v5596_v57 = vadd.f32 %v11297_v61, %v5561_v16  ;;  %5656 = vadd.xlane.f32.xlu0 %v5655_v63  ;;  %v5652_v45 = vsel %vm748_vm3, %v11446_v0, 0.0  ;;  %v5670_v61 = vmul.f32 0.03125, %v5633_v46  ;;  %8662 = vmatprep.subr.bf16.mxu1 %v8661_v48 }
 0xe35   : > { %v11463_v43 = vadd.f32 %v9324_v1, %v5597_v30  ;;  %5653 = vadd.xlane.f32.xlu1 %v5652_v45 }
 0xe36   : > { %v11468_v20 = vadd.f32 %v9325_v34, %v5596_v57  ;;  %v11485_v36 = vsub.f32 %v11347_v31, %v5670_v61  ;;  %v11497_v31 = vsub.f32 %v11364_v7, %v5672_v17  ;;  %8664 = vmatpush3.bf16.msra.mxu1 %v8661_v48 }
 0xe37   : > { %v5661_v44 = vsel %vm748_vm3, %v11463_v43, 0.0 }
 0xe38   : > { %5662 = vadd.xlane.f32.xlu0 %v5661_v44  ;;  %v5658_v56 = vsel %vm748_vm3, %v11468_v20, 0.0  ;;  %v5702_v24 = vmul.f32 %v11485_v36, %v11485_v36  ;;  %v5704_v21 = vmul.f32 %v11497_v31, %v11497_v31 }
 0xe39   : > { %5659 = vadd.xlane.f32.xlu1 %v5658_v56 }
 0xe3a   : > { %v5728_v7 = vsel %vm748_vm3, %v5702_v24, 0.0  ;;  %v5734_v53 = vsel %vm748_vm3, %v5704_v21, 0.0 }
 0xe3c   : > { %5717 = vadd.xlane.f32.xlu0 %v5716_v58 }
 0xe3d   : > { %5714 = vadd.xlane.f32.xlu1 %v5713_v23 }
 0xe40   : > { %5723 = vadd.xlane.f32.xlu0 %v5722_v10 }
 0xe41   : > { %5720 = vadd.xlane.f32.xlu1 %v5719_v40 }
 0xe44   : > { %5729 = vadd.xlane.f32.xlu0 %v5728_v7 }
 0xe45   : > { %5726 = vadd.xlane.f32.xlu1 %v5725_v60 }
 0xe48   : > { %5735 = vadd.xlane.f32.xlu0 %v5734_v53 }
 0xe49   : > { %5732 = vadd.xlane.f32.xlu1 %v5731_v47 }
 0xeb9   : > { %v5645_v28 = vpop.xlane.xlu0 %5644 }
 0xeba   : > { %v5674_v59 = vmul.f32 0.03125, %v5645_v28  ;;  %v5642_v6 = vpop.xlane.xlu1 %5641 }
 0xebb   : > { %v5673_v54 = vmul.f32 0.03125, %v5642_v6 }
 0xebc   : > { %v11521_v62 = vsub.f32 %v11409_v29, %v5674_v59 }
 0xebd   : > { %v11524_v46 = vsub.f32 %v11414_v25, %v5673_v54  ;;  %v5651_v39 = vpop.xlane.xlu0 %5650 }
 0xebe   : > { %v5676_v8 = vmul.f32 0.03125, %v5651_v39  ;;  %v5648_v4 = vpop.xlane.xlu1 %5647  ;;  %v5706_v33 = vmul.f32 %v11521_v62, %v11521_v62 }
 0xebf   : > { %v5675_v30 = vmul.f32 0.03125, %v5648_v4  ;;  %v5705_v16 = vmul.f32 %v11524_v46, %v11524_v46 }
 0xec0   : > { %v11531_v63 = vsub.f32 %v11425_v35, %v5676_v8  ;;  %v5740_v51 = vsel %vm748_vm3, %v5706_v33, 0.0  ;;  %v11569_v33 = vld [vmem:[%s9378_s24 + $0x84] ss:$0 sm:$0xff] }
 0xec1   : > { %v11535_v29 = vsub.f32 %v11430_v41, %v5675_v30  ;;  %v5657_v25 = vpop.xlane.xlu0 %5656  ;;  %5741 = vadd.xlane.f32.xlu0 %v5740_v51  ;;  %v5737_v57 = vsel %vm748_vm3, %v5705_v16, 0.0 }
 0xec2   : > { %v5678_v45 = vmul.f32 0.03125, %v5657_v25  ;;  %v5654_v1 = vpop.xlane.xlu1 %5653  ;;  %5738 = vadd.xlane.f32.xlu1 %v5737_v57  ;;  %v5708_v34 = vmul.f32 %v11531_v63, %v11531_v63 }
 0xec3   : > { %v5677_v61 = vmul.f32 0.03125, %v5654_v1  ;;  %v5707_v35 = vmul.f32 %v11535_v29, %v11535_v29 }
 0xec4   : > { %v11543_v44 = vsub.f32 %v11441_v19, %v5678_v45  ;;  %v5746_v41 = vsel %vm748_vm3, %v5708_v34, 0.0  ;;  %v11574_v45 = vld [vmem:[%s9378_s24 + $0x85] ss:$0 sm:$0xff] }
 0xec5   : > { %v11547_v32 = vsub.f32 %v11446_v0, %v5677_v61  ;;  %5747 = vadd.xlane.f32.xlu0 %v5746_v41  ;;  %v5663_v49 = vpop.xlane.xlu0 %5662  ;;  %v5743_v15 = vsel %vm748_vm3, %v5707_v35, 0.0 }
 0xec6   : > { %v5680_v56 = vmul.f32 0.03125, %v5663_v49  ;;  %5744 = vadd.xlane.f32.xlu1 %v5743_v15  ;;  %v5660_v2 = vpop.xlane.xlu1 %5659  ;;  %v5710_v37 = vmul.f32 %v11543_v44, %v11543_v44 }
 0xec7   : > { %v5679_v17 = vmul.f32 0.03125, %v5660_v2  ;;  %v5709_v19 = vmul.f32 %v11547_v32, %v11547_v32 }
 0xec8   : > { %v11555_v58 = vsub.f32 %v11463_v43, %v5680_v56  ;;  %v5752_v0 = vsel %vm748_vm3, %v5710_v37, 0.0 }
 0xec9   : > { %v11559_v5 = vsub.f32 %v11468_v20, %v5679_v17  ;;  %5753 = vadd.xlane.f32.xlu0 %v5752_v0  ;;  %v5718_v55 = vpop.xlane.xlu0 %5717  ;;  %v5749_v23 = vsel %vm748_vm3, %v5709_v19, 0.0 }
 0xeca   : > { %v5762_v52 = vmul.f32 0.03125, %v5718_v55  ;;  %5750 = vadd.xlane.f32.xlu1 %v5749_v23  ;;  %v5715_v10 = vpop.xlane.xlu1 %5714  ;;  %v5712_v24 = vmul.f32 %v11555_v58, %v11555_v58 }
 0xecb   : > { %v5761_v40 = vmul.f32 0.03125, %v5715_v10  ;;  %v5711_v43 = vmul.f32 %v11559_v5, %v11559_v5 }
 0xecc   : > { %v5778_v11 = vadd.f32 1e-05, %v5762_v52  ;;  %v5758_v7 = vsel %vm748_vm3, %v5712_v24, 0.0 }
 0xecd   : > { %v5777_v21 = vadd.f32 1e-05, %v5761_v40  ;;  %5759 = vadd.xlane.f32.xlu0 %v5758_v7  ;;  %v5724_v20 = vpop.xlane.xlu0 %5723  ;;  %v5755_v60 = vsel %vm748_vm3, %v5711_v43, 0.0  ;;  %v6084_v7 = vld [vmem:[%s9378_s24 + $0xaf] sm:$0xff] }
 0xece   : > { %9241 = vrsqrt.f32 %v5778_v11  ;;  %v5764_v3 = vmul.f32 0.03125, %v5724_v20  ;;  %5756 = vadd.xlane.f32.xlu1 %v5755_v60  ;;  %v5721_v53 = vpop.xlane.xlu1 %5720  ;;  %v6083_v11 = vld [vmem:[%s9378_s24 + $0xa7] sm:$0xff]  ;;  %v6086_v60 = vld [vmem:[%s9378_s24 + $0xbf] sm:$0xff] }
 0xecf   : > { %9243 = vrsqrt.f32 %v5777_v21  ;;  %v5763_v47 = vmul.f32 0.03125, %v5721_v53  ;;  %v6085_v21 = vld [vmem:[%s9378_s24 + $0xb7] sm:$0xff]  ;;  %v8665_v20 = vpack.c.bf16 %v6084_v7, %v6083_v11  ;;  %v6087_v53 = vld [vmem:[%s9378_s24 + $0xc7] sm:$0xff] }
 0xed0   : > { %v5780_v18 = vadd.f32 1e-05, %v5764_v3  ;;  %v8669_v3 = vpack.c.bf16 %v6086_v60, %v6085_v21 }
 0xed1   : > { %v5779_v42 = vadd.f32 1e-05, %v5763_v47  ;;  %v5730_v50 = vpop.xlane.xlu0 %5729  ;;  %v6088_v47 = vld [vmem:[%s9378_s24 + $0xcf] sm:$0xff]  ;;  %8666 = vmatprep.subr.bf16.mxu0 %v8665_v20 }
 0xed2   : > { %9245 = vrsqrt.f32 %v5780_v18  ;;  %v5766_v9 = vmul.f32 0.03125, %v5730_v50  ;;  %v5727_v12 = vpop.xlane.xlu1 %5726  ;;  %8668 = vmatpush3.bf16.msra.mxu0 %v8665_v20  ;;  %v8673_v18 = vpack.c.bf16 %v6088_v47, %v6087_v53  ;;  %v6090_v50 = vld [vmem:[%s9378_s24 + $0xdf] sm:$0xff] }
 0xed3   : > { %9247 = vrsqrt.f32 %v5779_v42  ;;  %v5765_v48 = vmul.f32 0.03125, %v5727_v12  ;;  %8670 = vmatprep.subr.bf16.mxu0 %v8669_v3  ;;  %v6089_v42 = vld [vmem:[%s9378_s24 + $0xd7] sm:$0xff] }
 0xed4   : > { %v5782_v28 = vadd.f32 1e-05, %v5766_v9  ;;  %v8677_v9 = vpack.c.bf16 %v6090_v50, %v6089_v42 }
 0xed5   : > { %v5781_v59 = vadd.f32 1e-05, %v5765_v48  ;;  %v5736_v6 = vpop.xlane.xlu0 %5735 }
 0xed6   : > { %9249 = vrsqrt.f32 %v5782_v28  ;;  %v5768_v54 = vmul.f32 0.03125, %v5736_v6  ;;  %v5733_v39 = vpop.xlane.xlu1 %5732  ;;  %8672 = vmatpush3.bf16.msra.mxu0 %v8669_v3 }
 0xed7   : > { %9251 = vrsqrt.f32 %v5781_v59  ;;  %v5767_v8 = vmul.f32 0.03125, %v5733_v39  ;;  %8674 = vmatprep.subr.bf16.mxu0 %v8673_v18 }
 0xed8   : > { %v9242_v4 = vpop.eup %9241  ;;  %v5784_v30 = vadd.f32 1e-05, %v5768_v54 }
 0xed9   : > { %v9244_v16 = vpop.eup %9243  ;;  %v5810_v51 = vmul.f32 %v9242_v4, %v11449_v13  ;;  %v5783_v25 = vadd.f32 1e-05, %v5767_v8 }
 0xeda   : > { %9253 = vrsqrt.f32 %v5784_v30  ;;  %v5809_v57 = vmul.f32 %v9244_v16, %v11455_v14  ;;  %8676 = vmatpush3.bf16.msra.mxu0 %v8673_v18 }
 0xedb   : > { %v5830_v1 = vmul.f32 %v11569_v33, %v5810_v51  ;;  %9255 = vrsqrt.f32 %v5783_v25  ;;  %8678 = vmatprep.subr.bf16.mxu0 %v8677_v9 }
 0xedc   : > { %v9246_v34 = vpop.eup %9245  ;;  %v5829_v61 = vmul.f32 %v11569_v33, %v5809_v57 }
 0xedd   : > { %v9248_v35 = vpop.eup %9247  ;;  %v5812_v41 = vmul.f32 %v9246_v34, %v11471_v27  ;;  %v11584_v15 = vadd.f32 %v11574_v45, %v5830_v1 }
 0xede   : > { %v11580_v49 = vadd.f32 %v11574_v45, %v5829_v61  ;;  %v5811_v13 = vmul.f32 %v9248_v35, %v11478_v26  ;;  %8680 = vmatpush3.bf16.msra.mxu0 %v8677_v9 }
 0xedf   : > { %v5832_v14 = vmul.f32 %v11569_v33, %v5812_v41 }
 0xee0   : > { %v9250_v56 = vpop.eup %9249  ;;  %8221 = vmatprep.mubr.msk.f32.mxu1 %vm748_vm3, %v11580_v49  ;;  %v5831_v2 = vmul.f32 %v11569_v33, %v5811_v13 }
 0xee1   : > { %v9252_v37 = vpop.eup %9251  ;;  %8222 = vmatmul.mubr.msk.f32.vlgmr.msra.gmra.mrb[96].mxu1 %vm748_vm3, %v11584_v15  ;;  %v5814_v27 = vmul.f32 %v9250_v56, %v11485_v36  ;;  %v11598_v19 = vadd.f32 %v11574_v45, %v5832_v14 }
 0xee2   : > { %v11594_v17 = vadd.f32 %v11574_v45, %v5831_v2  ;;  %v5813_v26 = vmul.f32 %v9252_v37, %v11491_v22 }
 0xee3   : > { %v5834_v0 = vmul.f32 %v11569_v33, %v5814_v27 }
 0xee4   : > { %v9254_v55 = vpop.eup %9253  ;;  %8224 = vmatprep.mubr.msk.f32.mxu1 %vm748_vm3, %v11594_v17  ;;  %v5833_v23 = vmul.f32 %v11569_v33, %v5813_v26 }
 0xee5   : > { %v9256_v52 = vpop.eup %9255  ;;  %8225 = vmatmul.mubr.msk.f32.gmra.mrb[98].mxu1 %vm748_vm3, %v11598_v19  ;;  %v5816_v36 = vmul.f32 %v9254_v55, %v11497_v31  ;;  %v11612_v24 = vadd.f32 %v11574_v45, %v5834_v0 }
 0xee6   : > { %v11608_v22 = vadd.f32 %v11574_v45, %v5833_v23  ;;  %v5815_v10 = vmul.f32 %v9256_v52, %v11503_v38 }
 0xee7   : > { %v5836_v40 = vmul.f32 %v11569_v33, %v5816_v36 }
 0xee8   : > { %8227 = vmatprep.mubr.msk.f32.mxu1 %vm748_vm3, %v11608_v22  ;;  %v5835_v43 = vmul.f32 %v11569_v33, %v5815_v10 }
 0xee9   : > { %8228 = vmatmul.mubr.msk.f32.gmra.mrb[100].mxu1 %vm748_vm3, %v11612_v24  ;;  %v11624_v38 = vadd.f32 %v11574_v45, %v5836_v40 }
 0xeea   : > { %v11621_v31 = vadd.f32 %v11574_v45, %v5835_v43 }
 0xeec   : > { %8230 = vmatprep.mubr.msk.f32.mxu1 %vm748_vm3, %v11621_v31 }
 0xeed   : > { %8231 = vmatmul.mubr.msk.f32.gmra.mrb[102].mxu1 %vm748_vm3, %v11624_v38 }
 0xf4e   : > { %v5742_v12 = vpop.xlane.xlu0 %5741 }
 0xf4f   : > { %v5770_v48 = vmul.f32 0.03125, %v5742_v12  ;;  %v5739_v28 = vpop.xlane.xlu1 %5738 }
 0xf50   : > { %v5769_v59 = vmul.f32 0.03125, %v5739_v28 }
 0xf51   : > { %v5786_v6 = vadd.f32 1e-05, %v5770_v48 }
 0xf52   : > { %v5785_v54 = vadd.f32 1e-05, %v5769_v59  ;;  %v5748_v39 = vpop.xlane.xlu0 %5747 }
 0xf53   : > { %9257 = vrsqrt.f32 %v5786_v6  ;;  %v5772_v8 = vmul.f32 0.03125, %v5748_v39  ;;  %v5745_v4 = vpop.xlane.xlu1 %5744 }
 0xf54   : > { %9259 = vrsqrt.f32 %v5785_v54  ;;  %v5771_v30 = vmul.f32 0.03125, %v5745_v4 }
 0xf55   : > { %v5788_v16 = vadd.f32 1e-05, %v5772_v8 }
 0xf56   : > { %v5787_v51 = vadd.f32 1e-05, %v5771_v30  ;;  %v5754_v25 = vpop.xlane.xlu0 %5753 }
 0xf57   : > { %9261 = vrsqrt.f32 %v5788_v16  ;;  %v5774_v57 = vmul.f32 0.03125, %v5754_v25  ;;  %v5751_v1 = vpop.xlane.xlu1 %5750 }
 0xf58   : > { %9263 = vrsqrt.f32 %v5787_v51  ;;  %v5773_v34 = vmul.f32 0.03125, %v5751_v1 }
 0xf59   : > { %v5790_v61 = vadd.f32 1e-05, %v5774_v57 }
 0xf5a   : > { %v5789_v35 = vadd.f32 1e-05, %v5773_v34  ;;  %v5760_v41 = vpop.xlane.xlu0 %5759 }
 0xf5b   : > { %9265 = vrsqrt.f32 %v5790_v61  ;;  %v5776_v13 = vmul.f32 0.03125, %v5760_v41  ;;  %v5757_v14 = vpop.xlane.xlu1 %5756 }
 0xf5c   : > { %9267 = vrsqrt.f32 %v5789_v35  ;;  %v5775_v56 = vmul.f32 0.03125, %v5757_v14 }
 0xf5d   : > { %v9258_v2 = vpop.eup %9257  ;;  %v5792_v37 = vadd.f32 1e-05, %v5776_v13 }
 0xf5e   : > { %v9260_v27 = vpop.eup %9259  ;;  %v5791_v26 = vadd.f32 1e-05, %v5775_v56  ;;  %v5818_v0 = vmul.f32 %v9258_v2, %v11521_v62 }
 0xf5f   : > { %9269 = vrsqrt.f32 %v5792_v37  ;;  %v5817_v55 = vmul.f32 %v9260_v27, %v11524_v46 }
 0xf60   : > { %9271 = vrsqrt.f32 %v5791_v26  ;;  %v5838_v23 = vmul.f32 %v11569_v33, %v5818_v0 }
 0xf61   : > { %v9262_v52 = vpop.eup %9261  ;;  %v5837_v36 = vmul.f32 %v11569_v33, %v5817_v55 }
 0xf62   : > { %v9264_v10 = vpop.eup %9263  ;;  %v5820_v40 = vmul.f32 %v9262_v52, %v11531_v63  ;;  %v11648_v7 = vadd.f32 %v11574_v45, %v5838_v23 }
 0xf63   : > { %v11644_v43 = vadd.f32 %v11574_v45, %v5837_v36  ;;  %v5819_v11 = vmul.f32 %v9264_v10, %v11535_v29 }
 0xf64   : > { %v5840_v62 = vmul.f32 %v11569_v33, %v5820_v40 }
 0xf65   : > { %v9266_v46 = vpop.eup %9265  ;;  %8233 = vmatprep.mubr.msk.f32.mxu1 %vm748_vm3, %v11644_v43  ;;  %v5839_v21 = vmul.f32 %v11569_v33, %v5819_v11 }
 0xf66   : > { %v9268_v20 = vpop.eup %9267  ;;  %8234 = vmatmul.mubr.msk.f32.gmra.mrb[104].mxu1 %vm748_vm3, %v11648_v7  ;;  %v5822_v63 = vmul.f32 %v9266_v46, %v11543_v44  ;;  %v11662_v3 = vadd.f32 %v11574_v45, %v5840_v62 }
 0xf67   : > { %v11658_v60 = vadd.f32 %v11574_v45, %v5839_v21  ;;  %v5821_v29 = vmul.f32 %v9268_v20, %v11547_v32 }
 0xf68   : > { %v5842_v53 = vmul.f32 %v11569_v33, %v5822_v63 }
 0xf69   : > { %v9270_v47 = vpop.eup %9269  ;;  %8236 = vmatprep.mubr.msk.f32.mxu1 %vm748_vm3, %v11658_v60  ;;  %v5841_v18 = vmul.f32 %v11569_v33, %v5821_v29 }
 0xf6a   : > { %v9272_v42 = vpop.eup %9271  ;;  %8237 = vmatmul.mubr.msk.f32.gmra.mrb[106].mxu1 %vm748_vm3, %v11662_v3  ;;  %v5824_v44 = vmul.f32 %v9270_v47, %v11555_v58  ;;  %v11676_v9 = vadd.f32 %v11574_v45, %v5842_v53 }
 0xf6b   : > { %v11672_v32 = vadd.f32 %v11574_v45, %v5841_v18  ;;  %v5823_v50 = vmul.f32 %v9272_v42, %v11559_v5  ;;  %v6965_v5 = vld [vmem:[%s9378_s24 + $0xa6] ss:$0 sm:$0xff] }
 0xf6c   : > { %v5844_v12 = vmul.f32 %v11569_v33, %v5824_v44 }
 0xf6d   : > { %8239 = vmatprep.mubr.msk.f32.mxu1 %vm748_vm3, %v11672_v32  ;;  %v5843_v48 = vmul.f32 %v11569_v33, %v5823_v50 }
 0xf6e   : > { %8240 = vmatmul.mubr.msk.f32.gmra.mrb[108].mxu1 %vm748_vm3, %v11676_v9  ;;  %v11688_v28 = vadd.f32 %v11574_v45, %v5844_v12 }
 0xf6f   : > { %v11685_v58 = vadd.f32 %v11574_v45, %v5843_v48 }
 0xf71   : > { %8242 = vmatprep.mubr.msk.f32.mxu1 %vm748_vm3, %v11685_v58 }
 0xf72   : > { %8243 = vmatmul.mubr.msk.f32.gmra.mrb[110].mxu1 %vm748_vm3, %v11688_v28 }
 0xfb4   : > { %v8223_v59 = vpop.f32.mrb[96].mxu1 }
 0xfb5   : > { %v5994_v6 = vadd.f32 %v8223_v59, %v6965_v5  ;;  %v5988_v54 = vpop.f32.mrb[97].mxu1 }
 0xfb6   : > { %v5989_v33 = vadd.f32 %v6965_v5, %v5988_v54  ;;  %v11712_v54 = vld [vmem:[%s9378_s24 + $0xe7] ss:$0 sm:$0xff] }
 0xfb7   : > { %v6068_v4 = vmax.f32 %v5994_v6, 0.0 }
 0xfb8   : > { %v6067_v39 = vmax.f32 %v5989_v33, 0.0  ;;  %v8226_v8 = vpop.f32.mrb[98].mxu1 }
 0xfb9   : > { %v6004_v30 = vadd.f32 %v8226_v8, %v6965_v5  ;;  %v5998_v16 = vpop.f32.mrb[99].mxu1 }
 0xfba   : > { %v5999_v51 = vadd.f32 %v6965_v5, %v5998_v16  ;;  %8261 = vmatprep.mubr.msk.f32.mxu0 %vm1446_vm6, %v6067_v39 }
 0xfbb   : > { %8262 = vmatmul.mubr.msk.f32.vlgmr.msra.gmra.mrb[96].mxu0 %vm1446_vm6, %v6068_v4  ;;  %v6070_v57 = vmax.f32 %v6004_v30, 0.0 }
 0xfbc   : > { %v6069_v45 = vmax.f32 %v5999_v51, 0.0  ;;  %v8229_v25 = vpop.f32.mrb[100].mxu1 }
 0xfbd   : > { %v6014_v1 = vadd.f32 %v8229_v25, %v6965_v5  ;;  %v6008_v34 = vpop.f32.mrb[101].mxu1 }
 0xfbe   : > { %v6009_v61 = vadd.f32 %v6965_v5, %v6008_v34  ;;  %8264 = vmatprep.mubr.msk.f32.mxu0 %vm1446_vm6, %v6069_v45 }
 0xfbf   : > { %8265 = vmatmul.mubr.msk.f32.gmra.mrb[98].mxu0 %vm1446_vm6, %v6070_v57  ;;  %v6072_v13 = vmax.f32 %v6014_v1, 0.0 }
 0xfc0   : > { %v6071_v35 = vmax.f32 %v6009_v61, 0.0  ;;  %v8232_v41 = vpop.f32.mrb[102].mxu1 }
 0xfc1   : > { %v6024_v14 = vadd.f32 %v8232_v41, %v6965_v5  ;;  %v6018_v56 = vpop.f32.mrb[103].mxu1 }
 0xfc2   : > { %v6019_v2 = vadd.f32 %v6965_v5, %v6018_v56  ;;  %8267 = vmatprep.mubr.msk.f32.mxu0 %vm1446_vm6, %v6071_v35 }
 0xfc3   : > { %8268 = vmatmul.mubr.msk.f32.gmra.mrb[100].mxu0 %vm1446_vm6, %v6072_v13  ;;  %v6074_v27 = vmax.f32 %v6024_v14, 0.0 }
 0xfc4   : > { %v6073_v37 = vmax.f32 %v6019_v2, 0.0 }
 0xfc6   : > { %8270 = vmatprep.mubr.msk.f32.mxu0 %vm1446_vm6, %v6073_v37 }
 0xfc7   : > { %8271 = vmatmul.mubr.msk.f32.gmra.mrb[102].mxu0 %vm1446_vm6, %v6074_v27 }
0x1039   : > { %v8235_v26 = vpop.f32.mrb[104].mxu1 }
0x103a   : > { %v6034_v0 = vadd.f32 %v8235_v26, %v6965_v5  ;;  %v6028_v55 = vpop.f32.mrb[105].mxu1 }
0x103b   : > { %v6029_v23 = vadd.f32 %v6965_v5, %v6028_v55 }
0x103c   : > { %v6076_v10 = vmax.f32 %v6034_v0, 0.0 }
0x103d   : > { %v6075_v52 = vmax.f32 %v6029_v23, 0.0  ;;  %v8238_v36 = vpop.f32.mrb[106].mxu1 }
0x103e   : > { %v6044_v40 = vadd.f32 %v8238_v36, %v6965_v5  ;;  %v6038_v11 = vpop.f32.mrb[107].mxu1 }
0x103f   : > { %v6039_v62 = vadd.f32 %v6965_v5, %v6038_v11  ;;  %8273 = vmatprep.mubr.msk.f32.mxu0 %vm1446_vm6, %v6075_v52 }
0x1040   : > { %8274 = vmatmul.mubr.msk.f32.gmra.mrb[104].mxu0 %vm1446_vm6, %v6076_v10  ;;  %v6078_v20 = vmax.f32 %v6044_v40, 0.0 }
0x1041   : > { %v6077_v46 = vmax.f32 %v6039_v62, 0.0  ;;  %v8241_v21 = vpop.f32.mrb[108].mxu1 }
0x1042   : > { %v6054_v63 = vadd.f32 %v8241_v21, %v6965_v5  ;;  %v6048_v29 = vpop.f32.mrb[109].mxu1 }
0x1043   : > { %v6049_v53 = vadd.f32 %v6965_v5, %v6048_v29  ;;  %8276 = vmatprep.mubr.msk.f32.mxu0 %vm1446_vm6, %v6077_v46 }
0x1044   : > { %8277 = vmatmul.mubr.msk.f32.gmra.mrb[106].mxu0 %vm1446_vm6, %v6078_v20  ;;  %v6080_v42 = vmax.f32 %v6054_v63, 0.0 }
0x1045   : > { %v6079_v47 = vmax.f32 %v6049_v53, 0.0  ;;  %v8244_v18 = vpop.f32.mrb[110].mxu1 }
0x1046   : > { %v6064_v44 = vadd.f32 %v8244_v18, %v6965_v5  ;;  %v6058_v50 = vpop.f32.mrb[111].mxu1 }
0x1047   : > { %v6059_v12 = vadd.f32 %v6965_v5, %v6058_v50  ;;  %8279 = vmatprep.mubr.msk.f32.mxu0 %vm1446_vm6, %v6079_v47 }
0x1048   : > { %8280 = vmatmul.mubr.msk.f32.gmra.mrb[108].mxu0 %vm1446_vm6, %v6080_v42  ;;  %v6082_v59 = vmax.f32 %v6064_v44, 0.0 }
0x1049   : > { %v6081_v48 = vmax.f32 %v6059_v12, 0.0 }
0x104b   : > { %8282 = vmatprep.mubr.msk.f32.mxu0 %vm1446_vm6, %v6081_v48 }
0x104c   : > { %8283 = vmatmul.mubr.msk.f32.gmra.mrb[110].mxu0 %vm1446_vm6, %v6082_v59 }
0x108e   : > { %v8263_v6 = vpop.f32.mrb[96].mxu0 }
0x108f   : > { %v6285_v33 = vadd.f32 %v8263_v6, %v11584_v15  ;;  %v6205_v39 = vpop.f32.mrb[97].mxu0 }
0x1090   : > { %v6284_v8 = vadd.f32 %v6205_v39, %v11580_v49 }
0x1091   : > { %v11717_v5 = vadd.f32 %v11712_v54, %v6285_v33 }
0x1092   : > { %v11720_v4 = vadd.f32 %v11712_v54, %v6284_v8  ;;  %v8266_v30 = vpop.f32.mrb[98].mxu0 }
0x1093   : > { %v6287_v16 = vadd.f32 %v8266_v30, %v11598_v19  ;;  %v6215_v51 = vpop.f32.mrb[99].mxu0  ;;  %v6326_v45 = vsel %vm748_vm3, %v11717_v5, 0.0 }
0x1094   : > { %v6286_v25 = vadd.f32 %v6215_v51, %v11594_v17  ;;  %6327 = vadd.xlane.f32.xlu0 %v6326_v45  ;;  %v6323_v15 = vsel %vm748_vm3, %v11720_v4, 0.0 }
0x1095   : > { %v11729_v49 = vadd.f32 %v11712_v54, %v6287_v16  ;;  %6324 = vadd.xlane.f32.xlu1 %v6323_v15 }
0x1096   : > { %v11732_v57 = vadd.f32 %v11712_v54, %v6286_v25  ;;  %v8269_v1 = vpop.f32.mrb[100].mxu0 }
0x1097   : > { %v6289_v19 = vadd.f32 %v8269_v1, %v11612_v24  ;;  %v6225_v34 = vpop.f32.mrb[101].mxu0  ;;  %v6332_v61 = vsel %vm748_vm3, %v11729_v49, 0.0 }
0x1098   : > { %v6288_v17 = vadd.f32 %v6225_v34, %v11608_v22  ;;  %6333 = vadd.xlane.f32.xlu0 %v6332_v61  ;;  %v6329_v35 = vsel %vm748_vm3, %v11732_v57, 0.0 }
0x1099   : > { %v11741_v41 = vadd.f32 %v11712_v54, %v6289_v19  ;;  %6330 = vadd.xlane.f32.xlu1 %v6329_v35 }
0x109a   : > { %v11744_v13 = vadd.f32 %v11712_v54, %v6288_v17  ;;  %v8272_v14 = vpop.f32.mrb[102].mxu0 }
0x109b   : > { %v6291_v24 = vadd.f32 %v8272_v14, %v11624_v38  ;;  %v6235_v56 = vpop.f32.mrb[103].mxu0  ;;  %v6338_v2 = vsel %vm748_vm3, %v11741_v41, 0.0 }
0x109c   : > { %v6290_v22 = vadd.f32 %v6235_v56, %v11621_v31  ;;  %6339 = vadd.xlane.f32.xlu0 %v6338_v2  ;;  %v6335_v37 = vsel %vm748_vm3, %v11744_v13, 0.0 }
0x109d   : > { %v11753_v27 = vadd.f32 %v11712_v54, %v6291_v24  ;;  %6336 = vadd.xlane.f32.xlu1 %v6335_v37 }
0x109e   : > { %v11756_v26 = vadd.f32 %v11712_v54, %v6290_v22 }
0x109f   : > { %v6344_v38 = vsel %vm748_vm3, %v11753_v27, 0.0 }
0x10a0   : > { %6345 = vadd.xlane.f32.xlu0 %v6344_v38  ;;  %v6341_v0 = vsel %vm748_vm3, %v11756_v26, 0.0 }
0x10a1   : > { %6342 = vadd.xlane.f32.xlu1 %v6341_v0 }
0x1113   : > { %v8275_v31 = vpop.f32.mrb[104].mxu0 }
0x1114   : > { %v6293_v55 = vadd.f32 %v8275_v31, %v11648_v7  ;;  %v6245_v23 = vpop.f32.mrb[105].mxu0 }
0x1115   : > { %v6292_v52 = vadd.f32 %v6245_v23, %v11644_v43 }
0x1116   : > { %v11765_v36 = vadd.f32 %v11712_v54, %v6293_v55 }
0x1117   : > { %v11768_v10 = vadd.f32 %v11712_v54, %v6292_v52  ;;  %v8278_v40 = vpop.f32.mrb[106].mxu0 }
0x1118   : > { %v6295_v11 = vadd.f32 %v8278_v40, %v11662_v3  ;;  %v6255_v62 = vpop.f32.mrb[107].mxu0  ;;  %v6350_v46 = vsel %vm748_vm3, %v11765_v36, 0.0 }
0x1119   : > { %v6294_v21 = vadd.f32 %v6255_v62, %v11658_v60  ;;  %6351 = vadd.xlane.f32.xlu0 %v6350_v46  ;;  %v6347_v7 = vsel %vm748_vm3, %v11768_v10, 0.0 }
0x111a   : > { %v11777_v43 = vadd.f32 %v11712_v54, %v6295_v11  ;;  %6348 = vadd.xlane.f32.xlu1 %v6347_v7 }
0x111b   : > { %v11780_v20 = vadd.f32 %v11712_v54, %v6294_v21  ;;  %v8281_v63 = vpop.f32.mrb[108].mxu0 }
0x111c   : > { %v6297_v3 = vadd.f32 %v8281_v63, %v11676_v9  ;;  %v6265_v29 = vpop.f32.mrb[109].mxu0  ;;  %v6356_v53 = vsel %vm748_vm3, %v11777_v43, 0.0 }
0x111d   : > { %v6296_v60 = vadd.f32 %v6265_v29, %v11672_v32  ;;  %6357 = vadd.xlane.f32.xlu0 %v6356_v53  ;;  %v6353_v47 = vsel %vm748_vm3, %v11780_v20, 0.0 }
0x111e   : > { %v11789_v18 = vadd.f32 %v11712_v54, %v6297_v3  ;;  %6354 = vadd.xlane.f32.xlu1 %v6353_v47 }
0x111f   : > { %v11792_v42 = vadd.f32 %v11712_v54, %v6296_v60  ;;  %v8284_v44 = vpop.f32.mrb[110].mxu0 }
0x1120   : > { %v6299_v9 = vadd.f32 %v8284_v44, %v11688_v28  ;;  %v6275_v50 = vpop.f32.mrb[111].mxu0  ;;  %v6362_v12 = vsel %vm748_vm3, %v11789_v18, 0.0 }
0x1121   : > { %v6298_v32 = vadd.f32 %v6275_v50, %v11685_v58  ;;  %v6328_v48 = vpop.xlane.xlu0 %6327  ;;  %6363 = vadd.xlane.f32.xlu0 %v6362_v12  ;;  %v6359_v59 = vsel %vm748_vm3, %v11792_v42, 0.0 }
0x1122   : > { %v11801_v6 = vadd.f32 %v11712_v54, %v6299_v9  ;;  %v6372_v33 = vmul.f32 0.03125, %v6328_v48  ;;  %6360 = vadd.xlane.f32.xlu1 %v6359_v59  ;;  %v6325_v39 = vpop.xlane.xlu1 %6324 }
0x1123   : > { %v11804_v8 = vadd.f32 %v11712_v54, %v6298_v32  ;;  %v6371_v28 = vmul.f32 0.03125, %v6325_v39 }
0x1124   : > { %v11807_v30 = vsub.f32 %v11717_v5, %v6372_v33  ;;  %v6368_v58 = vsel %vm748_vm3, %v11801_v6, 0.0 }
0x1125   : > { %v11812_v16 = vsub.f32 %v11720_v4, %v6371_v28  ;;  %v6334_v51 = vpop.xlane.xlu0 %6333  ;;  %6369 = vadd.xlane.f32.xlu0 %v6368_v58  ;;  %v6365_v45 = vsel %vm748_vm3, %v11804_v8, 0.0 }
0x1126   : > { %v6374_v25 = vmul.f32 0.03125, %v6334_v51  ;;  %6366 = vadd.xlane.f32.xlu1 %v6365_v45  ;;  %v6331_v15 = vpop.xlane.xlu1 %6330  ;;  %v6404_v54 = vmul.f32 %v11807_v30, %v11807_v30 }
0x1127   : > { %v6373_v1 = vmul.f32 0.03125, %v6331_v15  ;;  %v6403_v5 = vmul.f32 %v11812_v16, %v11812_v16 }
0x1128   : > { %v11821_v19 = vsub.f32 %v11729_v49, %v6374_v25  ;;  %v6422_v4 = vsel %vm748_vm3, %v6404_v54, 0.0 }
0x1129   : > { %v11825_v34 = vsub.f32 %v11732_v57, %v6373_v1  ;;  %v6340_v61 = vpop.xlane.xlu0 %6339  ;;  %6423 = vadd.xlane.f32.xlu0 %v6422_v4  ;;  %v6419_v17 = vsel %vm748_vm3, %v6403_v5, 0.0 }
0x112a   : > { %v6376_v35 = vmul.f32 0.03125, %v6340_v61  ;;  %6420 = vadd.xlane.f32.xlu1 %v6419_v17  ;;  %v6337_v14 = vpop.xlane.xlu1 %6336  ;;  %v6406_v24 = vmul.f32 %v11821_v19, %v11821_v19 }
0x112b   : > { %v6375_v56 = vmul.f32 0.03125, %v6337_v14  ;;  %v6405_v49 = vmul.f32 %v11825_v34, %v11825_v34 }
0x112c   : > { %v11833_v2 = vsub.f32 %v11741_v41, %v6376_v35  ;;  %v6428_v57 = vsel %vm748_vm3, %v6406_v24, 0.0 }
0x112d   : > { %v11837_v22 = vsub.f32 %v11744_v13, %v6375_v56  ;;  %v6346_v37 = vpop.xlane.xlu0 %6345  ;;  %6429 = vadd.xlane.f32.xlu0 %v6428_v57  ;;  %v6425_v38 = vsel %vm748_vm3, %v6405_v49, 0.0 }
0x112e   : > { %v6378_v0 = vmul.f32 0.03125, %v6346_v37  ;;  %6426 = vadd.xlane.f32.xlu1 %v6425_v38  ;;  %v6343_v31 = vpop.xlane.xlu1 %6342  ;;  %v6408_v55 = vmul.f32 %v11833_v2, %v11833_v2 }
0x112f   : > { %v6377_v23 = vmul.f32 0.03125, %v6343_v31  ;;  %v6407_v41 = vmul.f32 %v11837_v22, %v11837_v22 }
0x1130   : > { %v11845_v52 = vsub.f32 %v11753_v27, %v6378_v0  ;;  %v6434_v13 = vsel %vm748_vm3, %v6408_v55, 0.0 }
0x1131   : > { %v11849_v40 = vsub.f32 %v11756_v26, %v6377_v23  ;;  %6435 = vadd.xlane.f32.xlu0 %v6434_v13  ;;  %v6431_v11 = vsel %vm748_vm3, %v6407_v41, 0.0 }
0x1132   : > { %6432 = vadd.xlane.f32.xlu1 %v6431_v11  ;;  %v6410_v62 = vmul.f32 %v11845_v52, %v11845_v52 }
0x1133   : > { %v6409_v46 = vmul.f32 %v11849_v40, %v11849_v40 }
0x1134   : > { %v6440_v21 = vsel %vm748_vm3, %v6410_v62, 0.0 }
0x1135   : > { %6441 = vadd.xlane.f32.xlu0 %v6440_v21  ;;  %v6437_v27 = vsel %vm748_vm3, %v6409_v46, 0.0 }
0x1136   : > { %6438 = vadd.xlane.f32.xlu1 %v6437_v27 }
0x11a6   : > { %v6352_v7 = vpop.xlane.xlu0 %6351 }
0x11a7   : > { %v6380_v63 = vmul.f32 0.03125, %v6352_v7  ;;  %v6349_v26 = vpop.xlane.xlu1 %6348 }
0x11a8   : > { %v6379_v3 = vmul.f32 0.03125, %v6349_v26 }
0x11a9   : > { %v11859_v29 = vsub.f32 %v11765_v36, %v6380_v63 }
0x11aa   : > { %v11862_v53 = vsub.f32 %v11768_v10, %v6379_v3  ;;  %v6358_v60 = vpop.xlane.xlu0 %6357 }
0x11ab   : > { %v6382_v47 = vmul.f32 0.03125, %v6358_v60  ;;  %v6355_v44 = vpop.xlane.xlu1 %6354  ;;  %v6412_v9 = vmul.f32 %v11859_v29, %v11859_v29 }
0x11ac   : > { %v6381_v50 = vmul.f32 0.03125, %v6355_v44  ;;  %v6411_v12 = vmul.f32 %v11862_v53, %v11862_v53 }
0x11ad   : > { %v11869_v32 = vsub.f32 %v11777_v43, %v6382_v47  ;;  %v6446_v48 = vsel %vm748_vm3, %v6412_v9, 0.0  ;;  %v11907_v9 = vld [vmem:[%s9378_s24 + $0xe8] ss:$0 sm:$0xff] }
0x11ae   : > { %v11873_v36 = vsub.f32 %v11780_v20, %v6381_v50  ;;  %v6364_v10 = vpop.xlane.xlu0 %6363  ;;  %6447 = vadd.xlane.f32.xlu0 %v6446_v48  ;;  %v6443_v59 = vsel %vm748_vm3, %v6411_v12, 0.0 }
0x11af   : > { %v6384_v33 = vmul.f32 0.03125, %v6364_v10  ;;  %6444 = vadd.xlane.f32.xlu1 %v6443_v59  ;;  %v6361_v39 = vpop.xlane.xlu1 %6360  ;;  %v6414_v28 = vmul.f32 %v11869_v32, %v11869_v32  ;;  %v11911_v59 = vld [vmem:[%s9378_s24 + $0xe9] ss:$0 sm:$0xff] }
0x11b0   : > { %v6383_v58 = vmul.f32 0.03125, %v6361_v39  ;;  %v6413_v43 = vmul.f32 %v11873_v36, %v11873_v36 }
0x11b1   : > { %v11881_v51 = vsub.f32 %v11789_v18, %v6384_v33  ;;  %v6452_v20 = vsel %vm748_vm3, %v6414_v28, 0.0 }
0x11b2   : > { %v11885_v45 = vsub.f32 %v11792_v42, %v6383_v58  ;;  %6453 = vadd.xlane.f32.xlu0 %v6452_v20  ;;  %v6370_v25 = vpop.xlane.xlu0 %6369  ;;  %v6449_v15 = vsel %vm748_vm3, %v6413_v43, 0.0 }
0x11b3   : > { %v6386_v54 = vmul.f32 0.03125, %v6370_v25  ;;  %6450 = vadd.xlane.f32.xlu1 %v6449_v15  ;;  %v6367_v1 = vpop.xlane.xlu1 %6366  ;;  %v6416_v5 = vmul.f32 %v11881_v51, %v11881_v51 }
0x11b4   : > { %v6385_v4 = vmul.f32 0.03125, %v6367_v1  ;;  %v6415_v18 = vmul.f32 %v11885_v45, %v11885_v45 }
0x11b5   : > { %v11893_v61 = vsub.f32 %v11801_v6, %v6386_v54  ;;  %v6458_v42 = vsel %vm748_vm3, %v6416_v5, 0.0 }
0x11b6   : > { %v11897_v17 = vsub.f32 %v11804_v8, %v6385_v4  ;;  %6459 = vadd.xlane.f32.xlu0 %v6458_v42  ;;  %v6424_v35 = vpop.xlane.xlu0 %6423  ;;  %v6455_v14 = vsel %vm748_vm3, %v6415_v18, 0.0 }
0x11b7   : > { %v6468_v24 = vmul.f32 0.03125, %v6424_v35  ;;  %6456 = vadd.xlane.f32.xlu1 %v6455_v14  ;;  %v6421_v56 = vpop.xlane.xlu1 %6420  ;;  %v6418_v49 = vmul.f32 %v11893_v61, %v11893_v61 }
0x11b8   : > { %v6467_v57 = vmul.f32 0.03125, %v6421_v56  ;;  %v6417_v6 = vmul.f32 %v11897_v17, %v11897_v17 }
0x11b9   : > { %v6484_v37 = vadd.f32 1e-05, %v6468_v24  ;;  %v6464_v38 = vsel %vm748_vm3, %v6418_v49, 0.0 }
0x11ba   : > { %v6483_v0 = vadd.f32 1e-05, %v6467_v57  ;;  %6465 = vadd.xlane.f32.xlu0 %v6464_v38  ;;  %v6430_v8 = vpop.xlane.xlu0 %6429  ;;  %v6461_v31 = vsel %vm748_vm3, %v6417_v6, 0.0 }
0x11bb   : > { %9273 = vrsqrt.f32 %v6484_v37  ;;  %v6470_v55 = vmul.f32 0.03125, %v6430_v8  ;;  %6462 = vadd.xlane.f32.xlu1 %v6461_v31  ;;  %v6427_v23 = vpop.xlane.xlu1 %6426 }
0x11bc   : > { %9275 = vrsqrt.f32 %v6483_v0  ;;  %v6469_v41 = vmul.f32 0.03125, %v6427_v23 }
0x11bd   : > { %v6486_v13 = vadd.f32 1e-05, %v6470_v55 }
0x11be   : > { %v6485_v11 = vadd.f32 1e-05, %v6469_v41  ;;  %v6436_v62 = vpop.xlane.xlu0 %6435 }
0x11bf   : > { %9277 = vrsqrt.f32 %v6486_v13  ;;  %v6472_v46 = vmul.f32 0.03125, %v6436_v62  ;;  %v6433_v21 = vpop.xlane.xlu1 %6432 }
0x11c0   : > { %9279 = vrsqrt.f32 %v6485_v11  ;;  %v6471_v27 = vmul.f32 0.03125, %v6433_v21 }
0x11c1   : > { %v6488_v7 = vadd.f32 1e-05, %v6472_v46 }
0x11c2   : > { %v6487_v63 = vadd.f32 1e-05, %v6471_v27  ;;  %v6442_v26 = vpop.xlane.xlu0 %6441 }
0x11c3   : > { %9281 = vrsqrt.f32 %v6488_v7  ;;  %v6474_v3 = vmul.f32 0.03125, %v6442_v26  ;;  %v6439_v60 = vpop.xlane.xlu1 %6438 }
0x11c4   : > { %9283 = vrsqrt.f32 %v6487_v63  ;;  %v6473_v47 = vmul.f32 0.03125, %v6439_v60 }
0x11c5   : > { %v9274_v44 = vpop.eup %9273  ;;  %v6490_v50 = vadd.f32 1e-05, %v6474_v3 }
0x11c6   : > { %v9276_v12 = vpop.eup %9275  ;;  %v6516_v48 = vmul.f32 %v9274_v44, %v11807_v30  ;;  %v6489_v10 = vadd.f32 1e-05, %v6473_v47 }
0x11c7   : > { %v6515_v33 = vmul.f32 %v9276_v12, %v11812_v16  ;;  %9285 = vrsqrt.f32 %v6490_v50 }
0x11c8   : > { %v6536_v39 = vmul.f32 %v11907_v9, %v6516_v48  ;;  %9287 = vrsqrt.f32 %v6489_v10 }
0x11c9   : > { %v9278_v28 = vpop.eup %9277  ;;  %v6535_v58 = vmul.f32 %v11907_v9, %v6515_v33 }
0x11ca   : > { %v9280_v43 = vpop.eup %9279  ;;  %v6556_v20 = vadd.f32 %v11911_v59, %v6536_v39  ;;  %v6518_v25 = vmul.f32 %v9278_v28, %v11821_v19 }
0x11cb   : > { %v6555_v15 = vadd.f32 %v11911_v59, %v6535_v58  ;;  %v6517_v30 = vmul.f32 %v9280_v43, %v11825_v34 }
0x11cc   : > { %6572 = vst.msk [vmem:[%s12032_s5 + $0x8] sm:$0xff] %vm748_vm3, %v6556_v20  ;;  %v6538_v16 = vmul.f32 %v11907_v9, %v6518_v25 }
0x11cd   : > { %v9282_v54 = vpop.eup %9281  ;;  %6571 = vst.msk [vmem:[%s12032_s5] sm:$0xff] %vm748_vm3, %v6555_v15  ;;  %v6537_v1 = vmul.f32 %v11907_v9, %v6517_v30 }
0x11ce   : > { %v9284_v19 = vpop.eup %9283  ;;  %v6558_v5 = vadd.f32 %v11911_v59, %v6538_v16  ;;  %v6520_v34 = vmul.f32 %v9282_v54, %v11833_v2 }
0x11cf   : > { %v6557_v4 = vadd.f32 %v11911_v59, %v6537_v1  ;;  %v6519_v18 = vmul.f32 %v9284_v19, %v11837_v22 }
0x11d0   : > { %6574 = vst.msk [vmem:[%s12032_s5 + $0x18] sm:$0xff] %vm748_vm3, %v6558_v5  ;;  %v6540_v42 = vmul.f32 %v11907_v9, %v6520_v34 }
0x11d1   : > { %v9286_v35 = vpop.eup %9285  ;;  %6573 = vst.msk [vmem:[%s12032_s5 + $0x10] sm:$0xff] %vm748_vm3, %v6557_v4  ;;  %v6539_v14 = vmul.f32 %v11907_v9, %v6519_v18 }
0x11d2   : > { %v9288_v2 = vpop.eup %9287  ;;  %v6560_v24 = vadd.f32 %v11911_v59, %v6540_v42  ;;  %v6522_v22 = vmul.f32 %v9286_v35, %v11845_v52 }
0x11d3   : > { %v6559_v56 = vadd.f32 %v11911_v59, %v6539_v14  ;;  %v6521_v49 = vmul.f32 %v9288_v2, %v11849_v40 }
0x11d4   : > { %6576 = vst.msk [vmem:[%s12032_s5 + $0x28] sm:$0xff] %vm748_vm3, %v6560_v24  ;;  %v6542_v57 = vmul.f32 %v11907_v9, %v6522_v22 }
0x11d5   : > { %6575 = vst.msk [vmem:[%s12032_s5 + $0x20] sm:$0xff] %vm748_vm3, %v6559_v56  ;;  %v6541_v6 = vmul.f32 %v11907_v9, %v6521_v49 }
0x11d6   : > { %v6562_v52 = vadd.f32 %v11911_v59, %v6542_v57 }
0x11d7   : > { %v6561_v37 = vadd.f32 %v11911_v59, %v6541_v6 }
0x11d8   : > { %6578 = vst.msk [vmem:[%s12032_s5 + $0x38] sm:$0xff] %vm748_vm3, %v6562_v52 }
0x11d9   : > { %6577 = vst.msk [vmem:[%s12032_s5 + $0x30] sm:$0xff] %vm748_vm3, %v6561_v37 }
0x123b   : > { %v6448_v40 = vpop.xlane.xlu0 %6447 }
0x123c   : > { %v6476_v38 = vmul.f32 0.03125, %v6448_v40  ;;  %v6445_v0 = vpop.xlane.xlu1 %6444 }
0x123d   : > { %v6475_v8 = vmul.f32 0.03125, %v6445_v0 }
0x123e   : > { %v6492_v31 = vadd.f32 1e-05, %v6476_v38 }
0x123f   : > { %v6491_v55 = vadd.f32 1e-05, %v6475_v8  ;;  %v6454_v23 = vpop.xlane.xlu0 %6453 }
0x1240   : > { %9289 = vrsqrt.f32 %v6492_v31  ;;  %v6478_v41 = vmul.f32 0.03125, %v6454_v23  ;;  %v6451_v13 = vpop.xlane.xlu1 %6450 }
0x1241   : > { %9291 = vrsqrt.f32 %v6491_v55  ;;  %v6477_v11 = vmul.f32 0.03125, %v6451_v13 }
0x1242   : > { %v6494_v62 = vadd.f32 1e-05, %v6478_v41 }
0x1243   : > { %v6493_v46 = vadd.f32 1e-05, %v6477_v11  ;;  %v6460_v21 = vpop.xlane.xlu0 %6459 }
0x1244   : > { %9293 = vrsqrt.f32 %v6494_v62  ;;  %v6480_v27 = vmul.f32 0.03125, %v6460_v21  ;;  %v6457_v7 = vpop.xlane.xlu1 %6456 }
0x1245   : > { %9295 = vrsqrt.f32 %v6493_v46  ;;  %v6479_v63 = vmul.f32 0.03125, %v6457_v7 }
0x1246   : > { %v6496_v26 = vadd.f32 1e-05, %v6480_v27 }
0x1247   : > { %v6495_v3 = vadd.f32 1e-05, %v6479_v63  ;;  %v6466_v60 = vpop.xlane.xlu0 %6465 }
0x1248   : > { %9297 = vrsqrt.f32 %v6496_v26  ;;  %v6482_v47 = vmul.f32 0.03125, %v6466_v60  ;;  %v6463_v44 = vpop.xlane.xlu1 %6462 }
0x1249   : > { %9299 = vrsqrt.f32 %v6495_v3  ;;  %v6481_v50 = vmul.f32 0.03125, %v6463_v44 }
0x124a   : > { %v9290_v12 = vpop.eup %9289  ;;  %v6498_v48 = vadd.f32 1e-05, %v6482_v47 }
0x124b   : > { %v9292_v10 = vpop.eup %9291  ;;  %v6524_v33 = vmul.f32 %v9290_v12, %v11859_v29  ;;  %v6497_v39 = vadd.f32 1e-05, %v6481_v50 }
0x124c   : > { %v6523_v28 = vmul.f32 %v9292_v10, %v11862_v53  ;;  %9301 = vrsqrt.f32 %v6498_v48 }
0x124d   : > { %v6544_v58 = vmul.f32 %v11907_v9, %v6524_v33  ;;  %9303 = vrsqrt.f32 %v6497_v39 }
0x124e   : > { %v9294_v43 = vpop.eup %9293  ;;  %v6543_v20 = vmul.f32 %v11907_v9, %v6523_v28 }
0x124f   : > { %v9296_v25 = vpop.eup %9295  ;;  %v6564_v15 = vadd.f32 %v11911_v59, %v6544_v58  ;;  %v6526_v30 = vmul.f32 %v9294_v43, %v11869_v32 }
0x1250   : > { %v6563_v16 = vadd.f32 %v11911_v59, %v6543_v20  ;;  %v6525_v54 = vmul.f32 %v9296_v25, %v11873_v36 }
0x1251   : > { %6580 = vst.msk [vmem:[%s12032_s5 + $0x48] sm:$0xff] %vm748_vm3, %v6564_v15  ;;  %v6546_v29 = vmul.f32 %v11907_v9, %v6526_v30 }
0x1252   : > { %v9298_v53 = vpop.eup %9297  ;;  %6579 = vst.msk [vmem:[%s12032_s5 + $0x40] sm:$0xff] %vm748_vm3, %v6563_v16  ;;  %v6545_v1 = vmul.f32 %v11907_v9, %v6525_v54 }
0x1253   : > { %v9300_v32 = vpop.eup %9299  ;;  %v6566_v19 = vadd.f32 %v11911_v59, %v6546_v29  ;;  %v6528_v36 = vmul.f32 %v9298_v53, %v11881_v51 }
0x1254   : > { %v6565_v5 = vadd.f32 %v11911_v59, %v6545_v1  ;;  %v6527_v34 = vmul.f32 %v9300_v32, %v11885_v45 }
0x1255   : > { %6582 = vst.msk [vmem:[%s12032_s5 + $0x58] sm:$0xff] %vm748_vm3, %v6566_v19  ;;  %v6548_v4 = vmul.f32 %v11907_v9, %v6528_v36 }
0x1256   : > { %v9302_v18 = vpop.eup %9301  ;;  %6581 = vst.msk [vmem:[%s12032_s5 + $0x50] sm:$0xff] %vm748_vm3, %v6565_v5  ;;  %v6547_v42 = vmul.f32 %v11907_v9, %v6527_v34 }
0x1257   : > { %v9304_v51 = vpop.eup %9303  ;;  %v6568_v35 = vadd.f32 %v11911_v59, %v6548_v4  ;;  %v6530_v45 = vmul.f32 %v9302_v18, %v11893_v61 }
0x1258   : > { %v6567_v14 = vadd.f32 %v11911_v59, %v6547_v42  ;;  %v6529_v2 = vmul.f32 %v9304_v51, %v11897_v17 }
0x1259   : > { %6584 = vst.msk [vmem:[%s12032_s5 + $0x68] sm:$0xff] %vm748_vm3, %v6568_v35  ;;  %v6550_v24 = vmul.f32 %v11907_v9, %v6530_v45 }
0x125a   : > { %6583 = vst.msk [vmem:[%s12032_s5 + $0x60] sm:$0xff] %vm748_vm3, %v6567_v14  ;;  %v6549_v22 = vmul.f32 %v11907_v9, %v6529_v2 }
0x125b   : > { %v6570_v61 = vadd.f32 %v11911_v59, %v6550_v24 }
0x125c   : > { %v6569_v56 = vadd.f32 %v11911_v59, %v6549_v22 }
0x125d   : > { %6586 = vst.msk [vmem:[%s12032_s5 + $0x78] sm:$0xff] %vm748_vm3, %v6570_v61 }
0x125e   : > { %6585 = vst.msk [vmem:[%s12032_s5 + $0x70] sm:$0xff] %vm748_vm3, %v6569_v56 }
0x125f PF: > { %s15_s18 = sadd.s32 1, %s9332_s18  }
0x1260   : > { %p12_p5 = scmp.ge.s32.totalorder %s15_s18, 4  }
0x1262   :  { %14 = sbr.rel (!%p12_p5) target bundleno = 1 (0x1), region = 70 }

</bundles_post_ra>
